<compile_context>
chip_gen: v7x
topology: tpu7x:2x2x1
jax: 0.10.0
libtpu: 0.0.40
codegen_flags: <defaults>
</compile_context>

<pallas_src>
import jax
import jax.numpy as jnp
from jax import lax
from jax.experimental import pallas as pl
from jax.experimental.pallas import tpu as pltpu

# ---------------- configuration (small shapes consistent with the module) ------------
B = 2              # batch
N = 128            # number of input points (fixed); one grid step == one batch element
DIM = 3            # input point dimension
K = 8              # n_knn
H = 32             # hidden_dim
CDIM = 64          # c_dim
RESO_PLANE = 8     # plane_resolution
RESO_GRID = 4      # grid_resolution
PADDING = 0.1
EPS = 1e-6         # EPS used by the VN layers
NCELLS = RESO_PLANE ** 2
assert NCELLS == RESO_GRID ** 3, "fused scatter assumes plane^2 == grid^3 cells"
assert N % 128 == 0

CIN = 3            # conv_pos input channels
CIN_PAD = 16       # zero-padded so the bf16 conv operand is (16,*) tile aligned

MM_DT = jnp.bfloat16   # MXU operand dtype (accumulation stays f32); jnp.float32 for exact numerics


# ---------------- packed weight canvas (all layers in one (W_ROWS, 64) array) ---------
def _canvas_layout():
    entries = [("conv", 2 * H), ("fc", H)]
    for b in range(4):
        entries += [(f"b{b}_d0", H), (f"b{b}_f0", H), (f"b{b}_d1", H), (f"b{b}_f1", H)]
    # block 4: map_to_dir (H rows) and shortcut (CDIM rows) stacked -> one MXU call
    entries += [("b4_d0sc", H + CDIM), ("b4_f0", H), ("b4_d1", H), ("b4_f1", CDIM)]
    entries += [("vn1", CDIM), ("vn2", CDIM // 2), ("lin", 16)]
    offs, off = {}, 0
    for name, rows in entries:
        offs[name] = off
        off += rows
    return offs, off


W_OFFS, W_ROWS = _canvas_layout()
W_COLS = 64


# ---------------- in-kernel vector-neuron helpers (trace-time) -----------------------
def _w(w_ref, name, rows, cols):
    """Static slice of the packed weight canvas -> (rows, cols) weight (already MM_DT)."""
    off = W_OFFS[name]
    return w_ref[off:off + rows, 0:cols]


def _dot(w, x):
    """VNLinear on component-stacked activations: (out,in) @ (in, 3L) -> (out, 3L), f32 acc."""
    return jnp.dot(w, x.astype(MM_DT), preferred_element_type=jnp.float32)


def _vn_act3(p, d, L, neg):
    """VN leaky-relu. p, d are (C, 3L) with vector components stacked on lanes in blocks of L."""
    px, py, pz = p[:, 0:L], p[:, L:2 * L], p[:, 2 * L:3 * L]
    dx, dy, dz = d[:, 0:L], d[:, L:2 * L], d[:, 2 * L:3 * L]
    dot = px * dx + py * dy + pz * dz
    dsq = dx * dx + dy * dy + dz * dz
    coef = dot * pl.reciprocal(dsq + EPS, approx=True)
    keep = dot >= 0.0

    def comp(pc, dc):
        r = jnp.where(keep, pc, pc - coef * dc)
        if neg != 0.0:
            r = neg * pc + (1.0 - neg) * r
        return r

    return jnp.concatenate([comp(px, dx), comp(py, dy), comp(pz, dz)], axis=1)


def _vn_resblock(x, wd0, wf0, wd1, wf1, sc_rows=0):
    """VNResnetBlockFC. If sc_rows>0, wd0 carries [map_to_dir ; shortcut] stacked on rows."""
    d0sc = _dot(wd0, x)
    if sc_rows:
        d0, xs = d0sc[0:H, :], d0sc[H:H + sc_rows, :]
    else:
        d0, xs = d0sc, x
    a0 = _vn_act3(x, d0, N, 0.0)
    h = _dot(wf0, a0)
    a1 = _vn_act3(h, _dot(wd1, h), N, 0.0)
    dx = _dot(wf1, a1)
    return xs + dx


# ---------------- fused point-wise VN-PointNet + local scatter-mean kernel ------------
def vn_pointnet_fused_kernel(feat_ref, idx_ref, w_ref, out_ref):
    L3 = 3 * N

    # ---- conv_pos (VNLinearLeakyReLU 3->H, slope 0.0, feat/dir fused) + VN act + k mean-pool,
    #      fused per neighbour so the live set stays ~ (2H, 3N) instead of (2H, 3*K*N) ----
    w_conv = _w(w_ref, "conv", 2 * H, CIN_PAD)                  # (2H, 16); cols 3..15 are zero
    pooled = None
    for k in range(K):
        slab = feat_ref[:, k * L3:(k + 1) * L3]                 # (16, 3N), already MM_DT
        pd = jnp.dot(w_conv, slab, preferred_element_type=jnp.float32)   # (2H, 3N)
        a = _vn_act3(pd[0:H, :], pd[H:2 * H, :], N, 0.0)        # (H, 3N)
        pooled = a if pooled is None else pooled + a
    # NOTE: the 1/K mean-pool scale is folded into the fc_pos weight rows at packing time.

    # ---- fc_pos + 5 VN resnet blocks ----
    net = _dot(_w(w_ref, "fc", H, H), pooled)
    for b in range(4):
        net = _vn_resblock(net,
                           _w(w_ref, f"b{b}_d0", H, H), _w(w_ref, f"b{b}_f0", H, H),
                           _w(w_ref, f"b{b}_d1", H, H), _w(w_ref, f"b{b}_f1", H, H))
    net = _vn_resblock(net,
                       _w(w_ref, "b4_d0sc", H + CDIM, H), _w(w_ref, "b4_f0", H, H),
                       _w(w_ref, "b4_d1", H, H), _w(w_ref, "b4_f1", CDIM, H),
                       sc_rows=CDIM)                            # (CDIM, 3N)

    # ---- VNStdFeature(c_dim, dim=4, normalize_frame=True, no batchnorm); feat/dir fused ----
    pd1 = _dot(_w(w_ref, "vn1", CDIM, CDIM), net)
    z = _vn_act3(pd1[0:CDIM // 2, :], pd1[CDIM // 2:CDIM, :], N, 0.2)
    pd2 = _dot(_w(w_ref, "vn2", CDIM // 2, CDIM // 2), z)
    z = _vn_act3(pd2[0:CDIM // 4, :], pd2[CDIM // 4:CDIM // 2, :], N, 0.2)
    z0 = _dot(_w(w_ref, "lin", 2, CDIM // 4), z)                # (2, 3N) -> v1, v2

    v1 = (z0[0:1, 0:N], z0[0:1, N:2 * N], z0[0:1, 2 * N:3 * N])
    v2 = (z0[1:2, 0:N], z0[1:2, N:2 * N], z0[1:2, 2 * N:3 * N])
    v1n = jnp.sqrt(v1[0] * v1[0] + v1[1] * v1[1] + v1[2] * v1[2])
    inv1 = pl.reciprocal(v1n + EPS, approx=True)
    u1 = tuple(c * inv1 for c in v1)
    proj = v2[0] * u1[0] + v2[1] * u1[1] + v2[2] * u1[2]
    v2o = tuple(a_ - proj * b_ for a_, b_ in zip(v2, u1))
    v2n = jnp.sqrt(v2o[0] * v2o[0] + v2o[1] * v2o[1] + v2o[2] * v2o[2])
    inv2 = pl.reciprocal(v2n + EPS, approx=True)
    u2 = tuple(c * inv2 for c in v2o)
    u3 = (u1[1] * u2[2] - u1[2] * u2[1],
          u1[2] * u2[0] - u1[0] * u2[2],
          u1[0] * u2[1] - u1[1] * u2[0])

    # x_std = einsum('bijm,bjkm->bikm', x, frame); x_inv = (x_std * x_std).sum(frame axis)
    nx, ny, nz = net[:, 0:N], net[:, N:2 * N], net[:, 2 * N:3 * N]
    c_inv = jnp.zeros((CDIM, N), jnp.float32)
    for u in (u1, u2, u3):
        xs = nx * u[0] + ny * u[1] + nz * u[2]
        c_inv = c_inv + xs * xs                                  # (CDIM, N) rotation-invariant

    # ---- fused scatter-mean (grid, xz, xy, yz) for this batch element:
    #      one (N, 4*NCELLS) one-hot, one stacked (CDIM+1, N) @ (N, 256) matmul
    #      (feature sums + counts), one 256-lane unmasked output store. ----
    idx = idx_ref[0]                                             # (N, 4) int32, pre-offset by s*NCELLS
    lanes = lax.broadcasted_iota(jnp.int32, (N, 4 * NCELLS), 1)
    hit = (lanes == idx[:, 0:1]) | (lanes == idx[:, 1:2]) \
        | (lanes == idx[:, 2:3]) | (lanes == idx[:, 3:4])
    onehot = hit.astype(jnp.float32)                             # (N, 4*NCELLS)
    stacked = jnp.concatenate([c_inv, jnp.ones((1, N), jnp.float32)], axis=0)   # (CDIM+1, N)
    res = jnp.dot(stacked, onehot, preferred_element_type=jnp.float32)          # (CDIM+1, 256)
    counts = jnp.maximum(res[CDIM:CDIM + 1, :], 1.0)
    # exact divide for the integer-count normalization (parity with torch scatter_mean);
    # empty cells keep 0 (summed == 0), matching the preallocated-zero torch output.
    out_ref[0] = res[0:CDIM, :] / counts


# ---------------- plain-JAX glue (knn graph, packing, coordinate indexing) -------------
def knn_idx(p, k):
    # identical semantics to the torch knn(): top-k of negative squared distance
    xx = jnp.sum(p * p, axis=-1)                                 # (B, N)
    inner = jnp.einsum('bnd,bmd->bnm', p, p)
    neg_dist = -xx[:, :, None] + 2.0 * inner - xx[:, None, :]
    _, idx = jax.lax.top_k(neg_dist, k)                          # (B, N, k)
    return idx


def graph_feature_cross_packed(p, idx):
    # TODO(synk): kNN gather + cross-product graph feature stays in JAX (data-dependent gather)
    nb = jax.vmap(lambda pts, ind: pts[ind])(p, idx)             # (B, N, K, 3)
    ctr = jnp.broadcast_to(p[:, :, None, :], nb.shape)
    cross = jnp.cross(nb, ctr)
    feat5 = jnp.stack([nb - ctr, ctr, cross], axis=3)            # (B, N, K, 3ch, 3vec)
    # per-batch lane order [k, comp, n] so the kernel takes contiguous (CIN_PAD, 3N) per-k slabs
    f = jnp.transpose(feat5, (3, 0, 2, 4, 1))                    # (3ch, B, K, 3vec, N)
    f = f.reshape(CIN, B * K * 3 * N)
    # pad the channel (contraction) dim to 16 so the bf16 conv operand is tile-aligned
    f = jnp.concatenate([f, jnp.zeros((CIN_PAD - CIN, f.shape[1]), jnp.float32)], axis=0)
    return f.astype(MM_DT)                                       # (16, B*K*3*N), pre-cast for the MXU


def normalize_coordinate(p, padding=0.1, plane='xz'):
    if plane == 'xz':
        xy = p[..., jnp.array([0, 2])]
    elif plane == 'xy':
        xy = p[..., jnp.array([0, 1])]
    else:
        xy = p[..., jnp.array([1, 2])]
    xy = xy / (1 + padding + 10e-4) + 0.5
    xy = jnp.where(xy >= 1.0, 1.0 - 10e-6, xy)
    xy = jnp.where(xy < 0.0, 0.0, xy)
    return xy


def normalize_3d_coordinate(p, padding=0.1):
    pn = p / (1 + padding + 10e-4) + 0.5
    pn = jnp.where(pn >= 1.0, 1.0 - 10e-4, pn)
    pn = jnp.where(pn < 0.0, 0.0, pn)
    return pn


def coordinate2index(x, reso, coord_type='2d'):
    xi = (x * reso).astype(jnp.int32)
    if coord_type == '2d':
        return xi[..., 0] + reso * xi[..., 1]                    # (B, N)
    return xi[..., 0] + reso * (xi[..., 1] + reso * xi[..., 2])


def build_cell_indices(p):
    """(B, N, 4) int32 cell indices (grid, xz, xy, yz), pre-offset by s*NCELLS so all four
    scatters share one 4*NCELLS-lane one-hot / one fused output slab."""
    idx_grid = coordinate2index(normalize_3d_coordinate(p, PADDING), RESO_GRID, '3d')
    idx_xz = coordinate2index(normalize_coordinate(p, PADDING, 'xz'), RESO_PLANE)
    idx_xy = coordinate2index(normalize_coordinate(p, PADDING, 'xy'), RESO_PLANE)
    idx_yz = coordinate2index(normalize_coordinate(p, PADDING, 'yz'), RESO_PLANE)
    return jnp.stack([idx_grid,
                      idx_xz + NCELLS,
                      idx_xy + 2 * NCELLS,
                      idx_yz + 3 * NCELLS], axis=-1).astype(jnp.int32)


# ---------------- forward pass ----------------------------------------------------------
def local_pool_vn_pointnet_forward(p, w_canvas):
    idx = knn_idx(p, K)
    feat = graph_feature_cross_packed(p, idx)                    # (16, B*K*3*N) in MM_DT
    idx4 = build_cell_indices(p)                                 # (B, N, 4) int32, pre-offset
    w_mm = w_canvas.astype(MM_DT)                                # pre-cast canvas once (halves DMA)

    # grid=(B,) + "parallel": each v7x TensorCore takes one batch element.
    # (single-TC v5e/v6e alternative: collapse the batch onto lanes with grid=(1,).)
    fused = pl.pallas_call(
        vn_pointnet_fused_kernel,
        out_shape=jax.ShapeDtypeStruct((B, CDIM, 4 * NCELLS), jnp.float32),
        grid_spec=pltpu.PrefetchScalarGridSpec(
            num_scalar_prefetch=0,
            grid=(B,),
            in_specs=[
                pl.BlockSpec((CIN_PAD, K * 3 * N), lambda b: (0, b)),   # packed graph feature
                pl.BlockSpec((1, N, 4), lambda b: (b, 0, 0)),           # pre-offset cell indices
                pl.BlockSpec((W_ROWS, W_COLS), lambda b: (0, 0)),       # packed weight canvas
            ],
            out_specs=pl.BlockSpec((1, CDIM, 4 * NCELLS), lambda b: (b, 0, 0)),
        ),
        compiler_params=pltpu.CompilerParams(dimension_semantics=("parallel",)),
    )(feat, idx4, w_mm)

    return {
        'grid': fused[:, :, 0:NCELLS].reshape(B, CDIM, RESO_GRID, RESO_GRID, RESO_GRID),
        'xz': fused[:, :, NCELLS:2 * NCELLS].reshape(B, CDIM, RESO_PLANE, RESO_PLANE),
        'xy': fused[:, :, 2 * NCELLS:3 * NCELLS].reshape(B, CDIM, RESO_PLANE, RESO_PLANE),
        'yz': fused[:, :, 3 * NCELLS:4 * NCELLS].reshape(B, CDIM, RESO_PLANE, RESO_PLANE),
    }


# ---------------- deterministic parameter initialization --------------------------------
def _torch_linear_weight(key, out_f, in_f):
    bound = 1.0 / (in_f ** 0.5)
    return jax.random.uniform(key, (out_f, in_f), jnp.float32, -bound, bound)


def pack_weight_canvas(raw):
    """Pack raw torch-layout weights into the (W_ROWS, W_COLS) canvas.
    NOTE for checkpoint loading: feat/dir pairs are stacked [map_to_feat ; map_to_dir],
    block-4 packs [map_to_dir ; shortcut], and fc_pos rows are pre-scaled by 1/K (the
    mean-pool scale is folded into the linear layer)."""
    canvas = jnp.zeros((W_ROWS, W_COLS), jnp.float32)

    def place(cv, w, row):
        o, i = w.shape
        return cv.at[row:row + o, 0:i].set(w)

    canvas = place(canvas, raw['conv_feat'], W_OFFS['conv'])
    canvas = place(canvas, raw['conv_dir'], W_OFFS['conv'] + H)
    canvas = place(canvas, raw['fc'] * (1.0 / K), W_OFFS['fc'])          # fold mean-pool 1/K
    for b in range(4):
        for part in ('d0', 'f0', 'd1', 'f1'):
            canvas = place(canvas, raw[f'b{b}_{part}'], W_OFFS[f'b{b}_{part}'])
    canvas = place(canvas, raw['b4_d0'], W_OFFS['b4_d0sc'])              # map_to_dir
    canvas = place(canvas, raw['b4_sc'], W_OFFS['b4_d0sc'] + H)          # shortcut, stacked
    canvas = place(canvas, raw['b4_f0'], W_OFFS['b4_f0'])
    canvas = place(canvas, raw['b4_d1'], W_OFFS['b4_d1'])
    canvas = place(canvas, raw['b4_f1'], W_OFFS['b4_f1'])
    canvas = place(canvas, raw['vn1_feat'], W_OFFS['vn1'])
    canvas = place(canvas, raw['vn1_dir'], W_OFFS['vn1'] + CDIM // 2)
    canvas = place(canvas, raw['vn2_feat'], W_OFFS['vn2'])
    canvas = place(canvas, raw['vn2_dir'], W_OFFS['vn2'] + CDIM // 4)
    canvas = place(canvas, raw['lin'], W_OFFS['lin'])
    return canvas


def init_weight_canvas(key):
    shapes = [('conv_feat', H, 3), ('conv_dir', H, 3), ('fc', H, H)]
    for b in range(5):
        sout = CDIM if b == 4 else H
        shapes += [(f'b{b}_d0', H, H), (f'b{b}_f0', H, H), (f'b{b}_d1', H, H), (f'b{b}_f1', sout, H)]
    shapes += [('b4_sc', CDIM, H),
               ('vn1_feat', CDIM // 2, CDIM), ('vn1_dir', CDIM // 2, CDIM),
               ('vn2_feat', CDIM // 4, CDIM // 2), ('vn2_dir', CDIM // 4, CDIM // 2),
               ('lin', 2, CDIM // 4)]
    keys = jax.random.split(key, len(shapes))
    raw = {name: _torch_linear_weight(k, o, i) for k, (name, o, i) in zip(keys, shapes)}
    return pack_weight_canvas(raw)


if __name__ == "__main__":
    key = jax.random.PRNGKey(0)
    kp, kw = jax.random.split(key)
    p = jax.random.uniform(kp, (B, N, DIM), jnp.float32, -0.5, 0.5)
    w_canvas = init_weight_canvas(kw)

    fea = jax.jit(local_pool_vn_pointnet_forward)(p, w_canvas)
    fea = jax.block_until_ready(fea)

    assert fea['xz'].shape == (B, CDIM, RESO_PLANE, RESO_PLANE)
    assert fea['xy'].shape == (B, CDIM, RESO_PLANE, RESO_PLANE)
    assert fea['yz'].shape == (B, CDIM, RESO_PLANE, RESO_PLANE)
    assert fea['grid'].shape == (B, CDIM, RESO_GRID, RESO_GRID, RESO_GRID)
    for v in fea.values():
        assert bool(jnp.all(jnp.isfinite(v)))
    print("KERNEL_OK")
</pallas_src>

<mosaic_0001>
module attributes {stable_mosaic.version = 11 : i64} {
  func.func @vn_pointnet_fused_kernel(%arg0: i32, %arg1: memref<16x3072xbf16, #tpu.memory_space<vmem>>, %arg2: memref<1x128x4xi32, #tpu.memory_space<vmem>>, %arg3: memref<944x64xbf16, #tpu.memory_space<vmem>>, %arg4: memref<1x64x256xf32, #tpu.memory_space<vmem>>) attributes {dimension_semantics = [#tpu.dimension_semantics<parallel>], iteration_bounds = array<i64: 2>, scalar_prefetch = 0 : i64, scratch_operands = 0 : i64, tpu.core_type = #tpu.core_type<tc>, window_params = [{transform_indices = @transform_0, window_bounds = array<i64: 16, 3072>}, {transform_indices = @transform_1, window_bounds = array<i64: 1, 128, 4>}, {pipeline_mode = #tpu.pipeline_mode<synchronous>, transform_indices = @transform_2, window_bounds = array<i64: 944, 64>}, {transform_indices = @transform_3, window_bounds = array<i64: 1, 64, 256>}]} {
    %c0 = arith.constant 0 : index
    %c0_0 = arith.constant 0 : index
    %0 = vector.load %arg3[%c0, %c0_0] : memref<944x64xbf16, #tpu.memory_space<vmem>>, vector<64x16xbf16>
    %c0_1 = arith.constant 0 : index
    %c0_2 = arith.constant 0 : index
    %1 = vector.load %arg1[%c0_1, %c0_2] : memref<16x3072xbf16, #tpu.memory_space<vmem>>, vector<16x384xbf16>
    %cst = arith.constant dense<0.000000e+00> : vector<64x384xf32>
    %2 = tpu.matmul %0, %1, %cst {dimension_numbers = #tpu.dot_dimension_numbers<[1], [0], [0], [1], [0, 0, 1, 1], [], []>} : vector<64x16xbf16>, vector<16x384xbf16>, vector<64x384xf32> -> vector<64x384xf32>
    %3 = vector.extract_strided_slice %2 {offsets = [0, 0], sizes = [32, 384], strides = [1, 1]} : vector<64x384xf32> to vector<32x384xf32>
    %4 = vector.extract_strided_slice %2 {offsets = [32, 0], sizes = [32, 384], strides = [1, 1]} : vector<64x384xf32> to vector<32x384xf32>
    %5 = vector.extract_strided_slice %3 {offsets = [0, 0], sizes = [32, 128], strides = [1, 1]} : vector<32x384xf32> to vector<32x128xf32>
    %6 = vector.extract_strided_slice %3 {offsets = [0, 128], sizes = [32, 128], strides = [1, 1]} : vector<32x384xf32> to vector<32x128xf32>
    %7 = vector.extract_strided_slice %3 {offsets = [0, 256], sizes = [32, 128], strides = [1, 1]} : vector<32x384xf32> to vector<32x128xf32>
    %8 = vector.extract_strided_slice %4 {offsets = [0, 0], sizes = [32, 128], strides = [1, 1]} : vector<32x384xf32> to vector<32x128xf32>
    %9 = vector.extract_strided_slice %4 {offsets = [0, 128], sizes = [32, 128], strides = [1, 1]} : vector<32x384xf32> to vector<32x128xf32>
    %10 = vector.extract_strided_slice %4 {offsets = [0, 256], sizes = [32, 128], strides = [1, 1]} : vector<32x384xf32> to vector<32x128xf32>
    %11 = arith.mulf %5, %8 : vector<32x128xf32>
    %12 = arith.mulf %6, %9 : vector<32x128xf32>
    %13 = arith.addf %11, %12 : vector<32x128xf32>
    %14 = arith.mulf %7, %10 : vector<32x128xf32>
    %15 = arith.addf %13, %14 : vector<32x128xf32>
    %16 = arith.mulf %8, %8 : vector<32x128xf32>
    %17 = arith.mulf %9, %9 : vector<32x128xf32>
    %18 = arith.addf %16, %17 : vector<32x128xf32>
    %19 = arith.mulf %10, %10 : vector<32x128xf32>
    %20 = arith.addf %18, %19 : vector<32x128xf32>
    %cst_3 = arith.constant 9.99999997E-7 : f32
    %21 = vector.broadcast %cst_3 : f32 to vector<32x128xf32>
    %22 = arith.addf %20, %21 : vector<32x128xf32>
    %23 = tpu.reciprocal %22 {approx = true} : vector<32x128xf32> -> vector<32x128xf32>
    %24 = arith.mulf %15, %23 : vector<32x128xf32>
    %cst_4 = arith.constant 0.000000e+00 : f32
    %25 = vector.broadcast %cst_4 : f32 to vector<32x128xf32>
    %26 = arith.cmpf oge, %15, %25 : vector<32x128xf32>
    %27 = arith.mulf %24, %8 : vector<32x128xf32>
    %28 = arith.subf %5, %27 : vector<32x128xf32>
    %29 = arith.select %26, %5, %28 : vector<32x128xi1>, vector<32x128xf32>
    %30 = arith.mulf %24, %9 : vector<32x128xf32>
    %31 = arith.subf %6, %30 : vector<32x128xf32>
    %32 = arith.select %26, %6, %31 : vector<32x128xi1>, vector<32x128xf32>
    %33 = arith.mulf %24, %10 : vector<32x128xf32>
    %34 = arith.subf %7, %33 : vector<32x128xf32>
    %35 = arith.select %26, %7, %34 : vector<32x128xi1>, vector<32x128xf32>
    %36 = tpu.concatenate %29, %32, %35 in 1 : vector<32x128xf32>, vector<32x128xf32>, vector<32x128xf32> -> vector<32x384xf32>
    %c0_5 = arith.constant 0 : index
    %c384 = arith.constant 384 : index
    %37 = vector.load %arg1[%c0_5, %c384] : memref<16x3072xbf16, #tpu.memory_space<vmem>>, vector<16x384xbf16>
    %cst_6 = arith.constant dense<0.000000e+00> : vector<64x384xf32>
    %38 = tpu.matmul %0, %37, %cst_6 {dimension_numbers = #tpu.dot_dimension_numbers<[1], [0], [0], [1], [0, 0, 1, 1], [], []>} : vector<64x16xbf16>, vector<16x384xbf16>, vector<64x384xf32> -> vector<64x384xf32>
    %39 = vector.extract_strided_slice %38 {offsets = [0, 0], sizes = [32, 384], strides = [1, 1]} : vector<64x384xf32> to vector<32x384xf32>
    %40 = vector.extract_strided_slice %38 {offsets = [32, 0], sizes = [32, 384], strides = [1, 1]} : vector<64x384xf32> to vector<32x384xf32>
    %41 = vector.extract_strided_slice %39 {offsets = [0, 0], sizes = [32, 128], strides = [1, 1]} : vector<32x384xf32> to vector<32x128xf32>
    %42 = vector.extract_strided_slice %39 {offsets = [0, 128], sizes = [32, 128], strides = [1, 1]} : vector<32x384xf32> to vector<32x128xf32>
    %43 = vector.extract_strided_slice %39 {offsets = [0, 256], sizes = [32, 128], strides = [1, 1]} : vector<32x384xf32> to vector<32x128xf32>
    %44 = vector.extract_strided_slice %40 {offsets = [0, 0], sizes = [32, 128], strides = [1, 1]} : vector<32x384xf32> to vector<32x128xf32>
    %45 = vector.extract_strided_slice %40 {offsets = [0, 128], sizes = [32, 128], strides = [1, 1]} : vector<32x384xf32> to vector<32x128xf32>
    %46 = vector.extract_strided_slice %40 {offsets = [0, 256], sizes = [32, 128], strides = [1, 1]} : vector<32x384xf32> to vector<32x128xf32>
    %47 = arith.mulf %41, %44 : vector<32x128xf32>
    %48 = arith.mulf %42, %45 : vector<32x128xf32>
    %49 = arith.addf %47, %48 : vector<32x128xf32>
    %50 = arith.mulf %43, %46 : vector<32x128xf32>
    %51 = arith.addf %49, %50 : vector<32x128xf32>
    %52 = arith.mulf %44, %44 : vector<32x128xf32>
    %53 = arith.mulf %45, %45 : vector<32x128xf32>
    %54 = arith.addf %52, %53 : vector<32x128xf32>
    %55 = arith.mulf %46, %46 : vector<32x128xf32>
    %56 = arith.addf %54, %55 : vector<32x128xf32>
    %cst_7 = arith.constant 9.99999997E-7 : f32
    %57 = vector.broadcast %cst_7 : f32 to vector<32x128xf32>
    %58 = arith.addf %56, %57 : vector<32x128xf32>
    %59 = tpu.reciprocal %58 {approx = true} : vector<32x128xf32> -> vector<32x128xf32>
    %60 = arith.mulf %51, %59 : vector<32x128xf32>
    %cst_8 = arith.constant 0.000000e+00 : f32
    %61 = vector.broadcast %cst_8 : f32 to vector<32x128xf32>
    %62 = arith.cmpf oge, %51, %61 : vector<32x128xf32>
    %63 = arith.mulf %60, %44 : vector<32x128xf32>
    %64 = arith.subf %41, %63 : vector<32x128xf32>
    %65 = arith.select %62, %41, %64 : vector<32x128xi1>, vector<32x128xf32>
    %66 = arith.mulf %60, %45 : vector<32x128xf32>
    %67 = arith.subf %42, %66 : vector<32x128xf32>
    %68 = arith.select %62, %42, %67 : vector<32x128xi1>, vector<32x128xf32>
    %69 = arith.mulf %60, %46 : vector<32x128xf32>
    %70 = arith.subf %43, %69 : vector<32x128xf32>
    %71 = arith.select %62, %43, %70 : vector<32x128xi1>, vector<32x128xf32>
    %72 = tpu.concatenate %65, %68, %71 in 1 : vector<32x128xf32>, vector<32x128xf32>, vector<32x128xf32> -> vector<32x384xf32>
    %73 = arith.addf %36, %72 : vector<32x384xf32>
    %c0_9 = arith.constant 0 : index
    %c768 = arith.constant 768 : index
    %74 = vector.load %arg1[%c0_9, %c768] : memref<16x3072xbf16, #tpu.memory_space<vmem>>, vector<16x384xbf16>
    %cst_10 = arith.constant dense<0.000000e+00> : vector<64x384xf32>
    %75 = tpu.matmul %0, %74, %cst_10 {dimension_numbers = #tpu.dot_dimension_numbers<[1], [0], [0], [1], [0, 0, 1, 1], [], []>} : vector<64x16xbf16>, vector<16x384xbf16>, vector<64x384xf32> -> vector<64x384xf32>
    %76 = vector.extract_strided_slice %75 {offsets = [0, 0], sizes = [32, 384], strides = [1, 1]} : vector<64x384xf32> to vector<32x384xf32>
    %77 = vector.extract_strided_slice %75 {offsets = [32, 0], sizes = [32, 384], strides = [1, 1]} : vector<64x384xf32> to vector<32x384xf32>
    %78 = vector.extract_strided_slice %76 {offsets = [0, 0], sizes = [32, 128], strides = [1, 1]} : vector<32x384xf32> to vector<32x128xf32>
    %79 = vector.extract_strided_slice %76 {offsets = [0, 128], sizes = [32, 128], strides = [1, 1]} : vector<32x384xf32> to vector<32x128xf32>
    %80 = vector.extract_strided_slice %76 {offsets = [0, 256], sizes = [32, 128], strides = [1, 1]} : vector<32x384xf32> to vector<32x128xf32>
    %81 = vector.extract_strided_slice %77 {offsets = [0, 0], sizes = [32, 128], strides = [1, 1]} : vector<32x384xf32> to vector<32x128xf32>
    %82 = vector.extract_strided_slice %77 {offsets = [0, 128], sizes = [32, 128], strides = [1, 1]} : vector<32x384xf32> to vector<32x128xf32>
    %83 = vector.extract_strided_slice %77 {offsets = [0, 256], sizes = [32, 128], strides = [1, 1]} : vector<32x384xf32> to vector<32x128xf32>
    %84 = arith.mulf %78, %81 : vector<32x128xf32>
    %85 = arith.mulf %79, %82 : vector<32x128xf32>
    %86 = arith.addf %84, %85 : vector<32x128xf32>
    %87 = arith.mulf %80, %83 : vector<32x128xf32>
    %88 = arith.addf %86, %87 : vector<32x128xf32>
    %89 = arith.mulf %81, %81 : vector<32x128xf32>
    %90 = arith.mulf %82, %82 : vector<32x128xf32>
    %91 = arith.addf %89, %90 : vector<32x128xf32>
    %92 = arith.mulf %83, %83 : vector<32x128xf32>
    %93 = arith.addf %91, %92 : vector<32x128xf32>
    %cst_11 = arith.constant 9.99999997E-7 : f32
    %94 = vector.broadcast %cst_11 : f32 to vector<32x128xf32>
    %95 = arith.addf %93, %94 : vector<32x128xf32>
    %96 = tpu.reciprocal %95 {approx = true} : vector<32x128xf32> -> vector<32x128xf32>
    %97 = arith.mulf %88, %96 : vector<32x128xf32>
    %cst_12 = arith.constant 0.000000e+00 : f32
    %98 = vector.broadcast %cst_12 : f32 to vector<32x128xf32>
    %99 = arith.cmpf oge, %88, %98 : vector<32x128xf32>
    %100 = arith.mulf %97, %81 : vector<32x128xf32>
    %101 = arith.subf %78, %100 : vector<32x128xf32>
    %102 = arith.select %99, %78, %101 : vector<32x128xi1>, vector<32x128xf32>
    %103 = arith.mulf %97, %82 : vector<32x128xf32>
    %104 = arith.subf %79, %103 : vector<32x128xf32>
    %105 = arith.select %99, %79, %104 : vector<32x128xi1>, vector<32x128xf32>
    %106 = arith.mulf %97, %83 : vector<32x128xf32>
    %107 = arith.subf %80, %106 : vector<32x128xf32>
    %108 = arith.select %99, %80, %107 : vector<32x128xi1>, vector<32x128xf32>
    %109 = tpu.concatenate %102, %105, %108 in 1 : vector<32x128xf32>, vector<32x128xf32>, vector<32x128xf32> -> vector<32x384xf32>
    %110 = arith.addf %73, %109 : vector<32x384xf32>
    %c0_13 = arith.constant 0 : index
    %c1152 = arith.constant 1152 : index
    %111 = vector.load %arg1[%c0_13, %c1152] : memref<16x3072xbf16, #tpu.memory_space<vmem>>, vector<16x384xbf16>
    %cst_14 = arith.constant dense<0.000000e+00> : vector<64x384xf32>
    %112 = tpu.matmul %0, %111, %cst_14 {dimension_numbers = #tpu.dot_dimension_numbers<[1], [0], [0], [1], [0, 0, 1, 1], [], []>} : vector<64x16xbf16>, vector<16x384xbf16>, vector<64x384xf32> -> vector<64x384xf32>
    %113 = vector.extract_strided_slice %112 {offsets = [0, 0], sizes = [32, 384], strides = [1, 1]} : vector<64x384xf32> to vector<32x384xf32>
    %114 = vector.extract_strided_slice %112 {offsets = [32, 0], sizes = [32, 384], strides = [1, 1]} : vector<64x384xf32> to vector<32x384xf32>
    %115 = vector.extract_strided_slice %113 {offsets = [0, 0], sizes = [32, 128], strides = [1, 1]} : vector<32x384xf32> to vector<32x128xf32>
    %116 = vector.extract_strided_slice %113 {offsets = [0, 128], sizes = [32, 128], strides = [1, 1]} : vector<32x384xf32> to vector<32x128xf32>
    %117 = vector.extract_strided_slice %113 {offsets = [0, 256], sizes = [32, 128], strides = [1, 1]} : vector<32x384xf32> to vector<32x128xf32>
    %118 = vector.extract_strided_slice %114 {offsets = [0, 0], sizes = [32, 128], strides = [1, 1]} : vector<32x384xf32> to vector<32x128xf32>
    %119 = vector.extract_strided_slice %114 {offsets = [0, 128], sizes = [32, 128], strides = [1, 1]} : vector<32x384xf32> to vector<32x128xf32>
    %120 = vector.extract_strided_slice %114 {offsets = [0, 256], sizes = [32, 128], strides = [1, 1]} : vector<32x384xf32> to vector<32x128xf32>
    %121 = arith.mulf %115, %118 : vector<32x128xf32>
    %122 = arith.mulf %116, %119 : vector<32x128xf32>
    %123 = arith.addf %121, %122 : vector<32x128xf32>
    %124 = arith.mulf %117, %120 : vector<32x128xf32>
    %125 = arith.addf %123, %124 : vector<32x128xf32>
    %126 = arith.mulf %118, %118 : vector<32x128xf32>
    %127 = arith.mulf %119, %119 : vector<32x128xf32>
    %128 = arith.addf %126, %127 : vector<32x128xf32>
    %129 = arith.mulf %120, %120 : vector<32x128xf32>
    %130 = arith.addf %128, %129 : vector<32x128xf32>
    %cst_15 = arith.constant 9.99999997E-7 : f32
    %131 = vector.broadcast %cst_15 : f32 to vector<32x128xf32>
    %132 = arith.addf %130, %131 : vector<32x128xf32>
    %133 = tpu.reciprocal %132 {approx = true} : vector<32x128xf32> -> vector<32x128xf32>
    %134 = arith.mulf %125, %133 : vector<32x128xf32>
    %cst_16 = arith.constant 0.000000e+00 : f32
    %135 = vector.broadcast %cst_16 : f32 to vector<32x128xf32>
    %136 = arith.cmpf oge, %125, %135 : vector<32x128xf32>
    %137 = arith.mulf %134, %118 : vector<32x128xf32>
    %138 = arith.subf %115, %137 : vector<32x128xf32>
    %139 = arith.select %136, %115, %138 : vector<32x128xi1>, vector<32x128xf32>
    %140 = arith.mulf %134, %119 : vector<32x128xf32>
    %141 = arith.subf %116, %140 : vector<32x128xf32>
    %142 = arith.select %136, %116, %141 : vector<32x128xi1>, vector<32x128xf32>
    %143 = arith.mulf %134, %120 : vector<32x128xf32>
    %144 = arith.subf %117, %143 : vector<32x128xf32>
    %145 = arith.select %136, %117, %144 : vector<32x128xi1>, vector<32x128xf32>
    %146 = tpu.concatenate %139, %142, %145 in 1 : vector<32x128xf32>, vector<32x128xf32>, vector<32x128xf32> -> vector<32x384xf32>
    %147 = arith.addf %110, %146 : vector<32x384xf32>
    %c0_17 = arith.constant 0 : index
    %c1536 = arith.constant 1536 : index
    %148 = vector.load %arg1[%c0_17, %c1536] : memref<16x3072xbf16, #tpu.memory_space<vmem>>, vector<16x384xbf16>
    %cst_18 = arith.constant dense<0.000000e+00> : vector<64x384xf32>
    %149 = tpu.matmul %0, %148, %cst_18 {dimension_numbers = #tpu.dot_dimension_numbers<[1], [0], [0], [1], [0, 0, 1, 1], [], []>} : vector<64x16xbf16>, vector<16x384xbf16>, vector<64x384xf32> -> vector<64x384xf32>
    %150 = vector.extract_strided_slice %149 {offsets = [0, 0], sizes = [32, 384], strides = [1, 1]} : vector<64x384xf32> to vector<32x384xf32>
    %151 = vector.extract_strided_slice %149 {offsets = [32, 0], sizes = [32, 384], strides = [1, 1]} : vector<64x384xf32> to vector<32x384xf32>
    %152 = vector.extract_strided_slice %150 {offsets = [0, 0], sizes = [32, 128], strides = [1, 1]} : vector<32x384xf32> to vector<32x128xf32>
    %153 = vector.extract_strided_slice %150 {offsets = [0, 128], sizes = [32, 128], strides = [1, 1]} : vector<32x384xf32> to vector<32x128xf32>
    %154 = vector.extract_strided_slice %150 {offsets = [0, 256], sizes = [32, 128], strides = [1, 1]} : vector<32x384xf32> to vector<32x128xf32>
    %155 = vector.extract_strided_slice %151 {offsets = [0, 0], sizes = [32, 128], strides = [1, 1]} : vector<32x384xf32> to vector<32x128xf32>
    %156 = vector.extract_strided_slice %151 {offsets = [0, 128], sizes = [32, 128], strides = [1, 1]} : vector<32x384xf32> to vector<32x128xf32>
    %157 = vector.extract_strided_slice %151 {offsets = [0, 256], sizes = [32, 128], strides = [1, 1]} : vector<32x384xf32> to vector<32x128xf32>
    %158 = arith.mulf %152, %155 : vector<32x128xf32>
    %159 = arith.mulf %153, %156 : vector<32x128xf32>
    %160 = arith.addf %158, %159 : vector<32x128xf32>
    %161 = arith.mulf %154, %157 : vector<32x128xf32>
    %162 = arith.addf %160, %161 : vector<32x128xf32>
    %163 = arith.mulf %155, %155 : vector<32x128xf32>
    %164 = arith.mulf %156, %156 : vector<32x128xf32>
    %165 = arith.addf %163, %164 : vector<32x128xf32>
    %166 = arith.mulf %157, %157 : vector<32x128xf32>
    %167 = arith.addf %165, %166 : vector<32x128xf32>
    %cst_19 = arith.constant 9.99999997E-7 : f32
    %168 = vector.broadcast %cst_19 : f32 to vector<32x128xf32>
    %169 = arith.addf %167, %168 : vector<32x128xf32>
    %170 = tpu.reciprocal %169 {approx = true} : vector<32x128xf32> -> vector<32x128xf32>
    %171 = arith.mulf %162, %170 : vector<32x128xf32>
    %cst_20 = arith.constant 0.000000e+00 : f32
    %172 = vector.broadcast %cst_20 : f32 to vector<32x128xf32>
    %173 = arith.cmpf oge, %162, %172 : vector<32x128xf32>
    %174 = arith.mulf %171, %155 : vector<32x128xf32>
    %175 = arith.subf %152, %174 : vector<32x128xf32>
    %176 = arith.select %173, %152, %175 : vector<32x128xi1>, vector<32x128xf32>
    %177 = arith.mulf %171, %156 : vector<32x128xf32>
    %178 = arith.subf %153, %177 : vector<32x128xf32>
    %179 = arith.select %173, %153, %178 : vector<32x128xi1>, vector<32x128xf32>
    %180 = arith.mulf %171, %157 : vector<32x128xf32>
    %181 = arith.subf %154, %180 : vector<32x128xf32>
    %182 = arith.select %173, %154, %181 : vector<32x128xi1>, vector<32x128xf32>
    %183 = tpu.concatenate %176, %179, %182 in 1 : vector<32x128xf32>, vector<32x128xf32>, vector<32x128xf32> -> vector<32x384xf32>
    %184 = arith.addf %147, %183 : vector<32x384xf32>
    %c0_21 = arith.constant 0 : index
    %c1920 = arith.constant 1920 : index
    %185 = vector.load %arg1[%c0_21, %c1920] : memref<16x3072xbf16, #tpu.memory_space<vmem>>, vector<16x384xbf16>
    %cst_22 = arith.constant dense<0.000000e+00> : vector<64x384xf32>
    %186 = tpu.matmul %0, %185, %cst_22 {dimension_numbers = #tpu.dot_dimension_numbers<[1], [0], [0], [1], [0, 0, 1, 1], [], []>} : vector<64x16xbf16>, vector<16x384xbf16>, vector<64x384xf32> -> vector<64x384xf32>
    %187 = vector.extract_strided_slice %186 {offsets = [0, 0], sizes = [32, 384], strides = [1, 1]} : vector<64x384xf32> to vector<32x384xf32>
    %188 = vector.extract_strided_slice %186 {offsets = [32, 0], sizes = [32, 384], strides = [1, 1]} : vector<64x384xf32> to vector<32x384xf32>
    %189 = vector.extract_strided_slice %187 {offsets = [0, 0], sizes = [32, 128], strides = [1, 1]} : vector<32x384xf32> to vector<32x128xf32>
    %190 = vector.extract_strided_slice %187 {offsets = [0, 128], sizes = [32, 128], strides = [1, 1]} : vector<32x384xf32> to vector<32x128xf32>
    %191 = vector.extract_strided_slice %187 {offsets = [0, 256], sizes = [32, 128], strides = [1, 1]} : vector<32x384xf32> to vector<32x128xf32>
    %192 = vector.extract_strided_slice %188 {offsets = [0, 0], sizes = [32, 128], strides = [1, 1]} : vector<32x384xf32> to vector<32x128xf32>
    %193 = vector.extract_strided_slice %188 {offsets = [0, 128], sizes = [32, 128], strides = [1, 1]} : vector<32x384xf32> to vector<32x128xf32>
    %194 = vector.extract_strided_slice %188 {offsets = [0, 256], sizes = [32, 128], strides = [1, 1]} : vector<32x384xf32> to vector<32x128xf32>
    %195 = arith.mulf %189, %192 : vector<32x128xf32>
    %196 = arith.mulf %190, %193 : vector<32x128xf32>
    %197 = arith.addf %195, %196 : vector<32x128xf32>
    %198 = arith.mulf %191, %194 : vector<32x128xf32>
    %199 = arith.addf %197, %198 : vector<32x128xf32>
    %200 = arith.mulf %192, %192 : vector<32x128xf32>
    %201 = arith.mulf %193, %193 : vector<32x128xf32>
    %202 = arith.addf %200, %201 : vector<32x128xf32>
    %203 = arith.mulf %194, %194 : vector<32x128xf32>
    %204 = arith.addf %202, %203 : vector<32x128xf32>
    %cst_23 = arith.constant 9.99999997E-7 : f32
    %205 = vector.broadcast %cst_23 : f32 to vector<32x128xf32>
    %206 = arith.addf %204, %205 : vector<32x128xf32>
    %207 = tpu.reciprocal %206 {approx = true} : vector<32x128xf32> -> vector<32x128xf32>
    %208 = arith.mulf %199, %207 : vector<32x128xf32>
    %cst_24 = arith.constant 0.000000e+00 : f32
    %209 = vector.broadcast %cst_24 : f32 to vector<32x128xf32>
    %210 = arith.cmpf oge, %199, %209 : vector<32x128xf32>
    %211 = arith.mulf %208, %192 : vector<32x128xf32>
    %212 = arith.subf %189, %211 : vector<32x128xf32>
    %213 = arith.select %210, %189, %212 : vector<32x128xi1>, vector<32x128xf32>
    %214 = arith.mulf %208, %193 : vector<32x128xf32>
    %215 = arith.subf %190, %214 : vector<32x128xf32>
    %216 = arith.select %210, %190, %215 : vector<32x128xi1>, vector<32x128xf32>
    %217 = arith.mulf %208, %194 : vector<32x128xf32>
    %218 = arith.subf %191, %217 : vector<32x128xf32>
    %219 = arith.select %210, %191, %218 : vector<32x128xi1>, vector<32x128xf32>
    %220 = tpu.concatenate %213, %216, %219 in 1 : vector<32x128xf32>, vector<32x128xf32>, vector<32x128xf32> -> vector<32x384xf32>
    %221 = arith.addf %184, %220 : vector<32x384xf32>
    %c0_25 = arith.constant 0 : index
    %c2304 = arith.constant 2304 : index
    %222 = vector.load %arg1[%c0_25, %c2304] : memref<16x3072xbf16, #tpu.memory_space<vmem>>, vector<16x384xbf16>
    %cst_26 = arith.constant dense<0.000000e+00> : vector<64x384xf32>
    %223 = tpu.matmul %0, %222, %cst_26 {dimension_numbers = #tpu.dot_dimension_numbers<[1], [0], [0], [1], [0, 0, 1, 1], [], []>} : vector<64x16xbf16>, vector<16x384xbf16>, vector<64x384xf32> -> vector<64x384xf32>
    %224 = vector.extract_strided_slice %223 {offsets = [0, 0], sizes = [32, 384], strides = [1, 1]} : vector<64x384xf32> to vector<32x384xf32>
    %225 = vector.extract_strided_slice %223 {offsets = [32, 0], sizes = [32, 384], strides = [1, 1]} : vector<64x384xf32> to vector<32x384xf32>
    %226 = vector.extract_strided_slice %224 {offsets = [0, 0], sizes = [32, 128], strides = [1, 1]} : vector<32x384xf32> to vector<32x128xf32>
    %227 = vector.extract_strided_slice %224 {offsets = [0, 128], sizes = [32, 128], strides = [1, 1]} : vector<32x384xf32> to vector<32x128xf32>
    %228 = vector.extract_strided_slice %224 {offsets = [0, 256], sizes = [32, 128], strides = [1, 1]} : vector<32x384xf32> to vector<32x128xf32>
    %229 = vector.extract_strided_slice %225 {offsets = [0, 0], sizes = [32, 128], strides = [1, 1]} : vector<32x384xf32> to vector<32x128xf32>
    %230 = vector.extract_strided_slice %225 {offsets = [0, 128], sizes = [32, 128], strides = [1, 1]} : vector<32x384xf32> to vector<32x128xf32>
    %231 = vector.extract_strided_slice %225 {offsets = [0, 256], sizes = [32, 128], strides = [1, 1]} : vector<32x384xf32> to vector<32x128xf32>
    %232 = arith.mulf %226, %229 : vector<32x128xf32>
    %233 = arith.mulf %227, %230 : vector<32x128xf32>
    %234 = arith.addf %232, %233 : vector<32x128xf32>
    %235 = arith.mulf %228, %231 : vector<32x128xf32>
    %236 = arith.addf %234, %235 : vector<32x128xf32>
    %237 = arith.mulf %229, %229 : vector<32x128xf32>
    %238 = arith.mulf %230, %230 : vector<32x128xf32>
    %239 = arith.addf %237, %238 : vector<32x128xf32>
    %240 = arith.mulf %231, %231 : vector<32x128xf32>
    %241 = arith.addf %239, %240 : vector<32x128xf32>
    %cst_27 = arith.constant 9.99999997E-7 : f32
    %242 = vector.broadcast %cst_27 : f32 to vector<32x128xf32>
    %243 = arith.addf %241, %242 : vector<32x128xf32>
    %244 = tpu.reciprocal %243 {approx = true} : vector<32x128xf32> -> vector<32x128xf32>
    %245 = arith.mulf %236, %244 : vector<32x128xf32>
    %cst_28 = arith.constant 0.000000e+00 : f32
    %246 = vector.broadcast %cst_28 : f32 to vector<32x128xf32>
    %247 = arith.cmpf oge, %236, %246 : vector<32x128xf32>
    %248 = arith.mulf %245, %229 : vector<32x128xf32>
    %249 = arith.subf %226, %248 : vector<32x128xf32>
    %250 = arith.select %247, %226, %249 : vector<32x128xi1>, vector<32x128xf32>
    %251 = arith.mulf %245, %230 : vector<32x128xf32>
    %252 = arith.subf %227, %251 : vector<32x128xf32>
    %253 = arith.select %247, %227, %252 : vector<32x128xi1>, vector<32x128xf32>
    %254 = arith.mulf %245, %231 : vector<32x128xf32>
    %255 = arith.subf %228, %254 : vector<32x128xf32>
    %256 = arith.select %247, %228, %255 : vector<32x128xi1>, vector<32x128xf32>
    %257 = tpu.concatenate %250, %253, %256 in 1 : vector<32x128xf32>, vector<32x128xf32>, vector<32x128xf32> -> vector<32x384xf32>
    %258 = arith.addf %221, %257 : vector<32x384xf32>
    %c0_29 = arith.constant 0 : index
    %c2688 = arith.constant 2688 : index
    %259 = vector.load %arg1[%c0_29, %c2688] : memref<16x3072xbf16, #tpu.memory_space<vmem>>, vector<16x384xbf16>
    %cst_30 = arith.constant dense<0.000000e+00> : vector<64x384xf32>
    %260 = tpu.matmul %0, %259, %cst_30 {dimension_numbers = #tpu.dot_dimension_numbers<[1], [0], [0], [1], [0, 0, 1, 1], [], []>} : vector<64x16xbf16>, vector<16x384xbf16>, vector<64x384xf32> -> vector<64x384xf32>
    %261 = vector.extract_strided_slice %260 {offsets = [0, 0], sizes = [32, 384], strides = [1, 1]} : vector<64x384xf32> to vector<32x384xf32>
    %262 = vector.extract_strided_slice %260 {offsets = [32, 0], sizes = [32, 384], strides = [1, 1]} : vector<64x384xf32> to vector<32x384xf32>
    %263 = vector.extract_strided_slice %261 {offsets = [0, 0], sizes = [32, 128], strides = [1, 1]} : vector<32x384xf32> to vector<32x128xf32>
    %264 = vector.extract_strided_slice %261 {offsets = [0, 128], sizes = [32, 128], strides = [1, 1]} : vector<32x384xf32> to vector<32x128xf32>
    %265 = vector.extract_strided_slice %261 {offsets = [0, 256], sizes = [32, 128], strides = [1, 1]} : vector<32x384xf32> to vector<32x128xf32>
    %266 = vector.extract_strided_slice %262 {offsets = [0, 0], sizes = [32, 128], strides = [1, 1]} : vector<32x384xf32> to vector<32x128xf32>
    %267 = vector.extract_strided_slice %262 {offsets = [0, 128], sizes = [32, 128], strides = [1, 1]} : vector<32x384xf32> to vector<32x128xf32>
    %268 = vector.extract_strided_slice %262 {offsets = [0, 256], sizes = [32, 128], strides = [1, 1]} : vector<32x384xf32> to vector<32x128xf32>
    %269 = arith.mulf %263, %266 : vector<32x128xf32>
    %270 = arith.mulf %264, %267 : vector<32x128xf32>
    %271 = arith.addf %269, %270 : vector<32x128xf32>
    %272 = arith.mulf %265, %268 : vector<32x128xf32>
    %273 = arith.addf %271, %272 : vector<32x128xf32>
    %274 = arith.mulf %266, %266 : vector<32x128xf32>
    %275 = arith.mulf %267, %267 : vector<32x128xf32>
    %276 = arith.addf %274, %275 : vector<32x128xf32>
    %277 = arith.mulf %268, %268 : vector<32x128xf32>
    %278 = arith.addf %276, %277 : vector<32x128xf32>
    %cst_31 = arith.constant 9.99999997E-7 : f32
    %279 = vector.broadcast %cst_31 : f32 to vector<32x128xf32>
    %280 = arith.addf %278, %279 : vector<32x128xf32>
    %281 = tpu.reciprocal %280 {approx = true} : vector<32x128xf32> -> vector<32x128xf32>
    %282 = arith.mulf %273, %281 : vector<32x128xf32>
    %cst_32 = arith.constant 0.000000e+00 : f32
    %283 = vector.broadcast %cst_32 : f32 to vector<32x128xf32>
    %284 = arith.cmpf oge, %273, %283 : vector<32x128xf32>
    %285 = arith.mulf %282, %266 : vector<32x128xf32>
    %286 = arith.subf %263, %285 : vector<32x128xf32>
    %287 = arith.select %284, %263, %286 : vector<32x128xi1>, vector<32x128xf32>
    %288 = arith.mulf %282, %267 : vector<32x128xf32>
    %289 = arith.subf %264, %288 : vector<32x128xf32>
    %290 = arith.select %284, %264, %289 : vector<32x128xi1>, vector<32x128xf32>
    %291 = arith.mulf %282, %268 : vector<32x128xf32>
    %292 = arith.subf %265, %291 : vector<32x128xf32>
    %293 = arith.select %284, %265, %292 : vector<32x128xi1>, vector<32x128xf32>
    %294 = tpu.concatenate %287, %290, %293 in 1 : vector<32x128xf32>, vector<32x128xf32>, vector<32x128xf32> -> vector<32x384xf32>
    %295 = arith.addf %258, %294 : vector<32x384xf32>
    %c64 = arith.constant 64 : index
    %c0_33 = arith.constant 0 : index
    %296 = vector.load %arg3[%c64, %c0_33] : memref<944x64xbf16, #tpu.memory_space<vmem>>, vector<32x32xbf16>
    %297 = arith.truncf %295 : vector<32x384xf32> to vector<32x384xbf16>
    %cst_34 = arith.constant dense<0.000000e+00> : vector<32x384xf32>
    %298 = tpu.matmul %296, %297, %cst_34 {dimension_numbers = #tpu.dot_dimension_numbers<[1], [0], [0], [1], [0, 0, 1, 1], [], []>} : vector<32x32xbf16>, vector<32x384xbf16>, vector<32x384xf32> -> vector<32x384xf32>
    %c96 = arith.constant 96 : index
    %c0_35 = arith.constant 0 : index
    %299 = vector.load %arg3[%c96, %c0_35] : memref<944x64xbf16, #tpu.memory_space<vmem>>, vector<32x32xbf16>
    %c128 = arith.constant 128 : index
    %c0_36 = arith.constant 0 : index
    %300 = vector.load %arg3[%c128, %c0_36] : memref<944x64xbf16, #tpu.memory_space<vmem>>, vector<32x32xbf16>
    %c160 = arith.constant 160 : index
    %c0_37 = arith.constant 0 : index
    %301 = vector.load %arg3[%c160, %c0_37] : memref<944x64xbf16, #tpu.memory_space<vmem>>, vector<32x32xbf16>
    %c192 = arith.constant 192 : index
    %c0_38 = arith.constant 0 : index
    %302 = vector.load %arg3[%c192, %c0_38] : memref<944x64xbf16, #tpu.memory_space<vmem>>, vector<32x32xbf16>
    %303 = arith.truncf %298 : vector<32x384xf32> to vector<32x384xbf16>
    %cst_39 = arith.constant dense<0.000000e+00> : vector<32x384xf32>
    %304 = tpu.matmul %299, %303, %cst_39 {dimension_numbers = #tpu.dot_dimension_numbers<[1], [0], [0], [1], [0, 0, 1, 1], [], []>} : vector<32x32xbf16>, vector<32x384xbf16>, vector<32x384xf32> -> vector<32x384xf32>
    %305 = vector.extract_strided_slice %298 {offsets = [0, 0], sizes = [32, 128], strides = [1, 1]} : vector<32x384xf32> to vector<32x128xf32>
    %306 = vector.extract_strided_slice %298 {offsets = [0, 128], sizes = [32, 128], strides = [1, 1]} : vector<32x384xf32> to vector<32x128xf32>
    %307 = vector.extract_strided_slice %298 {offsets = [0, 256], sizes = [32, 128], strides = [1, 1]} : vector<32x384xf32> to vector<32x128xf32>
    %308 = vector.extract_strided_slice %304 {offsets = [0, 0], sizes = [32, 128], strides = [1, 1]} : vector<32x384xf32> to vector<32x128xf32>
    %309 = vector.extract_strided_slice %304 {offsets = [0, 128], sizes = [32, 128], strides = [1, 1]} : vector<32x384xf32> to vector<32x128xf32>
    %310 = vector.extract_strided_slice %304 {offsets = [0, 256], sizes = [32, 128], strides = [1, 1]} : vector<32x384xf32> to vector<32x128xf32>
    %311 = arith.mulf %305, %308 : vector<32x128xf32>
    %312 = arith.mulf %306, %309 : vector<32x128xf32>
    %313 = arith.addf %311, %312 : vector<32x128xf32>
    %314 = arith.mulf %307, %310 : vector<32x128xf32>
    %315 = arith.addf %313, %314 : vector<32x128xf32>
    %316 = arith.mulf %308, %308 : vector<32x128xf32>
    %317 = arith.mulf %309, %309 : vector<32x128xf32>
    %318 = arith.addf %316, %317 : vector<32x128xf32>
    %319 = arith.mulf %310, %310 : vector<32x128xf32>
    %320 = arith.addf %318, %319 : vector<32x128xf32>
    %cst_40 = arith.constant 9.99999997E-7 : f32
    %321 = vector.broadcast %cst_40 : f32 to vector<32x128xf32>
    %322 = arith.addf %320, %321 : vector<32x128xf32>
    %323 = tpu.reciprocal %322 {approx = true} : vector<32x128xf32> -> vector<32x128xf32>
    %324 = arith.mulf %315, %323 : vector<32x128xf32>
    %cst_41 = arith.constant 0.000000e+00 : f32
    %325 = vector.broadcast %cst_41 : f32 to vector<32x128xf32>
    %326 = arith.cmpf oge, %315, %325 : vector<32x128xf32>
    %327 = arith.mulf %324, %308 : vector<32x128xf32>
    %328 = arith.subf %305, %327 : vector<32x128xf32>
    %329 = arith.select %326, %305, %328 : vector<32x128xi1>, vector<32x128xf32>
    %330 = arith.mulf %324, %309 : vector<32x128xf32>
    %331 = arith.subf %306, %330 : vector<32x128xf32>
    %332 = arith.select %326, %306, %331 : vector<32x128xi1>, vector<32x128xf32>
    %333 = arith.mulf %324, %310 : vector<32x128xf32>
    %334 = arith.subf %307, %333 : vector<32x128xf32>
    %335 = arith.select %326, %307, %334 : vector<32x128xi1>, vector<32x128xf32>
    %336 = tpu.concatenate %329, %332, %335 in 1 : vector<32x128xf32>, vector<32x128xf32>, vector<32x128xf32> -> vector<32x384xf32>
    %337 = arith.truncf %336 : vector<32x384xf32> to vector<32x384xbf16>
    %cst_42 = arith.constant dense<0.000000e+00> : vector<32x384xf32>
    %338 = tpu.matmul %300, %337, %cst_42 {dimension_numbers = #tpu.dot_dimension_numbers<[1], [0], [0], [1], [0, 0, 1, 1], [], []>} : vector<32x32xbf16>, vector<32x384xbf16>, vector<32x384xf32> -> vector<32x384xf32>
    %339 = arith.truncf %338 : vector<32x384xf32> to vector<32x384xbf16>
    %cst_43 = arith.constant dense<0.000000e+00> : vector<32x384xf32>
    %340 = tpu.matmul %301, %339, %cst_43 {dimension_numbers = #tpu.dot_dimension_numbers<[1], [0], [0], [1], [0, 0, 1, 1], [], []>} : vector<32x32xbf16>, vector<32x384xbf16>, vector<32x384xf32> -> vector<32x384xf32>
    %341 = vector.extract_strided_slice %338 {offsets = [0, 0], sizes = [32, 128], strides = [1, 1]} : vector<32x384xf32> to vector<32x128xf32>
    %342 = vector.extract_strided_slice %338 {offsets = [0, 128], sizes = [32, 128], strides = [1, 1]} : vector<32x384xf32> to vector<32x128xf32>
    %343 = vector.extract_strided_slice %338 {offsets = [0, 256], sizes = [32, 128], strides = [1, 1]} : vector<32x384xf32> to vector<32x128xf32>
    %344 = vector.extract_strided_slice %340 {offsets = [0, 0], sizes = [32, 128], strides = [1, 1]} : vector<32x384xf32> to vector<32x128xf32>
    %345 = vector.extract_strided_slice %340 {offsets = [0, 128], sizes = [32, 128], strides = [1, 1]} : vector<32x384xf32> to vector<32x128xf32>
    %346 = vector.extract_strided_slice %340 {offsets = [0, 256], sizes = [32, 128], strides = [1, 1]} : vector<32x384xf32> to vector<32x128xf32>
    %347 = arith.mulf %341, %344 : vector<32x128xf32>
    %348 = arith.mulf %342, %345 : vector<32x128xf32>
    %349 = arith.addf %347, %348 : vector<32x128xf32>
    %350 = arith.mulf %343, %346 : vector<32x128xf32>
    %351 = arith.addf %349, %350 : vector<32x128xf32>
    %352 = arith.mulf %344, %344 : vector<32x128xf32>
    %353 = arith.mulf %345, %345 : vector<32x128xf32>
    %354 = arith.addf %352, %353 : vector<32x128xf32>
    %355 = arith.mulf %346, %346 : vector<32x128xf32>
    %356 = arith.addf %354, %355 : vector<32x128xf32>
    %cst_44 = arith.constant 9.99999997E-7 : f32
    %357 = vector.broadcast %cst_44 : f32 to vector<32x128xf32>
    %358 = arith.addf %356, %357 : vector<32x128xf32>
    %359 = tpu.reciprocal %358 {approx = true} : vector<32x128xf32> -> vector<32x128xf32>
    %360 = arith.mulf %351, %359 : vector<32x128xf32>
    %cst_45 = arith.constant 0.000000e+00 : f32
    %361 = vector.broadcast %cst_45 : f32 to vector<32x128xf32>
    %362 = arith.cmpf oge, %351, %361 : vector<32x128xf32>
    %363 = arith.mulf %360, %344 : vector<32x128xf32>
    %364 = arith.subf %341, %363 : vector<32x128xf32>
    %365 = arith.select %362, %341, %364 : vector<32x128xi1>, vector<32x128xf32>
    %366 = arith.mulf %360, %345 : vector<32x128xf32>
    %367 = arith.subf %342, %366 : vector<32x128xf32>
    %368 = arith.select %362, %342, %367 : vector<32x128xi1>, vector<32x128xf32>
    %369 = arith.mulf %360, %346 : vector<32x128xf32>
    %370 = arith.subf %343, %369 : vector<32x128xf32>
    %371 = arith.select %362, %343, %370 : vector<32x128xi1>, vector<32x128xf32>
    %372 = tpu.concatenate %365, %368, %371 in 1 : vector<32x128xf32>, vector<32x128xf32>, vector<32x128xf32> -> vector<32x384xf32>
    %373 = arith.truncf %372 : vector<32x384xf32> to vector<32x384xbf16>
    %cst_46 = arith.constant dense<0.000000e+00> : vector<32x384xf32>
    %374 = tpu.matmul %302, %373, %cst_46 {dimension_numbers = #tpu.dot_dimension_numbers<[1], [0], [0], [1], [0, 0, 1, 1], [], []>} : vector<32x32xbf16>, vector<32x384xbf16>, vector<32x384xf32> -> vector<32x384xf32>
    %375 = arith.addf %298, %374 : vector<32x384xf32>
    %c224 = arith.constant 224 : index
    %c0_47 = arith.constant 0 : index
    %376 = vector.load %arg3[%c224, %c0_47] : memref<944x64xbf16, #tpu.memory_space<vmem>>, vector<32x32xbf16>
    %c256 = arith.constant 256 : index
    %c0_48 = arith.constant 0 : index
    %377 = vector.load %arg3[%c256, %c0_48] : memref<944x64xbf16, #tpu.memory_space<vmem>>, vector<32x32xbf16>
    %c288 = arith.constant 288 : index
    %c0_49 = arith.constant 0 : index
    %378 = vector.load %arg3[%c288, %c0_49] : memref<944x64xbf16, #tpu.memory_space<vmem>>, vector<32x32xbf16>
    %c320 = arith.constant 320 : index
    %c0_50 = arith.constant 0 : index
    %379 = vector.load %arg3[%c320, %c0_50] : memref<944x64xbf16, #tpu.memory_space<vmem>>, vector<32x32xbf16>
    %380 = arith.truncf %375 : vector<32x384xf32> to vector<32x384xbf16>
    %cst_51 = arith.constant dense<0.000000e+00> : vector<32x384xf32>
    %381 = tpu.matmul %376, %380, %cst_51 {dimension_numbers = #tpu.dot_dimension_numbers<[1], [0], [0], [1], [0, 0, 1, 1], [], []>} : vector<32x32xbf16>, vector<32x384xbf16>, vector<32x384xf32> -> vector<32x384xf32>
    %382 = vector.extract_strided_slice %375 {offsets = [0, 0], sizes = [32, 128], strides = [1, 1]} : vector<32x384xf32> to vector<32x128xf32>
    %383 = vector.extract_strided_slice %375 {offsets = [0, 128], sizes = [32, 128], strides = [1, 1]} : vector<32x384xf32> to vector<32x128xf32>
    %384 = vector.extract_strided_slice %375 {offsets = [0, 256], sizes = [32, 128], strides = [1, 1]} : vector<32x384xf32> to vector<32x128xf32>
    %385 = vector.extract_strided_slice %381 {offsets = [0, 0], sizes = [32, 128], strides = [1, 1]} : vector<32x384xf32> to vector<32x128xf32>
    %386 = vector.extract_strided_slice %381 {offsets = [0, 128], sizes = [32, 128], strides = [1, 1]} : vector<32x384xf32> to vector<32x128xf32>
    %387 = vector.extract_strided_slice %381 {offsets = [0, 256], sizes = [32, 128], strides = [1, 1]} : vector<32x384xf32> to vector<32x128xf32>
    %388 = arith.mulf %382, %385 : vector<32x128xf32>
    %389 = arith.mulf %383, %386 : vector<32x128xf32>
    %390 = arith.addf %388, %389 : vector<32x128xf32>
    %391 = arith.mulf %384, %387 : vector<32x128xf32>
    %392 = arith.addf %390, %391 : vector<32x128xf32>
    %393 = arith.mulf %385, %385 : vector<32x128xf32>
    %394 = arith.mulf %386, %386 : vector<32x128xf32>
    %395 = arith.addf %393, %394 : vector<32x128xf32>
    %396 = arith.mulf %387, %387 : vector<32x128xf32>
    %397 = arith.addf %395, %396 : vector<32x128xf32>
    %cst_52 = arith.constant 9.99999997E-7 : f32
    %398 = vector.broadcast %cst_52 : f32 to vector<32x128xf32>
    %399 = arith.addf %397, %398 : vector<32x128xf32>
    %400 = tpu.reciprocal %399 {approx = true} : vector<32x128xf32> -> vector<32x128xf32>
    %401 = arith.mulf %392, %400 : vector<32x128xf32>
    %cst_53 = arith.constant 0.000000e+00 : f32
    %402 = vector.broadcast %cst_53 : f32 to vector<32x128xf32>
    %403 = arith.cmpf oge, %392, %402 : vector<32x128xf32>
    %404 = arith.mulf %401, %385 : vector<32x128xf32>
    %405 = arith.subf %382, %404 : vector<32x128xf32>
    %406 = arith.select %403, %382, %405 : vector<32x128xi1>, vector<32x128xf32>
    %407 = arith.mulf %401, %386 : vector<32x128xf32>
    %408 = arith.subf %383, %407 : vector<32x128xf32>
    %409 = arith.select %403, %383, %408 : vector<32x128xi1>, vector<32x128xf32>
    %410 = arith.mulf %401, %387 : vector<32x128xf32>
    %411 = arith.subf %384, %410 : vector<32x128xf32>
    %412 = arith.select %403, %384, %411 : vector<32x128xi1>, vector<32x128xf32>
    %413 = tpu.concatenate %406, %409, %412 in 1 : vector<32x128xf32>, vector<32x128xf32>, vector<32x128xf32> -> vector<32x384xf32>
    %414 = arith.truncf %413 : vector<32x384xf32> to vector<32x384xbf16>
    %cst_54 = arith.constant dense<0.000000e+00> : vector<32x384xf32>
    %415 = tpu.matmul %377, %414, %cst_54 {dimension_numbers = #tpu.dot_dimension_numbers<[1], [0], [0], [1], [0, 0, 1, 1], [], []>} : vector<32x32xbf16>, vector<32x384xbf16>, vector<32x384xf32> -> vector<32x384xf32>
    %416 = arith.truncf %415 : vector<32x384xf32> to vector<32x384xbf16>
    %cst_55 = arith.constant dense<0.000000e+00> : vector<32x384xf32>
    %417 = tpu.matmul %378, %416, %cst_55 {dimension_numbers = #tpu.dot_dimension_numbers<[1], [0], [0], [1], [0, 0, 1, 1], [], []>} : vector<32x32xbf16>, vector<32x384xbf16>, vector<32x384xf32> -> vector<32x384xf32>
    %418 = vector.extract_strided_slice %415 {offsets = [0, 0], sizes = [32, 128], strides = [1, 1]} : vector<32x384xf32> to vector<32x128xf32>
    %419 = vector.extract_strided_slice %415 {offsets = [0, 128], sizes = [32, 128], strides = [1, 1]} : vector<32x384xf32> to vector<32x128xf32>
    %420 = vector.extract_strided_slice %415 {offsets = [0, 256], sizes = [32, 128], strides = [1, 1]} : vector<32x384xf32> to vector<32x128xf32>
    %421 = vector.extract_strided_slice %417 {offsets = [0, 0], sizes = [32, 128], strides = [1, 1]} : vector<32x384xf32> to vector<32x128xf32>
    %422 = vector.extract_strided_slice %417 {offsets = [0, 128], sizes = [32, 128], strides = [1, 1]} : vector<32x384xf32> to vector<32x128xf32>
    %423 = vector.extract_strided_slice %417 {offsets = [0, 256], sizes = [32, 128], strides = [1, 1]} : vector<32x384xf32> to vector<32x128xf32>
    %424 = arith.mulf %418, %421 : vector<32x128xf32>
    %425 = arith.mulf %419, %422 : vector<32x128xf32>
    %426 = arith.addf %424, %425 : vector<32x128xf32>
    %427 = arith.mulf %420, %423 : vector<32x128xf32>
    %428 = arith.addf %426, %427 : vector<32x128xf32>
    %429 = arith.mulf %421, %421 : vector<32x128xf32>
    %430 = arith.mulf %422, %422 : vector<32x128xf32>
    %431 = arith.addf %429, %430 : vector<32x128xf32>
    %432 = arith.mulf %423, %423 : vector<32x128xf32>
    %433 = arith.addf %431, %432 : vector<32x128xf32>
    %cst_56 = arith.constant 9.99999997E-7 : f32
    %434 = vector.broadcast %cst_56 : f32 to vector<32x128xf32>
    %435 = arith.addf %433, %434 : vector<32x128xf32>
    %436 = tpu.reciprocal %435 {approx = true} : vector<32x128xf32> -> vector<32x128xf32>
    %437 = arith.mulf %428, %436 : vector<32x128xf32>
    %cst_57 = arith.constant 0.000000e+00 : f32
    %438 = vector.broadcast %cst_57 : f32 to vector<32x128xf32>
    %439 = arith.cmpf oge, %428, %438 : vector<32x128xf32>
    %440 = arith.mulf %437, %421 : vector<32x128xf32>
    %441 = arith.subf %418, %440 : vector<32x128xf32>
    %442 = arith.select %439, %418, %441 : vector<32x128xi1>, vector<32x128xf32>
    %443 = arith.mulf %437, %422 : vector<32x128xf32>
    %444 = arith.subf %419, %443 : vector<32x128xf32>
    %445 = arith.select %439, %419, %444 : vector<32x128xi1>, vector<32x128xf32>
    %446 = arith.mulf %437, %423 : vector<32x128xf32>
    %447 = arith.subf %420, %446 : vector<32x128xf32>
    %448 = arith.select %439, %420, %447 : vector<32x128xi1>, vector<32x128xf32>
    %449 = tpu.concatenate %442, %445, %448 in 1 : vector<32x128xf32>, vector<32x128xf32>, vector<32x128xf32> -> vector<32x384xf32>
    %450 = arith.truncf %449 : vector<32x384xf32> to vector<32x384xbf16>
    %cst_58 = arith.constant dense<0.000000e+00> : vector<32x384xf32>
    %451 = tpu.matmul %379, %450, %cst_58 {dimension_numbers = #tpu.dot_dimension_numbers<[1], [0], [0], [1], [0, 0, 1, 1], [], []>} : vector<32x32xbf16>, vector<32x384xbf16>, vector<32x384xf32> -> vector<32x384xf32>
    %452 = arith.addf %375, %451 : vector<32x384xf32>
    %c352 = arith.constant 352 : index
    %c0_59 = arith.constant 0 : index
    %453 = vector.load %arg3[%c352, %c0_59] : memref<944x64xbf16, #tpu.memory_space<vmem>>, vector<32x32xbf16>
    %c384_60 = arith.constant 384 : index
    %c0_61 = arith.constant 0 : index
    %454 = vector.load %arg3[%c384_60, %c0_61] : memref<944x64xbf16, #tpu.memory_space<vmem>>, vector<32x32xbf16>
    %c416 = arith.constant 416 : index
    %c0_62 = arith.constant 0 : index
    %455 = vector.load %arg3[%c416, %c0_62] : memref<944x64xbf16, #tpu.memory_space<vmem>>, vector<32x32xbf16>
    %c448 = arith.constant 448 : index
    %c0_63 = arith.constant 0 : index
    %456 = vector.load %arg3[%c448, %c0_63] : memref<944x64xbf16, #tpu.memory_space<vmem>>, vector<32x32xbf16>
    %457 = arith.truncf %452 : vector<32x384xf32> to vector<32x384xbf16>
    %cst_64 = arith.constant dense<0.000000e+00> : vector<32x384xf32>
    %458 = tpu.matmul %453, %457, %cst_64 {dimension_numbers = #tpu.dot_dimension_numbers<[1], [0], [0], [1], [0, 0, 1, 1], [], []>} : vector<32x32xbf16>, vector<32x384xbf16>, vector<32x384xf32> -> vector<32x384xf32>
    %459 = vector.extract_strided_slice %452 {offsets = [0, 0], sizes = [32, 128], strides = [1, 1]} : vector<32x384xf32> to vector<32x128xf32>
    %460 = vector.extract_strided_slice %452 {offsets = [0, 128], sizes = [32, 128], strides = [1, 1]} : vector<32x384xf32> to vector<32x128xf32>
    %461 = vector.extract_strided_slice %452 {offsets = [0, 256], sizes = [32, 128], strides = [1, 1]} : vector<32x384xf32> to vector<32x128xf32>
    %462 = vector.extract_strided_slice %458 {offsets = [0, 0], sizes = [32, 128], strides = [1, 1]} : vector<32x384xf32> to vector<32x128xf32>
    %463 = vector.extract_strided_slice %458 {offsets = [0, 128], sizes = [32, 128], strides = [1, 1]} : vector<32x384xf32> to vector<32x128xf32>
    %464 = vector.extract_strided_slice %458 {offsets = [0, 256], sizes = [32, 128], strides = [1, 1]} : vector<32x384xf32> to vector<32x128xf32>
    %465 = arith.mulf %459, %462 : vector<32x128xf32>
    %466 = arith.mulf %460, %463 : vector<32x128xf32>
    %467 = arith.addf %465, %466 : vector<32x128xf32>
    %468 = arith.mulf %461, %464 : vector<32x128xf32>
    %469 = arith.addf %467, %468 : vector<32x128xf32>
    %470 = arith.mulf %462, %462 : vector<32x128xf32>
    %471 = arith.mulf %463, %463 : vector<32x128xf32>
    %472 = arith.addf %470, %471 : vector<32x128xf32>
    %473 = arith.mulf %464, %464 : vector<32x128xf32>
    %474 = arith.addf %472, %473 : vector<32x128xf32>
    %cst_65 = arith.constant 9.99999997E-7 : f32
    %475 = vector.broadcast %cst_65 : f32 to vector<32x128xf32>
    %476 = arith.addf %474, %475 : vector<32x128xf32>
    %477 = tpu.reciprocal %476 {approx = true} : vector<32x128xf32> -> vector<32x128xf32>
    %478 = arith.mulf %469, %477 : vector<32x128xf32>
    %cst_66 = arith.constant 0.000000e+00 : f32
    %479 = vector.broadcast %cst_66 : f32 to vector<32x128xf32>
    %480 = arith.cmpf oge, %469, %479 : vector<32x128xf32>
    %481 = arith.mulf %478, %462 : vector<32x128xf32>
    %482 = arith.subf %459, %481 : vector<32x128xf32>
    %483 = arith.select %480, %459, %482 : vector<32x128xi1>, vector<32x128xf32>
    %484 = arith.mulf %478, %463 : vector<32x128xf32>
    %485 = arith.subf %460, %484 : vector<32x128xf32>
    %486 = arith.select %480, %460, %485 : vector<32x128xi1>, vector<32x128xf32>
    %487 = arith.mulf %478, %464 : vector<32x128xf32>
    %488 = arith.subf %461, %487 : vector<32x128xf32>
    %489 = arith.select %480, %461, %488 : vector<32x128xi1>, vector<32x128xf32>
    %490 = tpu.concatenate %483, %486, %489 in 1 : vector<32x128xf32>, vector<32x128xf32>, vector<32x128xf32> -> vector<32x384xf32>
    %491 = arith.truncf %490 : vector<32x384xf32> to vector<32x384xbf16>
    %cst_67 = arith.constant dense<0.000000e+00> : vector<32x384xf32>
    %492 = tpu.matmul %454, %491, %cst_67 {dimension_numbers = #tpu.dot_dimension_numbers<[1], [0], [0], [1], [0, 0, 1, 1], [], []>} : vector<32x32xbf16>, vector<32x384xbf16>, vector<32x384xf32> -> vector<32x384xf32>
    %493 = arith.truncf %492 : vector<32x384xf32> to vector<32x384xbf16>
    %cst_68 = arith.constant dense<0.000000e+00> : vector<32x384xf32>
    %494 = tpu.matmul %455, %493, %cst_68 {dimension_numbers = #tpu.dot_dimension_numbers<[1], [0], [0], [1], [0, 0, 1, 1], [], []>} : vector<32x32xbf16>, vector<32x384xbf16>, vector<32x384xf32> -> vector<32x384xf32>
    %495 = vector.extract_strided_slice %492 {offsets = [0, 0], sizes = [32, 128], strides = [1, 1]} : vector<32x384xf32> to vector<32x128xf32>
    %496 = vector.extract_strided_slice %492 {offsets = [0, 128], sizes = [32, 128], strides = [1, 1]} : vector<32x384xf32> to vector<32x128xf32>
    %497 = vector.extract_strided_slice %492 {offsets = [0, 256], sizes = [32, 128], strides = [1, 1]} : vector<32x384xf32> to vector<32x128xf32>
    %498 = vector.extract_strided_slice %494 {offsets = [0, 0], sizes = [32, 128], strides = [1, 1]} : vector<32x384xf32> to vector<32x128xf32>
    %499 = vector.extract_strided_slice %494 {offsets = [0, 128], sizes = [32, 128], strides = [1, 1]} : vector<32x384xf32> to vector<32x128xf32>
    %500 = vector.extract_strided_slice %494 {offsets = [0, 256], sizes = [32, 128], strides = [1, 1]} : vector<32x384xf32> to vector<32x128xf32>
    %501 = arith.mulf %495, %498 : vector<32x128xf32>
    %502 = arith.mulf %496, %499 : vector<32x128xf32>
    %503 = arith.addf %501, %502 : vector<32x128xf32>
    %504 = arith.mulf %497, %500 : vector<32x128xf32>
    %505 = arith.addf %503, %504 : vector<32x128xf32>
    %506 = arith.mulf %498, %498 : vector<32x128xf32>
    %507 = arith.mulf %499, %499 : vector<32x128xf32>
    %508 = arith.addf %506, %507 : vector<32x128xf32>
    %509 = arith.mulf %500, %500 : vector<32x128xf32>
    %510 = arith.addf %508, %509 : vector<32x128xf32>
    %cst_69 = arith.constant 9.99999997E-7 : f32
    %511 = vector.broadcast %cst_69 : f32 to vector<32x128xf32>
    %512 = arith.addf %510, %511 : vector<32x128xf32>
    %513 = tpu.reciprocal %512 {approx = true} : vector<32x128xf32> -> vector<32x128xf32>
    %514 = arith.mulf %505, %513 : vector<32x128xf32>
    %cst_70 = arith.constant 0.000000e+00 : f32
    %515 = vector.broadcast %cst_70 : f32 to vector<32x128xf32>
    %516 = arith.cmpf oge, %505, %515 : vector<32x128xf32>
    %517 = arith.mulf %514, %498 : vector<32x128xf32>
    %518 = arith.subf %495, %517 : vector<32x128xf32>
    %519 = arith.select %516, %495, %518 : vector<32x128xi1>, vector<32x128xf32>
    %520 = arith.mulf %514, %499 : vector<32x128xf32>
    %521 = arith.subf %496, %520 : vector<32x128xf32>
    %522 = arith.select %516, %496, %521 : vector<32x128xi1>, vector<32x128xf32>
    %523 = arith.mulf %514, %500 : vector<32x128xf32>
    %524 = arith.subf %497, %523 : vector<32x128xf32>
    %525 = arith.select %516, %497, %524 : vector<32x128xi1>, vector<32x128xf32>
    %526 = tpu.concatenate %519, %522, %525 in 1 : vector<32x128xf32>, vector<32x128xf32>, vector<32x128xf32> -> vector<32x384xf32>
    %527 = arith.truncf %526 : vector<32x384xf32> to vector<32x384xbf16>
    %cst_71 = arith.constant dense<0.000000e+00> : vector<32x384xf32>
    %528 = tpu.matmul %456, %527, %cst_71 {dimension_numbers = #tpu.dot_dimension_numbers<[1], [0], [0], [1], [0, 0, 1, 1], [], []>} : vector<32x32xbf16>, vector<32x384xbf16>, vector<32x384xf32> -> vector<32x384xf32>
    %529 = arith.addf %452, %528 : vector<32x384xf32>
    %c480 = arith.constant 480 : index
    %c0_72 = arith.constant 0 : index
    %530 = vector.load %arg3[%c480, %c0_72] : memref<944x64xbf16, #tpu.memory_space<vmem>>, vector<32x32xbf16>
    %c512 = arith.constant 512 : index
    %c0_73 = arith.constant 0 : index
    %531 = vector.load %arg3[%c512, %c0_73] : memref<944x64xbf16, #tpu.memory_space<vmem>>, vector<32x32xbf16>
    %c544 = arith.constant 544 : index
    %c0_74 = arith.constant 0 : index
    %532 = vector.load %arg3[%c544, %c0_74] : memref<944x64xbf16, #tpu.memory_space<vmem>>, vector<32x32xbf16>
    %c576 = arith.constant 576 : index
    %c0_75 = arith.constant 0 : index
    %533 = vector.load %arg3[%c576, %c0_75] : memref<944x64xbf16, #tpu.memory_space<vmem>>, vector<32x32xbf16>
    %534 = arith.truncf %529 : vector<32x384xf32> to vector<32x384xbf16>
    %cst_76 = arith.constant dense<0.000000e+00> : vector<32x384xf32>
    %535 = tpu.matmul %530, %534, %cst_76 {dimension_numbers = #tpu.dot_dimension_numbers<[1], [0], [0], [1], [0, 0, 1, 1], [], []>} : vector<32x32xbf16>, vector<32x384xbf16>, vector<32x384xf32> -> vector<32x384xf32>
    %536 = vector.extract_strided_slice %529 {offsets = [0, 0], sizes = [32, 128], strides = [1, 1]} : vector<32x384xf32> to vector<32x128xf32>
    %537 = vector.extract_strided_slice %529 {offsets = [0, 128], sizes = [32, 128], strides = [1, 1]} : vector<32x384xf32> to vector<32x128xf32>
    %538 = vector.extract_strided_slice %529 {offsets = [0, 256], sizes = [32, 128], strides = [1, 1]} : vector<32x384xf32> to vector<32x128xf32>
    %539 = vector.extract_strided_slice %535 {offsets = [0, 0], sizes = [32, 128], strides = [1, 1]} : vector<32x384xf32> to vector<32x128xf32>
    %540 = vector.extract_strided_slice %535 {offsets = [0, 128], sizes = [32, 128], strides = [1, 1]} : vector<32x384xf32> to vector<32x128xf32>
    %541 = vector.extract_strided_slice %535 {offsets = [0, 256], sizes = [32, 128], strides = [1, 1]} : vector<32x384xf32> to vector<32x128xf32>
    %542 = arith.mulf %536, %539 : vector<32x128xf32>
    %543 = arith.mulf %537, %540 : vector<32x128xf32>
    %544 = arith.addf %542, %543 : vector<32x128xf32>
    %545 = arith.mulf %538, %541 : vector<32x128xf32>
    %546 = arith.addf %544, %545 : vector<32x128xf32>
    %547 = arith.mulf %539, %539 : vector<32x128xf32>
    %548 = arith.mulf %540, %540 : vector<32x128xf32>
    %549 = arith.addf %547, %548 : vector<32x128xf32>
    %550 = arith.mulf %541, %541 : vector<32x128xf32>
    %551 = arith.addf %549, %550 : vector<32x128xf32>
    %cst_77 = arith.constant 9.99999997E-7 : f32
    %552 = vector.broadcast %cst_77 : f32 to vector<32x128xf32>
    %553 = arith.addf %551, %552 : vector<32x128xf32>
    %554 = tpu.reciprocal %553 {approx = true} : vector<32x128xf32> -> vector<32x128xf32>
    %555 = arith.mulf %546, %554 : vector<32x128xf32>
    %cst_78 = arith.constant 0.000000e+00 : f32
    %556 = vector.broadcast %cst_78 : f32 to vector<32x128xf32>
    %557 = arith.cmpf oge, %546, %556 : vector<32x128xf32>
    %558 = arith.mulf %555, %539 : vector<32x128xf32>
    %559 = arith.subf %536, %558 : vector<32x128xf32>
    %560 = arith.select %557, %536, %559 : vector<32x128xi1>, vector<32x128xf32>
    %561 = arith.mulf %555, %540 : vector<32x128xf32>
    %562 = arith.subf %537, %561 : vector<32x128xf32>
    %563 = arith.select %557, %537, %562 : vector<32x128xi1>, vector<32x128xf32>
    %564 = arith.mulf %555, %541 : vector<32x128xf32>
    %565 = arith.subf %538, %564 : vector<32x128xf32>
    %566 = arith.select %557, %538, %565 : vector<32x128xi1>, vector<32x128xf32>
    %567 = tpu.concatenate %560, %563, %566 in 1 : vector<32x128xf32>, vector<32x128xf32>, vector<32x128xf32> -> vector<32x384xf32>
    %568 = arith.truncf %567 : vector<32x384xf32> to vector<32x384xbf16>
    %cst_79 = arith.constant dense<0.000000e+00> : vector<32x384xf32>
    %569 = tpu.matmul %531, %568, %cst_79 {dimension_numbers = #tpu.dot_dimension_numbers<[1], [0], [0], [1], [0, 0, 1, 1], [], []>} : vector<32x32xbf16>, vector<32x384xbf16>, vector<32x384xf32> -> vector<32x384xf32>
    %570 = arith.truncf %569 : vector<32x384xf32> to vector<32x384xbf16>
    %cst_80 = arith.constant dense<0.000000e+00> : vector<32x384xf32>
    %571 = tpu.matmul %532, %570, %cst_80 {dimension_numbers = #tpu.dot_dimension_numbers<[1], [0], [0], [1], [0, 0, 1, 1], [], []>} : vector<32x32xbf16>, vector<32x384xbf16>, vector<32x384xf32> -> vector<32x384xf32>
    %572 = vector.extract_strided_slice %569 {offsets = [0, 0], sizes = [32, 128], strides = [1, 1]} : vector<32x384xf32> to vector<32x128xf32>
    %573 = vector.extract_strided_slice %569 {offsets = [0, 128], sizes = [32, 128], strides = [1, 1]} : vector<32x384xf32> to vector<32x128xf32>
    %574 = vector.extract_strided_slice %569 {offsets = [0, 256], sizes = [32, 128], strides = [1, 1]} : vector<32x384xf32> to vector<32x128xf32>
    %575 = vector.extract_strided_slice %571 {offsets = [0, 0], sizes = [32, 128], strides = [1, 1]} : vector<32x384xf32> to vector<32x128xf32>
    %576 = vector.extract_strided_slice %571 {offsets = [0, 128], sizes = [32, 128], strides = [1, 1]} : vector<32x384xf32> to vector<32x128xf32>
    %577 = vector.extract_strided_slice %571 {offsets = [0, 256], sizes = [32, 128], strides = [1, 1]} : vector<32x384xf32> to vector<32x128xf32>
    %578 = arith.mulf %572, %575 : vector<32x128xf32>
    %579 = arith.mulf %573, %576 : vector<32x128xf32>
    %580 = arith.addf %578, %579 : vector<32x128xf32>
    %581 = arith.mulf %574, %577 : vector<32x128xf32>
    %582 = arith.addf %580, %581 : vector<32x128xf32>
    %583 = arith.mulf %575, %575 : vector<32x128xf32>
    %584 = arith.mulf %576, %576 : vector<32x128xf32>
    %585 = arith.addf %583, %584 : vector<32x128xf32>
    %586 = arith.mulf %577, %577 : vector<32x128xf32>
    %587 = arith.addf %585, %586 : vector<32x128xf32>
    %cst_81 = arith.constant 9.99999997E-7 : f32
    %588 = vector.broadcast %cst_81 : f32 to vector<32x128xf32>
    %589 = arith.addf %587, %588 : vector<32x128xf32>
    %590 = tpu.reciprocal %589 {approx = true} : vector<32x128xf32> -> vector<32x128xf32>
    %591 = arith.mulf %582, %590 : vector<32x128xf32>
    %cst_82 = arith.constant 0.000000e+00 : f32
    %592 = vector.broadcast %cst_82 : f32 to vector<32x128xf32>
    %593 = arith.cmpf oge, %582, %592 : vector<32x128xf32>
    %594 = arith.mulf %591, %575 : vector<32x128xf32>
    %595 = arith.subf %572, %594 : vector<32x128xf32>
    %596 = arith.select %593, %572, %595 : vector<32x128xi1>, vector<32x128xf32>
    %597 = arith.mulf %591, %576 : vector<32x128xf32>
    %598 = arith.subf %573, %597 : vector<32x128xf32>
    %599 = arith.select %593, %573, %598 : vector<32x128xi1>, vector<32x128xf32>
    %600 = arith.mulf %591, %577 : vector<32x128xf32>
    %601 = arith.subf %574, %600 : vector<32x128xf32>
    %602 = arith.select %593, %574, %601 : vector<32x128xi1>, vector<32x128xf32>
    %603 = tpu.concatenate %596, %599, %602 in 1 : vector<32x128xf32>, vector<32x128xf32>, vector<32x128xf32> -> vector<32x384xf32>
    %604 = arith.truncf %603 : vector<32x384xf32> to vector<32x384xbf16>
    %cst_83 = arith.constant dense<0.000000e+00> : vector<32x384xf32>
    %605 = tpu.matmul %533, %604, %cst_83 {dimension_numbers = #tpu.dot_dimension_numbers<[1], [0], [0], [1], [0, 0, 1, 1], [], []>} : vector<32x32xbf16>, vector<32x384xbf16>, vector<32x384xf32> -> vector<32x384xf32>
    %606 = arith.addf %529, %605 : vector<32x384xf32>
    %c608 = arith.constant 608 : index
    %c0_84 = arith.constant 0 : index
    %607 = vector.load %arg3[%c608, %c0_84] : memref<944x64xbf16, #tpu.memory_space<vmem>>, vector<96x32xbf16>
    %c704 = arith.constant 704 : index
    %c0_85 = arith.constant 0 : index
    %608 = vector.load %arg3[%c704, %c0_85] : memref<944x64xbf16, #tpu.memory_space<vmem>>, vector<32x32xbf16>
    %c736 = arith.constant 736 : index
    %c0_86 = arith.constant 0 : index
    %609 = vector.load %arg3[%c736, %c0_86] : memref<944x64xbf16, #tpu.memory_space<vmem>>, vector<32x32xbf16>
    %c768_87 = arith.constant 768 : index
    %c0_88 = arith.constant 0 : index
    %610 = vector.load %arg3[%c768_87, %c0_88] : memref<944x64xbf16, #tpu.memory_space<vmem>>, vector<64x32xbf16>
    %611 = arith.truncf %606 : vector<32x384xf32> to vector<32x384xbf16>
    %cst_89 = arith.constant dense<0.000000e+00> : vector<96x384xf32>
    %612 = tpu.matmul %607, %611, %cst_89 {dimension_numbers = #tpu.dot_dimension_numbers<[1], [0], [0], [1], [0, 0, 1, 1], [], []>} : vector<96x32xbf16>, vector<32x384xbf16>, vector<96x384xf32> -> vector<96x384xf32>
    %613 = vector.extract_strided_slice %612 {offsets = [0, 0], sizes = [32, 384], strides = [1, 1]} : vector<96x384xf32> to vector<32x384xf32>
    %614 = vector.extract_strided_slice %612 {offsets = [32, 0], sizes = [64, 384], strides = [1, 1]} : vector<96x384xf32> to vector<64x384xf32>
    %615 = vector.extract_strided_slice %606 {offsets = [0, 0], sizes = [32, 128], strides = [1, 1]} : vector<32x384xf32> to vector<32x128xf32>
    %616 = vector.extract_strided_slice %606 {offsets = [0, 128], sizes = [32, 128], strides = [1, 1]} : vector<32x384xf32> to vector<32x128xf32>
    %617 = vector.extract_strided_slice %606 {offsets = [0, 256], sizes = [32, 128], strides = [1, 1]} : vector<32x384xf32> to vector<32x128xf32>
    %618 = vector.extract_strided_slice %613 {offsets = [0, 0], sizes = [32, 128], strides = [1, 1]} : vector<32x384xf32> to vector<32x128xf32>
    %619 = vector.extract_strided_slice %613 {offsets = [0, 128], sizes = [32, 128], strides = [1, 1]} : vector<32x384xf32> to vector<32x128xf32>
    %620 = vector.extract_strided_slice %613 {offsets = [0, 256], sizes = [32, 128], strides = [1, 1]} : vector<32x384xf32> to vector<32x128xf32>
    %621 = arith.mulf %615, %618 : vector<32x128xf32>
    %622 = arith.mulf %616, %619 : vector<32x128xf32>
    %623 = arith.addf %621, %622 : vector<32x128xf32>
    %624 = arith.mulf %617, %620 : vector<32x128xf32>
    %625 = arith.addf %623, %624 : vector<32x128xf32>
    %626 = arith.mulf %618, %618 : vector<32x128xf32>
    %627 = arith.mulf %619, %619 : vector<32x128xf32>
    %628 = arith.addf %626, %627 : vector<32x128xf32>
    %629 = arith.mulf %620, %620 : vector<32x128xf32>
    %630 = arith.addf %628, %629 : vector<32x128xf32>
    %cst_90 = arith.constant 9.99999997E-7 : f32
    %631 = vector.broadcast %cst_90 : f32 to vector<32x128xf32>
    %632 = arith.addf %630, %631 : vector<32x128xf32>
    %633 = tpu.reciprocal %632 {approx = true} : vector<32x128xf32> -> vector<32x128xf32>
    %634 = arith.mulf %625, %633 : vector<32x128xf32>
    %cst_91 = arith.constant 0.000000e+00 : f32
    %635 = vector.broadcast %cst_91 : f32 to vector<32x128xf32>
    %636 = arith.cmpf oge, %625, %635 : vector<32x128xf32>
    %637 = arith.mulf %634, %618 : vector<32x128xf32>
    %638 = arith.subf %615, %637 : vector<32x128xf32>
    %639 = arith.select %636, %615, %638 : vector<32x128xi1>, vector<32x128xf32>
    %640 = arith.mulf %634, %619 : vector<32x128xf32>
    %641 = arith.subf %616, %640 : vector<32x128xf32>
    %642 = arith.select %636, %616, %641 : vector<32x128xi1>, vector<32x128xf32>
    %643 = arith.mulf %634, %620 : vector<32x128xf32>
    %644 = arith.subf %617, %643 : vector<32x128xf32>
    %645 = arith.select %636, %617, %644 : vector<32x128xi1>, vector<32x128xf32>
    %646 = tpu.concatenate %639, %642, %645 in 1 : vector<32x128xf32>, vector<32x128xf32>, vector<32x128xf32> -> vector<32x384xf32>
    %647 = arith.truncf %646 : vector<32x384xf32> to vector<32x384xbf16>
    %cst_92 = arith.constant dense<0.000000e+00> : vector<32x384xf32>
    %648 = tpu.matmul %608, %647, %cst_92 {dimension_numbers = #tpu.dot_dimension_numbers<[1], [0], [0], [1], [0, 0, 1, 1], [], []>} : vector<32x32xbf16>, vector<32x384xbf16>, vector<32x384xf32> -> vector<32x384xf32>
    %649 = arith.truncf %648 : vector<32x384xf32> to vector<32x384xbf16>
    %cst_93 = arith.constant dense<0.000000e+00> : vector<32x384xf32>
    %650 = tpu.matmul %609, %649, %cst_93 {dimension_numbers = #tpu.dot_dimension_numbers<[1], [0], [0], [1], [0, 0, 1, 1], [], []>} : vector<32x32xbf16>, vector<32x384xbf16>, vector<32x384xf32> -> vector<32x384xf32>
    %651 = vector.extract_strided_slice %648 {offsets = [0, 0], sizes = [32, 128], strides = [1, 1]} : vector<32x384xf32> to vector<32x128xf32>
    %652 = vector.extract_strided_slice %648 {offsets = [0, 128], sizes = [32, 128], strides = [1, 1]} : vector<32x384xf32> to vector<32x128xf32>
    %653 = vector.extract_strided_slice %648 {offsets = [0, 256], sizes = [32, 128], strides = [1, 1]} : vector<32x384xf32> to vector<32x128xf32>
    %654 = vector.extract_strided_slice %650 {offsets = [0, 0], sizes = [32, 128], strides = [1, 1]} : vector<32x384xf32> to vector<32x128xf32>
    %655 = vector.extract_strided_slice %650 {offsets = [0, 128], sizes = [32, 128], strides = [1, 1]} : vector<32x384xf32> to vector<32x128xf32>
    %656 = vector.extract_strided_slice %650 {offsets = [0, 256], sizes = [32, 128], strides = [1, 1]} : vector<32x384xf32> to vector<32x128xf32>
    %657 = arith.mulf %651, %654 : vector<32x128xf32>
    %658 = arith.mulf %652, %655 : vector<32x128xf32>
    %659 = arith.addf %657, %658 : vector<32x128xf32>
    %660 = arith.mulf %653, %656 : vector<32x128xf32>
    %661 = arith.addf %659, %660 : vector<32x128xf32>
    %662 = arith.mulf %654, %654 : vector<32x128xf32>
    %663 = arith.mulf %655, %655 : vector<32x128xf32>
    %664 = arith.addf %662, %663 : vector<32x128xf32>
    %665 = arith.mulf %656, %656 : vector<32x128xf32>
    %666 = arith.addf %664, %665 : vector<32x128xf32>
    %cst_94 = arith.constant 9.99999997E-7 : f32
    %667 = vector.broadcast %cst_94 : f32 to vector<32x128xf32>
    %668 = arith.addf %666, %667 : vector<32x128xf32>
    %669 = tpu.reciprocal %668 {approx = true} : vector<32x128xf32> -> vector<32x128xf32>
    %670 = arith.mulf %661, %669 : vector<32x128xf32>
    %cst_95 = arith.constant 0.000000e+00 : f32
    %671 = vector.broadcast %cst_95 : f32 to vector<32x128xf32>
    %672 = arith.cmpf oge, %661, %671 : vector<32x128xf32>
    %673 = arith.mulf %670, %654 : vector<32x128xf32>
    %674 = arith.subf %651, %673 : vector<32x128xf32>
    %675 = arith.select %672, %651, %674 : vector<32x128xi1>, vector<32x128xf32>
    %676 = arith.mulf %670, %655 : vector<32x128xf32>
    %677 = arith.subf %652, %676 : vector<32x128xf32>
    %678 = arith.select %672, %652, %677 : vector<32x128xi1>, vector<32x128xf32>
    %679 = arith.mulf %670, %656 : vector<32x128xf32>
    %680 = arith.subf %653, %679 : vector<32x128xf32>
    %681 = arith.select %672, %653, %680 : vector<32x128xi1>, vector<32x128xf32>
    %682 = tpu.concatenate %675, %678, %681 in 1 : vector<32x128xf32>, vector<32x128xf32>, vector<32x128xf32> -> vector<32x384xf32>
    %683 = arith.truncf %682 : vector<32x384xf32> to vector<32x384xbf16>
    %cst_96 = arith.constant dense<0.000000e+00> : vector<64x384xf32>
    %684 = tpu.matmul %610, %683, %cst_96 {dimension_numbers = #tpu.dot_dimension_numbers<[1], [0], [0], [1], [0, 0, 1, 1], [], []>} : vector<64x32xbf16>, vector<32x384xbf16>, vector<64x384xf32> -> vector<64x384xf32>
    %685 = arith.addf %614, %684 : vector<64x384xf32>
    %c832 = arith.constant 832 : index
    %c0_97 = arith.constant 0 : index
    %686 = vector.load %arg3[%c832, %c0_97] : memref<944x64xbf16, #tpu.memory_space<vmem>>, vector<64x64xbf16>
    %687 = arith.truncf %685 : vector<64x384xf32> to vector<64x384xbf16>
    %cst_98 = arith.constant dense<0.000000e+00> : vector<64x384xf32>
    %688 = tpu.matmul %686, %687, %cst_98 {dimension_numbers = #tpu.dot_dimension_numbers<[1], [0], [0], [1], [0, 0, 1, 1], [], []>} : vector<64x64xbf16>, vector<64x384xbf16>, vector<64x384xf32> -> vector<64x384xf32>
    %689 = vector.extract_strided_slice %688 {offsets = [0, 0], sizes = [32, 384], strides = [1, 1]} : vector<64x384xf32> to vector<32x384xf32>
    %690 = vector.extract_strided_slice %688 {offsets = [32, 0], sizes = [32, 384], strides = [1, 1]} : vector<64x384xf32> to vector<32x384xf32>
    %691 = vector.extract_strided_slice %689 {offsets = [0, 0], sizes = [32, 128], strides = [1, 1]} : vector<32x384xf32> to vector<32x128xf32>
    %692 = vector.extract_strided_slice %689 {offsets = [0, 128], sizes = [32, 128], strides = [1, 1]} : vector<32x384xf32> to vector<32x128xf32>
    %693 = vector.extract_strided_slice %689 {offsets = [0, 256], sizes = [32, 128], strides = [1, 1]} : vector<32x384xf32> to vector<32x128xf32>
    %694 = vector.extract_strided_slice %690 {offsets = [0, 0], sizes = [32, 128], strides = [1, 1]} : vector<32x384xf32> to vector<32x128xf32>
    %695 = vector.extract_strided_slice %690 {offsets = [0, 128], sizes = [32, 128], strides = [1, 1]} : vector<32x384xf32> to vector<32x128xf32>
    %696 = vector.extract_strided_slice %690 {offsets = [0, 256], sizes = [32, 128], strides = [1, 1]} : vector<32x384xf32> to vector<32x128xf32>
    %697 = arith.mulf %691, %694 : vector<32x128xf32>
    %698 = arith.mulf %692, %695 : vector<32x128xf32>
    %699 = arith.addf %697, %698 : vector<32x128xf32>
    %700 = arith.mulf %693, %696 : vector<32x128xf32>
    %701 = arith.addf %699, %700 : vector<32x128xf32>
    %702 = arith.mulf %694, %694 : vector<32x128xf32>
    %703 = arith.mulf %695, %695 : vector<32x128xf32>
    %704 = arith.addf %702, %703 : vector<32x128xf32>
    %705 = arith.mulf %696, %696 : vector<32x128xf32>
    %706 = arith.addf %704, %705 : vector<32x128xf32>
    %cst_99 = arith.constant 9.99999997E-7 : f32
    %707 = vector.broadcast %cst_99 : f32 to vector<32x128xf32>
    %708 = arith.addf %706, %707 : vector<32x128xf32>
    %709 = tpu.reciprocal %708 {approx = true} : vector<32x128xf32> -> vector<32x128xf32>
    %710 = arith.mulf %701, %709 : vector<32x128xf32>
    %cst_100 = arith.constant 0.000000e+00 : f32
    %711 = vector.broadcast %cst_100 : f32 to vector<32x128xf32>
    %712 = arith.cmpf oge, %701, %711 : vector<32x128xf32>
    %713 = arith.mulf %710, %694 : vector<32x128xf32>
    %714 = arith.subf %691, %713 : vector<32x128xf32>
    %715 = arith.select %712, %691, %714 : vector<32x128xi1>, vector<32x128xf32>
    %cst_101 = arith.constant 2.000000e-01 : f32
    %716 = vector.broadcast %cst_101 : f32 to vector<32x128xf32>
    %717 = arith.mulf %716, %691 : vector<32x128xf32>
    %cst_102 = arith.constant 8.000000e-01 : f32
    %718 = vector.broadcast %cst_102 : f32 to vector<32x128xf32>
    %719 = arith.mulf %718, %715 : vector<32x128xf32>
    %720 = arith.addf %717, %719 : vector<32x128xf32>
    %721 = arith.mulf %710, %695 : vector<32x128xf32>
    %722 = arith.subf %692, %721 : vector<32x128xf32>
    %723 = arith.select %712, %692, %722 : vector<32x128xi1>, vector<32x128xf32>
    %cst_103 = arith.constant 2.000000e-01 : f32
    %724 = vector.broadcast %cst_103 : f32 to vector<32x128xf32>
    %725 = arith.mulf %724, %692 : vector<32x128xf32>
    %cst_104 = arith.constant 8.000000e-01 : f32
    %726 = vector.broadcast %cst_104 : f32 to vector<32x128xf32>
    %727 = arith.mulf %726, %723 : vector<32x128xf32>
    %728 = arith.addf %725, %727 : vector<32x128xf32>
    %729 = arith.mulf %710, %696 : vector<32x128xf32>
    %730 = arith.subf %693, %729 : vector<32x128xf32>
    %731 = arith.select %712, %693, %730 : vector<32x128xi1>, vector<32x128xf32>
    %cst_105 = arith.constant 2.000000e-01 : f32
    %732 = vector.broadcast %cst_105 : f32 to vector<32x128xf32>
    %733 = arith.mulf %732, %693 : vector<32x128xf32>
    %cst_106 = arith.constant 8.000000e-01 : f32
    %734 = vector.broadcast %cst_106 : f32 to vector<32x128xf32>
    %735 = arith.mulf %734, %731 : vector<32x128xf32>
    %736 = arith.addf %733, %735 : vector<32x128xf32>
    %737 = tpu.concatenate %720, %728, %736 in 1 : vector<32x128xf32>, vector<32x128xf32>, vector<32x128xf32> -> vector<32x384xf32>
    %c896 = arith.constant 896 : index
    %c0_107 = arith.constant 0 : index
    %738 = vector.load %arg3[%c896, %c0_107] : memref<944x64xbf16, #tpu.memory_space<vmem>>, vector<32x32xbf16>
    %739 = arith.truncf %737 : vector<32x384xf32> to vector<32x384xbf16>
    %cst_108 = arith.constant dense<0.000000e+00> : vector<32x384xf32>
    %740 = tpu.matmul %738, %739, %cst_108 {dimension_numbers = #tpu.dot_dimension_numbers<[1], [0], [0], [1], [0, 0, 1, 1], [], []>} : vector<32x32xbf16>, vector<32x384xbf16>, vector<32x384xf32> -> vector<32x384xf32>
    %741 = vector.extract_strided_slice %740 {offsets = [0, 0], sizes = [16, 384], strides = [1, 1]} : vector<32x384xf32> to vector<16x384xf32>
    %742 = vector.extract_strided_slice %740 {offsets = [16, 0], sizes = [16, 384], strides = [1, 1]} : vector<32x384xf32> to vector<16x384xf32>
    %743 = vector.extract_strided_slice %741 {offsets = [0, 0], sizes = [16, 128], strides = [1, 1]} : vector<16x384xf32> to vector<16x128xf32>
    %744 = vector.extract_strided_slice %741 {offsets = [0, 128], sizes = [16, 128], strides = [1, 1]} : vector<16x384xf32> to vector<16x128xf32>
    %745 = vector.extract_strided_slice %741 {offsets = [0, 256], sizes = [16, 128], strides = [1, 1]} : vector<16x384xf32> to vector<16x128xf32>
    %746 = vector.extract_strided_slice %742 {offsets = [0, 0], sizes = [16, 128], strides = [1, 1]} : vector<16x384xf32> to vector<16x128xf32>
    %747 = vector.extract_strided_slice %742 {offsets = [0, 128], sizes = [16, 128], strides = [1, 1]} : vector<16x384xf32> to vector<16x128xf32>
    %748 = vector.extract_strided_slice %742 {offsets = [0, 256], sizes = [16, 128], strides = [1, 1]} : vector<16x384xf32> to vector<16x128xf32>
    %749 = arith.mulf %743, %746 : vector<16x128xf32>
    %750 = arith.mulf %744, %747 : vector<16x128xf32>
    %751 = arith.addf %749, %750 : vector<16x128xf32>
    %752 = arith.mulf %745, %748 : vector<16x128xf32>
    %753 = arith.addf %751, %752 : vector<16x128xf32>
    %754 = arith.mulf %746, %746 : vector<16x128xf32>
    %755 = arith.mulf %747, %747 : vector<16x128xf32>
    %756 = arith.addf %754, %755 : vector<16x128xf32>
    %757 = arith.mulf %748, %748 : vector<16x128xf32>
    %758 = arith.addf %756, %757 : vector<16x128xf32>
    %cst_109 = arith.constant 9.99999997E-7 : f32
    %759 = vector.broadcast %cst_109 : f32 to vector<16x128xf32>
    %760 = arith.addf %758, %759 : vector<16x128xf32>
    %761 = tpu.reciprocal %760 {approx = true} : vector<16x128xf32> -> vector<16x128xf32>
    %762 = arith.mulf %753, %761 : vector<16x128xf32>
    %cst_110 = arith.constant 0.000000e+00 : f32
    %763 = vector.broadcast %cst_110 : f32 to vector<16x128xf32>
    %764 = arith.cmpf oge, %753, %763 : vector<16x128xf32>
    %765 = arith.mulf %762, %746 : vector<16x128xf32>
    %766 = arith.subf %743, %765 : vector<16x128xf32>
    %767 = arith.select %764, %743, %766 : vector<16x128xi1>, vector<16x128xf32>
    %cst_111 = arith.constant 2.000000e-01 : f32
    %768 = vector.broadcast %cst_111 : f32 to vector<16x128xf32>
    %769 = arith.mulf %768, %743 : vector<16x128xf32>
    %cst_112 = arith.constant 8.000000e-01 : f32
    %770 = vector.broadcast %cst_112 : f32 to vector<16x128xf32>
    %771 = arith.mulf %770, %767 : vector<16x128xf32>
    %772 = arith.addf %769, %771 : vector<16x128xf32>
    %773 = arith.mulf %762, %747 : vector<16x128xf32>
    %774 = arith.subf %744, %773 : vector<16x128xf32>
    %775 = arith.select %764, %744, %774 : vector<16x128xi1>, vector<16x128xf32>
    %cst_113 = arith.constant 2.000000e-01 : f32
    %776 = vector.broadcast %cst_113 : f32 to vector<16x128xf32>
    %777 = arith.mulf %776, %744 : vector<16x128xf32>
    %cst_114 = arith.constant 8.000000e-01 : f32
    %778 = vector.broadcast %cst_114 : f32 to vector<16x128xf32>
    %779 = arith.mulf %778, %775 : vector<16x128xf32>
    %780 = arith.addf %777, %779 : vector<16x128xf32>
    %781 = arith.mulf %762, %748 : vector<16x128xf32>
    %782 = arith.subf %745, %781 : vector<16x128xf32>
    %783 = arith.select %764, %745, %782 : vector<16x128xi1>, vector<16x128xf32>
    %cst_115 = arith.constant 2.000000e-01 : f32
    %784 = vector.broadcast %cst_115 : f32 to vector<16x128xf32>
    %785 = arith.mulf %784, %745 : vector<16x128xf32>
    %cst_116 = arith.constant 8.000000e-01 : f32
    %786 = vector.broadcast %cst_116 : f32 to vector<16x128xf32>
    %787 = arith.mulf %786, %783 : vector<16x128xf32>
    %788 = arith.addf %785, %787 : vector<16x128xf32>
    %789 = tpu.concatenate %772, %780, %788 in 1 : vector<16x128xf32>, vector<16x128xf32>, vector<16x128xf32> -> vector<16x384xf32>
    %c928 = arith.constant 928 : index
    %c0_117 = arith.constant 0 : index
    %790 = vector.load %arg3[%c928, %c0_117] : memref<944x64xbf16, #tpu.memory_space<vmem>>, vector<2x16xbf16>
    %791 = arith.truncf %789 : vector<16x384xf32> to vector<16x384xbf16>
    %cst_118 = arith.constant dense<0.000000e+00> : vector<2x384xf32>
    %792 = tpu.matmul %790, %791, %cst_118 {dimension_numbers = #tpu.dot_dimension_numbers<[1], [0], [0], [1], [0, 0, 1, 1], [], []>} : vector<2x16xbf16>, vector<16x384xbf16>, vector<2x384xf32> -> vector<2x384xf32>
    %793 = vector.extract_strided_slice %792 {offsets = [0, 0], sizes = [1, 128], strides = [1, 1]} : vector<2x384xf32> to vector<1x128xf32>
    %794 = vector.extract_strided_slice %792 {offsets = [0, 128], sizes = [1, 128], strides = [1, 1]} : vector<2x384xf32> to vector<1x128xf32>
    %795 = vector.extract_strided_slice %792 {offsets = [0, 256], sizes = [1, 128], strides = [1, 1]} : vector<2x384xf32> to vector<1x128xf32>
    %796 = vector.extract_strided_slice %792 {offsets = [1, 0], sizes = [1, 128], strides = [1, 1]} : vector<2x384xf32> to vector<1x128xf32>
    %797 = vector.extract_strided_slice %792 {offsets = [1, 128], sizes = [1, 128], strides = [1, 1]} : vector<2x384xf32> to vector<1x128xf32>
    %798 = vector.extract_strided_slice %792 {offsets = [1, 256], sizes = [1, 128], strides = [1, 1]} : vector<2x384xf32> to vector<1x128xf32>
    %799 = arith.mulf %793, %793 : vector<1x128xf32>
    %800 = arith.mulf %794, %794 : vector<1x128xf32>
    %801 = arith.addf %799, %800 : vector<1x128xf32>
    %802 = arith.mulf %795, %795 : vector<1x128xf32>
    %803 = arith.addf %801, %802 : vector<1x128xf32>
    %804 = math.sqrt %803 : vector<1x128xf32>
    %cst_119 = arith.constant 9.99999997E-7 : f32
    %805 = vector.broadcast %cst_119 : f32 to vector<1x128xf32>
    %806 = arith.addf %804, %805 : vector<1x128xf32>
    %807 = tpu.reciprocal %806 {approx = true} : vector<1x128xf32> -> vector<1x128xf32>
    %808 = arith.mulf %793, %807 : vector<1x128xf32>
    %809 = arith.mulf %794, %807 : vector<1x128xf32>
    %810 = arith.mulf %795, %807 : vector<1x128xf32>
    %811 = arith.mulf %796, %808 : vector<1x128xf32>
    %812 = arith.mulf %797, %809 : vector<1x128xf32>
    %813 = arith.addf %811, %812 : vector<1x128xf32>
    %814 = arith.mulf %798, %810 : vector<1x128xf32>
    %815 = arith.addf %813, %814 : vector<1x128xf32>
    %816 = arith.mulf %815, %808 : vector<1x128xf32>
    %817 = arith.subf %796, %816 : vector<1x128xf32>
    %818 = arith.mulf %815, %809 : vector<1x128xf32>
    %819 = arith.subf %797, %818 : vector<1x128xf32>
    %820 = arith.mulf %815, %810 : vector<1x128xf32>
    %821 = arith.subf %798, %820 : vector<1x128xf32>
    %822 = arith.mulf %817, %817 : vector<1x128xf32>
    %823 = arith.mulf %819, %819 : vector<1x128xf32>
    %824 = arith.addf %822, %823 : vector<1x128xf32>
    %825 = arith.mulf %821, %821 : vector<1x128xf32>
    %826 = arith.addf %824, %825 : vector<1x128xf32>
    %827 = math.sqrt %826 : vector<1x128xf32>
    %cst_120 = arith.constant 9.99999997E-7 : f32
    %828 = vector.broadcast %cst_120 : f32 to vector<1x128xf32>
    %829 = arith.addf %827, %828 : vector<1x128xf32>
    %830 = tpu.reciprocal %829 {approx = true} : vector<1x128xf32> -> vector<1x128xf32>
    %831 = arith.mulf %817, %830 : vector<1x128xf32>
    %832 = arith.mulf %819, %830 : vector<1x128xf32>
    %833 = arith.mulf %821, %830 : vector<1x128xf32>
    %834 = arith.mulf %809, %833 : vector<1x128xf32>
    %835 = arith.mulf %810, %832 : vector<1x128xf32>
    %836 = arith.subf %834, %835 : vector<1x128xf32>
    %837 = arith.mulf %810, %831 : vector<1x128xf32>
    %838 = arith.mulf %808, %833 : vector<1x128xf32>
    %839 = arith.subf %837, %838 : vector<1x128xf32>
    %840 = arith.mulf %808, %832 : vector<1x128xf32>
    %841 = arith.mulf %809, %831 : vector<1x128xf32>
    %842 = arith.subf %840, %841 : vector<1x128xf32>
    %843 = vector.extract_strided_slice %685 {offsets = [0, 0], sizes = [64, 128], strides = [1, 1]} : vector<64x384xf32> to vector<64x128xf32>
    %844 = vector.extract_strided_slice %685 {offsets = [0, 128], sizes = [64, 128], strides = [1, 1]} : vector<64x384xf32> to vector<64x128xf32>
    %845 = vector.extract_strided_slice %685 {offsets = [0, 256], sizes = [64, 128], strides = [1, 1]} : vector<64x384xf32> to vector<64x128xf32>
    %cst_121 = arith.constant 0.000000e+00 : f32
    %846 = vector.broadcast %cst_121 : f32 to vector<64x128xf32>
    %847 = vector.broadcast %808 : vector<1x128xf32> to vector<64x128xf32>
    %848 = arith.mulf %843, %847 : vector<64x128xf32>
    %849 = vector.broadcast %809 : vector<1x128xf32> to vector<64x128xf32>
    %850 = arith.mulf %844, %849 : vector<64x128xf32>
    %851 = arith.addf %848, %850 : vector<64x128xf32>
    %852 = vector.broadcast %810 : vector<1x128xf32> to vector<64x128xf32>
    %853 = arith.mulf %845, %852 : vector<64x128xf32>
    %854 = arith.addf %851, %853 : vector<64x128xf32>
    %855 = arith.mulf %854, %854 : vector<64x128xf32>
    %856 = arith.addf %846, %855 : vector<64x128xf32>
    %857 = vector.broadcast %831 : vector<1x128xf32> to vector<64x128xf32>
    %858 = arith.mulf %843, %857 : vector<64x128xf32>
    %859 = vector.broadcast %832 : vector<1x128xf32> to vector<64x128xf32>
    %860 = arith.mulf %844, %859 : vector<64x128xf32>
    %861 = arith.addf %858, %860 : vector<64x128xf32>
    %862 = vector.broadcast %833 : vector<1x128xf32> to vector<64x128xf32>
    %863 = arith.mulf %845, %862 : vector<64x128xf32>
    %864 = arith.addf %861, %863 : vector<64x128xf32>
    %865 = arith.mulf %864, %864 : vector<64x128xf32>
    %866 = arith.addf %856, %865 : vector<64x128xf32>
    %867 = vector.broadcast %836 : vector<1x128xf32> to vector<64x128xf32>
    %868 = arith.mulf %843, %867 : vector<64x128xf32>
    %869 = vector.broadcast %839 : vector<1x128xf32> to vector<64x128xf32>
    %870 = arith.mulf %844, %869 : vector<64x128xf32>
    %871 = arith.addf %868, %870 : vector<64x128xf32>
    %872 = vector.broadcast %842 : vector<1x128xf32> to vector<64x128xf32>
    %873 = arith.mulf %845, %872 : vector<64x128xf32>
    %874 = arith.addf %871, %873 : vector<64x128xf32>
    %875 = arith.mulf %874, %874 : vector<64x128xf32>
    %876 = arith.addf %866, %875 : vector<64x128xf32>
    %c0_122 = arith.constant 0 : index
    %c0_123 = arith.constant 0 : index
    %c0_124 = arith.constant 0 : index
    %877 = vector.load %arg2[%c0_122, %c0_123, %c0_124] : memref<1x128x4xi32, #tpu.memory_space<vmem>>, vector<1x128x4xi32>
    %878 = vector.shape_cast %877 : vector<1x128x4xi32> to vector<128x4xi32>
    %879 = tpu.iota {dimensions = array<i32: 1>} : vector<128x256xi32>
    %880 = vector.extract_strided_slice %878 {offsets = [0, 0], sizes = [128, 1], strides = [1, 1]} : vector<128x4xi32> to vector<128x1xi32>
    %881 = vector.broadcast %880 : vector<128x1xi32> to vector<128x256xi32>
    %882 = arith.cmpi eq, %879, %881 : vector<128x256xi32>
    %883 = vector.extract_strided_slice %878 {offsets = [0, 1], sizes = [128, 1], strides = [1, 1]} : vector<128x4xi32> to vector<128x1xi32>
    %884 = vector.broadcast %883 : vector<128x1xi32> to vector<128x256xi32>
    %885 = arith.cmpi eq, %879, %884 : vector<128x256xi32>
    %886 = arith.ori %882, %885 : vector<128x256xi1>
    %887 = vector.extract_strided_slice %878 {offsets = [0, 2], sizes = [128, 1], strides = [1, 1]} : vector<128x4xi32> to vector<128x1xi32>
    %888 = vector.broadcast %887 : vector<128x1xi32> to vector<128x256xi32>
    %889 = arith.cmpi eq, %879, %888 : vector<128x256xi32>
    %890 = arith.ori %886, %889 : vector<128x256xi1>
    %891 = vector.extract_strided_slice %878 {offsets = [0, 3], sizes = [128, 1], strides = [1, 1]} : vector<128x4xi32> to vector<128x1xi32>
    %892 = vector.broadcast %891 : vector<128x1xi32> to vector<128x256xi32>
    %893 = arith.cmpi eq, %879, %892 : vector<128x256xi32>
    %894 = arith.ori %890, %893 : vector<128x256xi1>
    %895 = arith.extui %894 : vector<128x256xi1> to vector<128x256xi32>
    %896 = arith.sitofp %895 : vector<128x256xi32> to vector<128x256xf32>
    %cst_125 = arith.constant 1.000000e+00 : f32
    %897 = vector.broadcast %cst_125 : f32 to vector<1x128xf32>
    %898 = tpu.concatenate %876, %897 in 0 : vector<64x128xf32>, vector<1x128xf32> -> vector<65x128xf32>
    %cst_126 = arith.constant dense<0.000000e+00> : vector<65x256xf32>
    %899 = tpu.matmul %898, %896, %cst_126 {dimension_numbers = #tpu.dot_dimension_numbers<[1], [0], [0], [1], [0, 0, 1, 1], [], []>} : vector<65x128xf32>, vector<128x256xf32>, vector<65x256xf32> -> vector<65x256xf32>
    %900 = vector.extract_strided_slice %899 {offsets = [64, 0], sizes = [1, 256], strides = [1, 1]} : vector<65x256xf32> to vector<1x256xf32>
    %cst_127 = arith.constant 1.000000e+00 : f32
    %901 = vector.broadcast %cst_127 : f32 to vector<1x256xf32>
    %902 = arith.maximumf %900, %901 : vector<1x256xf32>
    %903 = vector.extract_strided_slice %899 {offsets = [0, 0], sizes = [64, 256], strides = [1, 1]} : vector<65x256xf32> to vector<64x256xf32>
    %904 = vector.broadcast %902 : vector<1x256xf32> to vector<64x256xf32>
    %905 = arith.divf %903, %904 : vector<64x256xf32>
    %c0_128 = arith.constant 0 : index
    %c0_129 = arith.constant 0 : index
    %c0_130 = arith.constant 0 : index
    %906 = vector.load %arg4[%c0_128, %c0_129, %c0_130] : memref<1x64x256xf32, #tpu.memory_space<vmem>>, vector<1x64x256xf32>
    %907 = vector.shape_cast %906 : vector<1x64x256xf32> to vector<64x256xf32>
    %908 = vector.shape_cast %905 : vector<64x256xf32> to vector<1x64x256xf32>
    tpu.vector_store %arg4[%c0_128, %c0_129, %c0_130], %908 {strides = array<i32>} : memref<1x64x256xf32, #tpu.memory_space<vmem>>, vector<1x64x256xf32>,
    return
  }
  func.func @transform_0(%arg0: i32) -> (i32, i32) {
    %c0_i32 = arith.constant 0 : i32
    %c0_i32_0 = arith.constant 0 : i32
    return %c0_i32, %arg0 : i32, i32
  }
  func.func @transform_1(%arg0: i32) -> (i32, i32, i32) {
    %c0_i32 = arith.constant 0 : i32
    %c0_i32_0 = arith.constant 0 : i32
    %c0_i32_1 = arith.constant 0 : i32
    return %arg0, %c0_i32, %c0_i32_0 : i32, i32, i32
  }
  func.func @transform_2(%arg0: i32) -> (i32, i32) {
    %c0_i32 = arith.constant 0 : i32
    %c0_i32_0 = arith.constant 0 : i32
    %c0_i32_1 = arith.constant 0 : i32
    return %c0_i32, %c0_i32_0 : i32, i32
  }
  func.func @transform_3(%arg0: i32) -> (i32, i32, i32) {
    %c0_i32 = arith.constant 0 : i32
    %c0_i32_0 = arith.constant 0 : i32
    %c0_i32_1 = arith.constant 0 : i32
    return %arg0, %c0_i32, %c0_i32_0 : i32, i32, i32
  }
}

</mosaic_0001>

<bundles_post_ra>
// kernel: neg.5
= control target key start
LH: loop header
LB: loop body
LE: loop exit
PB: predicated region body
PF: predicated region fallthrough
CT: control target
= control target key end

     0   :  { %s24_s0 = inlined_call_operand.vmem [shape: f32[2,128], index: 0, kind: input, shape index: {}]   ;;  %s25_s1 = inlined_call_operand.vmem [shape: f32[2,128], index: 1, kind: output, shape index: {}]  }
   0x1   :  { %v2_v0 = vld [vmem:[%s24_s0] sm:$0x3] }
   0x2   :  { %v5_v1 = vxor.u32 2147483648, %v2_v0 }
   0x4   :  { %7 = vst [vmem:[%s25_s1] sm:$0x3] %v5_v1 }

// kernel: local_pool_vn_pointnet_forward.1
= control target key start
LH: loop header
LB: loop body
LE: loop exit
PB: predicated region body
PF: predicated region fallthrough
CT: control target
= control target key end

     0   :  { %s9019_s12 = smov 0   ;;  %s9021_s13 = smov 0   ;;  %s13506_s0 = inlined_call_operand.vmem [shape: bf16[16,6144], index: 0, kind: input, shape index: {}]   ;;  %s13507_s1 = inlined_call_operand.vmem [shape: s32[2,128,4], index: 1, kind: input, shape index: {}]   ;;  %s13508_s2 = inlined_call_operand.vmem [shape: bf16[944,64], index: 2, kind: input, shape index: {}]   ;;  %s13509_s3 = inlined_call_operand.vmem [shape: f32[2,64,256], index: 3, kind: output, shape index: {}]  }
   0x1   :  { %s9023_s14 = smov 0  }
   0x2 LB: > { %s7843_s15 = sadd.s32 4294967295, %s8989_s14   ;;  %s9036_s16 = sadd.s32 1, %s8989_s14   ;;  %s8989_s14 = sphi %s9023_s14, %s14009_s14   ;;  %s8985_s13 = sphi %s9021_s13, %s14008_s13   ;;  %s8981_s12 = sphi %s9019_s12, %s14007_s12  }
   0x3   : > { %s17_s17 = ssub.s32 %s8989_s14, %s9036_s16  ;;  %s20_s18 = sadd.s32 1, %s8985_s13 }
   0x4   : > { %p18_p0 = scmp.eq.s32.totalorder %s17_s17, 0  ;;  %p27_p1 = scmp.ne.s32.totalorder %s8985_s13, %s8981_s12 }
   0x5   : > { %p28_p2 = scmp.eq.s32.totalorder %s8989_s14, 0  ;;  %p7846_p4 = scmp.ge.s32.totalorder %s8989_s14, 2 }
   0x6   : > { %s9045_s19 = scalar_select %p18_p0, %s8985_s13, %s20_s18  }
   0x7   : > { %p29_p3 = por %p28_p2, %p27_p1  ;;  %129 = sbr.rel (%p7846_p4) target bundleno = 31 (0x1f), region = 20 }
   0xe   : > { %132 = sbr.rel (!%p29_p3) target bundleno = 31 (0x1f), region = 24  ;;  %s134_s20 = sand.u32 (%p29_p3), 1, %s8985_s13  }
   0xf   : > { %s8175_s21 = smul.u32 (%p29_p3), 96, %s8989_s14 }
  0x10   : > { %s8670_s22 = smul.u32 (%p29_p3), 192, %s134_s20 }
  0x11   : > { %s9053_s25 = scalar_lea.vmem (%p29_p3), %s13506_s0, %s8175_s21 }
  0x12   : > { %v152_v0 = vld [vmem:[%s9053_s25] sm:$0xff] (%p29_p3)  ;;  %v154_v1 = vld [vmem:[%s9053_s25 + $0x8] sm:$0xff] (%p29_p3)  ;;  %v156_v2 = vld [vmem:[%s9053_s25 + $0x10] sm:$0xff] (%p29_p3)  ;;  %s9058_s26 = scalar_lea.vmem (%p29_p3), [#allocation2], %s8670_s22 }
  0x13   : > { %153 = vst [vmem:[%s9058_s26] sm:$0xff] (%p29_p3), %v152_v0  ;;  %155 = vst [vmem:[%s9058_s26 + $0x8] sm:$0xff] (%p29_p3), %v154_v1  ;;  %v158_v3 = vld [vmem:[%s9053_s25 + $0x18] sm:$0xff] (%p29_p3)  ;;  %v160_v4 = vld [vmem:[%s9053_s25 + $0x20] sm:$0xff] (%p29_p3) }
  0x14   : > { %157 = vst [vmem:[%s9058_s26 + $0x10] sm:$0xff] (%p29_p3), %v156_v2  ;;  %v162_v5 = vld [vmem:[%s9053_s25 + $0x28] sm:$0xff] (%p29_p3)  ;;  %159 = vst [vmem:[%s9058_s26 + $0x18] sm:$0xff] (%p29_p3), %v158_v3  ;;  %v164_v6 = vld [vmem:[%s9053_s25 + $0x30] sm:$0xff] (%p29_p3) }
  0x15   : > { %161 = vst [vmem:[%s9058_s26 + $0x20] sm:$0xff] %v160_v4  ;;  %163 = vst [vmem:[%s9058_s26 + $0x28] sm:$0xff] %v162_v5  ;;  %v166_v7 = vld [vmem:[%s9053_s25 + $0x38] sm:$0xff]  ;;  %v168_v8 = vld [vmem:[%s9053_s25 + $0x40] sm:$0xff] }
  0x16   : > { %165 = vst [vmem:[%s9058_s26 + $0x30] sm:$0xff] %v164_v6  ;;  %167 = vst [vmem:[%s9058_s26 + $0x38] sm:$0xff] %v166_v7  ;;  %v170_v9 = vld [vmem:[%s9053_s25 + $0x48] sm:$0xff]  ;;  %v172_v10 = vld [vmem:[%s9053_s25 + $0x50] sm:$0xff] }
  0x17   : > { %169 = vst [vmem:[%s9058_s26 + $0x40] sm:$0xff] %v168_v8  ;;  %v174_v11 = vld [vmem:[%s9053_s25 + $0x58] sm:$0xff]  ;;  %171 = vst [vmem:[%s9058_s26 + $0x48] sm:$0xff] %v170_v9  ;;  %v176_v12 = vld [vmem:[%s9053_s25 + $0xc0] sm:$0xff] }
  0x18   : > { %173 = vst [vmem:[%s9058_s26 + $0x50] sm:$0xff] %v172_v10  ;;  %175 = vst [vmem:[%s9058_s26 + $0x58] sm:$0xff] %v174_v11  ;;  %v178_v13 = vld [vmem:[%s9053_s25 + $0xc8] sm:$0xff]  ;;  %v180_v14 = vld [vmem:[%s9053_s25 + $0xd0] sm:$0xff] }
  0x19   : > { %177 = vst [vmem:[%s9058_s26 + $0x60] sm:$0xff] %v176_v12  ;;  %179 = vst [vmem:[%s9058_s26 + $0x68] sm:$0xff] %v178_v13  ;;  %v182_v15 = vld [vmem:[%s9053_s25 + $0xd8] sm:$0xff]  ;;  %v184_v16 = vld [vmem:[%s9053_s25 + $0xe0] sm:$0xff] }
  0x1a   : > { %181 = vst [vmem:[%s9058_s26 + $0x70] sm:$0xff] %v180_v14  ;;  %v186_v17 = vld [vmem:[%s9053_s25 + $0xe8] sm:$0xff]  ;;  %183 = vst [vmem:[%s9058_s26 + $0x78] sm:$0xff] %v182_v15  ;;  %v188_v18 = vld [vmem:[%s9053_s25 + $0xf0] sm:$0xff] }
  0x1b   : > { %185 = vst [vmem:[%s9058_s26 + $0x80] sm:$0xff] %v184_v16  ;;  %187 = vst [vmem:[%s9058_s26 + $0x88] sm:$0xff] %v186_v17  ;;  %v190_v19 = vld [vmem:[%s9053_s25 + $0xf8] sm:$0xff]  ;;  %v192_v20 = vld [vmem:[%s9053_s25 + $0x100] sm:$0xff] }
  0x1c   : > { %189 = vst [vmem:[%s9058_s26 + $0x90] sm:$0xff] %v188_v18  ;;  %191 = vst [vmem:[%s9058_s26 + $0x98] sm:$0xff] %v190_v19  ;;  %v194_v21 = vld [vmem:[%s9053_s25 + $0x108] sm:$0xff]  ;;  %v196_v22 = vld [vmem:[%s9053_s25 + $0x110] sm:$0xff] }
  0x1d   : > { %193 = vst [vmem:[%s9058_s26 + $0xa0] sm:$0xff] %v192_v20  ;;  %v198_v23 = vld [vmem:[%s9053_s25 + $0x118] sm:$0xff]  ;;  %195 = vst [vmem:[%s9058_s26 + $0xa8] sm:$0xff] %v194_v21 }
  0x1e   : > { %197 = vst [vmem:[%s9058_s26 + $0xb0] sm:$0xff] %v196_v22  ;;  %199 = vst [vmem:[%s9058_s26 + $0xb8] sm:$0xff] %v198_v23 }
  0x1f PF: > { %p7848_p5 = scmp.ge.s32.totalorder %s8989_s14, 1  ;;  %p212_p6 = scmp.lt.s32.totalorder %s8989_s14, 3 }
  0x21   : > { %p213_p7 = pnand %p7848_p5, %p212_p6 }
  0x23   : > { %216 = sbr.rel (%p213_p7) target bundleno = 6747 (0x1a5b), region = 51 }
  0x2a   : > { %s219_s27 = sand.u32 1, %s8981_s12   ;;  %v13510_v24 = vmov 0   ;;  %v9112_v25 = vld [vmem:[%s13508_s2] sm:$0xff]   ;;  %vm307_vm0 = vcmask 130048   ;;  %v9131_v40 = vld [vmem:[%s13508_s2 + $0x10] sm:$0xff]   ;;  %v9136_v42 = vld [vmem:[%s13508_s2 + $0x8] sm:$0xff]  }
  0x2b   : > { %s8671_s28 = smul.u32 192, %s219_s27  ;;  %352 = vmatprep.mubr.bf16.mxu0 %v13510_v24  ;;  %8324 = vmatprep.mubr.msk.bf16.mxu1 %vm307_vm0, %v9112_v25  ;;  %v9148_v45 = vld [vmem:[%s13508_s2 + $0x18] sm:$0xff]   ;;  %p248_p8 = scmp.lt.s32.totalorder %s7843_s15, 1 }
  0x2d   : > { %s9116_s4 = scalar_lea.vmem [#allocation2], %s8671_s28  ;;  %s14011_s15 = smov (!%p248_p8, %s7843_s15), 1 }
  0x2e   : > { %v267_v26 = vld [vmem:[%s9116_s4] sm:$0xff]  ;;  %v268_v28 = vld [vmem:[%s9116_s4 + $0x8] sm:$0xf]  ;;  %v550_v32 = vld [vmem:[%s9116_s4 + $0xc] sm:$0xff]  ;;  %s8176_s9 = sshll.u32 %s14011_s15, 7 }
  0x2f   : > { %v269_v27 = vld [vmem:[%s9116_s4 + $0x60] sm:$0xff]  ;;  %v270_v31 = vld [vmem:[%s9116_s4 + $0x68] sm:$0xf]  ;;  %v552_v34 = vld [vmem:[%s9116_s4 + $0x6c] sm:$0xff]  ;;  %s12761_s12 = scalar_lea.vmem %s13507_s1, %s8176_s9  ;;  %s13478_s21 = scalar_lea.vmem %s13509_s3, %s8176_s9 }
  0x30   : > { %v7858_v29 = vcombine.high %v267_v26, %v269_v27  ;;  %v7857_v30 = vcombine.low %v267_v26, %v269_v27  ;;  %v7859_v33 = vcombine.low %v268_v28, %v270_v31  ;;  %v7869_v35 = vcombine.high %v550_v32, %v552_v34  ;;  %v551_v36 = vld [vmem:[%s9116_s4 + $0x14] sm:$0xf]  ;;  %v813_v38 = vld [vmem:[%s9116_s4 + $0x20] sm:$0xf]  ;;  %v1074_v46 = vld [vmem:[%s9116_s4 + $0x24] sm:$0xff] }
  0x31   : > { %v553_v37 = vld [vmem:[%s9116_s4 + $0x74] sm:$0xf]  ;;  %v815_v39 = vld [vmem:[%s9116_s4 + $0x80] sm:$0xf]  ;;  %v7868_v41 = vcombine.low %v550_v32, %v552_v34  ;;  %v1076_v47 = vld [vmem:[%s9116_s4 + $0x84] sm:$0xff] }
  0x32   : > { %320 = vmatprep.subr.bf16.mxu0 %v7858_v29  ;;  %8322 = vmatprep.subr.bf16.mxu1 %v7859_v33  ;;  %v7870_v43 = vcombine.low %v551_v36, %v553_v37  ;;  %v7881_v44 = vcombine.low %v813_v38, %v815_v39  ;;  %v7891_v48 = vcombine.high %v1074_v46, %v1076_v47  ;;  %v1337_v49 = vld [vmem:[%s9116_s4 + $0x38] sm:$0xf]  ;;  %v1598_v56 = vld [vmem:[%s9116_s4 + $0x3c] sm:$0xff]  ;;  %v1075_v59 = vld [vmem:[%s9116_s4 + $0x2c] sm:$0xf] }
  0x33   : > { %321 = vmatpush1.bf16.msra.mxu0 %v7857_v30  ;;  %8323 = vmatpush3.bf16.msra.mxu1 %v7859_v33  ;;  %v1339_v50 = vld [vmem:[%s9116_s4 + $0x98] sm:$0xf]  ;;  %v7890_v51 = vcombine.low %v1074_v46, %v1076_v47  ;;  %v1600_v57 = vld [vmem:[%s9116_s4 + $0x9c] sm:$0xff]  ;;  %v1077_v60 = vld [vmem:[%s9116_s4 + $0x8c] sm:$0xf] }
  0x34   : > { %570 = vmatprep.subr.bf16.mxu0 %v7869_v35  ;;  %8644 = vmatprep.subr.bf16.mxu1 %v7869_v35  ;;  %v7903_v52 = vcombine.low %v1337_v49, %v1339_v50  ;;  %v812_v53 = vld [vmem:[%s9116_s4 + $0x18] sm:$0xff]  ;;  %v7913_v58 = vcombine.high %v1598_v56, %v1600_v57  ;;  %v7892_v62 = vcombine.low %v1075_v59, %v1077_v60  ;;  %v1336_v63 = vld [vmem:[%s9116_s4 + $0x30] sm:$0xff]  ;;  %v1599_v9 = vld [vmem:[%s9116_s4 + $0x44] sm:$0xf] }
  0x35   : > { %v814_v54 = vld [vmem:[%s9116_s4 + $0x78] sm:$0xff]  ;;  %v1338_v0 = vld [vmem:[%s9116_s4 + $0x90] sm:$0xff]  ;;  %v7912_v4 = vcombine.low %v1598_v56, %v1600_v57  ;;  %v1601_v10 = vld [vmem:[%s9116_s4 + $0xa4] sm:$0xf] }
  0x36   : > { %7860 = vmatmul.mubr.msk.bf16.vlgmr.msra.gmra.mrb[0].mxu0 %vm307_vm0, %v9112_v25  ;;  %8325 = vmatmul.mubr.msk.bf16.vlgmr.msra.gmra.mrb[0].mxu1 %vm307_vm0, %v9136_v42  ;;  %v7880_v55 = vcombine.high %v812_v53, %v814_v54  ;;  %v7879_v61 = vcombine.low %v812_v53, %v814_v54  ;;  %v1861_v1 = vld [vmem:[%s9116_s4 + $0x50] sm:$0xf]  ;;  %v7902_v3 = vcombine.high %v1336_v63, %v1338_v0  ;;  %v2122_v6 = vld [vmem:[%s9116_s4 + $0x54] sm:$0xff]  ;;  %v1860_v13 = vld [vmem:[%s9116_s4 + $0x48] sm:$0xff] }
  0x37   : > { %362 = vmatprep.mubr.bf16.mxu0 %v13510_v24  ;;  %8328 = vmatprep.mubr.msk.bf16.mxu1 %vm307_vm0, %v9131_v40  ;;  %v1863_v2 = vld [vmem:[%s9116_s4 + $0xb0] sm:$0xf]  ;;  %v2124_v7 = vld [vmem:[%s9116_s4 + $0xb4] sm:$0xff]  ;;  %v7901_v11 = vcombine.low %v1336_v63, %v1338_v0  ;;  %v7914_v12 = vcombine.low %v1599_v9, %v1601_v10  ;;  %v1862_v14 = vld [vmem:[%s9116_s4 + $0xa8] sm:$0xff] }
  0x38   : > { %571 = vmatpush1.bf16.msra.mxu0 %v7868_v41  ;;  %8645 = vmatpush1.bf16.msra.mxu1 %v7868_v41  ;;  %v7925_v5 = vcombine.low %v1861_v1, %v1863_v2  ;;  %v7935_v8 = vcombine.high %v2122_v6, %v2124_v7  ;;  %v7924_v15 = vcombine.high %v1860_v13, %v1862_v14  ;;  %v2123_v17 = vld [vmem:[%s9116_s4 + $0x5c] sm:$0xf] }
  0x39   : > { %8332 = vmatprep.subr.bf16.mxu0 %v7870_v43  ;;  %8342 = vmatprep.subr.bf16.mxu1 %v7881_v44  ;;  %v7934_v16 = vcombine.low %v2122_v6, %v2124_v7  ;;  %v2125_v18 = vld [vmem:[%s9116_s4 + $0xbc] sm:$0xf]  ;;  %v7923_v19 = vcombine.low %v1860_v13, %v1862_v14 }
  0x3a   : > { %v7936_v20 = vcombine.low %v2123_v17, %v2125_v18 }
  0x3e   : > { %7861 = vmatmul.mubr.msk.bf16.gmra.mrb[4].mxu0 %vm307_vm0, %v9136_v42  ;;  %8329 = vmatmul.mubr.msk.bf16.gmra.mrb[4].mxu1 %vm307_vm0, %v9148_v45 }
  0x3f   : > { %372 = vmatprep.mubr.bf16.mxu0 %v13510_v24  ;;  %632 = vmatprep.mubr.bf16.mxu1 %v13510_v24 }
  0x46   : > { %7862 = vmatmul.mubr.msk.bf16.gmra.mrb[8].mxu0 %vm307_vm0, %v9131_v40  ;;  %7874 = vmatmul.mubr.msk.bf16.vlgmr.msra.gmra.mrb[8].mxu1 %vm307_vm0, %v9148_v45 }
  0x47   : > { %382 = vmatprep.mubr.bf16.mxu0 %v13510_v24  ;;  %8343 = vmatpush3.bf16.msra.mxu1 %v7881_v44 }
  0x48   : > { %8344 = vmatprep.mubr.msk.bf16.mxu1 %vm307_vm0, %v9112_v25  ;;  %1094 = vmatprep.subr.bf16.mxu1 %v7891_v48 }
  0x4e   : > { %7863 = vmatmul.mubr.msk.bf16.gmra.mrb[12].mxu0 %vm307_vm0, %v9148_v45  ;;  %8345 = vmatmul.mubr.msk.bf16.vlgmr.msra.gmra.mrb[12].mxu1 %vm307_vm0, %v9136_v42 }
  0x4f   : > { %602 = vmatprep.mubr.bf16.mxu0 %v13510_v24  ;;  %8348 = vmatprep.mubr.msk.bf16.mxu1 %vm307_vm0, %v9131_v40 }
  0x50   : > { %1095 = vmatpush1.bf16.msra.mxu1 %v7890_v51 }
  0x51   : > { %8362 = vmatprep.subr.bf16.mxu1 %v7903_v52 }
  0x56   : > { %7871 = vmatmul.mubr.msk.bf16.vlgmr.msra.gmra.mrb[16].mxu0 %vm307_vm0, %v9112_v25  ;;  %8349 = vmatmul.mubr.msk.bf16.gmra.mrb[16].mxu1 %vm307_vm0, %v9148_v45 }
  0x57   : > { %612 = vmatprep.mubr.bf16.mxu0 %v13510_v24  ;;  %8333 = vmatpush3.bf16.msra.mxu0 %v7870_v43 }
  0x58   : > { %832 = vmatprep.subr.bf16.mxu0 %v7880_v55  ;;  %1126 = vmatprep.mubr.bf16.mxu1 %v13510_v24 }
  0x5e   : > { %7872 = vmatmul.mubr.msk.bf16.gmra.mrb[20].mxu0 %vm307_vm0, %v9136_v42  ;;  %7893 = vmatmul.mubr.msk.bf16.vlgmr.msra.gmra.mrb[20].mxu1 %vm307_vm0, %v9112_v25 }
  0x5f   : > { %622 = vmatprep.mubr.bf16.mxu0 %v13510_v24  ;;  %1136 = vmatprep.mubr.bf16.mxu1 %v13510_v24 }
  0x60   : > { %8363 = vmatpush3.bf16.msra.mxu1 %v7903_v52 }
  0x61   : > { %1618 = vmatprep.subr.bf16.mxu1 %v7913_v58 }
  0x66   : > { %7873 = vmatmul.mubr.msk.bf16.gmra.mrb[24].mxu0 %vm307_vm0, %v9131_v40  ;;  %7894 = vmatmul.mubr.msk.bf16.gmra.mrb[24].mxu1 %vm307_vm0, %v9136_v42 }
  0x67   : > { %8334 = vmatprep.mubr.msk.bf16.mxu0 %vm307_vm0, %v9112_v25  ;;  %1146 = vmatprep.mubr.bf16.mxu1 %v13510_v24 }
  0x6e   : > { %8335 = vmatmul.mubr.msk.bf16.vlgmr.msra.gmra.mrb[28].mxu0 %vm307_vm0, %v9136_v42  ;;  %7895 = vmatmul.mubr.msk.bf16.gmra.mrb[28].mxu1 %vm307_vm0, %v9131_v40 }
  0x6f   : > { %8338 = vmatprep.mubr.msk.bf16.mxu0 %vm307_vm0, %v9131_v40  ;;  %833 = vmatpush1.bf16.msra.mxu0 %v7879_v61 }
  0x70   : > { %8352 = vmatprep.subr.bf16.mxu0 %v7892_v62  ;;  %1156 = vmatprep.mubr.bf16.mxu1 %v13510_v24 }
  0x76   : > { %8339 = vmatmul.mubr.msk.bf16.gmra.mrb[32].mxu0 %vm307_vm0, %v9148_v45  ;;  %7896 = vmatmul.mubr.msk.bf16.gmra.mrb[32].mxu1 %vm307_vm0, %v9148_v45 }
  0x77   : > { %864 = vmatprep.mubr.bf16.mxu0 %v13510_v24  ;;  %8364 = vmatprep.mubr.msk.bf16.mxu1 %vm307_vm0, %v9112_v25 }
  0x7e   : > { %7882 = vmatmul.mubr.msk.bf16.vlgmr.msra.gmra.mrb[36].mxu0 %vm307_vm0, %v9112_v25  ;;  %8365 = vmatmul.mubr.msk.bf16.vlgmr.msra.gmra.mrb[36].mxu1 %vm307_vm0, %v9136_v42 }
  0x7f   : > { %874 = vmatprep.mubr.bf16.mxu0 %v13510_v24  ;;  %8353 = vmatpush3.bf16.msra.mxu0 %v7892_v62 }
  0x80   : > { %1356 = vmatprep.subr.bf16.mxu0 %v7902_v3  ;;  %8368 = vmatprep.mubr.msk.bf16.mxu1 %vm307_vm0, %v9131_v40 }
  0x81   : > { %1619 = vmatpush1.bf16.msra.mxu1 %v7912_v4 }
  0x82   : > { %8382 = vmatprep.subr.bf16.mxu1 %v7925_v5 }
  0x86   : > { %7883 = vmatmul.mubr.msk.bf16.gmra.mrb[40].mxu0 %vm307_vm0, %v9136_v42  ;;  %8369 = vmatmul.mubr.msk.bf16.gmra.mrb[40].mxu1 %vm307_vm0, %v9148_v45 }
  0x87   : > { %884 = vmatprep.mubr.bf16.mxu0 %v13510_v24  ;;  %1650 = vmatprep.mubr.bf16.mxu1 %v13510_v24 }
  0x8e   : > { %7884 = vmatmul.mubr.msk.bf16.gmra.mrb[44].mxu0 %vm307_vm0, %v9131_v40  ;;  %7915 = vmatmul.mubr.msk.bf16.vlgmr.msra.gmra.mrb[44].mxu1 %vm307_vm0, %v9112_v25 }
  0x8f   : > { %894 = vmatprep.mubr.bf16.mxu0 %v13510_v24  ;;  %1660 = vmatprep.mubr.bf16.mxu1 %v13510_v24 }
  0x90   : > { %8383 = vmatpush3.bf16.msra.mxu1 %v7925_v5 }
  0x91   : > { %2142 = vmatprep.subr.bf16.mxu1 %v7935_v8 }
  0x96   : > { %7885 = vmatmul.mubr.msk.bf16.gmra.mrb[48].mxu0 %vm307_vm0, %v9148_v45  ;;  %7916 = vmatmul.mubr.msk.bf16.gmra.mrb[48].mxu1 %vm307_vm0, %v9136_v42 }
  0x97   : > { %8354 = vmatprep.mubr.msk.bf16.mxu0 %vm307_vm0, %v9112_v25  ;;  %1670 = vmatprep.mubr.bf16.mxu1 %v13510_v24 }
  0x9e   : > { %8355 = vmatmul.mubr.msk.bf16.vlgmr.msra.gmra.mrb[52].mxu0 %vm307_vm0, %v9136_v42  ;;  %7917 = vmatmul.mubr.msk.bf16.gmra.mrb[52].mxu1 %vm307_vm0, %v9131_v40 }
  0x9f   : > { %8358 = vmatprep.mubr.msk.bf16.mxu0 %vm307_vm0, %v9131_v40  ;;  %1357 = vmatpush1.bf16.msra.mxu0 %v7901_v11 }
  0xa0   : > { %8372 = vmatprep.subr.bf16.mxu0 %v7914_v12  ;;  %1680 = vmatprep.mubr.bf16.mxu1 %v13510_v24 }
  0xa6   : > { %8359 = vmatmul.mubr.msk.bf16.gmra.mrb[56].mxu0 %vm307_vm0, %v9148_v45  ;;  %7918 = vmatmul.mubr.msk.bf16.gmra.mrb[56].mxu1 %vm307_vm0, %v9148_v45 }
  0xa7   : > { %1388 = vmatprep.mubr.bf16.mxu0 %v13510_v24  ;;  %8384 = vmatprep.mubr.msk.bf16.mxu1 %vm307_vm0, %v9112_v25 }
  0xae   : > { %7904 = vmatmul.mubr.msk.bf16.vlgmr.msra.gmra.mrb[60].mxu0 %vm307_vm0, %v9112_v25  ;;  %8385 = vmatmul.mubr.msk.bf16.vlgmr.msra.gmra.mrb[60].mxu1 %vm307_vm0, %v9136_v42 }
  0xaf   : > { %1398 = vmatprep.mubr.bf16.mxu0 %v13510_v24  ;;  %8373 = vmatpush3.bf16.msra.mxu0 %v7914_v12 }
  0xb0   : > { %1880 = vmatprep.subr.bf16.mxu0 %v7924_v15  ;;  %8388 = vmatprep.mubr.msk.bf16.mxu1 %vm307_vm0, %v9131_v40 }
  0xb1   : > { %2143 = vmatpush1.bf16.msra.mxu1 %v7934_v16 }
  0xb6   : > { %7905 = vmatmul.mubr.msk.bf16.gmra.mrb[64].mxu0 %vm307_vm0, %v9136_v42  ;;  %8389 = vmatmul.mubr.msk.bf16.gmra.mrb[64].mxu1 %vm307_vm0, %v9148_v45 }
  0xb7   : > { %1408 = vmatprep.mubr.bf16.mxu0 %v13510_v24  ;;  %2174 = vmatprep.mubr.bf16.mxu1 %v13510_v24 }
  0xbe   : > { %7906 = vmatmul.mubr.msk.bf16.gmra.mrb[68].mxu0 %vm307_vm0, %v9131_v40  ;;  %7937 = vmatmul.mubr.msk.bf16.vlgmr.msra.gmra.mrb[68].mxu1 %vm307_vm0, %v9112_v25 }
  0xbf   : > { %1418 = vmatprep.mubr.bf16.mxu0 %v13510_v24  ;;  %2184 = vmatprep.mubr.bf16.mxu1 %v13510_v24 }
  0xc6   : > { %7907 = vmatmul.mubr.msk.bf16.gmra.mrb[72].mxu0 %vm307_vm0, %v9148_v45  ;;  %7938 = vmatmul.mubr.msk.bf16.gmra.mrb[72].mxu1 %vm307_vm0, %v9136_v42 }
  0xc7   : > { %8374 = vmatprep.mubr.msk.bf16.mxu0 %vm307_vm0, %v9112_v25  ;;  %2194 = vmatprep.mubr.bf16.mxu1 %v13510_v24 }
  0xce   : > { %8375 = vmatmul.mubr.msk.bf16.vlgmr.msra.gmra.mrb[76].mxu0 %vm307_vm0, %v9136_v42  ;;  %7939 = vmatmul.mubr.msk.bf16.gmra.mrb[76].mxu1 %vm307_vm0, %v9131_v40 }
  0xcf   : > { %8378 = vmatprep.mubr.msk.bf16.mxu0 %vm307_vm0, %v9131_v40  ;;  %1881 = vmatpush1.bf16.msra.mxu0 %v7923_v19 }
  0xd0   : > { %8392 = vmatprep.subr.bf16.mxu0 %v7936_v20  ;;  %2204 = vmatprep.mubr.bf16.mxu1 %v13510_v24 }
  0xd6   : > { %8379 = vmatmul.mubr.msk.bf16.gmra.mrb[80].mxu0 %vm307_vm0, %v9148_v45  ;;  %7940 = vmatmul.mubr.msk.bf16.gmra.mrb[80].mxu1 %vm307_vm0, %v9148_v45 }
  0xd7   : > { %1912 = vmatprep.mubr.bf16.mxu0 %v13510_v24 }
  0xde   : > { %7926 = vmatmul.mubr.msk.bf16.vlgmr.msra.gmra.mrb[84].mxu0 %vm307_vm0, %v9112_v25 }
  0xdf   : > { %1922 = vmatprep.mubr.bf16.mxu0 %v13510_v24  ;;  %8393 = vmatpush3.bf16.msra.mxu0 %v7936_v20 }
  0xe6   : > { %7927 = vmatmul.mubr.msk.bf16.gmra.mrb[88].mxu0 %vm307_vm0, %v9136_v42 }
  0xe7   : > { %1932 = vmatprep.mubr.bf16.mxu0 %v13510_v24 }
  0xee   : > { %7928 = vmatmul.mubr.msk.bf16.gmra.mrb[92].mxu0 %vm307_vm0, %v9131_v40 }
  0xef   : > { %1942 = vmatprep.mubr.bf16.mxu0 %v13510_v24 }
  0xf6   : > { %7929 = vmatmul.mubr.msk.bf16.gmra.mrb[96].mxu0 %vm307_vm0, %v9148_v45 }
  0xf7   : > { %8394 = vmatprep.mubr.msk.bf16.mxu0 %vm307_vm0, %v9112_v25 }
  0xfe   : > { %8395 = vmatmul.mubr.msk.bf16.vlgmr.msra.gmra.mrb[100].mxu0 %vm307_vm0, %v9136_v42 }
  0xff   : > { %8398 = vmatprep.mubr.msk.bf16.mxu0 %vm307_vm0, %v9131_v40 }
 0x106   : > { %8399 = vmatmul.mubr.msk.bf16.gmra.mrb[104].mxu0 %vm307_vm0, %v9148_v45 }
 0x107   : > { %2443 = vmatprep.mubr.bf16.mxu0 %v13510_v24 }
 0x109   : > { %v9323_v21 = vpop.f32.mrb[0].mxu0  ;;  %v9327_v23 = vpop.f32.mrb[0].mxu1 }
 0x10a   : > { %v9325_v22 = vpop.f32.mrb[1].mxu0  ;;  %v9331_v25 = vpop.f32.mrb[1].mxu1 }
 0x10b   : > { %v9329_v26 = vpop.f32.mrb[2].mxu0  ;;  %v9335_v28 = vpop.f32.mrb[2].mxu1 }
 0x10c   : > { %v9333_v27 = vpop.f32.mrb[3].mxu0  ;;  %v9337_v29 = vpop.f32.mrb[3].mxu1 }
 0x111   : > { %v9339_v30 = vpop.f32.mrb[4].mxu0  ;;  %v9343_v32 = vpop.f32.mrb[4].mxu1 }
 0x112   : > { %v9341_v31 = vpop.f32.mrb[5].mxu0  ;;  %v9349_v34 = vmul.f32 %v9343_v32, %v9327_v23  ;;  %v9351_v35 = vpop.f32.mrb[5].mxu1  ;;  %v492_v16 = vmul.f32 %v9343_v32, %v9343_v32 }
 0x113   : > { %v9345_v33 = vpop.f32.mrb[6].mxu0  ;;  %v470_v37 = vmul.f32 %v9351_v35, %v9331_v25  ;;  %v9357_v38 = vpop.f32.mrb[6].mxu1  ;;  %v490_v50 = vmul.f32 %v9351_v35, %v9351_v35 }
 0x114   : > { %v9353_v36 = vpop.f32.mrb[7].mxu0  ;;  %v9361_v39 = vmul.f32 %v9357_v38, %v9335_v28  ;;  %v9363_v40 = vpop.f32.mrb[7].mxu1 }
 0x115   : > { %v471_v41 = vmul.f32 %v9363_v40, %v9337_v29  ;;  %v491_v56 = vmul.f32 %v9363_v40, %v9363_v40 }
 0x119   : > { %v9367_v42 = vpop.f32.mrb[8].mxu0  ;;  %v9375_v46 = vpop.f32.mrb[8].mxu1 }
 0x11a   : > { %v458_v43 = vmul.f32 %v9367_v42, %v9323_v21  ;;  %v478_v44 = vmul.f32 %v9367_v42, %v9367_v42  ;;  %v9373_v45 = vpop.f32.mrb[9].mxu0  ;;  %v730_v51 = vmul.f32 %v9375_v46, %v9375_v46  ;;  %v9387_v52 = vpop.f32.mrb[9].mxu1 }
 0x11b   : > { %v462_v47 = vmul.f32 %v9373_v45, %v9325_v22  ;;  %v482_v48 = vmul.f32 %v9373_v45, %v9373_v45  ;;  %v9381_v49 = vpop.f32.mrb[10].mxu0  ;;  %v734_v57 = vmul.f32 %v9387_v52, %v9387_v52  ;;  %v9399_v58 = vpop.f32.mrb[10].mxu1 }
 0x11c   : > { %v459_v53 = vmul.f32 %v9381_v49, %v9329_v26  ;;  %v479_v54 = vmul.f32 %v9381_v49, %v9381_v49  ;;  %v9393_v55 = vpop.f32.mrb[11].mxu0  ;;  %v9405_v63 = vpop.f32.mrb[11].mxu1  ;;  %v731_v1 = vmul.f32 %v9399_v58, %v9399_v58 }
 0x11d   : > { %v463_v59 = vmul.f32 %v9393_v55, %v9333_v27  ;;  %v483_v60 = vmul.f32 %v9393_v55, %v9393_v55  ;;  %v466_v61 = vadd.f32 %v462_v47, %v458_v43  ;;  %v486_v62 = vadd.f32 %v482_v48, %v478_v44 }
 0x11e   : > { %v9407_v0 = vadd.f32 %v734_v57, %v730_v51  ;;  %v735_v2 = vmul.f32 %v9405_v63, %v9405_v63 }
 0x11f   : > { %v9413_v3 = vadd.f32 %v470_v37, %v466_v61  ;;  %v494_v4 = vadd.f32 %v490_v50, %v486_v62  ;;  %v467_v5 = vadd.f32 %v463_v59, %v459_v53  ;;  %v487_v6 = vadd.f32 %v483_v60, %v479_v54 }
 0x120   : > { %v9415_v7 = vadd.f32 %v735_v2, %v731_v1  ;;  %v493_v37 = vmul.f32 %v9357_v38, %v9357_v38 }
 0x121   : > { %v498_v8 = vadd.f32 1e-06, %v494_v4  ;;  %v9417_v9 = vadd.f32 %v471_v41, %v467_v5  ;;  %v495_v10 = vadd.f32 %v491_v56, %v487_v6  ;;  %v9419_v11 = vpop.f32.mrb[12].mxu0  ;;  %v9427_v15 = vpop.f32.mrb[12].mxu1  ;;  %vm510_vm1 = vcmp.ge.f32.partialorder %v9413_v3, 0.0 }
 0x122   : > { %v460_v12 = vmul.f32 %v9419_v11, %v9339_v30  ;;  %v480_v13 = vmul.f32 %v9419_v11, %v9419_v11  ;;  %v9425_v14 = vpop.f32.mrb[13].mxu0  ;;  %13660 = vst [vmem:[#allocation3_spill] sm:$0xff] %v9427_v15  ;;  %v9435_v20 = vpop.f32.mrb[13].mxu1 }
 0x123   : > { %8799 = vrcp.f32 %v498_v8  ;;  %v499_v17 = vadd.f32 1e-06, %v495_v10  ;;  %v464_v18 = vmul.f32 %v9425_v14, %v9341_v31  ;;  %v9433_v19 = vpop.f32.mrb[14].mxu0  ;;  %13661 = vst [vmem:[#allocation4_spill] sm:$0xff] %v9435_v20  ;;  %v484_v41 = vmul.f32 %v9425_v14, %v9425_v14  ;;  %v9447_v48 = vpop.f32.mrb[14].mxu1 }
 0x124   : > { %v461_v43 = vmul.f32 %v9433_v19, %v9345_v33  ;;  %v481_v44 = vmul.f32 %v9433_v19, %v9433_v19  ;;  %v9445_v47 = vpop.f32.mrb[15].mxu0  ;;  %13662 = vst [vmem:[#allocation5_spill] sm:$0xff] %v9447_v48  ;;  %v9453_v54 = vpop.f32.mrb[15].mxu1  ;;  %vm511_vm2 = vcmp.ge.f32.partialorder %v9417_v9, 0.0 }
 0x125   : > { %8801 = vrcp.f32 %v499_v17  ;;  %v468_v50 = vadd.f32 %v464_v18, %v460_v12  ;;  %v465_v51 = vmul.f32 %v9445_v47, %v9353_v36  ;;  %v485_v53 = vmul.f32 %v9445_v47, %v9445_v47  ;;  %13663 = vst [vmem:[#allocation6_spill] sm:$0xff] %v9453_v54 }
 0x126   : > { %v488_v56 = vadd.f32 %v484_v41, %v480_v13 }
 0x127   : > { %v9456_v57 = vadd.f32 %v9349_v34, %v468_v50  ;;  %v469_v59 = vadd.f32 %v465_v51, %v461_v43  ;;  %v489_v60 = vadd.f32 %v485_v53, %v481_v44 }
 0x128   : > { %v496_v61 = vadd.f32 %v492_v16, %v488_v56 }
 0x129   : > { %v9459_v62 = vadd.f32 %v9361_v39, %v469_v59  ;;  %v497_v1 = vadd.f32 %v493_v37, %v489_v60  ;;  %v9461_v2 = vpop.f32.mrb[16].mxu0  ;;  %v9467_v10 = vpop.f32.mrb[16].mxu1  ;;  %vm512_vm3 = vcmp.ge.f32.partialorder %v9456_v57, 0.0 }
 0x12a   : > { %v500_v4 = vadd.f32 1e-06, %v496_v61  ;;  %v9463_v5 = vpop.f32.mrb[17].mxu0  ;;  %13664 = vst [vmem:[#allocation7_spill] sm:$0xff] %v9467_v10  ;;  %v9473_v12 = vmul.f32 %v9467_v10, %v9427_v15  ;;  %v9475_v39 = vpop.f32.mrb[17].mxu1 }
 0x12b   : > { %v501_v6 = vadd.f32 1e-06, %v497_v1  ;;  %v9465_v8 = vpop.f32.mrb[18].mxu0  ;;  %13666 = vst [vmem:[#allocation9_spill] sm:$0xff] %v9475_v39  ;;  %v9479_v16 = vmul.f32 %v9475_v39, %v9435_v20  ;;  %v9481_v17 = vpop.f32.mrb[18].mxu1  ;;  %vm513_vm4 = vcmp.ge.f32.partialorder %v9459_v62, 0.0 }
 0x12c   : > { %8803 = vrcp.f32 %v500_v4  ;;  %v9469_v34 = vpop.f32.mrb[19].mxu0  ;;  %13665 = vst [vmem:[#allocation8_spill] sm:$0xff] %v9473_v12  ;;  %13668 = vst [vmem:[#allocation11_spill] sm:$0xff] %v9481_v17  ;;  %v9486_v37 = vmul.f32 %v9481_v17, %v9447_v48  ;;  %v9488_v41 = vpop.f32.mrb[19].mxu1 }
 0x12d   : > { %v8800_v13 = vpop.eup %8799  ;;  %8805 = vrcp.f32 %v501_v6  ;;  %13667 = vst [vmem:[#allocation10_spill] sm:$0xff] %v9479_v16  ;;  %13670 = vst [vmem:[#allocation13_spill] sm:$0xff] %v9488_v41  ;;  %v9492_v44 = vmul.f32 %v9488_v41, %v9453_v54 }
 0x12e   : > { %v506_v18 = vmul.f32 %v8800_v13, %v9413_v3  ;;  %13669 = vst [vmem:[#allocation12_spill] sm:$0xff] %v9486_v37 }
 0x12f   : > { %v8802_v43 = vpop.eup %8801  ;;  %13671 = vst [vmem:[#allocation14_spill] sm:$0xff] %v9492_v44 }
 0x130   : > { %v514_v50 = vmul.f32 %v506_v18, %v9367_v42  ;;  %v526_v51 = vmul.f32 %v506_v18, %v9373_v45  ;;  %v538_v53 = vmul.f32 %v506_v18, %v9351_v35  ;;  %v507_v56 = vmul.f32 %v8802_v43, %v9417_v9 }
 0x131   : > { %v9500_v59 = vpop.f32.mrb[20].mxu0  ;;  %v9516_v43 = vpop.f32.mrb[20].mxu1 }
 0x132   : > { %v518_v60 = vsub.f32 %v9323_v21, %v514_v50  ;;  %v530_v61 = vsub.f32 %v9325_v22, %v526_v51  ;;  %v542_v1 = vsub.f32 %v9331_v25, %v538_v53  ;;  %v515_v42 = vmul.f32 %v507_v56, %v9381_v49  ;;  %v9506_v4 = vpop.f32.mrb[21].mxu0  ;;  %13672 = vst [vmem:[#allocation15_spill] sm:$0xff] %v9516_v43  ;;  %v9536_v53 = vpop.f32.mrb[21].mxu1 }
 0x133   : > { %v527_v35 = vmul.f32 %v507_v56, %v9393_v55  ;;  %v539_v45 = vmul.f32 %v507_v56, %v9363_v40  ;;  %v710_v6 = vmul.f32 %v9375_v46, %v9500_v59  ;;  %v714_v13 = vmul.f32 %v9387_v52, %v9506_v4  ;;  %v9514_v18 = vpop.f32.mrb[22].mxu0  ;;  %13673 = vst [vmem:[#allocation16_spill] sm:$0xff] %v9536_v53 }
 0x134   : > { %v9521_v49 = vsel %vm510_vm1, %v9323_v21, %v518_v60  ;;  %v9526_v55 = vsel %vm510_vm1, %v9325_v22, %v530_v61  ;;  %v9531_v40 = vsel %vm510_vm1, %v9331_v25, %v542_v1  ;;  %v519_v50 = vsub.f32 %v9329_v26, %v515_v42  ;;  %v9534_v51 = vpop.f32.mrb[23].mxu0  ;;  %v9544_v61 = vpop.f32.mrb[22].mxu1 }
 0x135   : > { %v531_v56 = vsub.f32 %v9333_v27, %v527_v35  ;;  %v543_v21 = vsub.f32 %v9337_v29, %v539_v45  ;;  %v9540_v60 = vadd.f32 %v714_v13, %v710_v6  ;;  %v711_v22 = vmul.f32 %v9399_v58, %v9514_v18  ;;  %13674 = vst [vmem:[#allocation17_spill] sm:$0xff] %v9544_v61  ;;  %v9553_v42 = vpop.f32.mrb[23].mxu1 }
 0x136   : > { %v8804_v3 = vpop.eup %8803  ;;  %v9549_v25 = vsel %vm511_vm2, %v9329_v26, %v519_v50  ;;  %v715_v1 = vmul.f32 %v9405_v63, %v9534_v51  ;;  %13676 = vst [vmem:[#allocation19_spill] sm:$0xff] %v9553_v42 }
 0x137   : > { %13675 = vst [vmem:[#allocation18_spill] sm:$0xff] %v9549_v25  ;;  %v8806_v35 = vpop.eup %8805  ;;  %v9558_v45 = vsel %vm511_vm2, %v9333_v27, %v531_v56  ;;  %v9563_v6 = vsel %vm511_vm2, %v9337_v29, %v543_v21  ;;  %v508_v13 = vmul.f32 %v8804_v3, %v9456_v57 }
 0x138   : > { %13677 = vst [vmem:[#allocation20_spill] sm:$0xff] %v9558_v45  ;;  %13678 = vst [vmem:[#allocation21_spill] sm:$0xff] %v9563_v6  ;;  %v509_v26 = vmul.f32 %v8806_v35, %v9459_v62  ;;  %v9568_v50 = vadd.f32 %v715_v1, %v711_v22 }
 0x139   : > { %v516_v24 = vmul.f32 %v508_v13, %v9419_v11  ;;  %v528_v48 = vmul.f32 %v508_v13, %v9425_v14  ;;  %v540_v27 = vmul.f32 %v9343_v32, %v508_v13  ;;  %v9574_v56 = vpop.f32.mrb[24].mxu0 }
 0x13a   : > { %v517_v29 = vmul.f32 %v509_v26, %v9433_v19  ;;  %v529_v9 = vmul.f32 %v509_v26, %v9445_v47  ;;  %v541_v21 = vmul.f32 %v9357_v38, %v509_v26  ;;  %v708_v22 = vmul.f32 %v9574_v56, %v9461_v2  ;;  %v9581_v3 = vpop.f32.mrb[25].mxu0  ;;  %v9590_v19 = vpop.f32.mrb[24].mxu1 }
 0x13b   : > { %v520_v11 = vsub.f32 %v9339_v30, %v516_v24  ;;  %v532_v14 = vsub.f32 %v9341_v31, %v528_v48  ;;  %v544_v32 = vsub.f32 %v9327_v23, %v540_v27  ;;  %v728_v1 = vmul.f32 %v9574_v56, %v9574_v56  ;;  %v9588_v35 = vpop.f32.mrb[26].mxu0  ;;  %13679 = vst [vmem:[#allocation22_spill] sm:$0xff] %v9590_v19  ;;  %v9599_v48 = vpop.f32.mrb[25].mxu1 }
 0x13c   : > { %v521_v38 = vsub.f32 %v9345_v33, %v517_v29  ;;  %v533_v47 = vsub.f32 %v9353_v36, %v529_v9  ;;  %v545_v13 = vsub.f32 %v9335_v28, %v541_v21  ;;  %v712_v24 = vmul.f32 %v9581_v3, %v9463_v5  ;;  %v9597_v26 = vpop.f32.mrb[27].mxu0  ;;  %13680 = vst [vmem:[#allocation23_spill] sm:$0xff] %v9599_v48  ;;  %v9612_v21 = vpop.f32.mrb[26].mxu1 }
 0x13d   : > { %v9604_v27 = vsel %vm512_vm3, %v9341_v31, %v532_v14  ;;  %v732_v15 = vmul.f32 %v9581_v3, %v9581_v3  ;;  %v709_v29 = vmul.f32 %v9588_v35, %v9465_v8  ;;  %v729_v9 = vmul.f32 %v9588_v35, %v9588_v35  ;;  %13681 = vst [vmem:[#allocation24_spill] sm:$0xff] %v9612_v21  ;;  %v9623_v37 = vpop.f32.mrb[27].mxu1 }
 0x13e   : > { %v9617_v54 = vsel %vm513_vm4, %v9353_v36, %v533_v47  ;;  %v716_v20 = vadd.f32 %v712_v24, %v708_v22  ;;  %v713_v31 = vmul.f32 %v9597_v26, %v9469_v34  ;;  %v733_v14 = vmul.f32 %v9597_v26, %v9597_v26  ;;  %13682 = vst [vmem:[#allocation25_spill] sm:$0xff] %v9623_v37 }
 0x13f   : > { %v736_v17 = vadd.f32 %v732_v15, %v728_v1  ;;  %v9628_v12 = vsel %vm512_vm3, %v9339_v30, %v520_v11  ;;  %v9633_v36 = vsel %vm512_vm3, %v9327_v23, %v544_v32  ;;  %v9638_v22 = vsel %vm513_vm4, %v9345_v33, %v521_v38 }
 0x140   : > { %v717_v47 = vadd.f32 %v713_v31, %v709_v29  ;;  %v737_v24 = vadd.f32 %v733_v14, %v729_v9  ;;  %v9643_v15 = vsel %vm513_vm4, %v9335_v28, %v545_v13 }
 0x141   : > { %13683 = vst [vmem:[#allocation26_spill] sm:$0xff] %v9643_v15  ;;  %v9645_v1 = vpop.f32.mrb[28].mxu0  ;;  %v9651_v23 = vpop.f32.mrb[28].mxu1 }
 0x142   : > { %v9647_v30 = vpop.f32.mrb[29].mxu0  ;;  %13684 = vst [vmem:[#allocation27_spill] sm:$0xff] %v9651_v23  ;;  %v1232_v33 = vmul.f32 %v9651_v23, %v9516_v43  ;;  %v1252_v32 = vmul.f32 %v9651_v23, %v9651_v23  ;;  %v9659_v38 = vpop.f32.mrb[29].mxu1 }
 0x143   : > { %v9649_v11 = vpop.f32.mrb[30].mxu0  ;;  %13685 = vst [vmem:[#allocation28_spill] sm:$0xff] %v9659_v38  ;;  %v1236_v28 = vmul.f32 %v9659_v38, %v9536_v53  ;;  %v1256_v62 = vmul.f32 %v9659_v38, %v9659_v38  ;;  %v9665_v13 = vpop.f32.mrb[30].mxu1 }
 0x144   : > { %v9653_v57 = vpop.f32.mrb[31].mxu0  ;;  %13686 = vst [vmem:[#allocation29_spill] sm:$0xff] %v9665_v13  ;;  %v1233_v29 = vmul.f32 %v9665_v13, %v9544_v61  ;;  %v1253_v9 = vmul.f32 %v9665_v13, %v9665_v13  ;;  %v9671_v31 = vpop.f32.mrb[31].mxu1 }
 0x145   : > { %13687 = vst [vmem:[#allocation30_spill] sm:$0xff] %v9671_v31  ;;  %v9673_v14 = vadd.f32 %v1236_v28, %v1232_v33  ;;  %v9675_v43 = vadd.f32 %v1256_v62, %v1252_v32  ;;  %v1237_v53 = vmul.f32 %v9671_v31, %v9553_v42  ;;  %v1257_v38 = vmul.f32 %v9671_v31, %v9671_v31 }
 0x147   : > { %13688 = vst [vmem:[#allocation31_spill] sm:$0xff] %v9673_v14  ;;  %13689 = vst [vmem:[#allocation32_spill] sm:$0xff] %v9675_v43  ;;  %v9683_v44 = vadd.f32 %v1237_v53, %v1233_v29  ;;  %v9685_v61 = vadd.f32 %v1257_v38, %v1253_v9 }
 0x149   : > { %v9681_v23 = vpop.f32.mrb[32].mxu0  ;;  %13690 = vst [vmem:[#allocation33_spill] sm:$0xff] %v9683_v44  ;;  %13691 = vst [vmem:[#allocation34_spill] sm:$0xff] %v9685_v61  ;;  %v9699_v53 = vpop.f32.mrb[32].mxu1 }
 0x14a   : > { %v722_v13 = vmul.f32 %v9681_v23, %v9645_v1  ;;  %v742_v33 = vmul.f32 %v9681_v23, %v9681_v23  ;;  %v9691_v32 = vpop.f32.mrb[33].mxu0  ;;  %13692 = vst [vmem:[#allocation35_spill] sm:$0xff] %v9699_v53  ;;  %v9711_v44 = vpop.f32.mrb[33].mxu1 }
 0x14b   : > { %v720_v28 = vmul.f32 %v9691_v32, %v9647_v30  ;;  %v740_v62 = vmul.f32 %v9691_v32, %v9691_v32  ;;  %v9697_v42 = vpop.f32.mrb[34].mxu0  ;;  %13693 = vst [vmem:[#allocation36_spill] sm:$0xff] %v9711_v44 }
 0x14c   : > { %v9702_v38 = vadd.f32 %v722_v13, %v9540_v60  ;;  %v746_v29 = vadd.f32 %v742_v33, %v9407_v0  ;;  %v723_v9 = vmul.f32 %v9697_v42, %v9649_v11  ;;  %v743_v31 = vmul.f32 %v9697_v42, %v9697_v42  ;;  %v9709_v61 = vpop.f32.mrb[35].mxu0  ;;  %v9719_v0 = vpop.f32.mrb[34].mxu1 }
 0x14d   : > { %v9713_v43 = vadd.f32 %v720_v28, %v716_v20  ;;  %v744_v14 = vadd.f32 %v740_v62, %v736_v17  ;;  %v721_v10 = vmul.f32 %v9709_v61, %v9653_v57  ;;  %v741_v60 = vmul.f32 %v9709_v61, %v9709_v61  ;;  %13694 = vst [vmem:[#allocation37_spill] sm:$0xff] %v9719_v0  ;;  %v9725_v6 = vpop.f32.mrb[35].mxu1 }
 0x14e   : > { %v750_v13 = vadd.f32 1e-06, %v746_v29  ;;  %v9722_v33 = vadd.f32 %v723_v9, %v9568_v50  ;;  %v747_v16 = vadd.f32 %v743_v31, %v9415_v7  ;;  %13695 = vst [vmem:[#allocation38_spill] sm:$0xff] %v9725_v6  ;;  %v1234_v62 = vmul.f32 %v9699_v53, %v9590_v19 }
 0x14f   : > { %v748_v45 = vadd.f32 1e-06, %v744_v14  ;;  %v9727_v20 = vadd.f32 %v721_v10, %v717_v47  ;;  %v745_v17 = vadd.f32 %v741_v60, %v737_v24  ;;  %v1254_v50 = vmul.f32 %v9699_v53, %v9699_v53 }
 0x150   : > { %8807 = vrcp.f32 %v750_v13  ;;  %v751_v28 = vadd.f32 1e-06, %v747_v16  ;;  %v1238_v10 = vmul.f32 %v9711_v44, %v9599_v48  ;;  %v1258_v47 = vmul.f32 %v9711_v44, %v9711_v44 }
 0x151   : > { %8809 = vrcp.f32 %v748_v45  ;;  %v749_v25 = vadd.f32 1e-06, %v745_v17  ;;  %v9731_v15 = vpop.f32.mrb[36].mxu0  ;;  %v1235_v16 = vmul.f32 %v9719_v0, %v9612_v21  ;;  %v1255_v24 = vmul.f32 %v9719_v0, %v9719_v0  ;;  %v9751_v29 = vpop.f32.mrb[36].mxu1 }
 0x152   : > { %8811 = vrcp.f32 %v751_v28  ;;  %v9735_v7 = vpop.f32.mrb[37].mxu0  ;;  %v1239_v31 = vmul.f32 %v9725_v6, %v9623_v37  ;;  %v1259_v14 = vmul.f32 %v9725_v6, %v9725_v6  ;;  %13696 = vst [vmem:[#allocation39_spill] sm:$0xff] %v9751_v29  ;;  %v9755_v60 = vadd.f32 %v1238_v10, %v1234_v62 }
 0x153   : > { %8813 = vrcp.f32 %v749_v25  ;;  %v9743_v45 = vpop.f32.mrb[38].mxu0  ;;  %v9757_v13 = vadd.f32 %v1258_v47, %v1254_v50  ;;  %v9759_v25 = vpop.f32.mrb[37].mxu1  ;;  %vm762_vm5 = vcmp.ge.f32.partialorder %v9702_v38, 0.0  ;;  %v9777_v50 = vmul.f32 %v9475_v39, %v9475_v39 }
 0x154   : > { %v9753_v9 = vpop.f32.mrb[39].mxu0  ;;  %13697 = vst [vmem:[#allocation40_spill] sm:$0xff] %v9755_v60  ;;  %13699 = vst [vmem:[#allocation42_spill] sm:$0xff] %v9759_v25  ;;  %v9761_v17 = vadd.f32 %v1239_v31, %v1235_v16  ;;  %v9763_v28 = vadd.f32 %v1259_v14, %v1255_v24  ;;  %v9765_v21 = vpop.f32.mrb[38].mxu1  ;;  %v9781_v10 = vmul.f32 %v9488_v41, %v9488_v41  ;;  %vm760_vm6 = vcmp.ge.f32.partialorder %v9713_v43, 0.0 }
 0x155   : > { %13698 = vst [vmem:[#allocation41_spill] sm:$0xff] %v9757_v13  ;;  %13702 = vst [vmem:[#allocation45_spill] sm:$0xff] %v9765_v21  ;;  %v9767_v37 = vpop.f32.mrb[39].mxu1  ;;  %vm763_vm7 = vcmp.ge.f32.partialorder %v9722_v33, 0.0  ;;  %vm761_vm8 = vcmp.ge.f32.partialorder %v9727_v20, 0.0 }
 0x156   : > { %13700 = vst [vmem:[#allocation43_spill] sm:$0xff] %v9761_v17  ;;  %13701 = vst [vmem:[#allocation44_spill] sm:$0xff] %v9763_v28 }
 0x157   : > { %13703 = vst [vmem:[#allocation46_spill] sm:$0xff] %v9767_v37 }
 0x159   : > { %v9769_v0 = vpop.f32.mrb[40].mxu0  ;;  %v9785_v16 = vpop.f32.mrb[40].mxu1 }
 0x15a   : > { %v8808_v6 = vpop.eup %8807  ;;  %v9771_v48 = vpop.f32.mrb[41].mxu0  ;;  %13704 = vst [vmem:[#allocation47_spill] sm:$0xff] %v9785_v16  ;;  %v9794_v14 = vmul.f32 %v9785_v16, %v9751_v29 }
 0x15b   : > { %v8810_v19 = vpop.eup %8809  ;;  %v758_v62 = vmul.f32 %v8808_v6, %v9702_v38  ;;  %v9783_v47 = vpop.f32.mrb[42].mxu0 }
 0x15c   : > { %v8812_v24 = vpop.eup %8811  ;;  %v756_v31 = vmul.f32 %v8810_v19, %v9713_v43  ;;  %v9790_v6 = vpop.f32.mrb[43].mxu0  ;;  %13705 = vst [vmem:[#allocation48_spill] sm:$0xff] %v9794_v14 }
 0x15d   : > { %v9796_v44 = vpop.f32.mrb[41].mxu1  ;;  %v8814_v53 = vpop.eup %8813  ;;  %v766_v28 = vmul.f32 %v758_v62, %v9375_v46  ;;  %v778_v17 = vmul.f32 %v758_v62, %v9387_v52  ;;  %v790_v41 = vmul.f32 %v9681_v23, %v758_v62  ;;  %v759_v19 = vmul.f32 %v8812_v24, %v9722_v33 }
 0x15e   : > { %v9802_v39 = vpop.f32.mrb[42].mxu1  ;;  %v764_v13 = vmul.f32 %v756_v31, %v9574_v56  ;;  %v776_v60 = vmul.f32 %v756_v31, %v9581_v3  ;;  %v788_v29 = vmul.f32 %v756_v31, %v9691_v32  ;;  %v757_v14 = vmul.f32 %v8814_v53, %v9727_v20 }
 0x15f   : > { %13706 = vst [vmem:[#allocation49_spill] sm:$0xff] %v9802_v39  ;;  %v9808_v16 = vpop.f32.mrb[43].mxu1  ;;  %v770_v46 = vsub.f32 %v9500_v59, %v766_v28  ;;  %v782_v52 = vsub.f32 %v9506_v4, %v778_v17  ;;  %v794_v23 = vsub.f32 %v9645_v1, %v790_v41  ;;  %v767_v62 = vmul.f32 %v759_v19, %v9399_v58 }
 0x160   : > { %13707 = vst [vmem:[#allocation50_spill] sm:$0xff] %v9808_v16  ;;  %v768_v24 = vsub.f32 %v9461_v2, %v764_v13  ;;  %v780_v56 = vsub.f32 %v9463_v5, %v776_v60  ;;  %v792_v3 = vsub.f32 %v9647_v30, %v788_v29  ;;  %v779_v32 = vmul.f32 %v759_v19, %v9405_v63 }
 0x161   : > { %v774_v53 = vsel %vm762_vm5, %v9500_v59, %v770_v46  ;;  %v786_v41 = vsel %vm762_vm5, %v9506_v4, %v782_v52  ;;  %v798_v58 = vsel %vm762_vm5, %v9645_v1, %v794_v23  ;;  %v771_v60 = vsub.f32 %v9514_v18, %v767_v62  ;;  %v9829_v13 = vpop.f32.mrb[44].mxu0 }
 0x162   : > { %v9832_v63 = vadd.f32 %v774_v53, %v9628_v12  ;;  %v9835_v29 = vadd.f32 %v786_v41, %v9604_v27  ;;  %v9838_v59 = vadd.f32 %v798_v58, %v9633_v36  ;;  %v772_v4 = vsel %vm760_vm6, %v9461_v2, %v768_v24  ;;  %v9843_v17 = vpop.f32.mrb[45].mxu0  ;;  %v9859_v2 = vpop.f32.mrb[44].mxu1  ;;  %v13713_v58 = vld [vmem:[#allocation18_spill] sm:$0xff] }
 0x163   : > { %v784_v1 = vsel %vm760_vm6, %v9463_v5, %v780_v56  ;;  %v796_v12 = vsel %vm760_vm6, %v9647_v30, %v792_v3  ;;  %v9852_v27 = vadd.f32 %v772_v4, %v9521_v49  ;;  %v775_v36 = vsel %vm763_vm7, %v9514_v18, %v771_v60  ;;  %v9857_v38 = vpop.f32.mrb[46].mxu0  ;;  %13708 = vst [vmem:[#allocation51_spill] sm:$0xff] %v9859_v2  ;;  %v9871_v31 = vpop.f32.mrb[45].mxu1  ;;  %v13712_v3 = vld [vmem:[#allocation26_spill] sm:$0xff]  ;;  %v13714_v4 = vld [vmem:[#allocation20_spill] sm:$0xff] }
 0x164   : > { %v9862_v28 = vadd.f32 %v784_v1, %v9526_v55  ;;  %v9865_v5 = vadd.f32 %v796_v12, %v9531_v40  ;;  %v783_v43 = vsub.f32 %v9534_v51, %v779_v32  ;;  %v791_v30 = vmul.f32 %v9697_v42, %v759_v19  ;;  %v9869_v49 = vpop.f32.mrb[47].mxu0  ;;  %13709 = vst [vmem:[#allocation52_spill] sm:$0xff] %v9871_v31  ;;  %v9879_v23 = vpop.f32.mrb[46].mxu1  ;;  %v13715_v12 = vld [vmem:[#allocation21_spill] sm:$0xff] }
 0x165   : > { %v9874_v18 = vadd.f32 %v775_v36, %v9638_v22  ;;  %v765_v46 = vmul.f32 %v757_v14, %v9588_v35  ;;  %v777_v52 = vmul.f32 %v757_v14, %v9597_v26  ;;  %v789_v55 = vmul.f32 %v757_v14, %v9709_v61  ;;  %13710 = vst [vmem:[#allocation53_spill] sm:$0xff] %v9879_v23  ;;  %v9889_v62 = vpop.f32.mrb[47].mxu1 }
 0x166   : > { %v787_v40 = vsel %vm763_vm7, %v9534_v51, %v783_v43  ;;  %v795_v42 = vsub.f32 %v9649_v11, %v791_v30  ;;  %v970_v19 = vmul.f32 %v9829_v13, %v9731_v15  ;;  %v990_v22 = vmul.f32 %v9829_v13, %v9829_v13  ;;  %13711 = vst [vmem:[#allocation54_spill] sm:$0xff] %v9889_v62 }
 0x167   : > { %v9892_v35 = vadd.f32 %v787_v40, %v9617_v54  ;;  %v769_v61 = vsub.f32 %v9465_v8, %v765_v46  ;;  %v781_v26 = vsub.f32 %v9469_v34, %v777_v52  ;;  %v793_v14 = vsub.f32 %v9653_v57, %v789_v55  ;;  %v13717_v55 = vld [vmem:[#allocation10_spill] sm:$0xff] }
 0x168   : > { %v799_v51 = vsel %vm763_vm7, %v9649_v11, %v795_v42  ;;  %v974_v24 = vmul.f32 %v9843_v17, %v9735_v7  ;;  %v994_v56 = vmul.f32 %v9843_v17, %v9843_v17  ;;  %v971_v54 = vmul.f32 %v9857_v38, %v9743_v45 }
 0x169   : > { %v9907_v32 = vadd.f32 %v799_v51, %v13712_v3  ;;  %v773_v53 = vsel %vm761_vm8, %v9465_v8, %v769_v61  ;;  %v785_v11 = vsel %vm761_vm8, %v9469_v34, %v781_v26  ;;  %v797_v33 = vsel %vm761_vm8, %v9653_v57, %v793_v14  ;;  %v9918_v41 = vpop.f32.mrb[48].mxu0  ;;  %v9939_v52 = vpop.f32.mrb[48].mxu1 }
 0x16a   : > { %v9921_v60 = vadd.f32 %v773_v53, %v13713_v58  ;;  %v9924_v1 = vadd.f32 %v785_v11, %v13714_v4  ;;  %v9927_v36 = vadd.f32 %v797_v33, %v13715_v12  ;;  %v978_v8 = vadd.f32 %v974_v24, %v970_v19  ;;  %v9929_v43 = vpop.f32.mrb[49].mxu0  ;;  %13716 = vst [vmem:[#allocation26_spill] sm:$0xff] %v9939_v52  ;;  %v9952_v26 = vpop.f32.mrb[49].mxu1  ;;  %v13720_v53 = vld [vmem:[#allocation7_spill] sm:$0xff] }
 0x16b   : > { %v998_v30 = vadd.f32 %v994_v56, %v990_v22  ;;  %v991_v34 = vmul.f32 %v9857_v38, %v9857_v38  ;;  %v975_v57 = vmul.f32 %v9869_v49, %v9753_v9  ;;  %v995_v20 = vmul.f32 %v9869_v49, %v9869_v49  ;;  %v9937_v46 = vpop.f32.mrb[50].mxu0  ;;  %13718 = vst [vmem:[#allocation18_spill] sm:$0xff] %v9952_v26  ;;  %v9957_v3 = vpop.f32.mrb[50].mxu1 }
 0x16c   : > { %v9942_v40 = vadd.f32 %v13717_v55, %v978_v8  ;;  %v972_v42 = vmul.f32 %v9918_v41, %v9769_v0  ;;  %v992_v19 = vmul.f32 %v9918_v41, %v9918_v41  ;;  %v976_v22 = vmul.f32 %v9929_v43, %v9771_v48  ;;  %v9950_v61 = vpop.f32.mrb[51].mxu0  ;;  %13719 = vst [vmem:[#allocation20_spill] sm:$0xff] %v9957_v3  ;;  %v9965_v12 = vpop.f32.mrb[51].mxu1 }
 0x16d   : > { %v1006_v14 = vadd.f32 %v9777_v50, %v998_v30  ;;  %v979_v51 = vadd.f32 %v975_v57, %v971_v54  ;;  %v999_v24 = vadd.f32 %v995_v20, %v991_v34  ;;  %v996_v56 = vmul.f32 %v9929_v43, %v9929_v43  ;;  %13721 = vst [vmem:[#allocation21_spill] sm:$0xff] %v9965_v12  ;;  %v13722_v54 = vld [vmem:[#allocation14_spill] sm:$0xff]  ;;  %v13723_v57 = vld [vmem:[#allocation8_spill] sm:$0xff] }
 0x16e   : > { %v1004_v11 = vmul.f32 %v13720_v53, %v13720_v53  ;;  %v980_v33 = vadd.f32 %v976_v22, %v972_v42  ;;  %v973_v58 = vmul.f32 %v9937_v46, %v9783_v47  ;;  %v993_v4 = vmul.f32 %v9937_v46, %v9937_v46 }
 0x16f   : > { %v1010_v50 = vadd.f32 1e-06, %v1006_v14  ;;  %v9968_v8 = vadd.f32 %v13722_v54, %v979_v51  ;;  %v1007_v30 = vadd.f32 %v9781_v10, %v999_v24  ;;  %v1000_v34 = vadd.f32 %v996_v56, %v992_v19  ;;  %v13725_v10 = vld [vmem:[#allocation11_spill] sm:$0xff] }
 0x170   : > { %v9972_v20 = vadd.f32 %v13723_v57, %v980_v33  ;;  %v977_v55 = vmul.f32 %v9950_v61, %v9790_v6  ;;  %v997_v42 = vmul.f32 %v9950_v61, %v9950_v61  ;;  %v9980_v22 = vmul.f32 %v9796_v44, %v9759_v25 }
 0x171   : > { %8815 = vrcp.f32 %v1010_v50  ;;  %v1011_v14 = vadd.f32 1e-06, %v1007_v30  ;;  %v1008_v51 = vadd.f32 %v1004_v11, %v1000_v34  ;;  %v9982_v54 = vpop.f32.mrb[52].mxu0  ;;  %v1005_v19 = vmul.f32 %v13725_v10, %v13725_v10  ;;  %v9994_v50 = vpop.f32.mrb[52].mxu1  ;;  %v13730_v11 = vld [vmem:[#allocation12_spill] sm:$0xff] }
 0x172   : > { %13724 = vst [vmem:[#allocation10_spill] sm:$0xff] %v9980_v22  ;;  %v981_v24 = vadd.f32 %v977_v55, %v973_v58  ;;  %v1001_v56 = vadd.f32 %v997_v42, %v993_v4  ;;  %v9986_v33 = vpop.f32.mrb[53].mxu0  ;;  %v9992_v25 = vmul.f32 %v9802_v39, %v9765_v21  ;;  %13729 = vst [vmem:[#allocation11_spill] sm:$0xff] %v9994_v50  ;;  %v10005_v4 = vpop.f32.mrb[53].mxu1  ;;  %vm1022_vm9 = vcmp.ge.f32.partialorder %v9942_v40, 0.0 }
 0x173   : > { %13726 = vst [vmem:[#allocation7_spill] sm:$0xff] %v9986_v33  ;;  %8817 = vrcp.f32 %v1011_v14  ;;  %v1012_v57 = vadd.f32 1e-06, %v1008_v51  ;;  %v9988_v12 = vpop.f32.mrb[54].mxu0  ;;  %v10003_v58 = vmul.f32 %v9808_v16, %v9767_v37  ;;  %13733 = vst [vmem:[#allocation56_spill] sm:$0xff] %v10005_v4  ;;  %v1756_v55 = vmul.f32 %v9994_v50, %v9859_v2  ;;  %v10013_v51 = vpop.f32.mrb[54].mxu1 }
 0x174   : > { %13727 = vst [vmem:[#allocation14_spill] sm:$0xff] %v9988_v12  ;;  %13728 = vst [vmem:[#allocation8_spill] sm:$0xff] %v9992_v25  ;;  %v9997_v30 = vadd.f32 %v13730_v11, %v981_v24  ;;  %v1009_v34 = vadd.f32 %v1005_v19, %v1001_v56  ;;  %v9999_v22 = vpop.f32.mrb[55].mxu0  ;;  %v1776_v42 = vmul.f32 %v9994_v50, %v9994_v50  ;;  %v10019_v11 = vpop.f32.mrb[55].mxu1  ;;  %vm1023_vm10 = vcmp.ge.f32.partialorder %v9968_v8, 0.0 }
 0x175   : > { %13731 = vst [vmem:[#allocation12_spill] sm:$0xff] %v9999_v22  ;;  %13732 = vst [vmem:[#allocation55_spill] sm:$0xff] %v10003_v58  ;;  %8819 = vrcp.f32 %v1012_v57  ;;  %v1760_v14 = vmul.f32 %v10005_v4, %v9871_v31  ;;  %v1780_v24 = vmul.f32 %v10005_v4, %v10005_v4  ;;  %v1757_v56 = vmul.f32 %v10013_v51, %v9879_v23 }
 0x176   : > { %13734 = vst [vmem:[#allocation57_spill] sm:$0xff] %v10013_v51  ;;  %v1013_v19 = vadd.f32 1e-06, %v1009_v34  ;;  %13735 = vst [vmem:[#allocation58_spill] sm:$0xff] %v10019_v11  ;;  %v1777_v2 = vmul.f32 %v10013_v51, %v10013_v51  ;;  %v1761_v50 = vmul.f32 %v10019_v11, %v9889_v62  ;;  %v1781_v31 = vmul.f32 %v10019_v11, %v10019_v11  ;;  %v13744_v11 = vld [vmem:[#allocation40_spill] sm:$0xff] }
 0x177   : > { %v10021_v57 = vadd.f32 %v1760_v14, %v1756_v55  ;;  %v10029_v34 = vadd.f32 %v1780_v24, %v1776_v42  ;;  %vm1024_vm11 = vcmp.ge.f32.partialorder %v9972_v20, 0.0  ;;  %vm1025_vm12 = vcmp.ge.f32.partialorder %v9997_v30, 0.0 }
 0x178   : > { %8821 = vrcp.f32 %v1013_v19  ;;  %v10033_v21 = vadd.f32 %v1761_v50, %v1757_v56  ;;  %v10035_v23 = vadd.f32 %v1781_v31, %v1777_v2  ;;  %v13741_v2 = vld [vmem:[#allocation47_spill] sm:$0xff] }
 0x179   : > { %13736 = vst [vmem:[#allocation59_spill] sm:$0xff] %v10021_v57  ;;  %13737 = vst [vmem:[#allocation60_spill] sm:$0xff] %v10029_v34  ;;  %v10031_v4 = vpop.f32.mrb[56].mxu0  ;;  %v10052_v31 = vmul.f32 %v13741_v2, %v13741_v2  ;;  %v10054_v24 = vpop.f32.mrb[56].mxu1  ;;  %v13747_v2 = vld [vmem:[#allocation31_spill] sm:$0xff] }
 0x17a   : > { %13738 = vst [vmem:[#allocation61_spill] sm:$0xff] %v10033_v21  ;;  %13739 = vst [vmem:[#allocation62_spill] sm:$0xff] %v10035_v23  ;;  %v1246_v55 = vmul.f32 %v10031_v4, %v9982_v54  ;;  %v1266_v14 = vmul.f32 %v10031_v4, %v10031_v4  ;;  %v10041_v51 = vpop.f32.mrb[57].mxu0  ;;  %v13745_v21 = vld [vmem:[#allocation41_spill] sm:$0xff]  ;;  %v10067_v25 = vpop.f32.mrb[57].mxu1 }
 0x17b   : > { %13740 = vst [vmem:[#allocation63_spill] sm:$0xff] %v10041_v51  ;;  %v8816_v62 = vpop.eup %8815  ;;  %v1244_v42 = vmul.f32 %v10041_v51, %v9986_v33  ;;  %v1264_v50 = vmul.f32 %v10041_v51, %v10041_v51  ;;  %v10048_v19 = vpop.f32.mrb[58].mxu0  ;;  %13742 = vst [vmem:[#allocation64_spill] sm:$0xff] %v10052_v31 }
 0x17c   : > { %13743 = vst [vmem:[#allocation65_spill] sm:$0xff] %v10054_v24  ;;  %v1018_v56 = vmul.f32 %v8816_v62, %v9942_v40  ;;  %v10058_v23 = vadd.f32 %v1246_v55, %v13744_v11  ;;  %v1270_v34 = vadd.f32 %v1266_v14, %v13745_v21  ;;  %v10063_v57 = vmul.f32 %v10048_v19, %v9988_v12  ;;  %v10065_v37 = vpop.f32.mrb[59].mxu0  ;;  %v13749_v62 = vld [vmem:[#allocation32_spill] sm:$0xff]  ;;  %v10078_v21 = vpop.f32.mrb[58].mxu1  ;;  %v13751_v12 = vld [vmem:[#allocation9_spill] sm:$0xff] }
 0x17d   : > { %13746 = vst [vmem:[#allocation40_spill] sm:$0xff] %v10067_v25  ;;  %v8818_v39 = vpop.eup %8817  ;;  %v10071_v31 = vadd.f32 %v1244_v42, %v13747_v2  ;;  %v1268_v58 = vadd.f32 %v1264_v50, %v13749_v62  ;;  %v10076_v11 = vmul.f32 %v10065_v37, %v9999_v22  ;;  %13750 = vst [vmem:[#allocation31_spill] sm:$0xff] %v10078_v21  ;;  %v10084_v3 = vpop.f32.mrb[59].mxu1 }
 0x17e   : > { %v1026_v55 = vmul.f32 %v1018_v56, %v9829_v13  ;;  %v1038_v14 = vmul.f32 %v1018_v56, %v9843_v17  ;;  %v1050_v33 = vmul.f32 %v1018_v56, %v13751_v12  ;;  %v1019_v51 = vmul.f32 %v8818_v39, %v9968_v8  ;;  %13752 = vst [vmem:[#allocation32_spill] sm:$0xff] %v10084_v3  ;;  %v13754_v56 = vld [vmem:[#allocation13_spill] sm:$0xff] }
 0x17f   : > { %13748 = vst [vmem:[#allocation41_spill] sm:$0xff] %v10071_v31  ;;  %v8820_v42 = vpop.eup %8819  ;;  %v1274_v50 = vadd.f32 1e-06, %v1270_v34  ;;  %v1272_v2 = vadd.f32 1e-06, %v1268_v58  ;;  %v1267_v62 = vmul.f32 %v10048_v19, %v10048_v19  ;;  %v13753_v31 = vld [vmem:[#allocation4_spill] sm:$0xff] }
 0x180   : > { %v1030_v22 = vsub.f32 %v9731_v15, %v1026_v55  ;;  %v1042_v13 = vsub.f32 %v9735_v7, %v1038_v14  ;;  %v1054_v17 = vsub.f32 %v13753_v31, %v1050_v33  ;;  %v1027_v12 = vmul.f32 %v1019_v51, %v9857_v38 }
 0x181   : > { %v1039_v39 = vmul.f32 %v1019_v51, %v9869_v49  ;;  %v1051_v3 = vmul.f32 %v1019_v51, %v13754_v56  ;;  %v1020_v21 = vmul.f32 %v8820_v42, %v9972_v20  ;;  %8823 = vrcp.f32 %v1274_v50  ;;  %v10097_v58 = vpop.f32.mrb[60].mxu0  ;;  %v13755_v50 = vld [vmem:[#allocation6_spill] sm:$0xff]  ;;  %v13764_v20 = vld [vmem:[#allocation43_spill] sm:$0xff] }
 0x182   : > { %v8822_v34 = vpop.eup %8821  ;;  %v1034_v55 = vsel %vm1022_vm9, %v9731_v15, %v1030_v22  ;;  %v1046_v38 = vsel %vm1022_vm9, %v9735_v7, %v1042_v13  ;;  %v1058_v49 = vsel %vm1022_vm9, %v13753_v31, %v1054_v17  ;;  %v1031_v33 = vsub.f32 %v9743_v45, %v1027_v12  ;;  %v10109_v51 = vpop.f32.mrb[61].mxu0 }
 0x183   : > { %v10112_v14 = vadd.f32 %v1046_v38, %v9862_v28  ;;  %v1043_v42 = vsub.f32 %v9753_v9, %v1039_v39  ;;  %v1055_v56 = vsub.f32 %v13755_v50, %v1051_v3  ;;  %v1028_v15 = vmul.f32 %v1020_v21, %v9918_v41  ;;  %v10117_v22 = vpop.f32.mrb[62].mxu0  ;;  %v10119_v7 = vpop.f32.mrb[60].mxu1 }
 0x184   : > { %13756 = vst [vmem:[#allocation9_spill] sm:$0xff] %v10117_v22  ;;  %13757 = vst [vmem:[#allocation4_spill] sm:$0xff] %v10119_v7  ;;  %v1035_v40 = vsel %vm1023_vm10, %v9743_v45, %v1031_v33  ;;  %v1040_v31 = vmul.f32 %v1020_v21, %v9929_v43  ;;  %v1052_v13 = vmul.f32 %v13720_v53, %v1020_v21  ;;  %v10127_v17 = vpop.f32.mrb[63].mxu0  ;;  %v10129_v12 = vpop.f32.mrb[61].mxu1  ;;  %8825 = vrcp.f32 %v1272_v2 }
 0x185   : > { %v1021_v28 = vmul.f32 %v8822_v34, %v9997_v30  ;;  %13758 = vst [vmem:[#allocation13_spill] sm:$0xff] %v10127_v17  ;;  %13759 = vst [vmem:[#allocation6_spill] sm:$0xff] %v10129_v12  ;;  %v1047_v41 = vsel %vm1023_vm10, %v9753_v9, %v1043_v42  ;;  %v1059_v3 = vsel %vm1023_vm10, %v13755_v50, %v1055_v56  ;;  %v10141_v53 = vpop.f32.mrb[62].mxu1  ;;  %v13761_v34 = vld [vmem:[#allocation3_spill] sm:$0xff]  ;;  %vm1286_vm13 = vcmp.ge.f32.partialorder %v10058_v23, 0.0 }
 0x186   : > { %v1032_v45 = vsub.f32 %v9769_v0, %v1028_v15  ;;  %v10139_v43 = vadd.f32 %v1034_v55, %v9852_v27  ;;  %13760 = vst [vmem:[#allocation66_spill] sm:$0xff] %v10141_v53  ;;  %v10144_v21 = vadd.f32 %v1047_v41, %v9924_v1  ;;  %v1044_v39 = vsub.f32 %v9771_v48, %v1040_v31  ;;  %v10149_v33 = vpop.f32.mrb[63].mxu1 }
 0x187   : > { %v1056_v38 = vsub.f32 %v13761_v34, %v1052_v13  ;;  %v1029_v9 = vmul.f32 %v1021_v28, %v9937_v46  ;;  %13762 = vst [vmem:[#allocation3_spill] sm:$0xff] %v10149_v33  ;;  %v1041_v27 = vmul.f32 %v1021_v28, %v9950_v61  ;;  %v1053_v55 = vmul.f32 %v13725_v10, %v1021_v28  ;;  %v13763_v10 = vld [vmem:[#allocation5_spill] sm:$0xff] }
 0x188   : > { %v1036_v8 = vsel %vm1024_vm11, %v9769_v0, %v1032_v45  ;;  %v10157_v42 = vadd.f32 %v1058_v49, %v9865_v5  ;;  %v1048_v1 = vsel %vm1024_vm11, %v9771_v48, %v1044_v39  ;;  %v10178_v31 = vadd.f32 %v10063_v57, %v13764_v20 }
 0x189   : > { %v1060_v46 = vsel %vm1024_vm11, %v13761_v34, %v1056_v38  ;;  %v1033_v50 = vsub.f32 %v9783_v47, %v1029_v9  ;;  %v1068_v56 = vadd.f32 %v1036_v8, %v9832_v63  ;;  %v1069_v0 = vadd.f32 %v1048_v1, %v9835_v29  ;;  %v10171_v49 = vpop.f32.mrb[64].mxu0  ;;  %v13765_v63 = vld [vmem:[#allocation44_spill] sm:$0xff]  ;;  %v13770_v8 = vld [vmem:[#allocation35_spill] sm:$0xff] }
 0x18a   : > { %v1045_v61 = vsub.f32 %v9790_v6, %v1041_v27  ;;  %v1057_v15 = vsub.f32 %v13763_v10, %v1053_v55  ;;  %v1070_v5 = vadd.f32 %v1060_v46, %v9838_v59  ;;  %v1271_v13 = vadd.f32 %v1267_v62, %v13765_v63  ;;  %v10181_v29 = vpop.f32.mrb[65].mxu0  ;;  %v10197_v62 = vpop.f32.mrb[64].mxu1  ;;  %v13771_v55 = vld [vmem:[#allocation36_spill] sm:$0xff] }
 0x18b   : > { %v1037_v48 = vsel %vm1025_vm12, %v9783_v47, %v1033_v50  ;;  %v8824_v28 = vpop.eup %8823  ;;  %v10193_v2 = vadd.f32 %v1035_v40, %v9921_v60  ;;  %v10195_v57 = vpop.f32.mrb[66].mxu0  ;;  %13766 = vst [vmem:[#allocation5_spill] sm:$0xff] %v10197_v62  ;;  %v10211_v60 = vadd.f32 %v1059_v3, %v9927_v36  ;;  %v13768_v40 = vld [vmem:[#allocation33_spill] sm:$0xff]  ;;  %v1526_v9 = vmul.f32 %v9796_v44, %v9796_v44 }
 0x18c   : > { %v1049_v59 = vsel %vm1025_vm12, %v9790_v6, %v1045_v61  ;;  %v1061_v41 = vsel %vm1025_vm12, %v13763_v10, %v1057_v15  ;;  %v10190_v47 = vadd.f32 %v1037_v48, %v9874_v18  ;;  %v1282_v39 = vmul.f32 %v8824_v28, %v10058_v23  ;;  %v10206_v34 = vpop.f32.mrb[67].mxu0  ;;  %v10208_v18 = vpop.f32.mrb[65].mxu1  ;;  %v13774_v10 = vld [vmem:[#allocation22_spill] sm:$0xff]  ;;  %v13775_v48 = vld [vmem:[#allocation23_spill] sm:$0xff] }
 0x18d   : > { %v10200_v45 = vadd.f32 %v1049_v59, %v9892_v35  ;;  %v10204_v6 = vadd.f32 %v1061_v41, %v9907_v32  ;;  %v1275_v30 = vadd.f32 1e-06, %v1271_v13  ;;  %13767 = vst [vmem:[#allocation43_spill] sm:$0xff] %v10208_v18  ;;  %v10215_v38 = vadd.f32 %v10076_v11, %v13768_v40  ;;  %v10221_v32 = vpop.f32.mrb[66].mxu1  ;;  %v13773_v11 = vld [vmem:[#allocation34_spill] sm:$0xff]  ;;  %v13776_v41 = vld [vmem:[#allocation20_spill] sm:$0xff] }
 0x18e   : > { %v1265_v35 = vmul.f32 %v10065_v37, %v10065_v37  ;;  %13769 = vst [vmem:[#allocation44_spill] sm:$0xff] %v10221_v32  ;;  %v1290_v27 = vmul.f32 %v1282_v39, %v13770_v8  ;;  %v1302_v1 = vmul.f32 %v1282_v39, %v13771_v55  ;;  %v1314_v46 = vmul.f32 %v10031_v4, %v1282_v39  ;;  %v10226_v36 = vpop.f32.mrb[67].mxu1  ;;  %v13777_v39 = vld [vmem:[#allocation31_spill] sm:$0xff] }
 0x18f   : > { %8827 = vrcp.f32 %v1275_v30  ;;  %13772 = vst [vmem:[#allocation33_spill] sm:$0xff] %v10226_v36  ;;  %v1527_v50 = vmul.f32 %v9808_v16, %v9808_v16  ;;  %v1758_v61 = vmul.f32 %v10054_v24, %v9939_v52  ;;  %v1762_v4 = vmul.f32 %v10067_v25, %v9952_v26 }
 0x190   : > { %v1269_v3 = vadd.f32 %v1265_v35, %v13773_v11  ;;  %v1294_v15 = vsub.f32 %v13774_v10, %v1290_v27  ;;  %v1306_v20 = vsub.f32 %v13775_v48, %v1302_v1  ;;  %v1318_v63 = vsub.f32 %v9982_v54, %v1314_v46  ;;  %v13778_v27 = vld [vmem:[#allocation41_spill] sm:$0xff] }
 0x191   : > { %v10239_v28 = vpop.f32.mrb[68].mxu0  ;;  %v1778_v23 = vmul.f32 %v10054_v24, %v10054_v24  ;;  %v1782_v59 = vmul.f32 %v10067_v25, %v10067_v25  ;;  %v10247_v30 = vmul.f32 %v13777_v39, %v13776_v41  ;;  %vm1284_vm14 = vcmp.ge.f32.partialorder %v13778_v27, 0.0 }
 0x192   : > { %v1273_v13 = vadd.f32 1e-06, %v1269_v3  ;;  %v1298_v40 = vsel %vm1286_vm13, %v13774_v10, %v1294_v15  ;;  %v1310_v35 = vsel %vm1286_vm13, %v13775_v48, %v1306_v20  ;;  %v1322_v8 = vsel %vm1286_vm13, %v9982_v54, %v1318_v63  ;;  %v10255_v1 = vpop.f32.mrb[69].mxu0  ;;  %v10265_v10 = vpop.f32.mrb[68].mxu1 }
 0x193   : > { %v1494_v55 = vmul.f32 %v10239_v28, %v10097_v58  ;;  %v10257_v46 = vadd.f32 %v1298_v40, %v1068_v56  ;;  %v10259_v11 = vadd.f32 %v1310_v35, %v1069_v0  ;;  %v10261_v3 = vadd.f32 %v1322_v8, %v1070_v5  ;;  %v10263_v41 = vpop.f32.mrb[70].mxu0  ;;  %13782 = vst [vmem:[#allocation22_spill] sm:$0xff] %v10265_v10  ;;  %v8826_v15 = vpop.eup %8825  ;;  %v13789_v10 = vld [vmem:[#allocation63_spill] sm:$0xff] }
 0x194   : > { %8829 = vrcp.f32 %v1273_v13  ;;  %v1514_v54 = vmul.f32 %v10239_v28, %v10239_v28  ;;  %v1498_v48 = vmul.f32 %v10255_v1, %v10109_v51  ;;  %v1518_v56 = vmul.f32 %v10255_v1, %v10255_v1  ;;  %v10275_v5 = vpop.f32.mrb[71].mxu0  ;;  %v10277_v20 = vpop.f32.mrb[69].mxu1 }
 0x195   : > { %13779 = vst [vmem:[#allocation35_spill] sm:$0xff] %v10257_v46  ;;  %13780 = vst [vmem:[#allocation36_spill] sm:$0xff] %v10259_v11  ;;  %v1495_v0 = vmul.f32 %v10263_v41, %v10117_v22  ;;  %v1280_v63 = vmul.f32 %v8826_v15, %v13778_v27  ;;  %v1515_v13 = vmul.f32 %v10263_v41, %v10263_v41  ;;  %v10286_v8 = vpop.f32.mrb[70].mxu1  ;;  %v13787_v15 = vld [vmem:[#allocation27_spill] sm:$0xff]  ;;  %v13788_v11 = vld [vmem:[#allocation28_spill] sm:$0xff]  ;;  %vm1287_vm15 = vcmp.ge.f32.partialorder %v10178_v31, 0.0 }
 0x196   : > { %13781 = vst [vmem:[#allocation34_spill] sm:$0xff] %v10261_v3  ;;  %13783 = vst [vmem:[#allocation23_spill] sm:$0xff] %v10277_v20  ;;  %v1499_v40 = vmul.f32 %v10275_v5, %v10127_v17  ;;  %v1519_v35 = vmul.f32 %v10275_v5, %v10275_v5  ;;  %v1502_v3 = vadd.f32 %v1498_v48, %v1494_v55  ;;  %v10292_v24 = vpop.f32.mrb[71].mxu1  ;;  %v13790_v22 = vld [vmem:[#allocation10_spill] sm:$0xff]  ;;  %v13794_v48 = vld [vmem:[#allocation16_spill] sm:$0xff]  ;;  %vm1285_vm1 = vcmp.ge.f32.partialorder %v10215_v38, 0.0 }
 0x197   : > { %13784 = vst [vmem:[#allocation31_spill] sm:$0xff] %v10286_v8  ;;  %v1522_v26 = vadd.f32 %v1518_v56, %v1514_v54  ;;  %v10288_v52 = vadd.f32 %v1762_v4, %v1758_v61  ;;  %v10290_v25 = vadd.f32 %v1782_v59, %v1778_v23  ;;  %13786 = vst [vmem:[#allocation67_spill] sm:$0xff] %v10292_v24  ;;  %v13791_v54 = vld [vmem:[#allocation21_spill] sm:$0xff]  ;;  %v13792_v61 = vld [vmem:[#allocation32_spill] sm:$0xff] }
 0x198   : > { %v1288_v46 = vmul.f32 %v1280_v63, %v13787_v15  ;;  %v1300_v20 = vmul.f32 %v1280_v63, %v13788_v11  ;;  %v1312_v36 = vmul.f32 %v1280_v63, %v13789_v10  ;;  %v1503_v33 = vadd.f32 %v1499_v40, %v1495_v0  ;;  %v13793_v23 = vld [vmem:[#allocation15_spill] sm:$0xff]  ;;  %v13797_v0 = vld [vmem:[#allocation37_spill] sm:$0xff] }
 0x199   : > { %13785 = vst [vmem:[#allocation41_spill] sm:$0xff] %v10290_v25  ;;  %v8828_v17 = vpop.eup %8827  ;;  %v10298_v16 = vadd.f32 %v13790_v22, %v1502_v3  ;;  %v1530_v8 = vadd.f32 %v1526_v9, %v1522_v26  ;;  %v1523_v55 = vadd.f32 %v1519_v35, %v1515_v13  ;;  %v1763_v4 = vmul.f32 %v13792_v61, %v13791_v54  ;;  %v13795_v24 = vld [vmem:[#allocation7_spill] sm:$0xff]  ;;  %v10306_v25 = vpop.f32.mrb[72].mxu0  ;;  %v13800_v35 = vld [vmem:[#allocation38_spill] sm:$0xff] }
 0x19a   : > { %v1292_v59 = vsub.f32 %v13793_v23, %v1288_v46  ;;  %v1304_v56 = vsub.f32 %v13794_v48, %v1300_v20  ;;  %v1316_v15 = vsub.f32 %v13795_v24, %v1312_v36  ;;  %v1283_v11 = vmul.f32 %v8828_v17, %v10178_v31  ;;  %v13796_v22 = vld [vmem:[#allocation55_spill] sm:$0xff]  ;;  %v10312_v9 = vpop.f32.mrb[73].mxu0 }
 0x19b   : > { %v1534_v10 = vadd.f32 1e-06, %v1530_v8  ;;  %v10310_v3 = vadd.f32 %v13796_v22, %v1503_v33  ;;  %v1531_v26 = vadd.f32 %v1527_v50, %v1523_v55  ;;  %v10325_v33 = vpop.f32.mrb[74].mxu0  ;;  %v10327_v50 = vpop.f32.mrb[72].mxu1  ;;  %v1496_v22 = vmul.f32 %v10306_v25, %v10171_v49 }
 0x19c   : > { %v1296_v46 = vsel %vm1284_vm14, %v13793_v23, %v1292_v59  ;;  %v1308_v36 = vsel %vm1284_vm14, %v13794_v48, %v1304_v56  ;;  %v1320_v17 = vsel %vm1284_vm14, %v13795_v24, %v1316_v15  ;;  %v1291_v20 = vmul.f32 %v1283_v11, %v13797_v0  ;;  %13798 = vst [vmem:[#allocation27_spill] sm:$0xff] %v10327_v50  ;;  %v10339_v24 = vpop.f32.mrb[75].mxu0  ;;  %v10341_v8 = vpop.f32.mrb[73].mxu1  ;;  %v13802_v23 = vld [vmem:[#allocation24_spill] sm:$0xff] }
 0x19d   : > { %v10330_v63 = vadd.f32 %v1296_v46, %v10139_v43  ;;  %v10333_v13 = vadd.f32 %v1308_v36, %v10112_v14  ;;  %v10336_v40 = vadd.f32 %v1320_v17, %v10157_v42  ;;  %v1303_v27 = vmul.f32 %v1283_v11, %v13800_v35  ;;  %13801 = vst [vmem:[#allocation63_spill] sm:$0xff] %v10341_v8  ;;  %v10345_v56 = vpop.f32.mrb[74].mxu1  ;;  %v13804_v14 = vld [vmem:[#allocation25_spill] sm:$0xff] }
 0x19e   : > { %v8830_v55 = vpop.eup %8829  ;;  %v1295_v59 = vsub.f32 %v13802_v23, %v1291_v20  ;;  %v1315_v48 = vmul.f32 %v10048_v19, %v1283_v11  ;;  %8831 = vrcp.f32 %v1534_v10  ;;  %v1535_v43 = vadd.f32 1e-06, %v1531_v26  ;;  %13803 = vst [vmem:[#allocation10_spill] sm:$0xff] %v10345_v56  ;;  %v10353_v36 = vpop.f32.mrb[75].mxu1  ;;  %v13806_v11 = vld [vmem:[#allocation14_spill] sm:$0xff]  ;;  %v13807_v20 = vld [vmem:[#allocation29_spill] sm:$0xff] }
 0x19f   : > { %13799 = vst [vmem:[#allocation28_spill] sm:$0xff] %v10336_v40  ;;  %v1307_v15 = vsub.f32 %v13804_v14, %v1303_v27  ;;  %v1281_v42 = vmul.f32 %v8830_v55, %v10215_v38  ;;  %v1779_v46 = vmul.f32 %v13777_v39, %v13777_v39  ;;  %13805 = vst [vmem:[#allocation21_spill] sm:$0xff] %v10353_v36  ;;  %v13808_v27 = vld [vmem:[#allocation30_spill] sm:$0xff]  ;;  %vm1546_vm2 = vcmp.ge.f32.partialorder %v10298_v16, 0.0 }
 0x1a0   : > { %v1299_v19 = vsel %vm1287_vm15, %v13802_v23, %v1295_v59  ;;  %v1319_v10 = vsub.f32 %v13806_v11, %v1315_v48  ;;  %8833 = vrcp.f32 %v1535_v43  ;;  %v1516_v26 = vmul.f32 %v10306_v25, %v10306_v25 }
 0x1a1   : > { %v1311_v17 = vsel %vm1287_vm15, %v13804_v14, %v1307_v15  ;;  %v10365_v0 = vadd.f32 %v1299_v19, %v10190_v47  ;;  %v1289_v35 = vmul.f32 %v1281_v42, %v13807_v20  ;;  %v1301_v55 = vmul.f32 %v1281_v42, %v13808_v27  ;;  %v10378_v14 = vpop.f32.mrb[76].mxu0  ;;  %v13810_v15 = vld [vmem:[#allocation17_spill] sm:$0xff]  ;;  %v13811_v20 = vld [vmem:[#allocation19_spill] sm:$0xff] }
 0x1a2   : > { %v1323_v23 = vsel %vm1287_vm15, %v13806_v11, %v1319_v10  ;;  %v10373_v59 = vadd.f32 %v1311_v17, %v10200_v45  ;;  %v1313_v48 = vmul.f32 %v1281_v42, %v10065_v37  ;;  %v1500_v43 = vmul.f32 %v10312_v9, %v10181_v29  ;;  %v10387_v11 = vpop.f32.mrb[77].mxu0  ;;  %v13812_v45 = vld [vmem:[#allocation12_spill] sm:$0xff] }
 0x1a3   : > { %v10381_v47 = vadd.f32 %v1323_v23, %v10204_v6  ;;  %v1293_v19 = vsub.f32 %v13810_v15, %v1289_v35  ;;  %v1305_v27 = vsub.f32 %v13811_v20, %v1301_v55  ;;  %v1520_v31 = vmul.f32 %v10312_v9, %v10312_v9  ;;  %v10394_v6 = vpop.f32.mrb[78].mxu0  ;;  %v10396_v23 = vpop.f32.mrb[76].mxu1 }
 0x1a4   : > { %v1317_v10 = vsub.f32 %v13812_v45, %v1313_v48  ;;  %v1504_v37 = vadd.f32 %v1500_v43, %v1496_v22  ;;  %v1497_v42 = vmul.f32 %v10325_v33, %v10195_v57  ;;  %v1517_v17 = vmul.f32 %v10325_v33, %v10325_v33  ;;  %13813 = vst [vmem:[#allocation15_spill] sm:$0xff] %v10396_v23  ;;  %v10407_v43 = vpop.f32.mrb[79].mxu0 }
 0x1a5   : > { %13809 = vst [vmem:[#allocation32_spill] sm:$0xff] %v10381_v47  ;;  %v1297_v35 = vsel %vm1285_vm1, %v13810_v15, %v1293_v19  ;;  %v1309_v55 = vsel %vm1285_vm1, %v13811_v20, %v1305_v27  ;;  %v1524_v48 = vadd.f32 %v1520_v31, %v1516_v26  ;;  %v10405_v22 = vadd.f32 %v1763_v4, %v10247_v30  ;;  %v10409_v47 = vpop.f32.mrb[77].mxu1  ;;  %v13815_v19 = vld [vmem:[#allocation48_spill] sm:$0xff] }
 0x1a6   : > { %13814 = vst [vmem:[#allocation16_spill] sm:$0xff] %v10409_v47  ;;  %v1321_v40 = vsel %vm1285_vm1, %v13812_v45, %v1317_v10  ;;  %v10415_v36 = vadd.f32 %v1297_v35, %v10193_v2  ;;  %v1328_v15 = vadd.f32 %v1309_v55, %v10144_v21  ;;  %v10419_v56 = vadd.f32 %v13815_v19, %v1504_v37  ;;  %v10421_v26 = vpop.f32.mrb[78].mxu1  ;;  %v13818_v4 = vld [vmem:[#allocation64_spill] sm:$0xff]  ;;  %v13820_v21 = vld [vmem:[#allocation49_spill] sm:$0xff] }
 0x1a7   : > { %13816 = vst [vmem:[#allocation7_spill] sm:$0xff] %v10421_v26  ;;  %v10424_v30 = vadd.f32 %v1321_v40, %v10211_v60  ;;  %v1532_v20 = vadd.f32 %v13818_v4, %v1524_v48  ;;  %v1783_v27 = vmul.f32 %v13792_v61, %v13792_v61  ;;  %v1501_v38 = vmul.f32 %v10339_v24, %v10206_v34  ;;  %v10431_v2 = vpop.f32.mrb[79].mxu1 }
 0x1a8   : > { %13819 = vst [vmem:[#allocation37_spill] sm:$0xff] %v10431_v2  ;;  %v8832_v31 = vpop.eup %8831  ;;  %v1529_v45 = vmul.f32 %v13820_v21, %v13820_v21  ;;  %v1521_v10 = vmul.f32 %v10339_v24, %v10339_v24  ;;  %v10439_v60 = vmul.f32 %v10197_v62, %v10119_v7  ;;  %v10453_v7 = vmul.f32 %v10221_v32, %v10141_v53 }
 0x1a9   : > { %13817 = vst [vmem:[#allocation55_spill] sm:$0xff] %v10424_v30  ;;  %v1542_v40 = vmul.f32 %v8832_v31, %v10298_v16  ;;  %v1536_v37 = vadd.f32 1e-06, %v1532_v20  ;;  %v10442_v35 = vadd.f32 %v1783_v27, %v1779_v46  ;;  %v1505_v55 = vadd.f32 %v1501_v38, %v1497_v42  ;;  %v10445_v4 = vpop.f32.mrb[80].mxu0 }
 0x1aa   : > { %13821 = vst [vmem:[#allocation38_spill] sm:$0xff] %v10439_v60  ;;  %v8834_v48 = vpop.eup %8833  ;;  %v1525_v19 = vadd.f32 %v1521_v10, %v1517_v17  ;;  %v10449_v30 = vmul.f32 %v10208_v18, %v10129_v12  ;;  %13822 = vst [vmem:[#allocation24_spill] sm:$0xff] %v10453_v7  ;;  %v10459_v27 = vpop.f32.mrb[81].mxu0  ;;  %v13823_v17 = vld [vmem:[#allocation8_spill] sm:$0xff]  ;;  %v1770_v12 = vmul.f32 %v10445_v4, %v10378_v14  ;;  %vm1547_vm3 = vcmp.ge.f32.partialorder %v10310_v3, 0.0 }
 0x1ab   : > { %v1550_v31 = vmul.f32 %v1542_v40, %v10239_v28  ;;  %v1562_v46 = vmul.f32 %v1542_v40, %v10255_v1  ;;  %v1574_v42 = vmul.f32 %v1542_v40, %v9796_v44  ;;  %v1543_v20 = vmul.f32 %v8834_v48, %v10310_v3  ;;  %v10466_v53 = vpop.f32.mrb[82].mxu0  ;;  %v10468_v7 = vpop.f32.mrb[80].mxu1  ;;  %v13824_v1 = vld [vmem:[#allocation42_spill] sm:$0xff]  ;;  %v13838_v3 = vld [vmem:[#allocation59_spill] sm:$0xff] }
 0x1ac   : > { %8835 = vrcp.f32 %v1536_v37  ;;  %v10462_v38 = vadd.f32 %v13823_v17, %v1505_v55  ;;  %v1533_v10 = vadd.f32 %v1529_v45, %v1525_v19  ;;  %v10474_v37 = vpop.f32.mrb[83].mxu0  ;;  %v10476_v55 = vpop.f32.mrb[81].mxu1  ;;  %v13826_v19 = vld [vmem:[#allocation50_spill] sm:$0xff]  ;;  %v10506_v16 = vadd.f32 %v1770_v12, %v10288_v52 }
 0x1ad   : > { %v1554_v28 = vsub.f32 %v10097_v58, %v1550_v31  ;;  %v1566_v44 = vsub.f32 %v10109_v51, %v1562_v46  ;;  %v1578_v40 = vsub.f32 %v13824_v1, %v1574_v42  ;;  %v1551_v48 = vmul.f32 %v1543_v20, %v10263_v41  ;;  %13825 = vst [vmem:[#allocation25_spill] sm:$0xff] %v10476_v55  ;;  %v10481_v60 = vpop.f32.mrb[82].mxu1  ;;  %v13829_v42 = vld [vmem:[#allocation9_spill] sm:$0xff] }
 0x1ae   : > { %v1563_v45 = vmul.f32 %v1543_v20, %v10275_v5  ;;  %v1575_v17 = vmul.f32 %v1543_v20, %v13826_v19  ;;  %v1537_v32 = vadd.f32 1e-06, %v1533_v10  ;;  %13827 = vst [vmem:[#allocation14_spill] sm:$0xff] %v10481_v60  ;;  %v10495_v55 = vpop.f32.mrb[83].mxu1  ;;  %v13831_v10 = vld [vmem:[#allocation13_spill] sm:$0xff]  ;;  %v13832_v60 = vld [vmem:[#allocation46_spill] sm:$0xff]  ;;  %v1788_v52 = vmul.f32 %v10459_v27, %v10459_v27 }
 0x1af   : > { %v1558_v31 = vsel %vm1546_vm2, %v10097_v58, %v1554_v28  ;;  %v1570_v41 = vsel %vm1546_vm2, %v10109_v51, %v1566_v44  ;;  %v10492_v46 = vsel %vm1546_vm2, %v13824_v1, %v1578_v40  ;;  %v1555_v5 = vsub.f32 %v13829_v42, %v1551_v48 }
 0x1b0   : > { %13828 = vst [vmem:[#allocation29_spill] sm:$0xff] %v10492_v46  ;;  %v10498_v20 = vadd.f32 %v1570_v41, %v10333_v13  ;;  %v1567_v19 = vsub.f32 %v13831_v10, %v1563_v45  ;;  %v1579_v58 = vsub.f32 %v13832_v60, %v1575_v17  ;;  %8837 = vrcp.f32 %v1537_v32  ;;  %v13843_v46 = vld [vmem:[#allocation33_spill] sm:$0xff] }
 0x1b1   : > { %v1559_v51 = vsel %vm1547_vm3, %v13829_v42, %v1555_v5  ;;  %v1790_v28 = vmul.f32 %v10445_v4, %v10445_v4  ;;  %v10511_v44 = vadd.f32 %v1558_v31, %v10330_v63  ;;  %v1768_v1 = vmul.f32 %v10459_v27, %v10387_v11  ;;  %v10525_v12 = vpop.f32.mrb[84].mxu0  ;;  %v13836_v63 = vld [vmem:[#allocation41_spill] sm:$0xff]  ;;  %v13839_v31 = vld [vmem:[#allocation60_spill] sm:$0xff] }
 0x1b2   : > { %13830 = vst [vmem:[#allocation30_spill] sm:$0xff] %v10498_v20  ;;  %v1571_v13 = vsel %vm1547_vm3, %v13831_v10, %v1567_v19  ;;  %v10519_v32 = vsel %vm1547_vm3, %v13832_v60, %v1579_v58  ;;  %13834 = vst [vmem:[#allocation19_spill] sm:$0xff] %v10525_v12  ;;  %v1771_v45 = vmul.f32 %v10466_v53, %v10394_v6  ;;  %v10532_v17 = vpop.f32.mrb[85].mxu0  ;;  %vm1548_vm4 = vcmp.ge.f32.partialorder %v10419_v56, 0.0 }
 0x1b3   : > { %13833 = vst [vmem:[#allocation17_spill] sm:$0xff] %v10519_v32  ;;  %v10527_v40 = vadd.f32 %v1571_v13, %v1328_v15  ;;  %v1794_v48 = vadd.f32 %v1790_v28, %v13836_v63  ;;  %13837 = vst [vmem:[#allocation48_spill] sm:$0xff] %v10532_v17  ;;  %v10535_v60 = vadd.f32 %v1768_v1, %v13838_v3  ;;  %v10543_v15 = vpop.f32.mrb[86].mxu0  ;;  %v13840_v63 = vld [vmem:[#allocation61_spill] sm:$0xff]  ;;  %v13841_v3 = vld [vmem:[#allocation62_spill] sm:$0xff]  ;;  %vm1549_vm5 = vcmp.ge.f32.partialorder %v10462_v38, 0.0 }
 0x1b4   : > { %v1792_v41 = vadd.f32 %v1788_v52, %v13839_v31  ;;  %v1791_v42 = vmul.f32 %v10466_v53, %v10466_v53  ;;  %v10541_v5 = vadd.f32 %v1559_v51, %v10415_v36  ;;  %v10546_v19 = vadd.f32 %v1771_v45, %v10405_v22  ;;  %v10552_v13 = vpop.f32.mrb[87].mxu0  ;;  %v13842_v32 = vld [vmem:[#allocation3_spill] sm:$0xff] }
 0x1b5   : > { %13835 = vst [vmem:[#allocation12_spill] sm:$0xff] %v10527_v40  ;;  %v1798_v10 = vadd.f32 1e-06, %v1794_v48  ;;  %v1769_v58 = vmul.f32 %v10474_v37, %v10407_v43  ;;  %v1789_v28 = vmul.f32 %v10474_v37, %v10474_v37  ;;  %v10562_v48 = vmul.f32 %v10197_v62, %v10197_v62 }
 0x1b6   : > { %v8836_v1 = vpop.eup %8835  ;;  %v1796_v52 = vadd.f32 1e-06, %v1792_v41  ;;  %v1795_v36 = vadd.f32 %v1791_v42, %v10442_v35  ;;  %v10567_v40 = vmul.f32 %v13843_v46, %v13842_v32  ;;  %v13844_v42 = vld [vmem:[#allocation47_spill] sm:$0xff]  ;;  %vm1810_vm6 = vcmp.ge.f32.partialorder %v10506_v16, 0.0 }
 0x1b7   : > { %v1544_v51 = vmul.f32 %v8836_v1, %v10419_v56  ;;  %8839 = vrcp.f32 %v1798_v10  ;;  %v10558_v22 = vadd.f32 %v1769_v58, %v13840_v63  ;;  %v1793_v31 = vadd.f32 %v1789_v28, %v13841_v3  ;;  %v13846_v3 = vld [vmem:[#allocation39_spill] sm:$0xff] }
 0x1b8   : > { %8841 = vrcp.f32 %v1796_v52  ;;  %v1799_v45 = vadd.f32 1e-06, %v1795_v36  ;;  %v10574_v58 = vmul.f32 %v10208_v18, %v10208_v18  ;;  %v13845_v36 = vld [vmem:[#allocation22_spill] sm:$0xff]  ;;  %vm1808_vm7 = vcmp.ge.f32.partialorder %v10535_v60, 0.0 }
 0x1b9   : > { %v1552_v35 = vmul.f32 %v1544_v51, %v10306_v25  ;;  %v1564_v41 = vmul.f32 %v1544_v51, %v10312_v9  ;;  %v1576_v10 = vmul.f32 %v13844_v42, %v1544_v51  ;;  %v1797_v52 = vadd.f32 1e-06, %v1793_v31  ;;  %v10577_v28 = vpop.f32.mrb[88].mxu0  ;;  %v13847_v31 = vld [vmem:[#allocation23_spill] sm:$0xff] }
 0x1ba   : > { %v8838_v1 = vpop.eup %8837  ;;  %8843 = vrcp.f32 %v1799_v45  ;;  %v2280_v63 = vmul.f32 %v10396_v23, %v13845_v36  ;;  %v10585_v32 = vpop.f32.mrb[89].mxu0  ;;  %v2300_v45 = vmul.f32 %v10396_v23, %v10396_v23  ;;  %v2284_v18 = vmul.f32 %v10409_v47, %v13847_v31  ;;  %v13849_v31 = vld [vmem:[#allocation36_spill] sm:$0xff] }
 0x1bb   : > { %v1556_v25 = vsub.f32 %v10171_v49, %v1552_v35  ;;  %v1568_v9 = vsub.f32 %v10181_v29, %v1564_v41  ;;  %v1580_v51 = vsub.f32 %v13846_v3, %v1576_v10  ;;  %v1545_v42 = vmul.f32 %v8838_v1, %v10462_v38  ;;  %v10587_v62 = vpop.f32.mrb[90].mxu0 }
 0x1bc   : > { %8845 = vrcp.f32 %v1797_v52  ;;  %v2304_v35 = vmul.f32 %v10409_v47, %v10409_v47  ;;  %v10607_v36 = vpop.f32.mrb[91].mxu0  ;;  %v10617_v56 = vadd.f32 %v2284_v18, %v2280_v63  ;;  %vm1811_vm8 = vcmp.ge.f32.partialorder %v10546_v19, 0.0 }
 0x1bd   : > { %v1560_v41 = vsel %vm1548_vm4, %v10171_v49, %v1556_v25  ;;  %v1572_v10 = vsel %vm1548_vm4, %v10181_v29, %v1568_v9  ;;  %v10604_v1 = vsel %vm1548_vm4, %v13846_v3, %v1580_v51  ;;  %v1553_v52 = vmul.f32 %v1545_v42, %v10325_v33  ;;  %v13851_v25 = vld [vmem:[#allocation35_spill] sm:$0xff] }
 0x1be   : > { %13848 = vst [vmem:[#allocation64_spill] sm:$0xff] %v10604_v1  ;;  %v10610_v23 = vadd.f32 %v1572_v10, %v13849_v31  ;;  %v1565_v47 = vmul.f32 %v1545_v42, %v10339_v24  ;;  %v1577_v49 = vmul.f32 %v13820_v21, %v1545_v42  ;;  %v1592_v20 = vadd.f32 %v1560_v41, %v13851_v25  ;;  %v13854_v33 = vld [vmem:[#allocation31_spill] sm:$0xff]  ;;  %v13855_v31 = vld [vmem:[#allocation45_spill] sm:$0xff] }
 0x1bf   : > { %v1557_v29 = vsub.f32 %v10195_v57, %v1553_v52  ;;  %13852 = vst [vmem:[#allocation8_spill] sm:$0xff] %v10617_v56  ;;  %v10619_v9 = vadd.f32 %v2304_v35, %v2300_v45  ;;  %v10623_v3 = vmul.f32 %v10421_v26, %v13854_v33  ;;  %v10630_v21 = vmul.f32 %v13843_v46, %v13843_v46  ;;  %v13856_v42 = vld [vmem:[#allocation67_spill] sm:$0xff]  ;;  %v13864_v46 = vld [vmem:[#allocation26_spill] sm:$0xff]  ;;  %v13867_v56 = vld [vmem:[#allocation52_spill] sm:$0xff] }
 0x1c0   : > { %13850 = vst [vmem:[#allocation49_spill] sm:$0xff] %v10610_v23  ;;  %v1569_v51 = vsub.f32 %v10206_v34, %v1565_v47  ;;  %v1581_v24 = vsub.f32 %v13855_v31, %v1577_v49  ;;  %v10634_v18 = vmul.f32 %v10431_v2, %v13856_v42  ;;  %v10641_v47 = vmul.f32 %v10421_v26, %v10421_v26 }
 0x1c1   : > { %13853 = vst [vmem:[#allocation42_spill] sm:$0xff] %v10619_v9  ;;  %v8840_v63 = vpop.eup %8839  ;;  %v1561_v45 = vsel %vm1549_vm5, %v10195_v57, %v1557_v29  ;;  %v10645_v35 = vmul.f32 %v10431_v2, %v10431_v2  ;;  %v10649_v41 = vmul.f32 %v10468_v7, %v10327_v50  ;;  %v10661_v29 = vpop.f32.mrb[92].mxu0  ;;  %v13863_v2 = vld [vmem:[#allocation56_spill] sm:$0xff]  ;;  %vm1809_vm9 = vcmp.ge.f32.partialorder %v10558_v22, 0.0 }
 0x1c2   : > { %v8842_v10 = vpop.eup %8841  ;;  %v1573_v52 = vsel %vm1549_vm5, %v10206_v34, %v1569_v51  ;;  %v10657_v57 = vsel %vm1549_vm5, %v13855_v31, %v1581_v24  ;;  %v1806_v49 = vmul.f32 %v8840_v63, %v10506_v16  ;;  %v1595_v25 = vadd.f32 %v1561_v45, %v10365_v0  ;;  %13858 = vst [vmem:[#allocation9_spill] sm:$0xff] %v10661_v29  ;;  %v10672_v51 = vpop.f32.mrb[93].mxu0  ;;  %v13860_v24 = vld [vmem:[#allocation65_spill] sm:$0xff]  ;;  %v13861_v63 = vld [vmem:[#allocation40_spill] sm:$0xff] }
 0x1c3   : > { %13857 = vst [vmem:[#allocation50_spill] sm:$0xff] %v10657_v57  ;;  %v10664_v42 = vadd.f32 %v1573_v52, %v10373_v59  ;;  %v1804_v33 = vmul.f32 %v8842_v10, %v10535_v60  ;;  %v2018_v34 = vmul.f32 %v10661_v29, %v10525_v12  ;;  %v2038_v38 = vmul.f32 %v10661_v29, %v10661_v29  ;;  %v10679_v52 = vpop.f32.mrb[94].mxu0  ;;  %v13862_v57 = vld [vmem:[#allocation11_spill] sm:$0xff]  ;;  %v13865_v12 = vld [vmem:[#allocation18_spill] sm:$0xff]  ;;  %v13870_v16 = vld [vmem:[#allocation20_spill] sm:$0xff] }
 0x1c4   : > { %v8844_v31 = vpop.eup %8843  ;;  %v1814_v0 = vmul.f32 %v1806_v49, %v13860_v24  ;;  %v1826_v45 = vmul.f32 %v1806_v49, %v13861_v63  ;;  %v1838_v59 = vmul.f32 %v10445_v4, %v1806_v49  ;;  %v2022_v10 = vmul.f32 %v10672_v51, %v10532_v17  ;;  %v10685_v50 = vpop.f32.mrb[95].mxu0  ;;  %v13866_v29 = vld [vmem:[#allocation51_spill] sm:$0xff] }
 0x1c5   : > { %13859 = vst [vmem:[#allocation13_spill] sm:$0xff] %v10664_v42  ;;  %v1812_v1 = vmul.f32 %v1804_v33, %v13862_v57  ;;  %v1824_v26 = vmul.f32 %v1804_v33, %v13863_v2  ;;  %v1836_v42 = vmul.f32 %v1804_v33, %v10459_v27  ;;  %v1807_v23 = vmul.f32 %v8844_v31, %v10546_v19 }
 0x1c6   : > { %v8846_v24 = vpop.eup %8845  ;;  %v1818_v63 = vsub.f32 %v13864_v46, %v1814_v0  ;;  %v1830_v4 = vsub.f32 %v13865_v12, %v1826_v45  ;;  %v1842_v49 = vsub.f32 %v10378_v14, %v1838_v59  ;;  %v2026_v17 = vadd.f32 %v2022_v10, %v2018_v34  ;;  %v13872_v59 = vld [vmem:[#allocation57_spill] sm:$0xff] }
 0x1c7   : > { %v1816_v9 = vsub.f32 %v13866_v29, %v1812_v1  ;;  %v1828_v57 = vsub.f32 %v13867_v56, %v1824_v26  ;;  %v1840_v2 = vsub.f32 %v10387_v11, %v1836_v42  ;;  %v1815_v27 = vmul.f32 %v1807_v23, %v13777_v39 }
 0x1c8   : > { %v1822_v33 = vsel %vm1810_vm6, %v13864_v46, %v1818_v63  ;;  %v10700_v31 = vsel %vm1810_vm6, %v13865_v12, %v1830_v4  ;;  %v10705_v34 = vsel %vm1810_vm6, %v10378_v14, %v1842_v49  ;;  %v1827_v26 = vmul.f32 %v1807_v23, %v13792_v61 }
 0x1c9   : > { %13868 = vst [vmem:[#allocation46_spill] sm:$0xff] %v10705_v34  ;;  %v10709_v1 = vadd.f32 %v1822_v33, %v1592_v20  ;;  %v1820_v39 = vsel %vm1808_vm7, %v13866_v29, %v1816_v9  ;;  %v10717_v46 = vsel %vm1808_vm7, %v13867_v56, %v1828_v57  ;;  %v10722_v14 = vsel %vm1808_vm7, %v10387_v11, %v1840_v2  ;;  %v10730_v9 = vpop.f32.mrb[96].mxu0 }
 0x1ca   : > { %v10725_v61 = vadd.f32 %v1820_v39, %v10511_v44  ;;  %v1819_v20 = vsub.f32 %v13870_v16, %v1815_v27  ;;  %v1831_v12 = vsub.f32 %v13791_v54, %v1827_v26  ;;  %v1839_v42 = vmul.f32 %v10466_v53, %v1807_v23  ;;  %v10740_v60 = vpop.f32.mrb[97].mxu0  ;;  %v13875_v27 = vld [vmem:[#allocation53_spill] sm:$0xff]  ;;  %v13876_v26 = vld [vmem:[#allocation54_spill] sm:$0xff] }
 0x1cb   : > { %13869 = vst [vmem:[#allocation41_spill] sm:$0xff] %v10709_v1  ;;  %v1805_v29 = vmul.f32 %v8846_v24, %v10558_v22  ;;  %v10734_v56 = vadd.f32 %v10449_v30, %v2026_v17  ;;  %v2042_v11 = vmul.f32 %v10672_v51, %v10672_v51  ;;  %v2019_v44 = vmul.f32 %v10679_v52, %v10543_v15  ;;  %v10753_v17 = vpop.f32.mrb[98].mxu0  ;;  %v13873_v24 = vld [vmem:[#allocation58_spill] sm:$0xff] }
 0x1cc   : > { %v1823_v0 = vsel %vm1811_vm8, %v13870_v16, %v1819_v20  ;;  %v10748_v53 = vsel %vm1811_vm8, %v13791_v54, %v1831_v12  ;;  %v1843_v23 = vsub.f32 %v10394_v6, %v1839_v42  ;;  %v2302_v30 = vmul.f32 %v10468_v7, %v10468_v7  ;;  %v10760_v49 = vpop.f32.mrb[99].mxu0 }
 0x1cd   : > { %v10755_v45 = vadd.f32 %v1823_v0, %v1595_v25  ;;  %v1813_v10 = vmul.f32 %v1805_v29, %v13872_v59  ;;  %v1825_v63 = vmul.f32 %v1805_v29, %v13873_v24  ;;  %v1837_v4 = vmul.f32 %v1805_v29, %v10474_v37  ;;  %v13877_v0 = vld [vmem:[#allocation25_spill] sm:$0xff]  ;;  %v13878_v24 = vld [vmem:[#allocation10_spill] sm:$0xff] }
 0x1ce   : > { %v10765_v54 = vsel %vm1811_vm8, %v10394_v6, %v1843_v23  ;;  %v2046_v57 = vadd.f32 %v2042_v11, %v2038_v38  ;;  %v2039_v2 = vmul.f32 %v10679_v52, %v10679_v52  ;;  %v10771_v25 = vadd.f32 %v10634_v18, %v10623_v3 }
 0x1cf   : > { %13871 = vst [vmem:[#allocation59_spill] sm:$0xff] %v10755_v45  ;;  %13874 = vst [vmem:[#allocation60_spill] sm:$0xff] %v10765_v54  ;;  %v1817_v33 = vsub.f32 %v13875_v27, %v1813_v10  ;;  %v1829_v39 = vsub.f32 %v13876_v26, %v1825_v63  ;;  %v1841_v37 = vsub.f32 %v10407_v43, %v1837_v4  ;;  %v13879_v63 = vld [vmem:[#allocation14_spill] sm:$0xff]  ;;  %vm2070_vm10 = vcmp.ge.f32.partialorder %v10734_v56, 0.0 }
 0x1d0   : > { %v10778_v16 = vadd.f32 %v10645_v35, %v10641_v47  ;;  %v2054_v6 = vadd.f32 %v10574_v58, %v2046_v57  ;;  %v2023_v19 = vmul.f32 %v10685_v50, %v10552_v13  ;;  %v2043_v38 = vmul.f32 %v10685_v50, %v10685_v50 }
 0x1d1   : > { %v2020_v3 = vmul.f32 %v10730_v9, %v10577_v28  ;;  %v1821_v18 = vsel %vm1809_vm9, %v13875_v27, %v1817_v33  ;;  %v1833_v47 = vsel %vm1809_vm9, %v13876_v26, %v1829_v39  ;;  %v10796_v58 = vsel %vm1809_vm9, %v10407_v43, %v1841_v37  ;;  %v10803_v11 = vpop.f32.mrb[100].mxu0 }
 0x1d2   : > { %v2040_v35 = vmul.f32 %v10730_v9, %v10730_v9  ;;  %v10801_v20 = vadd.f32 %v1821_v18, %v10541_v5  ;;  %v2058_v12 = vadd.f32 1e-06, %v2054_v6  ;;  %v2027_v42 = vadd.f32 %v2023_v19, %v2019_v44  ;;  %v10813_v10 = vpop.f32.mrb[101].mxu0 }
 0x1d3   : > { %v2047_v29 = vadd.f32 %v2043_v38, %v2039_v2  ;;  %v2286_v23 = vmul.f32 %v13877_v0, %v10341_v8  ;;  %v2306_v59 = vmul.f32 %v13877_v0, %v13877_v0  ;;  %v2024_v43 = vmul.f32 %v10740_v60, %v10585_v32  ;;  %v10821_v57 = vpop.f32.mrb[102].mxu0 }
 0x1d4   : > { %v2044_v22 = vmul.f32 %v10740_v60, %v10740_v60  ;;  %8847 = vrcp.f32 %v2058_v12  ;;  %v10816_v5 = vadd.f32 %v10567_v40, %v2027_v42  ;;  %v2283_v4 = vmul.f32 %v13879_v63, %v13878_v24  ;;  %13880 = vst [vmem:[#allocation61_spill] sm:$0xff] %v10821_v57  ;;  %v10824_v39 = vpop.f32.mrb[103].mxu0  ;;  %v13883_v42 = vld [vmem:[#allocation44_spill] sm:$0xff] }
 0x1d5   : > { %v2055_v44 = vadd.f32 %v10630_v21, %v2047_v29  ;;  %v2290_v2 = vadd.f32 %v2286_v23, %v10649_v41  ;;  %v2310_v27 = vadd.f32 %v2306_v59, %v2302_v30  ;;  %v2028_v33 = vadd.f32 %v2024_v43, %v2020_v3  ;;  %v13881_v21 = vld [vmem:[#allocation38_spill] sm:$0xff]  ;;  %v13882_v30 = vld [vmem:[#allocation21_spill] sm:$0xff] }
 0x1d6   : > { %v2048_v26 = vadd.f32 %v2044_v22, %v2040_v35  ;;  %v2303_v6 = vmul.f32 %v13879_v63, %v13879_v63  ;;  %v2021_v40 = vmul.f32 %v10753_v17, %v10587_v62  ;;  %v2041_v41 = vmul.f32 %v10753_v17, %v10753_v17  ;;  %v13884_v59 = vld [vmem:[#allocation30_spill] sm:$0xff] }
 0x1d7   : > { %v2059_v37 = vadd.f32 1e-06, %v2055_v44  ;;  %v10831_v19 = vadd.f32 %v13881_v21, %v2028_v33  ;;  %v2287_v3 = vmul.f32 %v10495_v55, %v13882_v30  ;;  %v2307_v18 = vmul.f32 %v10495_v55, %v10495_v55  ;;  %v13891_v30 = vld [vmem:[#allocation9_spill] sm:$0xff] }
 0x1d8   : > { %v2056_v38 = vadd.f32 %v10562_v48, %v2048_v26  ;;  %v2025_v35 = vmul.f32 %v10760_v49, %v10607_v36  ;;  %v2045_v12 = vmul.f32 %v10760_v49, %v10760_v49  ;;  %v2053_v29 = vmul.f32 %v13883_v42, %v13883_v42 }
 0x1d9   : > { %8849 = vrcp.f32 %v2059_v37  ;;  %v2291_v23 = vadd.f32 %v2287_v3, %v2283_v4  ;;  %v1849_v43 = vadd.f32 %v10717_v46, %v13884_v59  ;;  %v2311_v22 = vadd.f32 %v2307_v18, %v2303_v6  ;;  %v10848_v26 = vpop.f32.mrb[104].mxu0  ;;  %v13885_v37 = vld [vmem:[#allocation12_spill] sm:$0xff]  ;;  %v13887_v3 = vld [vmem:[#allocation29_spill] sm:$0xff] }
 0x1da   : > { %v2060_v48 = vadd.f32 1e-06, %v2056_v38  ;;  %v2029_v44 = vadd.f32 %v2025_v35, %v2021_v40  ;;  %v2049_v33 = vadd.f32 %v2045_v12, %v2041_v41  ;;  %v10851_v21 = vadd.f32 %v1833_v47, %v13885_v37  ;;  %v10857_v38 = vpop.f32.mrb[105].mxu0  ;;  %v13886_v4 = vld [vmem:[#allocation28_spill] sm:$0xff] }
 0x1db   : > { %v2294_v45 = vmul.f32 %v10848_v26, %v10803_v11  ;;  %v2314_v1 = vmul.f32 %v10848_v26, %v10848_v26  ;;  %v1588_v46 = vadd.f32 %v13887_v3, %v13886_v4  ;;  %v13888_v6 = vld [vmem:[#allocation24_spill] sm:$0xff]  ;;  %v2292_v47 = vmul.f32 %v10857_v38, %v10813_v10  ;;  %v10868_v35 = vpop.f32.mrb[106].mxu0 }
 0x1dc   : > { %8851 = vrcp.f32 %v2060_v48  ;;  %v10862_v40 = vadd.f32 %v13888_v6, %v2029_v44  ;;  %v2057_v41 = vadd.f32 %v2053_v29, %v2049_v33  ;;  %v2312_v18 = vmul.f32 %v10857_v38, %v10857_v38  ;;  %v10876_v44 = vpop.f32.mrb[107].mxu0  ;;  %v13889_v4 = vld [vmem:[#allocation8_spill] sm:$0xff]  ;;  %v13890_v6 = vld [vmem:[#allocation42_spill] sm:$0xff] }
 0x1dd   : > { %v10870_v12 = vadd.f32 %v2294_v45, %v2290_v2  ;;  %v2318_v48 = vadd.f32 %v2314_v1, %v2310_v27  ;;  %v2295_v59 = vmul.f32 %v10868_v35, %v10821_v57  ;;  %v2315_v37 = vmul.f32 %v10868_v35, %v10868_v35 }
 0x1de   : > { %v8848_v29 = vpop.eup %8847  ;;  %v2061_v33 = vadd.f32 1e-06, %v2057_v41  ;;  %v10879_v3 = vadd.f32 %v2292_v47, %v13889_v4  ;;  %v2316_v54 = vadd.f32 %v2312_v18, %v13890_v6  ;;  %v13892_v41 = vld [vmem:[#allocation43_spill] sm:$0xff]  ;;  %vm2071_vm11 = vcmp.ge.f32.partialorder %v10816_v5, 0.0 }
 0x1df   : > { %v2066_v34 = vmul.f32 %v8848_v29, %v10734_v56  ;;  %v2322_v45 = vadd.f32 1e-06, %v2318_v48  ;;  %v10883_v2 = vadd.f32 %v2295_v59, %v2291_v23  ;;  %v2319_v27 = vadd.f32 %v2315_v37, %v2311_v22  ;;  %v13893_v48 = vld [vmem:[#allocation19_spill] sm:$0xff]  ;;  %v13894_v29 = vld [vmem:[#allocation48_spill] sm:$0xff]  ;;  %v13896_v37 = vld [vmem:[#allocation17_spill] sm:$0xff] }
 0x1e0   : > { %8853 = vrcp.f32 %v2061_v33  ;;  %v2320_v1 = vadd.f32 1e-06, %v2316_v54  ;;  %v2293_v23 = vmul.f32 %v10876_v44, %v10824_v39  ;;  %v1850_v4 = vadd.f32 %v10722_v14, %v1588_v46 }
 0x1e1   : > { %v2074_v8 = vmul.f32 %v2066_v34, %v13891_v30  ;;  %v2086_v57 = vmul.f32 %v2066_v34, %v10672_v51  ;;  %v2098_v24 = vmul.f32 %v2066_v34, %v13892_v41  ;;  %8855 = vrcp.f32 %v2322_v45  ;;  %v13895_v30 = vld [vmem:[#allocation55_spill] sm:$0xff] }
 0x1e2   : > { %8857 = vrcp.f32 %v2320_v1  ;;  %v2323_v18 = vadd.f32 1e-06, %v2319_v27  ;;  %v2313_v51 = vmul.f32 %v10876_v44, %v10876_v44  ;;  %v10898_v34 = vadd.f32 %v2293_v23, %v10771_v25  ;;  %v13897_v1 = vld [vmem:[#allocation33_spill] sm:$0xff] }
 0x1e3   : > { %v8850_v47 = vpop.eup %8849  ;;  %v2078_v59 = vsub.f32 %v13893_v48, %v2074_v8  ;;  %v2090_v54 = vsub.f32 %v13894_v29, %v2086_v57  ;;  %v1591_v33 = vadd.f32 %v13896_v37, %v13895_v30  ;;  %vm2072_vm12 = vcmp.ge.f32.partialorder %v10831_v19, 0.0 }
 0x1e4   : > { %v2067_v22 = vmul.f32 %v8850_v47, %v10816_v5  ;;  %8859 = vrcp.f32 %v2323_v18  ;;  %v2317_v25 = vadd.f32 %v2313_v51, %v10778_v16  ;;  %vm2073_vm13 = vcmp.ge.f32.partialorder %v10862_v40, 0.0 }
 0x1e5   : > { %v2082_v8 = vsel %vm2070_vm10, %v13893_v48, %v2078_v59  ;;  %v2094_v14 = vsel %vm2070_vm10, %v13894_v29, %v2090_v54  ;;  %v13898_v48 = vld [vmem:[#allocation5_spill] sm:$0xff]  ;;  %vm2334_vm14 = vcmp.ge.f32.partialorder %v10870_v12, 0.0  ;;  %vm2332_vm15 = vcmp.ge.f32.partialorder %v10879_v3, 0.0 }
 0x1e6   : > { %v8852_v6 = vpop.eup %8851  ;;  %v2075_v57 = vmul.f32 %v2067_v22, %v10679_v52  ;;  %v2087_v45 = vmul.f32 %v2067_v22, %v10685_v50  ;;  %v2099_v27 = vmul.f32 %v2067_v22, %v13897_v1  ;;  %v2111_v18 = vadd.f32 %v2094_v14, %v1849_v43 }
 0x1e7   : > { %v2068_v41 = vmul.f32 %v8852_v6, %v10831_v19  ;;  %v1853_v52 = vadd.f32 %v10796_v58, %v1591_v33  ;;  %v2321_v16 = vadd.f32 1e-06, %v2317_v25  ;;  %v2110_v6 = vadd.f32 %v2082_v8, %v10725_v61  ;;  %v8745_v19 = vld [vmem:[%s13508_s2 + $0x20] sm:$0xff]  }
 0x1e8   : > { %v2079_v46 = vsub.f32 %v10543_v15, %v2075_v57  ;;  %v2091_v47 = vsub.f32 %v10552_v13, %v2087_v45  ;;  %vm2335_vm1 = vcmp.ge.f32.partialorder %v10883_v2, 0.0  ;;  %vm2333_vm2 = vcmp.ge.f32.partialorder %v10898_v34, 0.0 }
 0x1e9   : > { %v2076_v50 = vmul.f32 %v2068_v41, %v10730_v9  ;;  %v10920_v23 = vmul.f32 %v2068_v41, %v10740_v60  ;;  %v10923_v59 = vmul.f32 %v13898_v48, %v2068_v41  ;;  %v13899_v9 = vld [vmem:[#allocation6_spill] sm:$0xff]  ;;  %v13900_v60 = vld [vmem:[#allocation3_spill] sm:$0xff]  ;;  %8861 = vrcp.f32 %v2321_v16 }
 0x1ea   : > { %v2083_v29 = vsel %vm2071_vm11, %v10543_v15, %v2079_v46  ;;  %v2095_v58 = vsel %vm2071_vm11, %v10552_v13, %v2091_v47  ;;  %v2102_v43 = vsub.f32 %v13899_v9, %v2098_v24  ;;  %v2103_v54 = vsub.f32 %v13900_v60, %v2099_v27  ;;  %v8854_v22 = vpop.eup %8853  ;;  %v13902_v47 = vld [vmem:[#allocation16_spill] sm:$0xff]  ;;  %v13904_v48 = vld [vmem:[#allocation22_spill] sm:$0xff] }
 0x1eb   : > { %v2080_v51 = vsub.f32 %v10577_v28, %v2076_v50  ;;  %v2092_v30 = vsub.f32 %v10585_v32, %v10920_v23  ;;  %v10940_v15 = vadd.f32 %v2095_v58, %v10851_v21  ;;  %v8856_v37 = vpop.eup %8855  ;;  %v2069_v33 = vmul.f32 %v8854_v22, %v10862_v40  ;;  %v13903_v50 = vld [vmem:[#allocation27_spill] sm:$0xff] }
 0x1ec   : > { %v2106_v13 = vsel %vm2070_vm10, %v13899_v9, %v2102_v43  ;;  %v2107_v24 = vsel %vm2071_vm11, %v13900_v60, %v2103_v54  ;;  %v8858_v57 = vpop.eup %8857  ;;  %v2330_v21 = vmul.f32 %v8856_v37, %v10870_v12  ;;  %v2113_v14 = vadd.f32 %v2083_v29, %v10801_v20  ;;  %v13905_v29 = vld [vmem:[#allocation23_spill] sm:$0xff]  ;;  %v13906_v9 = vld [vmem:[#allocation49_spill] sm:$0xff] }
 0x1ed   : > { %v10953_v45 = vsel %vm2072_vm12, %v10577_v28, %v2080_v51  ;;  %v2112_v1 = vadd.f32 %v2106_v13, %v1850_v4  ;;  %v10956_v27 = vadd.f32 %v2107_v24, %v1853_v52  ;;  %v2077_v56 = vmul.f32 %v2069_v33, %v10753_v17  ;;  %v13907_v37 = vld [vmem:[#allocation13_spill] sm:$0xff]  ;;  %v13908_v24 = vld [vmem:[#allocation10_spill] sm:$0xff]  ;;  %v13925_v12 = vld [vmem:[#allocation59_spill] sm:$0xff] }
 0x1ee   : > { %v2089_v41 = vmul.f32 %v2069_v33, %v10760_v49  ;;  %v10961_v5 = vmul.f32 %v13883_v42, %v2069_v33  ;;  %v2328_v61 = vmul.f32 %v8858_v57, %v10879_v3  ;;  %v8860_v8 = vpop.eup %8859  ;;  %v2338_v28 = vmul.f32 %v2330_v21, %v10468_v7  ;;  %v13901_v42 = vld [vmem:[#allocation15_spill] sm:$0xff] }
 0x1ef   : > { %v2350_v25 = vmul.f32 %v2330_v21, %v13877_v0  ;;  %v10968_v4 = vmul.f32 %v10848_v26, %v2330_v21  ;;  %v2081_v17 = vsub.f32 %v10587_v62, %v2077_v56  ;;  %v2331_v26 = vmul.f32 %v8860_v8, %v10883_v2  ;;  %v13909_v56 = vld [vmem:[#allocation61_spill] sm:$0xff] }
 0x1f0   : > { %v2093_v49 = vsub.f32 %v10607_v36, %v2089_v41  ;;  %v2336_v46 = vmul.f32 %v2328_v61, %v13901_v42  ;;  %v2348_v52 = vmul.f32 %v2328_v61, %v13902_v47  ;;  %v2342_v23 = vsub.f32 %v13903_v50, %v2338_v28  ;;  %v13911_v28 = vld [vmem:[#allocation7_spill] sm:$0xff]  ;;  %v13913_v47 = vld [vmem:[#allocation21_spill] sm:$0xff] }
 0x1f1   : > { %v2366_v7 = vsub.f32 %v10803_v11, %v10968_v4  ;;  %v2360_v0 = vmul.f32 %v2328_v61, %v10857_v38  ;;  %v2085_v20 = vsel %vm2073_vm13, %v10587_v62, %v2081_v17  ;;  %v1855_v43 = vadd.f32 %v10700_v31, %v13906_v9  ;;  %v13912_v17 = vld [vmem:[#allocation37_spill] sm:$0xff]  ;;  %v13920_v9 = vld [vmem:[#allocation46_spill] sm:$0xff] }
 0x1f2   : > { %v2340_v16 = vsub.f32 %v13904_v48, %v2336_v46  ;;  %v2352_v58 = vsub.f32 %v13905_v29, %v2348_v52  ;;  %v10990_v60 = vsel %vm2334_vm14, %v13903_v50, %v2342_v23  ;;  %v2339_v54 = vmul.f32 %v2331_v26, %v13879_v63  ;;  %v13914_v52 = vld [vmem:[#allocation34_spill] sm:$0xff]  ;;  %v13915_v50 = vld [vmem:[#allocation64_spill] sm:$0xff] }
 0x1f3   : > { %v2364_v38 = vsub.f32 %v10813_v10, %v2360_v0  ;;  %v2351_v22 = vmul.f32 %v2331_v26, %v10495_v55  ;;  %v2363_v51 = vmul.f32 %v10868_v35, %v2331_v26  ;;  %v1858_v33 = vadd.f32 %v10748_v53, %v13907_v37  ;;  %v8862_v13 = vpop.eup %8861 }
 0x1f4   : > { %v2344_v62 = vsel %vm2332_vm15, %v13904_v48, %v2340_v16  ;;  %v2356_v31 = vsel %vm2332_vm15, %v13905_v29, %v2352_v58  ;;  %v2343_v63 = vsub.f32 %v13908_v24, %v2339_v54  ;;  %v2329_v35 = vmul.f32 %v8862_v13, %v10898_v34  ;;  %v13919_v16 = vld [vmem:[#allocation67_spill] sm:$0xff] }
 0x1f5   : > { %v2373_v57 = vadd.f32 %v2356_v31, %v2111_v18  ;;  %v2368_v55 = vsel %vm2332_vm15, %v10813_v10, %v2364_v38  ;;  %v2372_v21 = vadd.f32 %v2344_v62, %v2110_v6  ;;  %v2367_v41 = vsub.f32 %v13909_v56, %v2363_v51  ;;  %v13910_v10 = vld [vmem:[#allocation63_spill] sm:$0xff]  ;;  %v13921_v38 = vld [vmem:[#allocation60_spill] sm:$0xff] }
 0x1f6   : > { %v2374_v61 = vadd.f32 %v2368_v55, %v2112_v1  ;;  %v2096_v8 = vsel %vm2072_vm12, %v10585_v32, %v2092_v30  ;;  %v2347_v53 = vsel %vm2335_vm1, %v13908_v24, %v2343_v63  ;;  %v2097_v18 = vsel %vm2073_vm13, %v10607_v36, %v2093_v49  ;;  %v13916_v36 = vld [vmem:[#allocation32_spill] sm:$0xff]  ;;  %v13917_v49 = vld [vmem:[#allocation50_spill] sm:$0xff] }
 0x1f7   : > { %v2117_v3 = vadd.f32 %v2096_v8, %v1855_v43  ;;  %v2354_v6 = vsub.f32 %v13910_v10, %v2350_v25  ;;  %v2337_v4 = vmul.f32 %v2329_v35, %v13911_v28  ;;  %v2349_v42 = vmul.f32 %v2329_v35, %v13912_v17  ;;  %v13918_v25 = vld [vmem:[#allocation31_spill] sm:$0xff] }
 0x1f8   : > { %v2361_v1 = vmul.f32 %v2329_v35, %v10876_v44  ;;  %v2120_v46 = vadd.f32 %v2097_v18, %v1858_v33  ;;  %v2355_v32 = vsub.f32 %v13913_v47, %v2351_v22  ;;  %v1594_v23 = vadd.f32 %v13915_v50, %v13914_v52  ;;  %v13922_v22 = vld [vmem:[#allocation4_spill] sm:$0xff] }
 0x1f9   : > { %v2358_v30 = vsel %vm2334_vm14, %v13910_v10, %v2354_v6  ;;  %v1597_v0 = vadd.f32 %v13917_v49, %v13916_v36  ;;  %v2341_v26 = vsub.f32 %v13918_v25, %v2337_v4  ;;  %v2353_v29 = vsub.f32 %v13919_v16, %v2349_v42  ;;  %v13924_v10 = vld [vmem:[#allocation41_spill] sm:$0xff]  ;;  %v8748_v36 = vld [vmem:[%s13508_s2 + $0x38] sm:$0xff]  }
 0x1fa   : > { %v2365_v48 = vsub.f32 %v10824_v39, %v2361_v1  ;;  %v2379_v44 = vadd.f32 %v2358_v30, %v2117_v3  ;;  %v2359_v58 = vsel %vm2335_vm1, %v13913_v47, %v2355_v32  ;;  %v1856_v43 = vadd.f32 %v13920_v9, %v1594_v23 }
 0x1fb   : > { %v1859_v54 = vadd.f32 %v13921_v38, %v1597_v0  ;;  %v2104_v62 = vsub.f32 %v13922_v22, %v10923_v59  ;;  %v2345_v51 = vsel %vm2333_vm2, %v13918_v25, %v2341_v26  ;;  %v2357_v31 = vsel %vm2333_vm2, %v13919_v16, %v2353_v29  ;;  %v13923_v59 = vld [vmem:[#allocation66_spill] sm:$0xff]  ;;  %v11134_v26 = vld [vmem:[%s13508_s2 + $0x40] sm:$0xff]  }
 0x1fc   : > { %v2369_v37 = vsel %vm2333_vm2, %v10824_v39, %v2365_v48  ;;  %v2382_v33 = vadd.f32 %v2359_v58, %v2120_v46  ;;  %v2376_v13 = vadd.f32 %v2357_v31, %v10940_v15  ;;  %v2375_v63 = vadd.f32 %v2345_v51, %v2113_v14 }
 0x1fd   : > { %v2377_v24 = vadd.f32 %v2369_v37, %v10956_v27  ;;  %v2105_v55 = vsub.f32 %v13923_v59, %v10961_v5  ;;  %v2108_v8 = vsel %vm2072_vm12, %v13922_v22, %v2104_v62  ;;  %v2370_v18 = vsel %vm2334_vm14, %v10803_v11, %v2366_v7 }
 0x1fe   : > { %v2392_v35 = vpack.c.bf16 %v2382_v33, %v2379_v44  ;;  %v2371_v39 = vsel %vm2335_vm1, %v13909_v56, %v2367_v41  ;;  %v2389_v34 = vpack.c.bf16 %v2376_v13, %v2373_v57  ;;  %v2388_v27 = vpack.c.bf16 %v2375_v63, %v2372_v21 }
 0x1ff   : > { %v2390_v15 = vpack.c.bf16 %v2377_v24, %v2374_v61  ;;  %v2109_v5 = vsel %vm2073_vm13, %v13923_v59, %v2105_v55  ;;  %v2118_v14 = vadd.f32 %v2108_v8, %v1856_v43  ;;  %v2116_v11 = vadd.f32 %v10953_v45, %v13924_v10  ;;  %v8746_v45 = vld [vmem:[%s13508_s2 + $0x28] sm:$0xff]  }
 0x200   : > { %v2121_v3 = vadd.f32 %v2109_v5, %v1859_v54  ;;  %v2119_v7 = vadd.f32 %v2085_v20, %v13925_v12  ;;  %2411 = vmatprep.subr.bf16.mxu0 %v2389_v34  ;;  %vm2404_vm3 = vcmask 261120   ;;  %v13926_v20 = vmov 0  }
 0x201   : > { %8402 = vmatprep.subr.bf16.mxu1 %v2390_v15  ;;  %2412 = vmatpush1.bf16.msra.mxu0 %v2388_v27  ;;  %v2380_v2 = vadd.f32 %v2370_v18, %v2118_v14  ;;  %v2378_v40 = vadd.f32 %v10990_v60, %v2116_v11  ;;  %v8747_v60 = vld [vmem:[%s13508_s2 + $0x30] sm:$0xff]  }
 0x202   : > { %8403 = vmatpush3.bf16.msra.mxu1 %v2390_v15  ;;  %v2383_v57 = vadd.f32 %v2371_v39, %v2121_v3  ;;  %2413 = vmatprep.subr.bf16.mxu0 %v2392_v35  ;;  %v2381_v21 = vadd.f32 %v2347_v53, %v2119_v7 }
 0x203   : > { %8406 = vmatprep.mubr.msk.bf16.mxu1 %vm2404_vm3, %v8745_v19 }
 0x204   : > { %v2393_v56 = vpack.c.bf16 %v2383_v57, %v2380_v2  ;;  %v2391_v41 = vpack.c.bf16 %v2381_v21, %v2378_v40 }
 0x206   : > { %8404 = vmatprep.subr.bf16.mxu1 %v2393_v56  ;;  %2414 = vmatpush1.bf16.msra.mxu0 %v2391_v41 }
 0x207   : > { %8405 = vmatpush3.bf16.msra.mxu1 %v2393_v56 }
 0x209   : > { %7947 = vmatmul.mubr.msk.bf16.vlgmr.msra.gmra.mrb[108].mxu0 %vm2404_vm3, %v8745_v19 }
 0x20a   : > { %8407 = vmatmul.mubr.msk.bf16.vlgmr.msra.gmra.mrb[84].mxu1 %vm2404_vm3, %v8746_v45  ;;  %2453 = vmatprep.mubr.bf16.mxu0 %v13926_v20 }
 0x20b   : > { %2583 = vmatprep.mubr.bf16.mxu1 %v13926_v20 }
 0x211   : > { %7948 = vmatmul.mubr.msk.bf16.gmra.mrb[112].mxu0 %vm2404_vm3, %v8746_v45 }
 0x212   : > { %8414 = vmatprep.mubr.msk.bf16.mxu0 %vm2404_vm3, %v8747_v60 }
 0x2dc   : > { %v11087_v61 = vpop.f32.mrb[108].mxu0 }
 0x2dd   : > { %v11089_v53 = vpop.f32.mrb[84].mxu1  ;;  %v11091_v6 = vpop.f32.mrb[109].mxu0 }
 0x2de   : > { %v11093_v28 = vpop.f32.mrb[85].mxu1  ;;  %v11095_v4 = vpop.f32.mrb[110].mxu0 }
 0x2df   : > { %v11097_v17 = vpop.f32.mrb[86].mxu1  ;;  %v11099_v42 = vpop.f32.mrb[111].mxu0  ;;  %v2529_v46 = vpack.c.bf16 %v11095_v4, %v11087_v61 }
 0x2e0   : > { %v11101_v1 = vpop.f32.mrb[87].mxu1  ;;  %v2534_v47 = vpack.c.bf16 %v11097_v17, %v11089_v53  ;;  %v2530_v32 = vpack.c.bf16 %v11099_v42, %v11091_v6 }
 0x2e1   : > { %v2531_v30 = vpack.c.bf16 %v11101_v1, %v11093_v28 }
 0x2e2   : > { %2551 = vmatprep.subr.bf16.mxu1 %v2530_v32 }
 0x2e3   : > { %8410 = vmatprep.subr.bf16.mxu0 %v2531_v30  ;;  %2552 = vmatpush1.bf16.msra.mxu1 %v2529_v46 }
 0x2e4   : > { %8411 = vmatpush3.bf16.msra.mxu0 %v2531_v30  ;;  %v11111_v52 = vpop.f32.mrb[112].mxu0 }
 0x2e5   : > { %8412 = vmatprep.subr.bf16.mxu0 %v2534_v47  ;;  %v11113_v50 = vpop.f32.mrb[113].mxu0 }
 0x2e6   : > { %v11115_v23 = vpop.f32.mrb[114].mxu0 }
 0x2e7   : > { %v11120_v49 = vpop.f32.mrb[115].mxu0  ;;  %v2532_v0 = vpack.c.bf16 %v11115_v23, %v11111_v52 }
 0x2e8   : > { %13927 = vst [vmem:[#allocation62_spill] sm:$0xff] %v11120_v49  ;;  %8413 = vmatpush3.bf16.msra.mxu0 %v2534_v47  ;;  %v2533_v25 = vpack.c.bf16 %v11120_v49, %v11113_v50 }
 0x2ea   : > { %2553 = vmatprep.subr.bf16.mxu1 %v2533_v25 }
 0x2eb   : > { %8415 = vmatmul.mubr.msk.bf16.vlgmr.msra.gmra.mrb[116].mxu0 %vm2404_vm3, %v8748_v36  ;;  %2554 = vmatpush1.bf16.msra.mxu1 %v2532_v0 }
 0x2ec   : > { %2799 = vmatprep.mubr.bf16.mxu0 %v13926_v20 }
 0x2ee   : > { %7953 = vmatmul.mubr.msk.bf16.vlgmr.msra.gmra.mrb[88].mxu1 %vm2404_vm3, %v8747_v60 }
 0x2ef   : > { %2593 = vmatprep.mubr.bf16.mxu1 %v13926_v20 }
 0x2f6   : > { %7954 = vmatmul.mubr.msk.bf16.gmra.mrb[92].mxu1 %vm2404_vm3, %v8748_v36 }
 0x2f7   : > { %8422 = vmatprep.mubr.msk.bf16.mxu1 %vm2404_vm3, %v11134_v26 }
 0x3be   : > { %v11138_v48 = vpop.f32.mrb[116].mxu0 }
 0x3bf   : > { %v2667_v16 = vmul.f32 %v11138_v48, %v11089_v53  ;;  %v11142_v29 = vpop.f32.mrb[117].mxu0  ;;  %v2687_v56 = vmul.f32 %v11138_v48, %v11138_v48 }
 0x3c0   : > { %v2665_v44 = vmul.f32 %v11142_v29, %v11093_v28  ;;  %v11146_v58 = vpop.f32.mrb[118].mxu0  ;;  %v2685_v31 = vmul.f32 %v11142_v29, %v11142_v29 }
 0x3c1   : > { %v2668_v9 = vmul.f32 %v11146_v58, %v11097_v17  ;;  %v11150_v43 = vpop.f32.mrb[119].mxu0  ;;  %v2585_v54 = vpop.f32.mrb[88].mxu1 }
 0x3c2   : > { %v2666_v38 = vmul.f32 %v11150_v43, %v11101_v1  ;;  %v2653_v22 = vmul.f32 %v2585_v54, %v11087_v61  ;;  %v2673_v62 = vmul.f32 %v2585_v54, %v2585_v54  ;;  %v2587_v51 = vpop.f32.mrb[89].mxu1  ;;  %v2686_v24 = vmul.f32 %v11150_v43, %v11150_v43 }
 0x3c3   : > { %v2657_v37 = vmul.f32 %v2587_v51, %v11091_v6  ;;  %v2677_v33 = vmul.f32 %v2587_v51, %v2587_v51  ;;  %v2589_v13 = vpop.f32.mrb[90].mxu1 }
 0x3c4   : > { %v2654_v63 = vmul.f32 %v2589_v13, %v11095_v4  ;;  %v2674_v59 = vmul.f32 %v2589_v13, %v2589_v13  ;;  %v2591_v55 = vpop.f32.mrb[91].mxu1 }
 0x3c5   : > { %v2661_v35 = vadd.f32 %v2657_v37, %v2653_v22  ;;  %v2681_v8 = vadd.f32 %v2677_v33, %v2673_v62  ;;  %v2658_v18 = vmul.f32 %v2591_v55, %v11099_v42  ;;  %v2678_v39 = vmul.f32 %v2591_v55, %v2591_v55 }
 0x3c7   : > { %v2669_v34 = vadd.f32 %v2665_v44, %v2661_v35  ;;  %v2689_v15 = vadd.f32 %v2685_v31, %v2681_v8  ;;  %v2662_v27 = vadd.f32 %v2658_v18, %v2654_v63  ;;  %v2682_v5 = vadd.f32 %v2678_v39, %v2674_v59 }
 0x3c8   : > { %v2688_v44 = vmul.f32 %v11146_v58, %v11146_v58 }
 0x3c9   : > { %v2693_v19 = vadd.f32 1e-06, %v2689_v15  ;;  %v2670_v14 = vadd.f32 %v2666_v38, %v2662_v27  ;;  %v2690_v3 = vadd.f32 %v2686_v24, %v2682_v5  ;;  %v2595_v10 = vpop.f32.mrb[92].mxu1  ;;  %vm2705_vm4 = vcmp.ge.f32.partialorder %v2669_v34, 0.0 }
 0x3ca   : > { %v2655_v11 = vmul.f32 %v2595_v10, %v11111_v52  ;;  %v2675_v12 = vmul.f32 %v2595_v10, %v2595_v10  ;;  %v2597_v7 = vpop.f32.mrb[93].mxu1 }
 0x3cb   : > { %8863 = vrcp.f32 %v2693_v19  ;;  %v2694_v2 = vadd.f32 1e-06, %v2690_v3  ;;  %v2659_v57 = vmul.f32 %v2597_v7, %v11113_v50  ;;  %v2679_v40 = vmul.f32 %v2597_v7, %v2597_v7  ;;  %v2599_v21 = vpop.f32.mrb[94].mxu1 }
 0x3cc   : > { %v2656_v41 = vmul.f32 %v2599_v21, %v11115_v23  ;;  %v2676_v45 = vmul.f32 %v2599_v21, %v2599_v21  ;;  %v2601_v60 = vpop.f32.mrb[95].mxu1  ;;  %vm2706_vm5 = vcmp.ge.f32.partialorder %v2670_v14, 0.0 }
 0x3cd   : > { %8865 = vrcp.f32 %v2694_v2  ;;  %v2663_v46 = vadd.f32 %v2659_v57, %v2655_v11  ;;  %v2683_v47 = vadd.f32 %v2679_v40, %v2675_v12  ;;  %v2660_v32 = vmul.f32 %v2601_v60, %v11120_v49 }
 0x3ce   : > { %v2680_v30 = vmul.f32 %v2601_v60, %v2601_v60 }
 0x3cf   : > { %v2671_v36 = vadd.f32 %v2667_v16, %v2663_v46  ;;  %v2691_v0 = vadd.f32 %v2687_v56, %v2683_v47  ;;  %v2664_v25 = vadd.f32 %v2660_v32, %v2656_v41 }
 0x3d0   : > { %v2684_v38 = vadd.f32 %v2680_v30, %v2676_v45 }
 0x3d1   : > { %v2695_v22 = vadd.f32 1e-06, %v2691_v0  ;;  %v2672_v62 = vadd.f32 %v2668_v9, %v2664_v25  ;;  %vm2707_vm6 = vcmp.ge.f32.partialorder %v2671_v36, 0.0 }
 0x3d2   : > { %v2692_v31 = vadd.f32 %v2688_v44, %v2684_v38 }
 0x3d3   : > { %8867 = vrcp.f32 %v2695_v22  ;;  %vm2708_vm7 = vcmp.ge.f32.partialorder %v2672_v62, 0.0 }
 0x3d4   : > { %v2696_v37 = vadd.f32 1e-06, %v2692_v31 }
 0x3d5   : > { %v8864_v33 = vpop.eup %8863 }
 0x3d6   : > { %v2701_v24 = vmul.f32 %v8864_v33, %v2669_v34  ;;  %8869 = vrcp.f32 %v2696_v37 }
 0x3d7   : > { %v8866_v63 = vpop.eup %8865 }
 0x3d8   : > { %v2709_v59 = vmul.f32 %v2701_v24, %v2585_v54  ;;  %v2721_v35 = vmul.f32 %v2701_v24, %v2587_v51  ;;  %v2702_v8 = vmul.f32 %v8866_v63, %v2670_v14  ;;  %v2733_v16 = vmul.f32 %v2701_v24, %v11142_v29  ;;  %v8750_v24 = vld [vmem:[%s13508_s2 + $0x48] sm:$0xff]  }
 0x3da   : > { %v2725_v18 = vsub.f32 %v11091_v6, %v2721_v35  ;;  %v2710_v39 = vmul.f32 %v2702_v8, %v2589_v13  ;;  %v2722_v15 = vmul.f32 %v2702_v8, %v2591_v55  ;;  %v2734_v27 = vmul.f32 %v2702_v8, %v11150_v43 }
 0x3db   : > { %v2737_v9 = vsub.f32 %v11093_v28, %v2733_v16  ;;  %v2713_v5 = vsub.f32 %v11087_v61, %v2709_v59 }
 0x3dc   : > { %v2726_v19 = vsub.f32 %v11099_v42, %v2722_v15  ;;  %v2729_v3 = vsel %vm2705_vm4, %v11091_v6, %v2725_v18  ;;  %v2738_v54 = vsub.f32 %v11101_v1, %v2734_v27  ;;  %v2714_v51 = vsub.f32 %v11095_v4, %v2710_v39 }
 0x3dd   : > { %v8868_v29 = vpop.eup %8867  ;;  %v2741_v13 = vsel %vm2705_vm4, %v11093_v28, %v2737_v9  ;;  %v2717_v55 = vsel %vm2705_vm4, %v11087_v61, %v2713_v5 }
 0x3de   : > { %v2703_v43 = vmul.f32 %v8868_v29, %v2671_v36  ;;  %v2730_v34 = vsel %vm2706_vm5, %v11099_v42, %v2726_v19  ;;  %v2742_v11 = vsel %vm2706_vm5, %v11101_v1, %v2738_v54  ;;  %v2718_v12 = vsel %vm2706_vm5, %v11095_v4, %v2714_v51  ;;  %v8752_v51 = vld [vmem:[%s13508_s2 + $0x58] sm:$0xff]  }
 0x3df   : > { %v2746_v2 = vpack.c.bf16 %v2730_v34, %v2729_v3  ;;  %v2747_v57 = vpack.c.bf16 %v2742_v11, %v2741_v13  ;;  %v2745_v40 = vpack.c.bf16 %v2718_v12, %v2717_v55 }
 0x3e0   : > { %v8870_v56 = vpop.eup %8869  ;;  %v2711_v41 = vmul.f32 %v2703_v43, %v2595_v10  ;;  %v2723_v45 = vmul.f32 %v2703_v43, %v2597_v7  ;;  %v2735_v46 = vmul.f32 %v11138_v48, %v2703_v43  ;;  %v11258_v43 = vld [vmem:[%s13508_s2 + $0x60] sm:$0xff]  }
 0x3e1   : > { %v2704_v14 = vmul.f32 %v8870_v56, %v2672_v62  ;;  %2767 = vmatprep.subr.bf16.mxu0 %v2746_v2  ;;  %8418 = vmatprep.subr.bf16.mxu1 %v2747_v57  ;;  %v8751_v62 = vld [vmem:[%s13508_s2 + $0x50] sm:$0xff]  }
 0x3e2   : > { %v2727_v47 = vsub.f32 %v11113_v50, %v2723_v45  ;;  %2768 = vmatpush1.bf16.msra.mxu0 %v2745_v40  ;;  %8419 = vmatpush3.bf16.msra.mxu1 %v2747_v57  ;;  %v2739_v32 = vsub.f32 %v11089_v53, %v2735_v46  ;;  %v2715_v30 = vsub.f32 %v11111_v52, %v2711_v41 }
 0x3e3   : > { %v2712_v0 = vmul.f32 %v2704_v14, %v2599_v21  ;;  %v2724_v25 = vmul.f32 %v2704_v14, %v2601_v60  ;;  %v2736_v44 = vmul.f32 %v11146_v58, %v2704_v14 }
 0x3e4   : > { %v2731_v10 = vsel %vm2707_vm6, %v11113_v50, %v2727_v47  ;;  %v2743_v48 = vsel %vm2707_vm6, %v11089_v53, %v2739_v32  ;;  %v2719_v7 = vsel %vm2707_vm6, %v11111_v52, %v2715_v30 }
 0x3e5   : > { %v2728_v38 = vsub.f32 %v11120_v49, %v2724_v25  ;;  %v2740_v22 = vsub.f32 %v11097_v17, %v2736_v44  ;;  %v2716_v31 = vsub.f32 %v11115_v23, %v2712_v0 }
 0x3e7   : > { %v2732_v37 = vsel %vm2708_vm7, %v11120_v49, %v2728_v38  ;;  %v2744_v21 = vsel %vm2708_vm7, %v11097_v17, %v2740_v22  ;;  %v2720_v60 = vsel %vm2708_vm7, %v11115_v23, %v2716_v31 }
 0x3e8   : > { %v2749_v58 = vpack.c.bf16 %v2732_v37, %v2731_v10  ;;  %v2750_v36 = vpack.c.bf16 %v2744_v21, %v2743_v48  ;;  %v2748_v33 = vpack.c.bf16 %v2720_v60, %v2719_v7 }
 0x3ea   : > { %2769 = vmatprep.subr.bf16.mxu0 %v2749_v58  ;;  %8420 = vmatprep.subr.bf16.mxu1 %v2750_v36 }
 0x3eb   : > { %2770 = vmatpush1.bf16.msra.mxu0 %v2748_v33  ;;  %8421 = vmatpush3.bf16.msra.mxu1 %v2750_v36 }
 0x3ee   : > { %7959 = vmatmul.mubr.msk.bf16.vlgmr.msra.gmra.mrb[120].mxu0 %vm2404_vm3, %v11134_v26  ;;  %8423 = vmatmul.mubr.msk.bf16.vlgmr.msra.gmra.mrb[96].mxu1 %vm2404_vm3, %v8750_v24 }
 0x3ef   : > { %2809 = vmatprep.mubr.bf16.mxu0 %v13926_v20  ;;  %2923 = vmatprep.mubr.bf16.mxu1 %v13926_v20 }
 0x3f6   : > { %7960 = vmatmul.mubr.msk.bf16.gmra.mrb[124].mxu0 %vm2404_vm3, %v8750_v24 }
 0x3f7   : > { %8430 = vmatprep.mubr.msk.bf16.mxu0 %vm2404_vm3, %v8751_v62 }
 0x4c1   : > { %v11211_v63 = vpop.f32.mrb[120].mxu0  ;;  %v11213_v59 = vpop.f32.mrb[96].mxu1 }
 0x4c2   : > { %v11215_v35 = vpop.f32.mrb[121].mxu0  ;;  %v11217_v26 = vpop.f32.mrb[97].mxu1 }
 0x4c3   : > { %v11219_v8 = vpop.f32.mrb[122].mxu0  ;;  %v11221_v16 = vpop.f32.mrb[98].mxu1 }
 0x4c4   : > { %v2869_v18 = vpack.c.bf16 %v11219_v8, %v11211_v63  ;;  %v11225_v39 = vpop.f32.mrb[123].mxu0  ;;  %v11227_v15 = vpop.f32.mrb[99].mxu1  ;;  %v2874_v27 = vpack.c.bf16 %v11221_v16, %v11213_v59 }
 0x4c5   : > { %v2870_v9 = vpack.c.bf16 %v11225_v39, %v11215_v35  ;;  %v2871_v5 = vpack.c.bf16 %v11227_v15, %v11217_v26 }
 0x4c7   : > { %2891 = vmatprep.subr.bf16.mxu1 %v2870_v9  ;;  %8426 = vmatprep.subr.bf16.mxu0 %v2871_v5 }
 0x4c8   : > { %2892 = vmatpush1.bf16.msra.mxu1 %v2869_v18  ;;  %8427 = vmatpush3.bf16.msra.mxu0 %v2871_v5 }
 0x4c9   : > { %v11235_v19 = vpop.f32.mrb[124].mxu0  ;;  %8428 = vmatprep.subr.bf16.mxu0 %v2874_v27 }
 0x4ca   : > { %v11237_v3 = vpop.f32.mrb[125].mxu0 }
 0x4cb   : > { %v11239_v54 = vpop.f32.mrb[126].mxu0 }
 0x4cc   : > { %v2872_v29 = vpack.c.bf16 %v11239_v54, %v11235_v19  ;;  %v11246_v13 = vpop.f32.mrb[127].mxu0  ;;  %8429 = vmatpush3.bf16.msra.mxu0 %v2874_v27 }
 0x4cd   : > { %v2873_v55 = vpack.c.bf16 %v11246_v13, %v11237_v3 }
 0x4cf   : > { %2893 = vmatprep.subr.bf16.mxu1 %v2873_v55  ;;  %8431 = vmatmul.mubr.msk.bf16.vlgmr.msra.gmra.mrb[128].mxu0 %vm2404_vm3, %v8752_v51 }
 0x4d0   : > { %2894 = vmatpush1.bf16.msra.mxu1 %v2872_v29  ;;  %3139 = vmatprep.mubr.bf16.mxu0 %v13926_v20 }
 0x4d3   : > { %7965 = vmatmul.mubr.msk.bf16.vlgmr.msra.gmra.mrb[100].mxu1 %vm2404_vm3, %v8751_v62 }
 0x4d4   : > { %2933 = vmatprep.mubr.bf16.mxu1 %v13926_v20 }
 0x4db   : > { %7966 = vmatmul.mubr.msk.bf16.gmra.mrb[104].mxu1 %vm2404_vm3, %v8752_v51 }
 0x4dc   : > { %8438 = vmatprep.mubr.msk.bf16.mxu1 %vm2404_vm3, %v11258_v43 }
 0x5a2   : > { %v11262_v34 = vpop.f32.mrb[128].mxu0 }
 0x5a3   : > { %v3007_v11 = vmul.f32 %v11262_v34, %v11213_v59  ;;  %v11266_v12 = vpop.f32.mrb[129].mxu0 }
 0x5a4   : > { %v3005_v2 = vmul.f32 %v11266_v12, %v11217_v26  ;;  %v11270_v57 = vpop.f32.mrb[130].mxu0  ;;  %v3025_v32 = vmul.f32 %v11266_v12, %v11266_v12 }
 0x5a5   : > { %v3008_v40 = vmul.f32 %v11270_v57, %v11221_v16  ;;  %v11274_v56 = vpop.f32.mrb[131].mxu0 }
 0x5a6   : > { %v3006_v41 = vmul.f32 %v11274_v56, %v11227_v15  ;;  %v2925_v45 = vpop.f32.mrb[100].mxu1  ;;  %v3026_v44 = vmul.f32 %v11274_v56, %v11274_v56 }
 0x5a7   : > { %v2993_v46 = vmul.f32 %v2925_v45, %v11211_v63  ;;  %v3013_v14 = vmul.f32 %v2925_v45, %v2925_v45  ;;  %v2927_v47 = vpop.f32.mrb[101].mxu1 }
 0x5a8   : > { %v2997_v30 = vmul.f32 %v2927_v47, %v11215_v35  ;;  %v3017_v0 = vmul.f32 %v2927_v47, %v2927_v47  ;;  %v2929_v25 = vpop.f32.mrb[102].mxu1 }
 0x5a9   : > { %v2994_v10 = vmul.f32 %v2929_v25, %v11219_v8  ;;  %v3014_v48 = vmul.f32 %v2929_v25, %v2929_v25  ;;  %v2931_v7 = vpop.f32.mrb[103].mxu1 }
 0x5aa   : > { %v3001_v38 = vadd.f32 %v2997_v30, %v2993_v46  ;;  %v3021_v22 = vadd.f32 %v3017_v0, %v3013_v14  ;;  %v2998_v31 = vmul.f32 %v2931_v7, %v11225_v39  ;;  %v3018_v37 = vmul.f32 %v2931_v7, %v2931_v7 }
 0x5ac   : > { %v3009_v21 = vadd.f32 %v3005_v2, %v3001_v38  ;;  %v3029_v60 = vadd.f32 %v3025_v32, %v3021_v22  ;;  %v3002_v58 = vadd.f32 %v2998_v31, %v2994_v10  ;;  %v3022_v36 = vadd.f32 %v3018_v37, %v3014_v48 }
 0x5ad   : > { %v3027_v2 = vmul.f32 %v11262_v34, %v11262_v34  ;;  %v3028_v31 = vmul.f32 %v11270_v57, %v11270_v57 }
 0x5ae   : > { %v3033_v33 = vadd.f32 1e-06, %v3029_v60  ;;  %v3010_v24 = vadd.f32 %v3006_v41, %v3002_v58  ;;  %v3030_v62 = vadd.f32 %v3026_v44, %v3022_v36  ;;  %v2935_v18 = vpop.f32.mrb[104].mxu1  ;;  %vm3045_vm8 = vcmp.ge.f32.partialorder %v3009_v21, 0.0 }
 0x5af   : > { %v2995_v27 = vmul.f32 %v2935_v18, %v11235_v19  ;;  %v3015_v9 = vmul.f32 %v2935_v18, %v2935_v18  ;;  %v2937_v5 = vpop.f32.mrb[105].mxu1 }
 0x5b0   : > { %8871 = vrcp.f32 %v3033_v33  ;;  %v3034_v51 = vadd.f32 1e-06, %v3030_v62  ;;  %v2999_v29 = vmul.f32 %v2937_v5, %v11237_v3  ;;  %v3019_v55 = vmul.f32 %v2937_v5, %v2937_v5  ;;  %v2939_v46 = vpop.f32.mrb[106].mxu1 }
 0x5b1   : > { %v2996_v14 = vmul.f32 %v2939_v46, %v11239_v54  ;;  %v3016_v32 = vmul.f32 %v2939_v46, %v2939_v46  ;;  %v2941_v30 = vpop.f32.mrb[107].mxu1  ;;  %vm3046_vm9 = vcmp.ge.f32.partialorder %v3010_v24, 0.0 }
 0x5b2   : > { %8873 = vrcp.f32 %v3034_v51  ;;  %v3003_v41 = vadd.f32 %v2999_v29, %v2995_v27  ;;  %v3023_v0 = vadd.f32 %v3019_v55, %v3015_v9  ;;  %v3000_v44 = vmul.f32 %v2941_v30, %v11246_v13 }
 0x5b3   : > { %v3020_v10 = vmul.f32 %v2941_v30, %v2941_v30 }
 0x5b4   : > { %v3011_v48 = vadd.f32 %v3007_v11, %v3003_v41  ;;  %v3031_v38 = vadd.f32 %v3027_v2, %v3023_v0  ;;  %v3004_v22 = vadd.f32 %v3000_v44, %v2996_v14 }
 0x5b5   : > { %v3024_v37 = vadd.f32 %v3020_v10, %v3016_v32 }
 0x5b6   : > { %v3035_v60 = vadd.f32 1e-06, %v3031_v38  ;;  %v3012_v58 = vadd.f32 %v3008_v40, %v3004_v22  ;;  %vm3047_vm10 = vcmp.ge.f32.partialorder %v3011_v48, 0.0 }
 0x5b7   : > { %v3032_v36 = vadd.f32 %v3028_v31, %v3024_v37 }
 0x5b8   : > { %8875 = vrcp.f32 %v3035_v60  ;;  %vm3048_vm11 = vcmp.ge.f32.partialorder %v3012_v58, 0.0 }
 0x5b9   : > { %v3036_v33 = vadd.f32 1e-06, %v3032_v36 }
 0x5ba   : > { %v8872_v62 = vpop.eup %8871 }
 0x5bb   : > { %v3041_v49 = vmul.f32 %v8872_v62, %v3009_v21  ;;  %8877 = vrcp.f32 %v3036_v33 }
 0x5bc   : > { %v8874_v27 = vpop.eup %8873 }
 0x5bd   : > { %v3049_v9 = vmul.f32 %v3041_v49, %v2925_v45  ;;  %v3061_v51 = vmul.f32 %v3041_v49, %v2927_v47  ;;  %v3042_v29 = vmul.f32 %v8874_v27, %v3010_v24  ;;  %v3073_v11 = vmul.f32 %v3041_v49, %v11266_v12 }
 0x5bf   : > { %v3065_v55 = vsub.f32 %v11215_v35, %v3061_v51  ;;  %v3050_v2 = vmul.f32 %v3042_v29, %v2929_v25  ;;  %v3062_v14 = vmul.f32 %v3042_v29, %v2931_v7  ;;  %v3074_v32 = vmul.f32 %v3042_v29, %v11274_v56 }
 0x5c0   : > { %v3077_v40 = vsub.f32 %v11217_v26, %v3073_v11  ;;  %v3053_v41 = vsub.f32 %v11211_v63, %v3049_v9 }
 0x5c1   : > { %v3066_v0 = vsub.f32 %v11225_v39, %v3062_v14  ;;  %v3069_v44 = vsel %vm3045_vm8, %v11215_v35, %v3065_v55  ;;  %v3078_v45 = vsub.f32 %v11227_v15, %v3074_v32  ;;  %v3054_v47 = vsub.f32 %v11219_v8, %v3050_v2 }
 0x5c2   : > { %v8876_v49 = vpop.eup %8875  ;;  %v3081_v12 = vsel %vm3045_vm8, %v11217_v26, %v3077_v40  ;;  %v3057_v25 = vsel %vm3045_vm8, %v11211_v63, %v3053_v41 }
 0x5c3   : > { %v3043_v56 = vmul.f32 %v8876_v49, %v3011_v48  ;;  %v3070_v7 = vsel %vm3046_vm9, %v11225_v39, %v3066_v0  ;;  %v3082_v21 = vsel %vm3046_vm9, %v11227_v15, %v3078_v45  ;;  %v3058_v10 = vsel %vm3046_vm9, %v11219_v8, %v3054_v47 }
 0x5c4   : > { %v3086_v38 = vpack.c.bf16 %v3070_v7, %v3069_v44  ;;  %v3087_v22 = vpack.c.bf16 %v3082_v21, %v3081_v12  ;;  %v3085_v35 = vpack.c.bf16 %v3058_v10, %v3057_v25  ;;  %v13929_v25 = vld [vmem:[#allocation62_spill] sm:$0xff] }
 0x5c5   : > { %v8878_v31 = vpop.eup %8877  ;;  %v3051_v37 = vmul.f32 %v3043_v56, %v2935_v18  ;;  %v3063_v60 = vmul.f32 %v3043_v56, %v2937_v5  ;;  %v3075_v36 = vmul.f32 %v11262_v34, %v3043_v56 }
 0x5c6   : > { %v3044_v24 = vmul.f32 %v8878_v31, %v3012_v58  ;;  %3107 = vmatprep.subr.bf16.mxu0 %v3086_v38  ;;  %8434 = vmatprep.subr.bf16.mxu1 %v3087_v22 }
 0x5c7   : > { %v3067_v63 = vsub.f32 %v11237_v3, %v3063_v60  ;;  %3108 = vmatpush1.bf16.msra.mxu0 %v3085_v35  ;;  %8435 = vmatpush3.bf16.msra.mxu1 %v3087_v22  ;;  %v3079_v26 = vsub.f32 %v11213_v59, %v3075_v36  ;;  %v3055_v39 = vsub.f32 %v11235_v19, %v3051_v37 }
 0x5c8   : > { %v3052_v8 = vmul.f32 %v3044_v24, %v2939_v46  ;;  %v3064_v15 = vmul.f32 %v3044_v24, %v2941_v30  ;;  %v3076_v33 = vmul.f32 %v11270_v57, %v3044_v24 }
 0x5c9   : > { %v3071_v18 = vsel %vm3047_vm10, %v11237_v3, %v3067_v63  ;;  %v3083_v34 = vsel %vm3047_vm10, %v11213_v59, %v3079_v26  ;;  %v3059_v5 = vsel %vm3047_vm10, %v11235_v19, %v3055_v39  ;;  %v8754_v59 = vld [vmem:[%s13508_s2 + $0x68] sm:$0xff]  }
 0x5ca   : > { %v3068_v62 = vsub.f32 %v11246_v13, %v3064_v15  ;;  %v3080_v27 = vsub.f32 %v11221_v16, %v3076_v33  ;;  %v3056_v9 = vsub.f32 %v11239_v54, %v3052_v8 }
 0x5cc   : > { %v3072_v51 = vsel %vm3048_vm11, %v11246_v13, %v3068_v62  ;;  %v3084_v46 = vsel %vm3048_vm11, %v11221_v16, %v3080_v27  ;;  %v3060_v30 = vsel %vm3048_vm11, %v11239_v54, %v3056_v9  ;;  %v8755_v16 = vld [vmem:[%s13508_s2 + $0x70] sm:$0xff]  }
 0x5cd   : > { %v3089_v57 = vpack.c.bf16 %v3072_v51, %v3071_v18  ;;  %v3090_v48 = vpack.c.bf16 %v3084_v46, %v3083_v34  ;;  %v3088_v3 = vpack.c.bf16 %v3060_v30, %v3059_v5 }
 0x5cf   : > { %3109 = vmatprep.subr.bf16.mxu0 %v3089_v57  ;;  %8436 = vmatprep.subr.bf16.mxu1 %v3090_v48 }
 0x5d0   : > { %3110 = vmatpush1.bf16.msra.mxu0 %v3088_v3  ;;  %8437 = vmatpush3.bf16.msra.mxu1 %v3090_v48 }
 0x5d3   : > { %7971 = vmatmul.mubr.msk.bf16.vlgmr.msra.gmra.mrb[132].mxu0 %vm2404_vm3, %v11258_v43  ;;  %8439 = vmatmul.mubr.msk.bf16.vlgmr.msra.gmra.mrb[108].mxu1 %vm2404_vm3, %v8754_v59 }
 0x5d4   : > { %3149 = vmatprep.mubr.bf16.mxu0 %v13926_v20  ;;  %3291 = vmatprep.mubr.bf16.mxu1 %v13926_v20 }
 0x5db   : > { %7972 = vmatmul.mubr.msk.bf16.gmra.mrb[136].mxu0 %vm2404_vm3, %v8754_v59 }
 0x5dc   : > { %8446 = vmatprep.mubr.msk.bf16.mxu0 %vm2404_vm3, %v8755_v16 }
 0x6a6   : > { %v3141_v19 = vpop.f32.mrb[132].mxu0  ;;  %v8440_v54 = vpop.f32.mrb[108].mxu1 }
 0x6a7   : > { %v11336_v13 = vadd.f32 %v3141_v19, %v11087_v61  ;;  %v11339_v43 = vadd.f32 %v8440_v54, %v11089_v53  ;;  %v3143_v58 = vpop.f32.mrb[133].mxu0  ;;  %v3194_v29 = vpop.f32.mrb[109].mxu1 }
 0x6a8   : > { %v11342_v11 = vadd.f32 %v3143_v58, %v11091_v6  ;;  %v11345_v55 = vadd.f32 %v3194_v29, %v11093_v28  ;;  %v3145_v2 = vpop.f32.mrb[134].mxu0  ;;  %v8441_v14 = vpop.f32.mrb[110].mxu1 }
 0x6a9   : > { %v11348_v32 = vadd.f32 %v3145_v2, %v11095_v4  ;;  %v11351_v40 = vadd.f32 %v8441_v14, %v11097_v17  ;;  %v3147_v61 = vpop.f32.mrb[135].mxu0  ;;  %v3197_v41 = vpop.f32.mrb[111].mxu1 }
 0x6aa   : > { %v11354_v53 = vadd.f32 %v3147_v61, %v11099_v42  ;;  %v11357_v0 = vadd.f32 %v3197_v41, %v11101_v1 }
 0x6ab   : > { %v3237_v4 = vpack.c.bf16 %v11348_v32, %v11336_v13  ;;  %v3242_v17 = vpack.c.bf16 %v11351_v40, %v11339_v43 }
 0x6ac   : > { %v3238_v6 = vpack.c.bf16 %v11354_v53, %v11342_v11  ;;  %v3239_v28 = vpack.c.bf16 %v11357_v0, %v11345_v55 }
 0x6ae   : > { %v3151_v44 = vpop.f32.mrb[136].mxu0  ;;  %3259 = vmatprep.subr.bf16.mxu1 %v3238_v6  ;;  %8442 = vmatprep.subr.bf16.mxu0 %v3239_v28 }
 0x6af   : > { %v11368_v42 = vadd.f32 %v3151_v44, %v11111_v52  ;;  %v3153_v1 = vpop.f32.mrb[137].mxu0  ;;  %3260 = vmatpush1.bf16.msra.mxu1 %v3237_v4  ;;  %8443 = vmatpush3.bf16.msra.mxu0 %v3239_v28  ;;  %v8756_v52 = vld [vmem:[%s13508_s2 + $0x78] sm:$0xff]  }
 0x6b0   : > { %v11371_v45 = vadd.f32 %v3153_v1, %v11113_v50  ;;  %v3155_v47 = vpop.f32.mrb[138].mxu0  ;;  %8444 = vmatprep.subr.bf16.mxu0 %v3242_v17 }
 0x6b1   : > { %13928 = vst [vmem:[#allocation47_spill] sm:$0xff] %v11368_v42  ;;  %v11374_v49 = vadd.f32 %v3155_v47, %v11115_v23  ;;  %v3157_v12 = vpop.f32.mrb[139].mxu0  ;;  %v11394_v23 = vld [vmem:[%s13508_s2 + $0x80] sm:$0xff]  }
 0x6b2   : > { %v11377_v56 = vadd.f32 %v3157_v12, %v13929_v25 }
 0x6b3   : > { %8445 = vmatpush3.bf16.msra.mxu0 %v3242_v17  ;;  %v3240_v50 = vpack.c.bf16 %v11374_v49, %v11368_v42 }
 0x6b4   : > { %v3241_v7 = vpack.c.bf16 %v11377_v56, %v11371_v45 }
 0x6b6   : > { %3261 = vmatprep.subr.bf16.mxu1 %v3241_v7  ;;  %8447 = vmatmul.mubr.msk.bf16.vlgmr.msra.gmra.mrb[140].mxu0 %vm2404_vm3, %v8756_v52 }
 0x6b7   : > { %3262 = vmatpush1.bf16.msra.mxu1 %v3240_v50  ;;  %3507 = vmatprep.mubr.bf16.mxu0 %v13926_v20 }
 0x6ba   : > { %7977 = vmatmul.mubr.msk.bf16.vlgmr.msra.gmra.mrb[112].mxu1 %vm2404_vm3, %v8755_v16 }
 0x6bb   : > { %3301 = vmatprep.mubr.bf16.mxu1 %v13926_v20 }
 0x6c2   : > { %7978 = vmatmul.mubr.msk.bf16.gmra.mrb[116].mxu1 %vm2404_vm3, %v8756_v52 }
 0x6c3   : > { %8454 = vmatprep.mubr.msk.bf16.mxu1 %vm2404_vm3, %v11394_v23 }
 0x789   : > { %v11398_v21 = vpop.f32.mrb[140].mxu0 }
 0x78a   : > { %v11400_v10 = vpop.f32.mrb[141].mxu0  ;;  %v3375_v41 = vmul.f32 %v11398_v21, %v11339_v43  ;;  %v3395_v6 = vmul.f32 %v11398_v21, %v11398_v21 }
 0x78b   : > { %v11402_v38 = vpop.f32.mrb[142].mxu0  ;;  %v3393_v36 = vmul.f32 %v11400_v10, %v11400_v10  ;;  %v3373_v39 = vmul.f32 %v11400_v10, %v11345_v55 }
 0x78c   : > { %v11404_v22 = vpop.f32.mrb[143].mxu0  ;;  %v3376_v25 = vmul.f32 %v11402_v38, %v11351_v40 }
 0x78d   : > { %v3293_v35 = vpop.f32.mrb[112].mxu1  ;;  %v3394_v8 = vmul.f32 %v11404_v22, %v11404_v22  ;;  %v3374_v9 = vmul.f32 %v11404_v22, %v11357_v0 }
 0x78e   : > { %v3361_v31 = vmul.f32 %v3293_v35, %v11336_v13  ;;  %v3381_v37 = vmul.f32 %v3293_v35, %v3293_v35  ;;  %v3295_v60 = vpop.f32.mrb[113].mxu1 }
 0x78f   : > { %v3365_v24 = vmul.f32 %v3295_v60, %v11342_v11  ;;  %v3385_v63 = vmul.f32 %v3295_v60, %v3295_v60  ;;  %v3297_v26 = vpop.f32.mrb[114].mxu1 }
 0x790   : > { %v3362_v15 = vmul.f32 %v3297_v26, %v11348_v32  ;;  %v3382_v33 = vmul.f32 %v3297_v26, %v3297_v26  ;;  %v3299_v18 = vpop.f32.mrb[115].mxu1 }
 0x791   : > { %v3369_v34 = vadd.f32 %v3365_v24, %v3361_v31  ;;  %v3389_v5 = vadd.f32 %v3385_v63, %v3381_v37  ;;  %v3366_v62 = vmul.f32 %v3299_v18, %v11354_v53  ;;  %v3386_v27 = vmul.f32 %v3299_v18, %v3299_v18 }
 0x792   : > { %v3396_v31 = vmul.f32 %v11402_v38, %v11402_v38 }
 0x793   : > { %v3377_v51 = vadd.f32 %v3373_v39, %v3369_v34  ;;  %v3397_v46 = vadd.f32 %v3393_v36, %v3389_v5  ;;  %v3370_v30 = vadd.f32 %v3366_v62, %v3362_v15  ;;  %v3390_v57 = vadd.f32 %v3386_v27, %v3382_v33 }
 0x795   : > { %v3401_v48 = vadd.f32 1e-06, %v3397_v46  ;;  %v3378_v3 = vadd.f32 %v3374_v9, %v3370_v30  ;;  %v3398_v59 = vadd.f32 %v3394_v8, %v3390_v57  ;;  %v3303_v16 = vpop.f32.mrb[116].mxu1  ;;  %vm3413_vm12 = vcmp.ge.f32.partialorder %v3377_v51, 0.0 }
 0x796   : > { %v3363_v19 = vmul.f32 %v3303_v16, %v11368_v42  ;;  %v3383_v54 = vmul.f32 %v3303_v16, %v3303_v16  ;;  %v3305_v58 = vpop.f32.mrb[117].mxu1 }
 0x797   : > { %8879 = vrcp.f32 %v3401_v48  ;;  %v3402_v29 = vadd.f32 1e-06, %v3398_v59  ;;  %v3367_v2 = vmul.f32 %v3305_v58, %v11371_v45  ;;  %v3387_v14 = vmul.f32 %v3305_v58, %v3305_v58  ;;  %v11420_v61 = vpop.f32.mrb[118].mxu1 }
 0x798   : > { %v3364_v28 = vmul.f32 %v11420_v61, %v11374_v49  ;;  %v3384_v4 = vmul.f32 %v11420_v61, %v11420_v61  ;;  %v3309_v44 = vpop.f32.mrb[119].mxu1  ;;  %vm3414_vm13 = vcmp.ge.f32.partialorder %v3378_v3, 0.0 }
 0x799   : > { %8881 = vrcp.f32 %v3402_v29  ;;  %v3371_v17 = vadd.f32 %v3367_v2, %v3363_v19  ;;  %v3391_v1 = vadd.f32 %v3387_v14, %v3383_v54  ;;  %v3368_v47 = vmul.f32 %v3309_v44, %v11377_v56 }
 0x79a   : > { %v3388_v12 = vmul.f32 %v3309_v44, %v3309_v44 }
 0x79b   : > { %v3379_v52 = vadd.f32 %v3375_v41, %v3371_v17  ;;  %v3399_v7 = vadd.f32 %v3395_v6, %v3391_v1  ;;  %v3372_v50 = vadd.f32 %v3368_v47, %v3364_v28 }
 0x79c   : > { %v3392_v37 = vadd.f32 %v3388_v12, %v3384_v4 }
 0x79d   : > { %v3403_v36 = vadd.f32 1e-06, %v3399_v7  ;;  %v3380_v24 = vadd.f32 %v3376_v25, %v3372_v50  ;;  %vm3415_vm14 = vcmp.ge.f32.partialorder %v3379_v52, 0.0 }
 0x79e   : > { %v3400_v63 = vadd.f32 %v3396_v31, %v3392_v37 }
 0x79f   : > { %8883 = vrcp.f32 %v3403_v36  ;;  %vm3416_vm15 = vcmp.ge.f32.partialorder %v3380_v24, 0.0 }
 0x7a0   : > { %v3404_v39 = vadd.f32 1e-06, %v3400_v63 }
 0x7a1   : > { %v8880_v8 = vpop.eup %8879 }
 0x7a2   : > { %v3409_v15 = vmul.f32 %v8880_v8, %v3377_v51  ;;  %8885 = vrcp.f32 %v3404_v39 }
 0x7a3   : > { %v8882_v33 = vpop.eup %8881 }
 0x7a4   : > { %v3417_v34 = vmul.f32 %v3409_v15, %v3293_v35  ;;  %v3429_v5 = vmul.f32 %v3409_v15, %v3295_v60  ;;  %v3410_v62 = vmul.f32 %v8882_v33, %v3378_v3  ;;  %v3441_v27 = vmul.f32 %v3409_v15, %v11400_v10  ;;  %v8758_v15 = vld [vmem:[%s13508_s2 + $0x88] sm:$0xff]  }
 0x7a6   : > { %v3433_v9 = vsub.f32 %v11342_v11, %v3429_v5  ;;  %v3418_v46 = vmul.f32 %v3410_v62, %v3297_v26  ;;  %v3430_v30 = vmul.f32 %v3410_v62, %v3299_v18  ;;  %v3442_v57 = vmul.f32 %v3410_v62, %v11404_v22 }
 0x7a7   : > { %v3445_v48 = vsub.f32 %v11345_v55, %v3441_v27  ;;  %v3421_v59 = vsub.f32 %v11336_v13, %v3417_v34 }
 0x7a8   : > { %v3434_v19 = vsub.f32 %v11354_v53, %v3430_v30  ;;  %v3437_v54 = vsel %vm3413_vm12, %v11342_v11, %v3433_v9  ;;  %v3446_v35 = vsub.f32 %v11357_v0, %v3442_v57  ;;  %v3422_v60 = vsub.f32 %v11348_v32, %v3418_v46 }
 0x7a9   : > { %v8884_v10 = vpop.eup %8883  ;;  %v3449_v26 = vsel %vm3413_vm12, %v11345_v55, %v3445_v48  ;;  %v3425_v18 = vsel %vm3413_vm12, %v11336_v13, %v3421_v59 }
 0x7aa   : > { %v3411_v22 = vmul.f32 %v8884_v10, %v3379_v52  ;;  %v3438_v51 = vsel %vm3414_vm13, %v11354_v53, %v3434_v19  ;;  %v3450_v29 = vsel %vm3414_vm13, %v11357_v0, %v3446_v35  ;;  %v3426_v2 = vsel %vm3414_vm13, %v11348_v32, %v3422_v60  ;;  %v8760_v60 = vld [vmem:[%s13508_s2 + $0x98] sm:$0xff]  }
 0x7ab   : > { %v3454_v14 = vpack.c.bf16 %v3438_v51, %v3437_v54  ;;  %v3455_v41 = vpack.c.bf16 %v3450_v29, %v3449_v26  ;;  %v3453_v6 = vpack.c.bf16 %v3426_v2, %v3425_v18 }
 0x7ac   : > { %v8886_v28 = vpop.eup %8885  ;;  %v3419_v4 = vmul.f32 %v3411_v22, %v3303_v16  ;;  %v3431_v17 = vmul.f32 %v3411_v22, %v3305_v58  ;;  %v3443_v1 = vmul.f32 %v11398_v21, %v3411_v22  ;;  %v11524_v22 = vld [vmem:[%s13508_s2 + $0xa0] sm:$0xff]  }
 0x7ad   : > { %v3412_v3 = vmul.f32 %v8886_v28, %v3380_v24  ;;  %3475 = vmatprep.subr.bf16.mxu0 %v3454_v14  ;;  %8450 = vmatprep.subr.bf16.mxu1 %v3455_v41  ;;  %v8759_v24 = vld [vmem:[%s13508_s2 + $0x90] sm:$0xff]  }
 0x7ae   : > { %v3435_v47 = vsub.f32 %v11371_v45, %v3431_v17  ;;  %3476 = vmatpush1.bf16.msra.mxu0 %v3453_v6  ;;  %8451 = vmatpush3.bf16.msra.mxu1 %v3455_v41  ;;  %v3447_v12 = vsub.f32 %v11339_v43, %v3443_v1  ;;  %v3423_v25 = vsub.f32 %v11368_v42, %v3419_v4 }
 0x7af   : > { %v3420_v7 = vmul.f32 %v3412_v3, %v11420_v61  ;;  %v3432_v50 = vmul.f32 %v3412_v3, %v3309_v44  ;;  %v3444_v16 = vmul.f32 %v11402_v38, %v3412_v3 }
 0x7b0   : > { %v3439_v58 = vsel %vm3415_vm14, %v11371_v45, %v3435_v47  ;;  %v3451_v21 = vsel %vm3415_vm14, %v11339_v43, %v3447_v12  ;;  %v3427_v31 = vsel %vm3415_vm14, %v11368_v42, %v3423_v25 }
 0x7b1   : > { %v3436_v37 = vsub.f32 %v11377_v56, %v3432_v50  ;;  %v3448_v36 = vsub.f32 %v11351_v40, %v3444_v16  ;;  %v3424_v63 = vsub.f32 %v11374_v49, %v3420_v7 }
 0x7b3   : > { %v3440_v39 = vsel %vm3416_vm15, %v11377_v56, %v3436_v37  ;;  %v3452_v61 = vsel %vm3416_vm15, %v11351_v40, %v3448_v36  ;;  %v3428_v44 = vsel %vm3416_vm15, %v11374_v49, %v3424_v63 }
 0x7b4   : > { %v3457_v38 = vpack.c.bf16 %v3440_v39, %v3439_v58  ;;  %v3458_v52 = vpack.c.bf16 %v3452_v61, %v3451_v21  ;;  %v3456_v8 = vpack.c.bf16 %v3428_v44, %v3427_v31 }
 0x7b6   : > { %3477 = vmatprep.subr.bf16.mxu0 %v3457_v38  ;;  %8452 = vmatprep.subr.bf16.mxu1 %v3458_v52 }
 0x7b7   : > { %3478 = vmatpush1.bf16.msra.mxu0 %v3456_v8  ;;  %8453 = vmatpush3.bf16.msra.mxu1 %v3458_v52 }
 0x7ba   : > { %7983 = vmatmul.mubr.msk.bf16.vlgmr.msra.gmra.mrb[144].mxu0 %vm2404_vm3, %v11394_v23  ;;  %8455 = vmatmul.mubr.msk.bf16.vlgmr.msra.gmra.mrb[120].mxu1 %vm2404_vm3, %v8758_v15 }
 0x7bb   : > { %3517 = vmatprep.mubr.bf16.mxu0 %v13926_v20  ;;  %3631 = vmatprep.mubr.bf16.mxu1 %v13926_v20 }
 0x7c2   : > { %7984 = vmatmul.mubr.msk.bf16.gmra.mrb[148].mxu0 %vm2404_vm3, %v8758_v15 }
 0x7c3   : > { %8462 = vmatprep.mubr.msk.bf16.mxu0 %vm2404_vm3, %v8759_v24 }
 0x88d   : > { %v11477_v33 = vpop.f32.mrb[144].mxu0  ;;  %v11479_v34 = vpop.f32.mrb[120].mxu1 }
 0x88e   : > { %v11481_v5 = vpop.f32.mrb[145].mxu0  ;;  %v11483_v23 = vpop.f32.mrb[121].mxu1 }
 0x88f   : > { %v11485_v62 = vpop.f32.mrb[146].mxu0  ;;  %v11487_v27 = vpop.f32.mrb[122].mxu1 }
 0x890   : > { %v3577_v9 = vpack.c.bf16 %v11485_v62, %v11477_v33  ;;  %v11491_v46 = vpop.f32.mrb[147].mxu0  ;;  %v11493_v30 = vpop.f32.mrb[123].mxu1  ;;  %v3582_v57 = vpack.c.bf16 %v11487_v27, %v11479_v34 }
 0x891   : > { %v3578_v48 = vpack.c.bf16 %v11491_v46, %v11481_v5  ;;  %v3579_v59 = vpack.c.bf16 %v11493_v30, %v11483_v23 }
 0x893   : > { %3599 = vmatprep.subr.bf16.mxu1 %v3578_v48  ;;  %8458 = vmatprep.subr.bf16.mxu0 %v3579_v59 }
 0x894   : > { %3600 = vmatpush1.bf16.msra.mxu1 %v3577_v9  ;;  %8459 = vmatpush3.bf16.msra.mxu0 %v3579_v59 }
 0x895   : > { %v11501_v19 = vpop.f32.mrb[148].mxu0  ;;  %8460 = vmatprep.subr.bf16.mxu0 %v3582_v57 }
 0x896   : > { %v11503_v54 = vpop.f32.mrb[149].mxu0 }
 0x897   : > { %v11505_v35 = vpop.f32.mrb[150].mxu0 }
 0x898   : > { %v3580_v10 = vpack.c.bf16 %v11505_v35, %v11501_v19  ;;  %v11512_v26 = vpop.f32.mrb[151].mxu0  ;;  %8461 = vmatpush3.bf16.msra.mxu0 %v3582_v57 }
 0x899   : > { %v3581_v18 = vpack.c.bf16 %v11512_v26, %v11503_v54 }
 0x89b   : > { %3601 = vmatprep.subr.bf16.mxu1 %v3581_v18  ;;  %8463 = vmatmul.mubr.msk.bf16.vlgmr.msra.gmra.mrb[152].mxu0 %vm2404_vm3, %v8760_v60 }
 0x89c   : > { %3602 = vmatpush1.bf16.msra.mxu1 %v3580_v10  ;;  %3847 = vmatprep.mubr.bf16.mxu0 %v13926_v20 }
 0x89f   : > { %7989 = vmatmul.mubr.msk.bf16.vlgmr.msra.gmra.mrb[124].mxu1 %vm2404_vm3, %v8759_v24 }
 0x8a0   : > { %3641 = vmatprep.mubr.bf16.mxu1 %v13926_v20 }
 0x8a7   : > { %7990 = vmatmul.mubr.msk.bf16.gmra.mrb[128].mxu1 %vm2404_vm3, %v8760_v60 }
 0x8a8   : > { %8470 = vmatprep.mubr.msk.bf16.mxu1 %vm2404_vm3, %v11524_v22 }
 0x96e   : > { %v11528_v51 = vpop.f32.mrb[152].mxu0 }
 0x96f   : > { %v3715_v29 = vmul.f32 %v11528_v51, %v11479_v34  ;;  %v11532_v2 = vpop.f32.mrb[153].mxu0 }
 0x970   : > { %v3713_v14 = vmul.f32 %v11532_v2, %v11483_v23  ;;  %v11536_v41 = vpop.f32.mrb[154].mxu0  ;;  %v3733_v12 = vmul.f32 %v11532_v2, %v11532_v2 }
 0x971   : > { %v3716_v6 = vmul.f32 %v11536_v41, %v11487_v27  ;;  %v11540_v28 = vpop.f32.mrb[155].mxu0 }
 0x972   : > { %v3714_v4 = vmul.f32 %v11540_v28, %v11493_v30  ;;  %v3633_v17 = vpop.f32.mrb[124].mxu1  ;;  %v3734_v16 = vmul.f32 %v11540_v28, %v11540_v28 }
 0x973   : > { %v3701_v1 = vmul.f32 %v3633_v17, %v11477_v33  ;;  %v3721_v3 = vmul.f32 %v3633_v17, %v3633_v17  ;;  %v3635_v47 = vpop.f32.mrb[125].mxu1 }
 0x974   : > { %v3705_v25 = vmul.f32 %v3635_v47, %v11481_v5  ;;  %v3725_v7 = vmul.f32 %v3635_v47, %v3635_v47  ;;  %v3637_v50 = vpop.f32.mrb[126].mxu1 }
 0x975   : > { %v3702_v58 = vmul.f32 %v3637_v50, %v11485_v62  ;;  %v3722_v21 = vmul.f32 %v3637_v50, %v3637_v50  ;;  %v3639_v31 = vpop.f32.mrb[127].mxu1 }
 0x976   : > { %v3709_v37 = vadd.f32 %v3705_v25, %v3701_v1  ;;  %v3729_v36 = vadd.f32 %v3725_v7, %v3721_v3  ;;  %v3706_v63 = vmul.f32 %v3639_v31, %v11491_v46  ;;  %v3726_v39 = vmul.f32 %v3639_v31, %v3639_v31 }
 0x978   : > { %v3717_v61 = vadd.f32 %v3713_v14, %v3709_v37  ;;  %v3737_v44 = vadd.f32 %v3733_v12, %v3729_v36  ;;  %v3710_v38 = vadd.f32 %v3706_v63, %v3702_v58  ;;  %v3730_v52 = vadd.f32 %v3726_v39, %v3722_v21 }
 0x979   : > { %v3735_v14 = vmul.f32 %v11528_v51, %v11528_v51  ;;  %v3736_v63 = vmul.f32 %v11536_v41, %v11536_v41 }
 0x97a   : > { %v3741_v8 = vadd.f32 1e-06, %v3737_v44  ;;  %v3718_v15 = vadd.f32 %v3714_v4, %v3710_v38  ;;  %v3738_v24 = vadd.f32 %v3734_v16, %v3730_v52  ;;  %v3643_v9 = vpop.f32.mrb[128].mxu1  ;;  %vm3753_vm1 = vcmp.ge.f32.partialorder %v3717_v61, 0.0 }
 0x97b   : > { %v3703_v57 = vmul.f32 %v3643_v9, %v11501_v19  ;;  %v3723_v48 = vmul.f32 %v3643_v9, %v3643_v9  ;;  %v3645_v59 = vpop.f32.mrb[129].mxu1 }
 0x97c   : > { %8887 = vrcp.f32 %v3741_v8  ;;  %v3742_v60 = vadd.f32 1e-06, %v3738_v24  ;;  %v3707_v10 = vmul.f32 %v3645_v59, %v11503_v54  ;;  %v3727_v18 = vmul.f32 %v3645_v59, %v3645_v59  ;;  %v3647_v1 = vpop.f32.mrb[130].mxu1 }
 0x97d   : > { %v3704_v3 = vmul.f32 %v3647_v1, %v11505_v35  ;;  %v3724_v12 = vmul.f32 %v3647_v1, %v3647_v1  ;;  %v3649_v25 = vpop.f32.mrb[131].mxu1  ;;  %vm3754_vm2 = vcmp.ge.f32.partialorder %v3718_v15, 0.0 }
 0x97e   : > { %8889 = vrcp.f32 %v3742_v60  ;;  %v3711_v4 = vadd.f32 %v3707_v10, %v3703_v57  ;;  %v3731_v7 = vadd.f32 %v3727_v18, %v3723_v48  ;;  %v3708_v16 = vmul.f32 %v3649_v25, %v11512_v26 }
 0x97f   : > { %v3728_v58 = vmul.f32 %v3649_v25, %v3649_v25 }
 0x980   : > { %v3719_v21 = vadd.f32 %v3715_v29, %v3711_v4  ;;  %v3739_v37 = vadd.f32 %v3735_v14, %v3731_v7  ;;  %v3712_v36 = vadd.f32 %v3708_v16, %v3704_v3 }
 0x981   : > { %v3732_v39 = vadd.f32 %v3728_v58, %v3724_v12 }
 0x982   : > { %v3743_v44 = vadd.f32 1e-06, %v3739_v37  ;;  %v3720_v38 = vadd.f32 %v3716_v6, %v3712_v36  ;;  %vm3755_vm4 = vcmp.ge.f32.partialorder %v3719_v21, 0.0 }
 0x983   : > { %v3740_v52 = vadd.f32 %v3736_v63, %v3732_v39 }
 0x984   : > { %8891 = vrcp.f32 %v3743_v44  ;;  %vm3756_vm5 = vcmp.ge.f32.partialorder %v3720_v38, 0.0 }
 0x985   : > { %v3744_v8 = vadd.f32 1e-06, %v3740_v52 }
 0x986   : > { %v8888_v24 = vpop.eup %8887 }
 0x987   : > { %v3749_v42 = vmul.f32 %v8888_v24, %v3717_v61  ;;  %8893 = vrcp.f32 %v3744_v8 }
 0x988   : > { %v8890_v57 = vpop.eup %8889 }
 0x989   : > { %v3757_v48 = vmul.f32 %v3749_v42, %v3633_v17  ;;  %v3769_v60 = vmul.f32 %v3749_v42, %v3635_v47  ;;  %v3750_v10 = vmul.f32 %v8890_v57, %v3718_v15  ;;  %v3781_v29 = vmul.f32 %v3749_v42, %v11532_v2 }
 0x98b   : > { %v3773_v18 = vsub.f32 %v11481_v5, %v3769_v60  ;;  %v3758_v14 = vmul.f32 %v3750_v10, %v3637_v50  ;;  %v3770_v3 = vmul.f32 %v3750_v10, %v3639_v31  ;;  %v3782_v12 = vmul.f32 %v3750_v10, %v11540_v28 }
 0x98c   : > { %v3785_v6 = vsub.f32 %v11483_v23, %v3781_v29  ;;  %v3761_v4 = vsub.f32 %v11477_v33, %v3757_v48 }
 0x98d   : > { %v3774_v7 = vsub.f32 %v11491_v46, %v3770_v3  ;;  %v3777_v16 = vsel %vm3753_vm1, %v11481_v5, %v3773_v18  ;;  %v3786_v17 = vsub.f32 %v11493_v30, %v3782_v12  ;;  %v3762_v47 = vsub.f32 %v11485_v62, %v3758_v14 }
 0x98e   : > { %v8892_v42 = vpop.eup %8891  ;;  %v3789_v2 = vsel %vm3753_vm1, %v11483_v23, %v3785_v6  ;;  %v3765_v50 = vsel %vm3753_vm1, %v11477_v33, %v3761_v4 }
 0x98f   : > { %v3751_v28 = vmul.f32 %v8892_v42, %v3719_v21  ;;  %v3778_v31 = vsel %vm3754_vm2, %v11491_v46, %v3774_v7  ;;  %v3790_v61 = vsel %vm3754_vm2, %v11493_v30, %v3786_v17  ;;  %v3766_v58 = vsel %vm3754_vm2, %v11485_v62, %v3762_v47 }
 0x990   : > { %v3794_v37 = vpack.c.bf16 %v3778_v31, %v3777_v16  ;;  %v3795_v36 = vpack.c.bf16 %v3790_v61, %v3789_v2  ;;  %v3793_v5 = vpack.c.bf16 %v3766_v58, %v3765_v50  ;;  %v8764_v50 = vld [vmem:[%s13508_s2 + $0xb8] sm:$0xff]  }
 0x991   : > { %v8894_v63 = vpop.eup %8893  ;;  %v3759_v39 = vmul.f32 %v3751_v28, %v3643_v9  ;;  %v3771_v44 = vmul.f32 %v3751_v28, %v3645_v59  ;;  %v3783_v52 = vmul.f32 %v11528_v51, %v3751_v28  ;;  %v13930_v28 = vld [vmem:[#allocation47_spill] sm:$0xff] }
 0x992   : > { %v3752_v15 = vmul.f32 %v8894_v63, %v3720_v38  ;;  %3815 = vmatprep.subr.bf16.mxu0 %v3794_v37  ;;  %8466 = vmatprep.subr.bf16.mxu1 %v3795_v36 }
 0x993   : > { %v3775_v33 = vsub.f32 %v11503_v54, %v3771_v44  ;;  %3816 = vmatpush1.bf16.msra.mxu0 %v3793_v5  ;;  %8467 = vmatpush3.bf16.msra.mxu1 %v3795_v36  ;;  %v3787_v23 = vsub.f32 %v11479_v34, %v3783_v52  ;;  %v3763_v46 = vsub.f32 %v11501_v19, %v3759_v39 }
 0x994   : > { %v3760_v62 = vmul.f32 %v3752_v15, %v3647_v1  ;;  %v3772_v30 = vmul.f32 %v3752_v15, %v3649_v25  ;;  %v3784_v8 = vmul.f32 %v11536_v41, %v3752_v15 }
 0x995   : > { %v3779_v9 = vsel %vm3755_vm4, %v11503_v54, %v3775_v33  ;;  %v3791_v51 = vsel %vm3755_vm4, %v11479_v34, %v3787_v23  ;;  %v3767_v59 = vsel %vm3755_vm4, %v11501_v19, %v3763_v46  ;;  %v8762_v34 = vld [vmem:[%s13508_s2 + $0xa8] sm:$0xff]  }
 0x996   : > { %v3776_v24 = vsub.f32 %v11512_v26, %v3772_v30  ;;  %v3788_v57 = vsub.f32 %v11487_v27, %v3784_v8  ;;  %v3764_v48 = vsub.f32 %v11505_v35, %v3760_v62 }
 0x998   : > { %v3780_v60 = vsel %vm3756_vm5, %v11512_v26, %v3776_v24  ;;  %v3792_v1 = vsel %vm3756_vm5, %v11487_v27, %v3788_v57  ;;  %v3768_v25 = vsel %vm3756_vm5, %v11505_v35, %v3764_v48  ;;  %v8763_v27 = vld [vmem:[%s13508_s2 + $0xb0] sm:$0xff]  }
 0x999   : > { %v3797_v41 = vpack.c.bf16 %v3780_v60, %v3779_v9  ;;  %v3798_v21 = vpack.c.bf16 %v3792_v1, %v3791_v51  ;;  %v3796_v54 = vpack.c.bf16 %v3768_v25, %v3767_v59 }
 0x99b   : > { %3817 = vmatprep.subr.bf16.mxu0 %v3797_v41  ;;  %8468 = vmatprep.subr.bf16.mxu1 %v3798_v21 }
 0x99c   : > { %3818 = vmatpush1.bf16.msra.mxu0 %v3796_v54  ;;  %8469 = vmatpush3.bf16.msra.mxu1 %v3798_v21 }
 0x99f   : > { %7995 = vmatmul.mubr.msk.bf16.vlgmr.msra.gmra.mrb[156].mxu0 %vm2404_vm3, %v11524_v22  ;;  %8471 = vmatmul.mubr.msk.bf16.vlgmr.msra.gmra.mrb[132].mxu1 %vm2404_vm3, %v8762_v34 }
 0x9a0   : > { %3857 = vmatprep.mubr.bf16.mxu0 %v13926_v20  ;;  %3999 = vmatprep.mubr.bf16.mxu1 %v13926_v20 }
 0x9a7   : > { %7996 = vmatmul.mubr.msk.bf16.gmra.mrb[160].mxu0 %vm2404_vm3, %v8762_v34 }
 0x9a8   : > { %8478 = vmatprep.mubr.msk.bf16.mxu0 %vm2404_vm3, %v8763_v27 }
 0xa72   : > { %v3849_v19 = vpop.f32.mrb[156].mxu0  ;;  %v8472_v35 = vpop.f32.mrb[132].mxu1 }
 0xa73   : > { %v3851_v26 = vpop.f32.mrb[157].mxu0  ;;  %v3902_v38 = vpop.f32.mrb[133].mxu1 }
 0xa74   : > { %v3853_v10 = vpop.f32.mrb[158].mxu0  ;;  %v8473_v22 = vpop.f32.mrb[134].mxu1  ;;  %v11602_v29 = vadd.f32 %v3851_v26, %v11342_v11  ;;  %v11608_v12 = vadd.f32 %v3902_v38, %v11345_v55  ;;  %v11620_v11 = vadd.f32 %v3849_v19, %v11336_v13 }
 0xa75   : > { %v11605_v18 = vadd.f32 %v3853_v10, %v11348_v32  ;;  %v3855_v14 = vpop.f32.mrb[159].mxu0  ;;  %v3905_v3 = vpop.f32.mrb[135].mxu1  ;;  %v11611_v6 = vadd.f32 %v8473_v22, %v11351_v40  ;;  %v11623_v32 = vadd.f32 %v8472_v35, %v11339_v43 }
 0xa76   : > { %v11614_v4 = vadd.f32 %v3855_v14, %v11354_v53  ;;  %v11617_v7 = vadd.f32 %v3905_v3, %v11357_v0 }
 0xa77   : > { %v3945_v40 = vpack.c.bf16 %v11605_v18, %v11620_v11  ;;  %v3950_v0 = vpack.c.bf16 %v11611_v6, %v11623_v32 }
 0xa78   : > { %v3946_v16 = vpack.c.bf16 %v11614_v4, %v11602_v29  ;;  %v3947_v55 = vpack.c.bf16 %v11617_v7, %v11608_v12 }
 0xa7a   : > { %v3859_v53 = vpop.f32.mrb[160].mxu0  ;;  %3967 = vmatprep.subr.bf16.mxu1 %v3946_v16  ;;  %8474 = vmatprep.subr.bf16.mxu0 %v3947_v55 }
 0xa7b   : > { %v3861_v13 = vpop.f32.mrb[161].mxu0  ;;  %3968 = vmatpush1.bf16.msra.mxu1 %v3945_v40  ;;  %8475 = vmatpush3.bf16.msra.mxu0 %v3947_v55  ;;  %v11646_v31 = vadd.f32 %v3859_v53, %v13930_v28 }
 0xa7c   : > { %v3863_v43 = vpop.f32.mrb[162].mxu0  ;;  %8476 = vmatprep.subr.bf16.mxu0 %v3950_v0  ;;  %v11637_v42 = vadd.f32 %v3861_v13, %v11371_v45  ;;  %v11660_v45 = vld [vmem:[%s13508_s2 + $0xc0] sm:$0xff]  }
 0xa7d   : > { %v11634_v17 = vadd.f32 %v3863_v43, %v11374_v49  ;;  %v3865_v47 = vpop.f32.mrb[163].mxu0  ;;  %13931 = vst [vmem:[#allocation39_spill] sm:$0xff] %v11646_v31 }
 0xa7e   : > { %v11640_v2 = vadd.f32 %v3865_v47, %v11377_v56 }
 0xa7f   : > { %8477 = vmatpush3.bf16.msra.mxu0 %v3950_v0  ;;  %v3948_v49 = vpack.c.bf16 %v11634_v17, %v11646_v31 }
 0xa80   : > { %v3949_v61 = vpack.c.bf16 %v11640_v2, %v11637_v42 }
 0xa82   : > { %3969 = vmatprep.subr.bf16.mxu1 %v3949_v61  ;;  %8479 = vmatmul.mubr.msk.bf16.vlgmr.msra.gmra.mrb[164].mxu0 %vm2404_vm3, %v8764_v50 }
 0xa83   : > { %3970 = vmatpush1.bf16.msra.mxu1 %v3948_v49  ;;  %4215 = vmatprep.mubr.bf16.mxu0 %v13926_v20 }
 0xa86   : > { %8001 = vmatmul.mubr.msk.bf16.vlgmr.msra.gmra.mrb[136].mxu1 %vm2404_vm3, %v8763_v27 }
 0xa87   : > { %4009 = vmatprep.mubr.bf16.mxu1 %v13926_v20 }
 0xa8e   : > { %8002 = vmatmul.mubr.msk.bf16.gmra.mrb[140].mxu1 %vm2404_vm3, %v8764_v50 }
 0xa8f   : > { %8486 = vmatprep.mubr.msk.bf16.mxu1 %vm2404_vm3, %v11660_v45 }
 0xb55   : > { %v11664_v56 = vpop.f32.mrb[164].mxu0 }
 0xb56   : > { %v11666_v58 = vpop.f32.mrb[165].mxu0  ;;  %v4083_v3 = vmul.f32 %v11664_v56, %v11623_v32  ;;  %v4103_v16 = vmul.f32 %v11664_v56, %v11664_v56 }
 0xb57   : > { %v11668_v37 = vpop.f32.mrb[166].mxu0  ;;  %v4101_v52 = vmul.f32 %v11666_v58, %v11666_v58  ;;  %v4081_v46 = vmul.f32 %v11666_v58, %v11608_v12 }
 0xb58   : > { %v11670_v36 = vpop.f32.mrb[167].mxu0  ;;  %v4084_v50 = vmul.f32 %v11668_v37, %v11611_v6 }
 0xb59   : > { %v4001_v5 = vpop.f32.mrb[136].mxu1  ;;  %v4102_v62 = vmul.f32 %v11670_v36, %v11670_v36  ;;  %v4082_v48 = vmul.f32 %v11670_v36, %v11617_v7 }
 0xb5a   : > { %v4069_v63 = vmul.f32 %v4001_v5, %v11620_v11  ;;  %v4089_v39 = vmul.f32 %v4001_v5, %v4001_v5  ;;  %v4003_v44 = vpop.f32.mrb[137].mxu1 }
 0xb5b   : > { %v4073_v15 = vmul.f32 %v4003_v44, %v11602_v29  ;;  %v4093_v33 = vmul.f32 %v4003_v44, %v4003_v44  ;;  %v4005_v23 = vpop.f32.mrb[138].mxu1 }
 0xb5c   : > { %v4070_v30 = vmul.f32 %v4005_v23, %v11605_v18  ;;  %v4090_v8 = vmul.f32 %v4005_v23, %v4005_v23  ;;  %v4007_v9 = vpop.f32.mrb[139].mxu1 }
 0xb5d   : > { %v4077_v51 = vadd.f32 %v4073_v15, %v4069_v63  ;;  %v4097_v59 = vadd.f32 %v4093_v33, %v4089_v39  ;;  %v4074_v24 = vmul.f32 %v4007_v9, %v11614_v4  ;;  %v4094_v57 = vmul.f32 %v4007_v9, %v4007_v9 }
 0xb5e   : > { %v4104_v63 = vmul.f32 %v11668_v37, %v11668_v37 }
 0xb5f   : > { %v4085_v60 = vadd.f32 %v4081_v46, %v4077_v51  ;;  %v4105_v1 = vadd.f32 %v4101_v52, %v4097_v59  ;;  %v4078_v25 = vadd.f32 %v4074_v24, %v4070_v30  ;;  %v4098_v41 = vadd.f32 %v4094_v57, %v4090_v8 }
 0xb61   : > { %v4109_v21 = vadd.f32 1e-06, %v4105_v1  ;;  %v4086_v54 = vadd.f32 %v4082_v48, %v4078_v25  ;;  %v4106_v34 = vadd.f32 %v4102_v62, %v4098_v41  ;;  %v4011_v27 = vpop.f32.mrb[140].mxu1  ;;  %vm4121_vm6 = vcmp.ge.f32.partialorder %v4085_v60, 0.0 }
 0xb62   : > { %v4071_v19 = vmul.f32 %v4011_v27, %v11646_v31  ;;  %v4091_v35 = vmul.f32 %v4011_v27, %v4011_v27  ;;  %v4013_v26 = vpop.f32.mrb[141].mxu1 }
 0xb63   : > { %8895 = vrcp.f32 %v4109_v21  ;;  %v4110_v38 = vadd.f32 1e-06, %v4106_v34  ;;  %v4075_v10 = vmul.f32 %v4013_v26, %v11637_v42  ;;  %v4095_v22 = vmul.f32 %v4013_v26, %v4013_v26  ;;  %v11686_v14 = vpop.f32.mrb[142].mxu1 }
 0xb64   : > { %v4072_v55 = vmul.f32 %v11686_v14, %v11634_v17  ;;  %v4092_v40 = vmul.f32 %v11686_v14, %v11686_v14  ;;  %v4017_v53 = vpop.f32.mrb[143].mxu1  ;;  %vm4122_vm7 = vcmp.ge.f32.partialorder %v4086_v54, 0.0 }
 0xb65   : > { %8897 = vrcp.f32 %v4110_v38  ;;  %v4079_v0 = vadd.f32 %v4075_v10, %v4071_v19  ;;  %v4099_v13 = vadd.f32 %v4095_v22, %v4091_v35  ;;  %v4076_v43 = vmul.f32 %v4017_v53, %v11640_v2 }
 0xb66   : > { %v4096_v47 = vmul.f32 %v4017_v53, %v4017_v53 }
 0xb67   : > { %v4087_v28 = vadd.f32 %v4083_v3, %v4079_v0  ;;  %v4107_v61 = vadd.f32 %v4103_v16, %v4099_v13  ;;  %v4080_v49 = vadd.f32 %v4076_v43, %v4072_v55 }
 0xb68   : > { %v4100_v39 = vadd.f32 %v4096_v47, %v4092_v40 }
 0xb69   : > { %v4111_v52 = vadd.f32 1e-06, %v4107_v61  ;;  %v4088_v15 = vadd.f32 %v4084_v50, %v4080_v49  ;;  %vm4123_vm8 = vcmp.ge.f32.partialorder %v4087_v28, 0.0 }
 0xb6a   : > { %v4108_v33 = vadd.f32 %v4104_v63, %v4100_v39 }
 0xb6b   : > { %8899 = vrcp.f32 %v4111_v52  ;;  %vm4124_vm9 = vcmp.ge.f32.partialorder %v4088_v15, 0.0 }
 0xb6c   : > { %v4112_v46 = vadd.f32 1e-06, %v4108_v33 }
 0xb6d   : > { %v8896_v62 = vpop.eup %8895 }
 0xb6e   : > { %v4117_v30 = vmul.f32 %v8896_v62, %v4085_v60  ;;  %8901 = vrcp.f32 %v4112_v46 }
 0xb6f   : > { %v8898_v8 = vpop.eup %8897 }
 0xb70   : > { %v4125_v51 = vmul.f32 %v4117_v30, %v4001_v5  ;;  %v4137_v59 = vmul.f32 %v4117_v30, %v4003_v44  ;;  %v4118_v24 = vmul.f32 %v8898_v8, %v4086_v54  ;;  %v4149_v57 = vmul.f32 %v4117_v30, %v11666_v58  ;;  %v8766_v30 = vld [vmem:[%s13508_s2 + $0xc8] sm:$0xff]  }
 0xb72   : > { %v4141_v48 = vsub.f32 %v11602_v29, %v4137_v59  ;;  %v4126_v1 = vmul.f32 %v4118_v24, %v4005_v23  ;;  %v4138_v25 = vmul.f32 %v4118_v24, %v4007_v9  ;;  %v4150_v41 = vmul.f32 %v4118_v24, %v11670_v36 }
 0xb73   : > { %v4153_v21 = vsub.f32 %v11608_v12, %v4149_v57  ;;  %v4129_v34 = vsub.f32 %v11620_v11, %v4125_v51 }
 0xb74   : > { %v4142_v19 = vsub.f32 %v11614_v4, %v4138_v25  ;;  %v4145_v35 = vsel %vm4121_vm6, %v11602_v29, %v4141_v48  ;;  %v4154_v5 = vsub.f32 %v11617_v7, %v4150_v41  ;;  %v4130_v44 = vsub.f32 %v11605_v18, %v4126_v1 }
 0xb75   : > { %v8900_v58 = vpop.eup %8899  ;;  %v4157_v23 = vsel %vm4121_vm6, %v11608_v12, %v4153_v21  ;;  %v4133_v9 = vsel %vm4121_vm6, %v11620_v11, %v4129_v34 }
 0xb76   : > { %v4119_v36 = vmul.f32 %v8900_v58, %v4087_v28  ;;  %v4146_v60 = vsel %vm4122_vm7, %v11614_v4, %v4142_v19  ;;  %v4158_v38 = vsel %vm4122_vm7, %v11617_v7, %v4154_v5  ;;  %v4134_v10 = vsel %vm4122_vm7, %v11605_v18, %v4130_v44  ;;  %v8768_v44 = vld [vmem:[%s13508_s2 + $0xd8] sm:$0xff]  }
 0xb77   : > { %v4162_v22 = vpack.c.bf16 %v4146_v60, %v4145_v35  ;;  %v4163_v3 = vpack.c.bf16 %v4158_v38, %v4157_v23  ;;  %v4161_v16 = vpack.c.bf16 %v4134_v10, %v4133_v9 }
 0xb78   : > { %v8902_v55 = vpop.eup %8901  ;;  %v4127_v40 = vmul.f32 %v4119_v36, %v4011_v27  ;;  %v4139_v0 = vmul.f32 %v4119_v36, %v4013_v26  ;;  %v4151_v13 = vmul.f32 %v11664_v56, %v4119_v36  ;;  %v11790_v36 = vld [vmem:[%s13508_s2 + $0xe0] sm:$0xff]  }
 0xb79   : > { %v4120_v54 = vmul.f32 %v8902_v55, %v4088_v15  ;;  %4183 = vmatprep.subr.bf16.mxu0 %v4162_v22  ;;  %8482 = vmatprep.subr.bf16.mxu1 %v4163_v3  ;;  %v8767_v15 = vld [vmem:[%s13508_s2 + $0xd0] sm:$0xff]  }
 0xb7a   : > { %v4143_v43 = vsub.f32 %v11637_v42, %v4139_v0  ;;  %4184 = vmatpush1.bf16.msra.mxu0 %v4161_v16  ;;  %8483 = vmatpush3.bf16.msra.mxu1 %v4163_v3  ;;  %v4155_v47 = vsub.f32 %v11623_v32, %v4151_v13  ;;  %v4131_v50 = vsub.f32 %v11646_v31, %v4127_v40 }
 0xb7b   : > { %v4128_v61 = vmul.f32 %v4120_v54, %v11686_v14  ;;  %v4140_v49 = vmul.f32 %v4120_v54, %v4017_v53  ;;  %v4152_v27 = vmul.f32 %v11668_v37, %v4120_v54 }
 0xb7c   : > { %v4147_v26 = vsel %vm4123_vm8, %v11637_v42, %v4143_v43  ;;  %v4159_v56 = vsel %vm4123_vm8, %v11623_v32, %v4155_v47  ;;  %v4135_v63 = vsel %vm4123_vm8, %v11646_v31, %v4131_v50 }
 0xb7d   : > { %v4144_v39 = vsub.f32 %v11640_v2, %v4140_v49  ;;  %v4156_v52 = vsub.f32 %v11611_v6, %v4152_v27  ;;  %v4132_v33 = vsub.f32 %v11634_v17, %v4128_v61 }
 0xb7f   : > { %v4148_v46 = vsel %vm4124_vm9, %v11640_v2, %v4144_v39  ;;  %v4160_v14 = vsel %vm4124_vm9, %v11611_v6, %v4156_v52  ;;  %v4136_v53 = vsel %vm4124_vm9, %v11634_v17, %v4132_v33 }
 0xb80   : > { %v4165_v37 = vpack.c.bf16 %v4148_v46, %v4147_v26  ;;  %v4166_v28 = vpack.c.bf16 %v4160_v14, %v4159_v56  ;;  %v4164_v62 = vpack.c.bf16 %v4136_v53, %v4135_v63 }
 0xb82   : > { %4185 = vmatprep.subr.bf16.mxu0 %v4165_v37  ;;  %8484 = vmatprep.subr.bf16.mxu1 %v4166_v28 }
 0xb83   : > { %4186 = vmatpush1.bf16.msra.mxu0 %v4164_v62  ;;  %8485 = vmatpush3.bf16.msra.mxu1 %v4166_v28 }
 0xb86   : > { %8007 = vmatmul.mubr.msk.bf16.vlgmr.msra.gmra.mrb[168].mxu0 %vm2404_vm3, %v11660_v45  ;;  %8487 = vmatmul.mubr.msk.bf16.vlgmr.msra.gmra.mrb[144].mxu1 %vm2404_vm3, %v8766_v30 }
 0xb87   : > { %4225 = vmatprep.mubr.bf16.mxu0 %v13926_v20  ;;  %4339 = vmatprep.mubr.bf16.mxu1 %v13926_v20 }
 0xb8e   : > { %8008 = vmatmul.mubr.msk.bf16.gmra.mrb[172].mxu0 %vm2404_vm3, %v8766_v30 }
 0xb8f   : > { %8494 = vmatprep.mubr.msk.bf16.mxu0 %vm2404_vm3, %v8767_v15 }
 0xc59   : > { %v11743_v8 = vpop.f32.mrb[168].mxu0  ;;  %v11745_v51 = vpop.f32.mrb[144].mxu1 }
 0xc5a   : > { %v11747_v59 = vpop.f32.mrb[169].mxu0  ;;  %v11749_v45 = vpop.f32.mrb[145].mxu1 }
 0xc5b   : > { %v11751_v24 = vpop.f32.mrb[170].mxu0  ;;  %v11753_v57 = vpop.f32.mrb[146].mxu1 }
 0xc5c   : > { %v4285_v48 = vpack.c.bf16 %v11751_v24, %v11743_v8  ;;  %v11757_v1 = vpop.f32.mrb[171].mxu0  ;;  %v11759_v25 = vpop.f32.mrb[147].mxu1  ;;  %v4290_v41 = vpack.c.bf16 %v11753_v57, %v11745_v51 }
 0xc5d   : > { %v4286_v21 = vpack.c.bf16 %v11757_v1, %v11747_v59  ;;  %v4287_v34 = vpack.c.bf16 %v11759_v25, %v11749_v45 }
 0xc5f   : > { %4307 = vmatprep.subr.bf16.mxu1 %v4286_v21  ;;  %8490 = vmatprep.subr.bf16.mxu0 %v4287_v34 }
 0xc60   : > { %4308 = vmatpush1.bf16.msra.mxu1 %v4285_v48  ;;  %8491 = vmatpush3.bf16.msra.mxu0 %v4287_v34 }
 0xc61   : > { %v11767_v19 = vpop.f32.mrb[172].mxu0  ;;  %8492 = vmatprep.subr.bf16.mxu0 %v4290_v41 }
 0xc62   : > { %v11769_v35 = vpop.f32.mrb[173].mxu0 }
 0xc63   : > { %v11771_v5 = vpop.f32.mrb[174].mxu0 }
 0xc64   : > { %v4288_v58 = vpack.c.bf16 %v11771_v5, %v11767_v19  ;;  %v11778_v23 = vpop.f32.mrb[175].mxu0  ;;  %8493 = vmatpush3.bf16.msra.mxu0 %v4290_v41 }
 0xc65   : > { %v4289_v9 = vpack.c.bf16 %v11778_v23, %v11769_v35 }
 0xc67   : > { %4309 = vmatprep.subr.bf16.mxu1 %v4289_v9  ;;  %8495 = vmatmul.mubr.msk.bf16.vlgmr.msra.gmra.mrb[176].mxu0 %vm2404_vm3, %v8768_v44 }
 0xc68   : > { %4310 = vmatpush1.bf16.msra.mxu1 %v4288_v58  ;;  %4555 = vmatprep.mubr.bf16.mxu0 %v13926_v20 }
 0xc6b   : > { %8013 = vmatmul.mubr.msk.bf16.vlgmr.msra.gmra.mrb[148].mxu1 %vm2404_vm3, %v8767_v15 }
 0xc6c   : > { %4349 = vmatprep.mubr.bf16.mxu1 %v13926_v20 }
 0xc73   : > { %8014 = vmatmul.mubr.msk.bf16.gmra.mrb[152].mxu1 %vm2404_vm3, %v8768_v44 }
 0xc74   : > { %8502 = vmatprep.mubr.msk.bf16.mxu1 %vm2404_vm3, %v11790_v36 }
 0xd3a   : > { %v11794_v60 = vpop.f32.mrb[176].mxu0 }
 0xd3b   : > { %v4423_v38 = vmul.f32 %v11794_v60, %v11745_v51  ;;  %v11798_v10 = vpop.f32.mrb[177].mxu0 }
 0xd3c   : > { %v4421_v22 = vmul.f32 %v11798_v10, %v11749_v45  ;;  %v11802_v3 = vpop.f32.mrb[178].mxu0  ;;  %v4441_v47 = vmul.f32 %v11798_v10, %v11798_v10 }
 0xd3d   : > { %v4424_v16 = vmul.f32 %v11802_v3, %v11753_v57  ;;  %v11806_v55 = vpop.f32.mrb[179].mxu0 }
 0xd3e   : > { %v4422_v40 = vmul.f32 %v11806_v55, %v11759_v25  ;;  %v4341_v0 = vpop.f32.mrb[148].mxu1  ;;  %v4442_v27 = vmul.f32 %v11806_v55, %v11806_v55 }
 0xd3f   : > { %v4409_v13 = vmul.f32 %v4341_v0, %v11743_v8  ;;  %v4429_v54 = vmul.f32 %v4341_v0, %v4341_v0  ;;  %v4343_v43 = vpop.f32.mrb[149].mxu1 }
 0xd40   : > { %v4413_v50 = vmul.f32 %v4343_v43, %v11747_v59  ;;  %v4433_v61 = vmul.f32 %v4343_v43, %v4343_v43  ;;  %v4345_v49 = vpop.f32.mrb[150].mxu1 }
 0xd41   : > { %v4410_v26 = vmul.f32 %v4345_v49, %v11751_v24  ;;  %v4430_v56 = vmul.f32 %v4345_v49, %v4345_v49  ;;  %v4347_v63 = vpop.f32.mrb[151].mxu1 }
 0xd42   : > { %v4417_v39 = vadd.f32 %v4413_v50, %v4409_v13  ;;  %v4437_v52 = vadd.f32 %v4433_v61, %v4429_v54  ;;  %v4414_v33 = vmul.f32 %v4347_v63, %v11757_v1  ;;  %v4434_v46 = vmul.f32 %v4347_v63, %v4347_v63 }
 0xd44   : > { %v4425_v14 = vadd.f32 %v4421_v22, %v4417_v39  ;;  %v4445_v53 = vadd.f32 %v4441_v47, %v4437_v52  ;;  %v4418_v37 = vadd.f32 %v4414_v33, %v4410_v26  ;;  %v4438_v28 = vadd.f32 %v4434_v46, %v4430_v56 }
 0xd45   : > { %v4443_v22 = vmul.f32 %v11794_v60, %v11794_v60  ;;  %v4444_v33 = vmul.f32 %v11802_v3, %v11802_v3 }
 0xd46   : > { %v4449_v62 = vadd.f32 1e-06, %v4445_v53  ;;  %v4426_v30 = vadd.f32 %v4422_v40, %v4418_v37  ;;  %v4446_v15 = vadd.f32 %v4442_v27, %v4438_v28  ;;  %v4351_v48 = vpop.f32.mrb[152].mxu1  ;;  %vm4461_vm10 = vcmp.ge.f32.partialorder %v4425_v14, 0.0 }
 0xd47   : > { %v4411_v41 = vmul.f32 %v4351_v48, %v11767_v19  ;;  %v4431_v21 = vmul.f32 %v4351_v48, %v4351_v48  ;;  %v4353_v34 = vpop.f32.mrb[153].mxu1 }
 0xd48   : > { %8903 = vrcp.f32 %v4449_v62  ;;  %v4450_v44 = vadd.f32 1e-06, %v4446_v15  ;;  %v4415_v58 = vmul.f32 %v4353_v34, %v11769_v35  ;;  %v4435_v9 = vmul.f32 %v4353_v34, %v4353_v34  ;;  %v4355_v13 = vpop.f32.mrb[154].mxu1 }
 0xd49   : > { %v4412_v54 = vmul.f32 %v4355_v13, %v11771_v5  ;;  %v4432_v47 = vmul.f32 %v4355_v13, %v4355_v13  ;;  %v4357_v50 = vpop.f32.mrb[155].mxu1  ;;  %vm4462_vm11 = vcmp.ge.f32.partialorder %v4426_v30, 0.0 }
 0xd4a   : > { %8905 = vrcp.f32 %v4450_v44  ;;  %v4419_v40 = vadd.f32 %v4415_v58, %v4411_v41  ;;  %v4439_v61 = vadd.f32 %v4435_v9, %v4431_v21  ;;  %v4416_v27 = vmul.f32 %v4357_v50, %v11778_v23 }
 0xd4b   : > { %v4436_v26 = vmul.f32 %v4357_v50, %v4357_v50 }
 0xd4c   : > { %v4427_v56 = vadd.f32 %v4423_v38, %v4419_v40  ;;  %v4447_v39 = vadd.f32 %v4443_v22, %v4439_v61  ;;  %v4420_v52 = vadd.f32 %v4416_v27, %v4412_v54 }
 0xd4d   : > { %v4440_v46 = vadd.f32 %v4436_v26, %v4432_v47 }
 0xd4e   : > { %v4451_v53 = vadd.f32 1e-06, %v4447_v39  ;;  %v4428_v37 = vadd.f32 %v4424_v16, %v4420_v52  ;;  %vm4463_vm12 = vcmp.ge.f32.partialorder %v4427_v56, 0.0 }
 0xd4f   : > { %v4448_v28 = vadd.f32 %v4444_v33, %v4440_v46 }
 0xd50   : > { %8907 = vrcp.f32 %v4451_v53  ;;  %vm4464_vm13 = vcmp.ge.f32.partialorder %v4428_v37, 0.0 }
 0xd51   : > { %v4452_v62 = vadd.f32 1e-06, %v4448_v28 }
 0xd52   : > { %v8904_v15 = vpop.eup %8903 }
 0xd53   : > { %v4457_v31 = vmul.f32 %v8904_v15, %v4425_v14  ;;  %8909 = vrcp.f32 %v4452_v62 }
 0xd54   : > { %v8906_v41 = vpop.eup %8905 }
 0xd55   : > { %v4465_v21 = vmul.f32 %v4457_v31, %v4341_v0  ;;  %v4477_v44 = vmul.f32 %v4457_v31, %v4343_v43  ;;  %v4458_v58 = vmul.f32 %v8906_v41, %v4426_v30  ;;  %v4489_v38 = vmul.f32 %v4457_v31, %v11798_v10 }
 0xd57   : > { %v4481_v9 = vsub.f32 %v11747_v59, %v4477_v44  ;;  %v4466_v22 = vmul.f32 %v4458_v58, %v4345_v49  ;;  %v4478_v54 = vmul.f32 %v4458_v58, %v4347_v63  ;;  %v4490_v47 = vmul.f32 %v4458_v58, %v11806_v55 }
 0xd58   : > { %v4493_v16 = vsub.f32 %v11749_v45, %v4489_v38  ;;  %v4469_v40 = vsub.f32 %v11743_v8, %v4465_v21 }
 0xd59   : > { %v4482_v61 = vsub.f32 %v11757_v1, %v4478_v54  ;;  %v4485_v27 = vsel %vm4461_vm10, %v11747_v59, %v4481_v9  ;;  %v4494_v0 = vsub.f32 %v11759_v25, %v4490_v47  ;;  %v4470_v43 = vsub.f32 %v11751_v24, %v4466_v22 }
 0xd5a   : > { %v8908_v31 = vpop.eup %8907  ;;  %v4497_v10 = vsel %vm4461_vm10, %v11749_v45, %v4493_v16  ;;  %v4473_v49 = vsel %vm4461_vm10, %v11743_v8, %v4469_v40 }
 0xd5b   : > { %v4459_v55 = vmul.f32 %v8908_v31, %v4427_v56  ;;  %v4486_v63 = vsel %vm4462_vm11, %v11757_v1, %v4482_v61  ;;  %v4498_v14 = vsel %vm4462_vm11, %v11759_v25, %v4494_v0  ;;  %v4474_v26 = vsel %vm4462_vm11, %v11751_v24, %v4470_v43 }
 0xd5c   : > { %v4502_v39 = vpack.c.bf16 %v4486_v63, %v4485_v27  ;;  %v4503_v52 = vpack.c.bf16 %v4498_v14, %v4497_v10  ;;  %v4501_v59 = vpack.c.bf16 %v4474_v26, %v4473_v49  ;;  %v8772_v49 = vld [vmem:[%s13508_s2 + $0xf8] sm:$0xff]  }
 0xd5d   : > { %v8910_v33 = vpop.eup %8909  ;;  %v4467_v46 = vmul.f32 %v4459_v55, %v4351_v48  ;;  %v4479_v53 = vmul.f32 %v4459_v55, %v4353_v34  ;;  %v4491_v28 = vmul.f32 %v11794_v60, %v4459_v55  ;;  %v13932_v55 = vld [vmem:[#allocation39_spill] sm:$0xff] }
 0xd5e   : > { %v4460_v30 = vmul.f32 %v8910_v33, %v4428_v37  ;;  %4523 = vmatprep.subr.bf16.mxu0 %v4502_v39  ;;  %8498 = vmatprep.subr.bf16.mxu1 %v4503_v52 }
 0xd5f   : > { %v4483_v8 = vsub.f32 %v11769_v35, %v4479_v53  ;;  %4524 = vmatpush1.bf16.msra.mxu0 %v4501_v59  ;;  %8499 = vmatpush3.bf16.msra.mxu1 %v4503_v52  ;;  %v4495_v45 = vsub.f32 %v11745_v51, %v4491_v28  ;;  %v4471_v1 = vsub.f32 %v11767_v19, %v4467_v46 }
 0xd60   : > { %v4468_v24 = vmul.f32 %v4460_v30, %v4355_v13  ;;  %v4480_v25 = vmul.f32 %v4460_v30, %v4357_v50  ;;  %v4492_v62 = vmul.f32 %v11802_v3, %v4460_v30 }
 0xd61   : > { %v4487_v48 = vsel %vm4463_vm12, %v11769_v35, %v4483_v8  ;;  %v4499_v60 = vsel %vm4463_vm12, %v11745_v51, %v4495_v45  ;;  %v4475_v34 = vsel %vm4463_vm12, %v11767_v19, %v4471_v1  ;;  %v8770_v51 = vld [vmem:[%s13508_s2 + $0xe8] sm:$0xff]  }
 0xd62   : > { %v4484_v15 = vsub.f32 %v11778_v23, %v4480_v25  ;;  %v4496_v41 = vsub.f32 %v11753_v57, %v4492_v62  ;;  %v4472_v21 = vsub.f32 %v11771_v5, %v4468_v24 }
 0xd64   : > { %v4488_v44 = vsel %vm4464_vm13, %v11778_v23, %v4484_v15  ;;  %v4500_v13 = vsel %vm4464_vm13, %v11753_v57, %v4496_v41  ;;  %v4476_v50 = vsel %vm4464_vm13, %v11771_v5, %v4472_v21  ;;  %v8771_v57 = vld [vmem:[%s13508_s2 + $0xf0] sm:$0xff]  }
 0xd65   : > { %v4505_v3 = vpack.c.bf16 %v4488_v44, %v4487_v48  ;;  %v4506_v56 = vpack.c.bf16 %v4500_v13, %v4499_v60  ;;  %v4504_v35 = vpack.c.bf16 %v4476_v50, %v4475_v34 }
 0xd67   : > { %4525 = vmatprep.subr.bf16.mxu0 %v4505_v3  ;;  %8500 = vmatprep.subr.bf16.mxu1 %v4506_v56 }
 0xd68   : > { %4526 = vmatpush1.bf16.msra.mxu0 %v4504_v35  ;;  %8501 = vmatpush3.bf16.msra.mxu1 %v4506_v56 }
 0xd6b   : > { %8019 = vmatmul.mubr.msk.bf16.vlgmr.msra.gmra.mrb[180].mxu0 %vm2404_vm3, %v11790_v36  ;;  %8503 = vmatmul.mubr.msk.bf16.vlgmr.msra.gmra.mrb[156].mxu1 %vm2404_vm3, %v8770_v51 }
 0xd6c   : > { %4565 = vmatprep.mubr.bf16.mxu0 %v13926_v20  ;;  %4707 = vmatprep.mubr.bf16.mxu1 %v13926_v20 }
 0xd73   : > { %8020 = vmatmul.mubr.msk.bf16.gmra.mrb[184].mxu0 %vm2404_vm3, %v8770_v51 }
 0xd74   : > { %8510 = vmatprep.mubr.msk.bf16.mxu0 %vm2404_vm3, %v8771_v57 }
 0xe3e   : > { %v4557_v19 = vpop.f32.mrb[180].mxu0  ;;  %v8504_v5 = vpop.f32.mrb[156].mxu1 }
 0xe3f   : > { %v4559_v23 = vpop.f32.mrb[181].mxu0  ;;  %v4610_v37 = vpop.f32.mrb[157].mxu1 }
 0xe40   : > { %v4561_v58 = vpop.f32.mrb[182].mxu0  ;;  %v8505_v36 = vpop.f32.mrb[158].mxu1  ;;  %v11868_v38 = vadd.f32 %v4559_v23, %v11602_v29  ;;  %v11874_v47 = vadd.f32 %v4610_v37, %v11608_v12  ;;  %v11886_v29 = vadd.f32 %v4557_v19, %v11620_v11 }
 0xe41   : > { %v11871_v9 = vadd.f32 %v4561_v58, %v11605_v18  ;;  %v4563_v22 = vpop.f32.mrb[183].mxu0  ;;  %v4613_v54 = vpop.f32.mrb[159].mxu1  ;;  %v11877_v16 = vadd.f32 %v8505_v36, %v11611_v6  ;;  %v11889_v18 = vadd.f32 %v8504_v5, %v11623_v32 }
 0xe42   : > { %v11880_v40 = vadd.f32 %v4563_v22, %v11614_v4  ;;  %v11883_v61 = vadd.f32 %v4613_v54, %v11617_v7 }
 0xe43   : > { %v4653_v6 = vpack.c.bf16 %v11871_v9, %v11886_v29  ;;  %v4658_v7 = vpack.c.bf16 %v11877_v16, %v11889_v18 }
 0xe44   : > { %v4654_v27 = vpack.c.bf16 %v11880_v40, %v11868_v38  ;;  %v4655_v12 = vpack.c.bf16 %v11883_v61, %v11874_v47 }
 0xe46   : > { %v4567_v4 = vpop.f32.mrb[184].mxu0  ;;  %4675 = vmatprep.subr.bf16.mxu1 %v4654_v27  ;;  %8506 = vmatprep.subr.bf16.mxu0 %v4655_v12 }
 0xe47   : > { %v4569_v11 = vpop.f32.mrb[185].mxu0  ;;  %4676 = vmatpush1.bf16.msra.mxu1 %v4653_v6  ;;  %8507 = vmatpush3.bf16.msra.mxu0 %v4655_v12  ;;  %v11912_v63 = vadd.f32 %v4567_v4, %v13932_v55 }
 0xe48   : > { %v4571_v32 = vpop.f32.mrb[186].mxu0  ;;  %8508 = vmatprep.subr.bf16.mxu0 %v4658_v7  ;;  %v11903_v31 = vadd.f32 %v4569_v11, %v11637_v42  ;;  %v11926_v42 = vld [vmem:[%s13508_s2 + $0x100] sm:$0xff]  }
 0xe49   : > { %v11900_v0 = vadd.f32 %v4571_v32, %v11634_v17  ;;  %v4573_v43 = vpop.f32.mrb[187].mxu0  ;;  %13933 = vst [vmem:[#allocation36_spill] sm:$0xff] %v11912_v63 }
 0xe4a   : > { %v11906_v10 = vadd.f32 %v4573_v43, %v11640_v2 }
 0xe4b   : > { %8509 = vmatpush3.bf16.msra.mxu0 %v4658_v7  ;;  %v4656_v17 = vpack.c.bf16 %v11900_v0, %v11912_v63 }
 0xe4c   : > { %v4657_v14 = vpack.c.bf16 %v11906_v10, %v11903_v31 }
 0xe4e   : > { %4677 = vmatprep.subr.bf16.mxu1 %v4657_v14  ;;  %8511 = vmatmul.mubr.msk.bf16.vlgmr.msra.gmra.mrb[188].mxu0 %vm2404_vm3, %v8772_v49 }
 0xe4f   : > { %4678 = vmatpush1.bf16.msra.mxu1 %v4656_v17  ;;  %4923 = vmatprep.mubr.bf16.mxu0 %v13926_v20 }
 0xe52   : > { %8025 = vmatmul.mubr.msk.bf16.vlgmr.msra.gmra.mrb[160].mxu1 %vm2404_vm3, %v8771_v57 }
 0xe53   : > { %4717 = vmatprep.mubr.bf16.mxu1 %v13926_v20 }
 0xe5a   : > { %8026 = vmatmul.mubr.msk.bf16.gmra.mrb[164].mxu1 %vm2404_vm3, %v8772_v49 }
 0xe5b   : > { %8518 = vmatprep.mubr.msk.bf16.mxu1 %vm2404_vm3, %v11926_v42 }
 0xf21   : > { %v11930_v2 = vpop.f32.mrb[188].mxu0 }
 0xf22   : > { %v11932_v26 = vpop.f32.mrb[189].mxu0  ;;  %v4791_v54 = vmul.f32 %v11930_v2, %v11889_v18  ;;  %v4811_v27 = vmul.f32 %v11930_v2, %v11930_v2 }
 0xf23   : > { %v11934_v39 = vpop.f32.mrb[190].mxu0  ;;  %v4809_v28 = vmul.f32 %v11932_v26, %v11932_v26  ;;  %v4789_v1 = vmul.f32 %v11932_v26, %v11874_v47 }
 0xf24   : > { %v11936_v52 = vpop.f32.mrb[191].mxu0  ;;  %v4792_v49 = vmul.f32 %v11934_v39, %v11877_v16 }
 0xf25   : > { %v4709_v59 = vpop.f32.mrb[160].mxu1  ;;  %v4810_v24 = vmul.f32 %v11936_v52, %v11936_v52  ;;  %v4790_v21 = vmul.f32 %v11936_v52, %v11883_v61 }
 0xf26   : > { %v4777_v33 = vmul.f32 %v4709_v59, %v11886_v29  ;;  %v4797_v46 = vmul.f32 %v4709_v59, %v4709_v59  ;;  %v4711_v53 = vpop.f32.mrb[161].mxu1 }
 0xf27   : > { %v4781_v30 = vmul.f32 %v4711_v53, %v11868_v38  ;;  %v4801_v8 = vmul.f32 %v4711_v53, %v4711_v53  ;;  %v4713_v45 = vpop.f32.mrb[162].mxu1 }
 0xf28   : > { %v4778_v25 = vmul.f32 %v4713_v45, %v11871_v9  ;;  %v4798_v62 = vmul.f32 %v4713_v45, %v4713_v45  ;;  %v4715_v48 = vpop.f32.mrb[163].mxu1 }
 0xf29   : > { %v4785_v60 = vadd.f32 %v4781_v30, %v4777_v33  ;;  %v4805_v34 = vadd.f32 %v4801_v8, %v4797_v46  ;;  %v4782_v15 = vmul.f32 %v4715_v48, %v11880_v40  ;;  %v4802_v41 = vmul.f32 %v4715_v48, %v4715_v48 }
 0xf2a   : > { %v4812_v33 = vmul.f32 %v11934_v39, %v11934_v39 }
 0xf2b   : > { %v4793_v44 = vadd.f32 %v4789_v1, %v4785_v60  ;;  %v4813_v13 = vadd.f32 %v4809_v28, %v4805_v34  ;;  %v4786_v50 = vadd.f32 %v4782_v15, %v4778_v25  ;;  %v4806_v3 = vadd.f32 %v4802_v41, %v4798_v62 }
 0xf2d   : > { %v4817_v56 = vadd.f32 1e-06, %v4813_v13  ;;  %v4794_v35 = vadd.f32 %v4790_v21, %v4786_v50  ;;  %v4814_v51 = vadd.f32 %v4810_v24, %v4806_v3  ;;  %v4719_v57 = vpop.f32.mrb[164].mxu1  ;;  %vm4829_vm14 = vcmp.ge.f32.partialorder %v4793_v44, 0.0 }
 0xf2e   : > { %v4779_v19 = vmul.f32 %v4719_v57, %v11912_v63  ;;  %v4799_v5 = vmul.f32 %v4719_v57, %v4719_v57  ;;  %v4721_v23 = vpop.f32.mrb[165].mxu1 }
 0xf2f   : > { %8911 = vrcp.f32 %v4817_v56  ;;  %v4818_v37 = vadd.f32 1e-06, %v4814_v51  ;;  %v4783_v58 = vmul.f32 %v4721_v23, %v11903_v31  ;;  %v4803_v36 = vmul.f32 %v4721_v23, %v4721_v23  ;;  %v11952_v22 = vpop.f32.mrb[166].mxu1 }
 0xf30   : > { %v4780_v12 = vmul.f32 %v11952_v22, %v11900_v0  ;;  %v4800_v6 = vmul.f32 %v11952_v22, %v11952_v22  ;;  %v4725_v4 = vpop.f32.mrb[167].mxu1  ;;  %vm4830_vm15 = vcmp.ge.f32.partialorder %v4794_v35, 0.0 }
 0xf31   : > { %8913 = vrcp.f32 %v4818_v37  ;;  %v4787_v7 = vadd.f32 %v4783_v58, %v4779_v19  ;;  %v4807_v11 = vadd.f32 %v4803_v36, %v4799_v5  ;;  %v4784_v32 = vmul.f32 %v4725_v4, %v11906_v10 }
 0xf32   : > { %v4804_v43 = vmul.f32 %v4725_v4, %v4725_v4 }
 0xf33   : > { %v4795_v55 = vadd.f32 %v4791_v54, %v4787_v7  ;;  %v4815_v14 = vadd.f32 %v4811_v27, %v4807_v11  ;;  %v4788_v17 = vadd.f32 %v4784_v32, %v4780_v12 }
 0xf34   : > { %v4808_v46 = vadd.f32 %v4804_v43, %v4800_v6 }
 0xf35   : > { %v4819_v28 = vadd.f32 1e-06, %v4815_v14  ;;  %v4796_v30 = vadd.f32 %v4792_v49, %v4788_v17  ;;  %vm4831_vm1 = vcmp.ge.f32.partialorder %v4795_v55, 0.0 }
 0xf36   : > { %v4816_v8 = vadd.f32 %v4812_v33, %v4808_v46 }
 0xf37   : > { %8915 = vrcp.f32 %v4819_v28  ;;  %vm4832_vm2 = vcmp.ge.f32.partialorder %v4796_v30, 0.0 }
 0xf38   : > { %v4820_v1 = vadd.f32 1e-06, %v4816_v8 }
 0xf39   : > { %v8912_v24 = vpop.eup %8911 }
 0xf3a   : > { %v4825_v25 = vmul.f32 %v8912_v24, %v4793_v44  ;;  %8917 = vrcp.f32 %v4820_v1 }
 0xf3b   : > { %v8914_v62 = vpop.eup %8913 }
 0xf3c   : > { %v4833_v60 = vmul.f32 %v4825_v25, %v4709_v59  ;;  %v4845_v34 = vmul.f32 %v4825_v25, %v4711_v53  ;;  %v4826_v15 = vmul.f32 %v8914_v62, %v4794_v35  ;;  %v4857_v41 = vmul.f32 %v4825_v25, %v11932_v26  ;;  %v8774_v25 = vld [vmem:[%s13508_s2 + $0x108] sm:$0xff]  }
 0xf3e   : > { %v4849_v21 = vsub.f32 %v11868_v38, %v4845_v34  ;;  %v4834_v13 = vmul.f32 %v4826_v15, %v4713_v45  ;;  %v4846_v50 = vmul.f32 %v4826_v15, %v4715_v48  ;;  %v4858_v3 = vmul.f32 %v4826_v15, %v11936_v52 }
 0xf3f   : > { %v4861_v56 = vsub.f32 %v11874_v47, %v4857_v41  ;;  %v4837_v51 = vsub.f32 %v11886_v29, %v4833_v60 }
 0xf40   : > { %v4850_v19 = vsub.f32 %v11880_v40, %v4846_v50  ;;  %v4853_v5 = vsel %vm4829_vm14, %v11868_v38, %v4849_v21  ;;  %v4862_v59 = vsub.f32 %v11883_v61, %v4858_v3  ;;  %v4838_v53 = vsub.f32 %v11871_v9, %v4834_v13 }
 0xf41   : > { %v8916_v26 = vpop.eup %8915  ;;  %v4865_v45 = vsel %vm4829_vm14, %v11874_v47, %v4861_v56  ;;  %v4841_v48 = vsel %vm4829_vm14, %v11886_v29, %v4837_v51 }
 0xf42   : > { %v4827_v52 = vmul.f32 %v8916_v26, %v4795_v55  ;;  %v4854_v44 = vsel %vm4830_vm15, %v11880_v40, %v4850_v19  ;;  %v4866_v37 = vsel %vm4830_vm15, %v11883_v61, %v4862_v59  ;;  %v4842_v58 = vsel %vm4830_vm15, %v11871_v9, %v4838_v53  ;;  %v8776_v53 = vld [vmem:[%s13508_s2 + $0x118] sm:$0xff]  }
 0xf43   : > { %v4870_v36 = vpack.c.bf16 %v4854_v44, %v4853_v5  ;;  %v4871_v54 = vpack.c.bf16 %v4866_v37, %v4865_v45  ;;  %v4869_v27 = vpack.c.bf16 %v4842_v58, %v4841_v48 }
 0xf44   : > { %v8918_v12 = vpop.eup %8917  ;;  %v4835_v6 = vmul.f32 %v4827_v52, %v4719_v57  ;;  %v4847_v7 = vmul.f32 %v4827_v52, %v4721_v23  ;;  %v4859_v11 = vmul.f32 %v11930_v2, %v4827_v52  ;;  %v12056_v52 = vld [vmem:[%s13508_s2 + $0x120] sm:$0xff]  }
 0xf45   : > { %v4828_v35 = vmul.f32 %v8918_v12, %v4796_v30  ;;  %4891 = vmatprep.subr.bf16.mxu0 %v4870_v36  ;;  %8514 = vmatprep.subr.bf16.mxu1 %v4871_v54  ;;  %v8775_v30 = vld [vmem:[%s13508_s2 + $0x110] sm:$0xff]  }
 0xf46   : > { %v4851_v32 = vsub.f32 %v11903_v31, %v4847_v7  ;;  %4892 = vmatpush1.bf16.msra.mxu0 %v4869_v27  ;;  %8515 = vmatpush3.bf16.msra.mxu1 %v4871_v54  ;;  %v4863_v43 = vsub.f32 %v11889_v18, %v4859_v11  ;;  %v4839_v49 = vsub.f32 %v11912_v63, %v4835_v6 }
 0xf47   : > { %v4836_v14 = vmul.f32 %v4828_v35, %v11952_v22  ;;  %v4848_v17 = vmul.f32 %v4828_v35, %v4725_v4  ;;  %v4860_v57 = vmul.f32 %v11934_v39, %v4828_v35 }
 0xf48   : > { %v4855_v23 = vsel %vm4831_vm1, %v11903_v31, %v4851_v32  ;;  %v4867_v2 = vsel %vm4831_vm1, %v11889_v18, %v4863_v43  ;;  %v4843_v33 = vsel %vm4831_vm1, %v11912_v63, %v4839_v49  ;;  %vm6273_vm1 = vcmask 523264  }
 0xf49   : > { %v4852_v46 = vsub.f32 %v11906_v10, %v4848_v17  ;;  %v4864_v28 = vsub.f32 %v11877_v16, %v4860_v57  ;;  %v4840_v8 = vsub.f32 %v11900_v0, %v4836_v14 }
 0xf4b   : > { %v4856_v1 = vsel %vm4832_vm2, %v11906_v10, %v4852_v46  ;;  %v4868_v22 = vsel %vm4832_vm2, %v11877_v16, %v4864_v28  ;;  %v4844_v4 = vsel %vm4832_vm2, %v11900_v0, %v4840_v8 }
 0xf4c   : > { %v4873_v39 = vpack.c.bf16 %v4856_v1, %v4855_v23  ;;  %v4874_v55 = vpack.c.bf16 %v4868_v22, %v4867_v2  ;;  %v4872_v24 = vpack.c.bf16 %v4844_v4, %v4843_v33 }
 0xf4e   : > { %4893 = vmatprep.subr.bf16.mxu0 %v4873_v39  ;;  %8516 = vmatprep.subr.bf16.mxu1 %v4874_v55 }
 0xf4f   : > { %4894 = vmatpush1.bf16.msra.mxu0 %v4872_v24  ;;  %8517 = vmatpush3.bf16.msra.mxu1 %v4874_v55 }
 0xf52   : > { %8031 = vmatmul.mubr.msk.bf16.vlgmr.msra.gmra.mrb[192].mxu0 %vm2404_vm3, %v11926_v42  ;;  %8519 = vmatmul.mubr.msk.bf16.vlgmr.msra.gmra.mrb[168].mxu1 %vm2404_vm3, %v8774_v25 }
 0xf53   : > { %4933 = vmatprep.mubr.bf16.mxu0 %v13926_v20  ;;  %5047 = vmatprep.mubr.bf16.mxu1 %v13926_v20 }
 0xf5a   : > { %8032 = vmatmul.mubr.msk.bf16.gmra.mrb[196].mxu0 %vm2404_vm3, %v8774_v25 }
 0xf5b   : > { %8526 = vmatprep.mubr.msk.bf16.mxu0 %vm2404_vm3, %v8775_v30 }
0x1025   : > { %v12009_v62 = vpop.f32.mrb[192].mxu0  ;;  %v12011_v60 = vpop.f32.mrb[168].mxu1 }
0x1026   : > { %v12013_v34 = vpop.f32.mrb[193].mxu0  ;;  %v12015_v42 = vpop.f32.mrb[169].mxu1 }
0x1027   : > { %v12017_v15 = vpop.f32.mrb[194].mxu0  ;;  %v12019_v41 = vpop.f32.mrb[170].mxu1 }
0x1028   : > { %v4993_v21 = vpack.c.bf16 %v12017_v15, %v12009_v62  ;;  %v12023_v13 = vpop.f32.mrb[195].mxu0  ;;  %v12025_v50 = vpop.f32.mrb[171].mxu1  ;;  %v4998_v3 = vpack.c.bf16 %v12019_v41, %v12011_v60 }
0x1029   : > { %v4994_v56 = vpack.c.bf16 %v12023_v13, %v12013_v34  ;;  %v4995_v51 = vpack.c.bf16 %v12025_v50, %v12015_v42 }
0x102b   : > { %5015 = vmatprep.subr.bf16.mxu1 %v4994_v56  ;;  %8522 = vmatprep.subr.bf16.mxu0 %v4995_v51 }
0x102c   : > { %5016 = vmatpush1.bf16.msra.mxu1 %v4993_v21  ;;  %8523 = vmatpush3.bf16.msra.mxu0 %v4995_v51 }
0x102d   : > { %v12033_v19 = vpop.f32.mrb[196].mxu0  ;;  %8524 = vmatprep.subr.bf16.mxu0 %v4998_v3 }
0x102e   : > { %v12035_v5 = vpop.f32.mrb[197].mxu0 }
0x102f   : > { %v12037_v59 = vpop.f32.mrb[198].mxu0 }
0x1030   : > { %v4996_v26 = vpack.c.bf16 %v12037_v59, %v12033_v19  ;;  %v12044_v45 = vpop.f32.mrb[199].mxu0  ;;  %8525 = vmatpush3.bf16.msra.mxu0 %v4998_v3 }
0x1031   : > { %v4997_v48 = vpack.c.bf16 %v12044_v45, %v12035_v5 }
0x1033   : > { %5017 = vmatprep.subr.bf16.mxu1 %v4997_v48  ;;  %8527 = vmatmul.mubr.msk.bf16.vlgmr.msra.gmra.mrb[200].mxu0 %vm2404_vm3, %v8776_v53 }
0x1034   : > { %5018 = vmatpush1.bf16.msra.mxu1 %v4996_v26  ;;  %5263 = vmatprep.mubr.bf16.mxu0 %v13926_v20 }
0x1037   : > { %8037 = vmatmul.mubr.msk.bf16.vlgmr.msra.gmra.mrb[172].mxu1 %vm2404_vm3, %v8775_v30 }
0x1038   : > { %5057 = vmatprep.mubr.bf16.mxu1 %v13926_v20 }
0x103f   : > { %8038 = vmatmul.mubr.msk.bf16.gmra.mrb[176].mxu1 %vm2404_vm3, %v8776_v53 }
0x1040   : > { %8534 = vmatprep.mubr.msk.bf16.mxu1 %vm2404_vm3, %v12056_v52 }
0x1106   : > { %v12060_v44 = vpop.f32.mrb[200].mxu0 }
0x1107   : > { %v5131_v37 = vmul.f32 %v12060_v44, %v12011_v60  ;;  %v12064_v58 = vpop.f32.mrb[201].mxu0 }
0x1108   : > { %v5129_v36 = vmul.f32 %v12064_v58, %v12015_v42  ;;  %v12068_v54 = vpop.f32.mrb[202].mxu0  ;;  %v5149_v43 = vmul.f32 %v12064_v58, %v12064_v58 }
0x1109   : > { %v5132_v27 = vmul.f32 %v12068_v54, %v12019_v41  ;;  %v12072_v12 = vpop.f32.mrb[203].mxu0 }
0x110a   : > { %v5130_v6 = vmul.f32 %v12072_v12, %v12025_v50  ;;  %v5049_v7 = vpop.f32.mrb[172].mxu1  ;;  %v5150_v57 = vmul.f32 %v12072_v12, %v12072_v12 }
0x110b   : > { %v5117_v11 = vmul.f32 %v5049_v7, %v12009_v62  ;;  %v5137_v35 = vmul.f32 %v5049_v7, %v5049_v7  ;;  %v5051_v32 = vpop.f32.mrb[173].mxu1 }
0x110c   : > { %v5121_v49 = vmul.f32 %v5051_v32, %v12013_v34  ;;  %v5141_v14 = vmul.f32 %v5051_v32, %v5051_v32  ;;  %v5053_v17 = vpop.f32.mrb[174].mxu1 }
0x110d   : > { %v5118_v23 = vmul.f32 %v5053_v17, %v12017_v15  ;;  %v5138_v2 = vmul.f32 %v5053_v17, %v5053_v17  ;;  %v5055_v33 = vpop.f32.mrb[175].mxu1 }
0x110e   : > { %v5125_v46 = vadd.f32 %v5121_v49, %v5117_v11  ;;  %v5145_v28 = vadd.f32 %v5141_v14, %v5137_v35  ;;  %v5122_v8 = vmul.f32 %v5055_v33, %v12023_v13  ;;  %v5142_v1 = vmul.f32 %v5055_v33, %v5055_v33 }
0x1110   : > { %v5133_v22 = vadd.f32 %v5129_v36, %v5125_v46  ;;  %v5153_v4 = vadd.f32 %v5149_v43, %v5145_v28  ;;  %v5126_v39 = vadd.f32 %v5122_v8, %v5118_v23  ;;  %v5146_v55 = vadd.f32 %v5142_v1, %v5138_v2 }
0x1111   : > { %v5151_v36 = vmul.f32 %v12060_v44, %v12060_v44  ;;  %v5152_v8 = vmul.f32 %v12068_v54, %v12068_v54 }
0x1112   : > { %v5157_v24 = vadd.f32 1e-06, %v5153_v4  ;;  %v5134_v25 = vadd.f32 %v5130_v6, %v5126_v39  ;;  %v5154_v30 = vadd.f32 %v5150_v57, %v5146_v55  ;;  %v5059_v21 = vpop.f32.mrb[176].mxu1  ;;  %vm5169_vm4 = vcmp.ge.f32.partialorder %v5133_v22, 0.0 }
0x1113   : > { %v5119_v3 = vmul.f32 %v5059_v21, %v12033_v19  ;;  %v5139_v56 = vmul.f32 %v5059_v21, %v5059_v21  ;;  %v5061_v51 = vpop.f32.mrb[177].mxu1 }
0x1114   : > { %8919 = vrcp.f32 %v5157_v24  ;;  %v5158_v53 = vadd.f32 1e-06, %v5154_v30  ;;  %v5123_v26 = vmul.f32 %v5061_v51, %v12035_v5  ;;  %v5143_v48 = vmul.f32 %v5061_v51, %v5061_v51  ;;  %v5063_v11 = vpop.f32.mrb[178].mxu1 }
0x1115   : > { %v5120_v35 = vmul.f32 %v5063_v11, %v12037_v59  ;;  %v5140_v43 = vmul.f32 %v5063_v11, %v5063_v11  ;;  %v5065_v49 = vpop.f32.mrb[179].mxu1  ;;  %vm5170_vm5 = vcmp.ge.f32.partialorder %v5134_v25, 0.0 }
0x1116   : > { %8921 = vrcp.f32 %v5158_v53  ;;  %v5127_v6 = vadd.f32 %v5123_v26, %v5119_v3  ;;  %v5147_v14 = vadd.f32 %v5143_v48, %v5139_v56  ;;  %v5124_v57 = vmul.f32 %v5065_v49, %v12044_v45 }
0x1117   : > { %v5144_v23 = vmul.f32 %v5065_v49, %v5065_v49 }
0x1118   : > { %v5135_v2 = vadd.f32 %v5131_v37, %v5127_v6  ;;  %v5155_v46 = vadd.f32 %v5151_v36, %v5147_v14  ;;  %v5128_v28 = vadd.f32 %v5124_v57, %v5120_v35 }
0x1119   : > { %v5148_v1 = vadd.f32 %v5144_v23, %v5140_v43 }
0x111a   : > { %v5159_v4 = vadd.f32 1e-06, %v5155_v46  ;;  %v5136_v39 = vadd.f32 %v5132_v27, %v5128_v28  ;;  %vm5171_vm6 = vcmp.ge.f32.partialorder %v5135_v2, 0.0 }
0x111b   : > { %v5156_v55 = vadd.f32 %v5152_v8, %v5148_v1 }
0x111c   : > { %8923 = vrcp.f32 %v5159_v4  ;;  %vm5172_vm7 = vcmp.ge.f32.partialorder %v5136_v39, 0.0 }
0x111d   : > { %v5160_v24 = vadd.f32 1e-06, %v5156_v55 }
0x111e   : > { %v8920_v30 = vpop.eup %8919 }
0x111f   : > { %v5165_v63 = vmul.f32 %v8920_v30, %v5133_v22  ;;  %8925 = vrcp.f32 %v5160_v24 }
0x1120   : > { %v8922_v3 = vpop.eup %8921 }
0x1121   : > { %v5173_v56 = vmul.f32 %v5165_v63, %v5049_v7  ;;  %v5185_v53 = vmul.f32 %v5165_v63, %v5051_v32  ;;  %v5166_v26 = vmul.f32 %v8922_v3, %v5134_v25  ;;  %v5197_v37 = vmul.f32 %v5165_v63, %v12064_v58 }
0x1123   : > { %v5189_v48 = vsub.f32 %v12013_v34, %v5185_v53  ;;  %v5174_v36 = vmul.f32 %v5166_v26, %v5053_v17  ;;  %v5186_v35 = vmul.f32 %v5166_v26, %v5055_v33  ;;  %v5198_v43 = vmul.f32 %v5166_v26, %v12072_v12 }
0x1124   : > { %v5201_v27 = vsub.f32 %v12015_v42, %v5197_v37  ;;  %v5177_v6 = vsub.f32 %v12009_v62, %v5173_v56 }
0x1125   : > { %v5190_v14 = vsub.f32 %v12023_v13, %v5186_v35  ;;  %v5193_v57 = vsel %vm5169_vm4, %v12013_v34, %v5189_v48  ;;  %v5202_v7 = vsub.f32 %v12025_v50, %v5198_v43  ;;  %v5178_v32 = vsub.f32 %v12017_v15, %v5174_v36 }
0x1126   : > { %v8924_v63 = vpop.eup %8923  ;;  %v5205_v58 = vsel %vm5169_vm4, %v12015_v42, %v5201_v27  ;;  %v5181_v17 = vsel %vm5169_vm4, %v12009_v62, %v5177_v6 }
0x1127   : > { %v5167_v12 = vmul.f32 %v8924_v63, %v5135_v2  ;;  %v5194_v33 = vsel %vm5170_vm5, %v12023_v13, %v5190_v14  ;;  %v5206_v22 = vsel %vm5170_vm5, %v12025_v50, %v5202_v7  ;;  %v5182_v23 = vsel %vm5170_vm5, %v12017_v15, %v5178_v32 }
0x1128   : > { %v5210_v46 = vpack.c.bf16 %v5194_v33, %v5193_v57  ;;  %v5211_v28 = vpack.c.bf16 %v5206_v22, %v5205_v58  ;;  %v5209_v34 = vpack.c.bf16 %v5182_v23, %v5181_v17  ;;  %v8780_v17 = vld [vmem:[%s13508_s2 + $0x138] sm:$0xff]   ;;  %v8783_v23 = vld [vmem:[%s13508_s2 + $0x150] sm:$0xff]  }
0x1129   : > { %v8926_v8 = vpop.eup %8925  ;;  %v5175_v1 = vmul.f32 %v5167_v12, %v5059_v21  ;;  %v5187_v4 = vmul.f32 %v5167_v12, %v5061_v51  ;;  %v5199_v55 = vmul.f32 %v12060_v44, %v5167_v12  ;;  %v13934_v12 = vld [vmem:[#allocation36_spill] sm:$0xff] }
0x112a   : > { %v5168_v25 = vmul.f32 %v8926_v8, %v5136_v39  ;;  %5231 = vmatprep.subr.bf16.mxu0 %v5210_v46  ;;  %8530 = vmatprep.subr.bf16.mxu1 %v5211_v28  ;;  %v8784_v46 = vld [vmem:[%s13508_s2 + $0x158] sm:$0xff]  }
0x112b   : > { %v5191_v62 = vsub.f32 %v12035_v5, %v5187_v4  ;;  %5232 = vmatpush1.bf16.msra.mxu0 %v5209_v34  ;;  %8531 = vmatpush3.bf16.msra.mxu1 %v5211_v28  ;;  %v5203_v42 = vsub.f32 %v12011_v60, %v5199_v55  ;;  %v5179_v13 = vsub.f32 %v12033_v19, %v5175_v1 }
0x112c   : > { %v5176_v15 = vmul.f32 %v5168_v25, %v5063_v11  ;;  %v5188_v50 = vmul.f32 %v5168_v25, %v5065_v49  ;;  %v5200_v24 = vmul.f32 %v12068_v54, %v5168_v25 }
0x112d   : > { %v5195_v21 = vsel %vm5171_vm6, %v12035_v5, %v5191_v62  ;;  %v5207_v44 = vsel %vm5171_vm6, %v12011_v60, %v5203_v42  ;;  %v5183_v51 = vsel %vm5171_vm6, %v12033_v19, %v5179_v13  ;;  %v8778_v60 = vld [vmem:[%s13508_s2 + $0x128] sm:$0xff]  }
0x112e   : > { %v5192_v30 = vsub.f32 %v12044_v45, %v5188_v50  ;;  %v5204_v3 = vsub.f32 %v12019_v41, %v5200_v24  ;;  %v5180_v56 = vsub.f32 %v12037_v59, %v5176_v15 }
0x1130   : > { %v5196_v53 = vsel %vm5172_vm7, %v12044_v45, %v5192_v30  ;;  %v5208_v11 = vsel %vm5172_vm7, %v12019_v41, %v5204_v3  ;;  %v5184_v49 = vsel %vm5172_vm7, %v12037_v59, %v5180_v56  ;;  %v8779_v41 = vld [vmem:[%s13508_s2 + $0x130] sm:$0xff]  }
0x1131   : > { %v5213_v54 = vpack.c.bf16 %v5196_v53, %v5195_v21  ;;  %v5214_v2 = vpack.c.bf16 %v5208_v11, %v5207_v44  ;;  %v5212_v5 = vpack.c.bf16 %v5184_v49, %v5183_v51 }
0x1133   : > { %5233 = vmatprep.subr.bf16.mxu0 %v5213_v54  ;;  %8532 = vmatprep.subr.bf16.mxu1 %v5214_v2 }
0x1134   : > { %5234 = vmatpush1.bf16.msra.mxu0 %v5212_v5  ;;  %8533 = vmatpush3.bf16.msra.mxu1 %v5214_v2 }
0x1137   : > { %8043 = vmatmul.mubr.msk.bf16.vlgmr.msra.gmra.mrb[204].mxu0 %vm2404_vm3, %v12056_v52  ;;  %8535 = vmatmul.mubr.msk.bf16.vlgmr.msra.gmra.mrb[180].mxu1 %vm2404_vm3, %v8778_v60 }
0x1138   : > { %5273 = vmatprep.mubr.bf16.mxu0 %v13926_v20  ;;  %5459 = vmatprep.mubr.bf16.mxu1 %v13926_v20 }
0x113f   : > { %8044 = vmatmul.mubr.msk.bf16.gmra.mrb[208].mxu0 %vm2404_vm3, %v8778_v60 }
0x1140   : > { %8542 = vmatprep.mubr.msk.bf16.mxu0 %vm2404_vm3, %v8779_v41 }
0x120a   : > { %v5265_v19 = vpop.f32.mrb[204].mxu0  ;;  %v8536_v59 = vpop.f32.mrb[180].mxu1 }
0x120b   : > { %v5267_v45 = vpop.f32.mrb[205].mxu0  ;;  %v5318_v39 = vpop.f32.mrb[181].mxu1 }
0x120c   : > { %v5269_v26 = vpop.f32.mrb[206].mxu0  ;;  %v8537_v52 = vpop.f32.mrb[182].mxu1  ;;  %v12134_v37 = vadd.f32 %v5267_v45, %v11868_v38  ;;  %v12140_v43 = vadd.f32 %v5318_v39, %v11874_v47  ;;  %v12152_v38 = vadd.f32 %v5265_v19, %v11886_v29 }
0x120d   : > { %v12137_v48 = vadd.f32 %v5269_v26, %v11871_v9  ;;  %v5271_v36 = vpop.f32.mrb[207].mxu0  ;;  %v5321_v35 = vpop.f32.mrb[183].mxu1  ;;  %v12143_v27 = vadd.f32 %v8537_v52, %v11877_v16  ;;  %v12155_v9 = vadd.f32 %v8536_v59, %v11889_v18 }
0x120e   : > { %v12146_v6 = vadd.f32 %v5271_v36, %v11880_v40  ;;  %v12149_v14 = vadd.f32 %v5321_v35, %v11883_v61 }
0x120f   : > { %v5373_v16 = vpack.c.bf16 %v12137_v48, %v12152_v38  ;;  %v5378_v61 = vpack.c.bf16 %v12143_v27, %v12155_v9 }
0x1210   : > { %v5374_v57 = vpack.c.bf16 %v12146_v6, %v12134_v37  ;;  %v5375_v47 = vpack.c.bf16 %v12149_v14, %v12140_v43 }
0x1212   : > { %v5275_v40 = vpop.f32.mrb[208].mxu0  ;;  %5427 = vmatprep.subr.bf16.mxu1 %v5374_v57  ;;  %8538 = vmatprep.subr.bf16.mxu0 %v5375_v47 }
0x1213   : > { %v5277_v29 = vpop.f32.mrb[209].mxu0  ;;  %5428 = vmatpush1.bf16.msra.mxu1 %v5373_v16  ;;  %8539 = vmatpush3.bf16.msra.mxu0 %v5375_v47  ;;  %v12178_v33 = vadd.f32 %v5275_v40, %v13934_v12 }
0x1214   : > { %v5279_v18 = vpop.f32.mrb[210].mxu0  ;;  %8540 = vmatprep.subr.bf16.mxu0 %v5378_v61  ;;  %v12169_v63 = vadd.f32 %v5277_v29, %v11903_v31  ;;  %v8781_v31 = vld [vmem:[%s13508_s2 + $0x140] sm:$0xff]  }
0x1215   : > { %v12166_v7 = vadd.f32 %v5279_v18, %v11900_v0  ;;  %v5281_v32 = vpop.f32.mrb[211].mxu0 }
0x1216   : > { %v12172_v58 = vadd.f32 %v5281_v32, %v11906_v10  ;;  %v8782_v10 = vld [vmem:[%s13508_s2 + $0x148] sm:$0xff]  }
0x1217   : > { %8541 = vmatpush3.bf16.msra.mxu0 %v5378_v61  ;;  %v5376_v0 = vpack.c.bf16 %v12166_v7, %v12178_v33 }
0x1218   : > { %v5377_v22 = vpack.c.bf16 %v12172_v58, %v12169_v63 }
0x121a   : > { %5429 = vmatprep.subr.bf16.mxu1 %v5377_v22  ;;  %8543 = vmatmul.mubr.msk.bf16.vlgmr.msra.gmra.mrb[212].mxu0 %vm2404_vm3, %v8780_v17 }
0x121b   : > { %5430 = vmatpush1.bf16.msra.mxu1 %v5376_v0  ;;  %8546 = vmatprep.mubr.msk.bf16.mxu0 %vm2404_vm3, %v8781_v31 }
0x121e   : > { %8053 = vmatmul.mubr.msk.bf16.vlgmr.msra.gmra.mrb[184].mxu1 %vm2404_vm3, %v8779_v41 }
0x121f   : > { %5469 = vmatprep.mubr.bf16.mxu1 %v13926_v20 }
0x1222   : > { %8547 = vmatmul.mubr.msk.bf16.gmra.mrb[216].mxu0 %vm2404_vm3, %v8782_v10 }
0x1223   : > { %8550 = vmatprep.mubr.msk.bf16.mxu0 %vm2404_vm3, %v8783_v23 }
0x1226   : > { %8054 = vmatmul.mubr.msk.bf16.gmra.mrb[188].mxu1 %vm2404_vm3, %v8780_v17 }
0x1227   : > { %5479 = vmatprep.mubr.bf16.mxu1 %v13926_v20 }
0x122a   : > { %8551 = vmatmul.mubr.msk.bf16.gmra.mrb[220].mxu0 %vm2404_vm3, %v8784_v46 }
0x122b   : > { %5747 = vmatprep.mubr.bf16.mxu0 %v13926_v20 }
0x122e   : > { %8055 = vmatmul.mubr.msk.bf16.gmra.mrb[192].mxu1 %vm2404_vm3, %v8781_v31 }
0x122f   : > { %5489 = vmatprep.mubr.bf16.mxu1 %v13926_v20 }
0x1236   : > { %8056 = vmatmul.mubr.msk.bf16.gmra.mrb[196].mxu1 %vm2404_vm3, %v8782_v10 }
0x1237   : > { %5499 = vmatprep.mubr.bf16.mxu1 %v13926_v20 }
0x123e   : > { %8057 = vmatmul.mubr.msk.bf16.gmra.mrb[200].mxu1 %vm2404_vm3, %v8783_v23 }
0x123f   : > { %5509 = vmatprep.mubr.bf16.mxu1 %v13926_v20 }
0x1246   : > { %8058 = vmatmul.mubr.msk.bf16.gmra.mrb[204].mxu1 %vm2404_vm3, %v8784_v46 }
0x1247   : > { %5871 = vmatprep.mubr.bf16.mxu1 %v13926_v20 }
0x12ed   : > { %v12214_v28 = vpop.f32.mrb[212].mxu0 }
0x12ee   : > { %v12216_v34 = vpop.f32.mrb[213].mxu0  ;;  %v5615_v16 = vmul.f32 %v12214_v28, %v12155_v9  ;;  %v5635_v40 = vmul.f32 %v12214_v28, %v12214_v28 }
0x12ef   : > { %v12218_v8 = vpop.f32.mrb[214].mxu0  ;;  %v5633_v42 = vmul.f32 %v12216_v34, %v12216_v34  ;;  %v5613_v24 = vmul.f32 %v12216_v34, %v12140_v43 }
0x12f0   : > { %v12220_v1 = vpop.f32.mrb[215].mxu0  ;;  %v5616_v0 = vmul.f32 %v12218_v8, %v12143_v27  ;;  %v5636_v46 = vmul.f32 %v12218_v8, %v12218_v8 }
0x12f1   : > { %v5461_v4 = vpop.f32.mrb[184].mxu1  ;;  %v5634_v21 = vmul.f32 %v12220_v1, %v12220_v1  ;;  %v5614_v49 = vmul.f32 %v12220_v1, %v12149_v14 }
0x12f2   : > { %v5601_v55 = vmul.f32 %v5461_v4, %v12152_v38  ;;  %v5621_v25 = vmul.f32 %v5461_v4, %v5461_v4  ;;  %v5463_v62 = vpop.f32.mrb[185].mxu1 }
0x12f3   : > { %v5605_v13 = vmul.f32 %v5463_v62, %v12134_v37  ;;  %v5625_v15 = vmul.f32 %v5463_v62, %v5463_v62  ;;  %v5465_v50 = vpop.f32.mrb[186].mxu1 }
0x12f4   : > { %v5602_v44 = vmul.f32 %v5465_v50, %v12137_v48  ;;  %v5622_v51 = vmul.f32 %v5465_v50, %v5465_v50  ;;  %v5467_v30 = vpop.f32.mrb[187].mxu1 }
0x12f5   : > { %v5609_v3 = vadd.f32 %v5605_v13, %v5601_v55  ;;  %v5629_v56 = vadd.f32 %v5625_v15, %v5621_v25  ;;  %v5606_v53 = vmul.f32 %v5467_v30, %v12146_v6  ;;  %v5626_v11 = vmul.f32 %v5467_v30, %v5467_v30 }
0x12f7   : > { %v5617_v54 = vadd.f32 %v5613_v24, %v5609_v3  ;;  %v5637_v2 = vadd.f32 %v5633_v42, %v5629_v56  ;;  %v5610_v5 = vadd.f32 %v5606_v53, %v5602_v44  ;;  %v5630_v60 = vadd.f32 %v5626_v11, %v5622_v51 }
0x12f9   : > { %v5641_v41 = vadd.f32 1e-06, %v5637_v2  ;;  %v5618_v19 = vadd.f32 %v5614_v49, %v5610_v5  ;;  %v5638_v59 = vadd.f32 %v5634_v21, %v5630_v60  ;;  %v5471_v45 = vpop.f32.mrb[188].mxu1  ;;  %vm5653_vm8 = vcmp.ge.f32.partialorder %v5617_v54, 0.0 }
0x12fa   : > { %v5603_v39 = vmul.f32 %v5471_v45, %v12178_v33  ;;  %v5623_v26 = vmul.f32 %v5471_v45, %v5471_v45  ;;  %v5473_v52 = vpop.f32.mrb[189].mxu1 }
0x12fb   : > { %8927 = vrcp.f32 %v5641_v41  ;;  %v5642_v36 = vadd.f32 1e-06, %v5638_v59  ;;  %v5607_v35 = vmul.f32 %v5473_v52, %v12169_v63  ;;  %v5627_v57 = vmul.f32 %v5473_v52, %v5473_v52  ;;  %v5475_v47 = vpop.f32.mrb[190].mxu1 }
0x12fc   : > { %v5604_v61 = vmul.f32 %v5475_v47, %v12166_v7  ;;  %v5624_v29 = vmul.f32 %v5475_v47, %v5475_v47  ;;  %v5477_v18 = vpop.f32.mrb[191].mxu1  ;;  %vm5654_vm9 = vcmp.ge.f32.partialorder %v5618_v19, 0.0 }
0x12fd   : > { %8929 = vrcp.f32 %v5642_v36  ;;  %v5611_v32 = vadd.f32 %v5607_v35, %v5603_v39  ;;  %v5631_v17 = vadd.f32 %v5627_v57, %v5623_v26  ;;  %v5608_v12 = vmul.f32 %v5477_v18, %v12172_v58 }
0x12fe   : > { %v5628_v22 = vmul.f32 %v5477_v18, %v5477_v18 }
0x12ff   : > { %v5619_v31 = vadd.f32 %v5615_v16, %v5611_v32  ;;  %v5639_v10 = vadd.f32 %v5635_v40, %v5631_v17  ;;  %v5612_v23 = vadd.f32 %v5608_v12, %v5604_v61 }
0x1300   : > { %v5632_v55 = vadd.f32 %v5628_v22, %v5624_v29 }
0x1301   : > { %v5643_v25 = vadd.f32 1e-06, %v5639_v10  ;;  %v5620_v42 = vadd.f32 %v5616_v0, %v5612_v23  ;;  %vm5655_vm10 = vcmp.ge.f32.partialorder %v5619_v31, 0.0 }
0x1302   : > { %v5640_v13 = vadd.f32 %v5636_v46, %v5632_v55 }
0x1303   : > { %8931 = vrcp.f32 %v5643_v25  ;;  %vm5656_vm11 = vcmp.ge.f32.partialorder %v5620_v42, 0.0 }
0x1304   : > { %v5644_v15 = vadd.f32 1e-06, %v5640_v13 }
0x1305   : > { %v8928_v24 = vpop.eup %8927 }
0x1306   : > { %v5649_v21 = vmul.f32 %v8928_v24, %v5617_v54  ;;  %8933 = vrcp.f32 %v5644_v15 }
0x1307   : > { %v8930_v44 = vpop.eup %8929 }
0x1308   : > { %v5657_v51 = vmul.f32 %v5649_v21, %v5461_v4  ;;  %v5669_v3 = vmul.f32 %v5649_v21, %v5463_v62  ;;  %v5650_v56 = vmul.f32 %v8930_v44, %v5618_v19  ;;  %v5681_v53 = vmul.f32 %v5649_v21, %v12216_v34 }
0x130a   : > { %v5673_v11 = vsub.f32 %v12134_v37, %v5669_v3  ;;  %v5658_v49 = vmul.f32 %v5650_v56, %v5465_v50  ;;  %v5670_v2 = vmul.f32 %v5650_v56, %v5467_v30  ;;  %v5661_v5 = vsub.f32 %v12152_v38, %v5657_v51 }
0x130b   : > { %v5682_v60 = vmul.f32 %v5650_v56, %v12220_v1  ;;  %v5685_v41 = vsub.f32 %v12140_v43, %v5681_v53 }
0x130c   : > { %v5674_v59 = vsub.f32 %v12146_v6, %v5670_v2  ;;  %v5677_v39 = vsel %vm5653_vm8, %v12134_v37, %v5673_v11  ;;  %v5662_v4 = vsub.f32 %v12137_v48, %v5658_v49  ;;  %v5665_v62 = vsel %vm5653_vm8, %v12152_v38, %v5661_v5  ;;  %v8788_v49 = vld [vmem:[%s13508_s2 + $0x178] sm:$0xff]   ;;  %v12336_v2 = vld [vmem:[%s13508_s2 + $0x180] sm:$0xff]  }
0x130d   : > { %v8932_v34 = vpop.eup %8931  ;;  %v5686_v50 = vsub.f32 %v12149_v14, %v5682_v60  ;;  %v5689_v30 = vsel %vm5653_vm8, %v12140_v43, %v5685_v41 }
0x130e   : > { %v5651_v26 = vmul.f32 %v8932_v34, %v5619_v31  ;;  %v5678_v54 = vsel %vm5654_vm9, %v12146_v6, %v5674_v59  ;;  %v5666_v1 = vsel %vm5654_vm9, %v12137_v48, %v5662_v4 }
0x130f   : > { %v5694_v36 = vpack.c.bf16 %v5678_v54, %v5677_v39  ;;  %v5693_v35 = vpack.c.bf16 %v5666_v1, %v5665_v62  ;;  %v5690_v57 = vsel %vm5654_vm9, %v12149_v14, %v5686_v50 }
0x1310   : > { %v8934_v37 = vpop.eup %8933  ;;  %v5659_v16 = vmul.f32 %v5651_v26, %v5471_v45  ;;  %v5671_v40 = vmul.f32 %v5651_v26, %v5473_v52  ;;  %v5695_v61 = vpack.c.bf16 %v5690_v57, %v5689_v30  ;;  %v5683_v38 = vmul.f32 %v12214_v28, %v5651_v26 }
0x1311   : > { %v5652_v19 = vmul.f32 %v8934_v37, %v5620_v42  ;;  %5715 = vmatprep.subr.bf16.mxu0 %v5694_v36 }
0x1312   : > { %v5675_v29 = vsub.f32 %v12169_v63, %v5671_v40  ;;  %5716 = vmatpush1.bf16.msra.mxu0 %v5693_v35  ;;  %v5663_v43 = vsub.f32 %v12178_v33, %v5659_v16  ;;  %v5687_v6 = vsub.f32 %v12155_v9, %v5683_v38 }
0x1313   : > { %v5660_v48 = vmul.f32 %v5652_v19, %v5475_v47  ;;  %v5672_v32 = vmul.f32 %v5652_v19, %v5477_v18  ;;  %v5684_v14 = vmul.f32 %v12218_v8, %v5652_v19 }
0x1314   : > { %v5679_v45 = vsel %vm5655_vm10, %v12169_v63, %v5675_v29  ;;  %v5667_v52 = vsel %vm5655_vm10, %v12178_v33, %v5663_v43  ;;  %v5691_v28 = vsel %vm5655_vm10, %v12155_v9, %v5687_v6  ;;  %v8785_v9 = vld [vmem:[%s13508_s2 + $0x160] sm:$0xff]  }
0x1315   : > { %v5676_v17 = vsub.f32 %v12172_v58, %v5672_v32  ;;  %v5664_v12 = vsub.f32 %v12166_v7, %v5660_v48  ;;  %v5688_v22 = vsub.f32 %v12143_v27, %v5684_v14 }
0x1317   : > { %v5680_v0 = vsel %vm5656_vm11, %v12172_v58, %v5676_v17  ;;  %v5668_v47 = vsel %vm5656_vm11, %v12166_v7, %v5664_v12  ;;  %v5692_v18 = vsel %vm5656_vm11, %v12143_v27, %v5688_v22  ;;  %v8786_v27 = vld [vmem:[%s13508_s2 + $0x168] sm:$0xff]   ;;  %v8787_v7 = vld [vmem:[%s13508_s2 + $0x170] sm:$0xff]  }
0x1318   : > { %v5697_v8 = vpack.c.bf16 %v5680_v0, %v5679_v45  ;;  %v5696_v31 = vpack.c.bf16 %v5668_v47, %v5667_v52  ;;  %v5698_v63 = vpack.c.bf16 %v5692_v18, %v5691_v28 }
0x131a   : > { %5717 = vmatprep.subr.bf16.mxu0 %v5697_v8 }
0x131b   : > { %5718 = vmatpush1.bf16.msra.mxu0 %v5696_v31 }
0x131c   : > { %8554 = vmatprep.subr.bf16.mxu0 %v5695_v61 }
0x131e   : > { %8067 = vmatmul.mubr.msk.bf16.vlgmr.msra.gmra.mrb[224].mxu0 %vm2404_vm3, %v8785_v9 }
0x131f   : > { %8555 = vmatpush3.bf16.msra.mxu0 %v5695_v61  ;;  %5757 = vmatprep.mubr.bf16.mxu0 %v13926_v20 }
0x1320   : > { %8556 = vmatprep.subr.bf16.mxu0 %v5698_v63 }
0x1323   : > { %8557 = vmatpush3.bf16.msra.mxu0 %v5698_v63 }
0x1326   : > { %8068 = vmatmul.mubr.msk.bf16.gmra.mrb[228].mxu0 %vm2404_vm3, %v8786_v27 }
0x1327   : > { %8558 = vmatprep.mubr.msk.bf16.mxu0 %vm2404_vm3, %v8785_v9 }
0x132e   : > { %8559 = vmatmul.mubr.msk.bf16.vlgmr.msra.gmra.mrb[232].mxu0 %vm2404_vm3, %v8786_v27 }
0x132f   : > { %8566 = vmatprep.mubr.msk.bf16.mxu0 %vm2404_vm3, %v8787_v7 }
0x13f1   : > { %v12289_v58 = vpop.f32.mrb[224].mxu0 }
0x13f2   : > { %v12291_v33 = vpop.f32.mrb[225].mxu0 }
0x13f3   : > { %v12293_v10 = vpop.f32.mrb[226].mxu0 }
0x13f4   : > { %v5817_v23 = vpack.c.bf16 %v12293_v10, %v12289_v58  ;;  %v12297_v46 = vpop.f32.mrb[227].mxu0 }
0x13f5   : > { %v5818_v55 = vpack.c.bf16 %v12297_v46, %v12291_v33 }
0x13f7   : > { %5839 = vmatprep.subr.bf16.mxu1 %v5818_v55 }
0x13f8   : > { %5840 = vmatpush1.bf16.msra.mxu1 %v5817_v23 }
0x13f9   : > { %v12301_v25 = vpop.f32.mrb[228].mxu0 }
0x13fa   : > { %v12303_v42 = vpop.f32.mrb[229].mxu0 }
0x13fb   : > { %v12305_v13 = vpop.f32.mrb[230].mxu0 }
0x13fc   : > { %v5820_v15 = vpack.c.bf16 %v12305_v13, %v12301_v25  ;;  %v12309_v24 = vpop.f32.mrb[231].mxu0 }
0x13fd   : > { %v5821_v21 = vpack.c.bf16 %v12309_v24, %v12303_v42 }
0x13ff   : > { %5841 = vmatprep.subr.bf16.mxu1 %v5821_v21 }
0x1400   : > { %5842 = vmatpush1.bf16.msra.mxu1 %v5820_v15 }
0x1401   : > { %v12313_v44 = vpop.f32.mrb[232].mxu0 }
0x1402   : > { %v12315_v51 = vpop.f32.mrb[233].mxu0 }
0x1403   : > { %v12317_v3 = vpop.f32.mrb[234].mxu0  ;;  %8073 = vmatmul.mubr.msk.bf16.vlgmr.msra.gmra.mrb[208].mxu1 %vm2404_vm3, %v8787_v7 }
0x1404   : > { %v12320_v56 = vpop.f32.mrb[235].mxu0  ;;  %5881 = vmatprep.mubr.bf16.mxu1 %v13926_v20  ;;  %v5822_v53 = vpack.c.bf16 %v12317_v3, %v12313_v44 }
0x1405   : > { %v5819_v11 = vpack.c.bf16 %v12320_v56, %v12315_v51 }
0x1407   : > { %8562 = vmatprep.subr.bf16.mxu0 %v5819_v11 }
0x1408   : > { %8563 = vmatpush3.bf16.msra.mxu0 %v5819_v11 }
0x1409   : > { %8564 = vmatprep.subr.bf16.mxu0 %v5822_v53 }
0x140b   : > { %8074 = vmatmul.mubr.msk.bf16.gmra.mrb[212].mxu1 %vm2404_vm3, %v8788_v49 }
0x140c   : > { %8565 = vmatpush3.bf16.msra.mxu0 %v5822_v53  ;;  %6103 = vmatprep.mubr.bf16.mxu1 %v13926_v20 }
0x140f   : > { %8567 = vmatmul.mubr.msk.bf16.vlgmr.msra.gmra.mrb[236].mxu0 %vm2404_vm3, %v8788_v49 }
0x1410   : > { %8574 = vmatprep.mubr.msk.bf16.mxu0 %vm2404_vm3, %v12336_v2 }
0x14d6   : > { %v12340_v5 = vpop.f32.mrb[208].mxu1 }
0x14d7   : > { %v5941_v60 = vmul.f32 %v12340_v5, %v12289_v58  ;;  %v5961_v41 = vmul.f32 %v12340_v5, %v12340_v5  ;;  %v12346_v59 = vpop.f32.mrb[209].mxu1 }
0x14d8   : > { %v5945_v39 = vmul.f32 %v12346_v59, %v12291_v33  ;;  %v5965_v4 = vmul.f32 %v12346_v59, %v12346_v59  ;;  %v12352_v62 = vpop.f32.mrb[210].mxu1 }
0x14d9   : > { %v5942_v34 = vmul.f32 %v12352_v62, %v12293_v10  ;;  %v5962_v50 = vmul.f32 %v12352_v62, %v12352_v62  ;;  %v12358_v30 = vpop.f32.mrb[211].mxu1 }
0x14da   : > { %v5949_v26 = vadd.f32 %v5945_v39, %v5941_v60  ;;  %v5969_v54 = vadd.f32 %v5965_v4, %v5961_v41  ;;  %v5946_v1 = vmul.f32 %v12358_v30, %v12297_v46  ;;  %v5966_v36 = vmul.f32 %v12358_v30, %v12358_v30 }
0x14dc   : > { %v5950_v35 = vadd.f32 %v5946_v1, %v5942_v34  ;;  %v5970_v57 = vadd.f32 %v5966_v36, %v5962_v50 }
0x14de   : > { %v5883_v37 = vpop.f32.mrb[212].mxu1 }
0x14df   : > { %v5943_v16 = vmul.f32 %v5883_v37, %v12301_v25  ;;  %v5963_v40 = vmul.f32 %v5883_v37, %v5883_v37  ;;  %v5885_v61 = vpop.f32.mrb[213].mxu1 }
0x14e0   : > { %v5947_v38 = vmul.f32 %v5885_v61, %v12303_v42  ;;  %v5967_v19 = vmul.f32 %v5885_v61, %v5885_v61  ;;  %v5887_v29 = vpop.f32.mrb[214].mxu1 }
0x14e1   : > { %v5944_v43 = vmul.f32 %v5887_v29, %v12305_v13  ;;  %v5964_v6 = vmul.f32 %v5887_v29, %v5887_v29  ;;  %v5889_v48 = vpop.f32.mrb[215].mxu1 }
0x14e2   : > { %v5951_v32 = vadd.f32 %v5947_v38, %v5943_v16  ;;  %v5971_v14 = vadd.f32 %v5967_v19, %v5963_v40  ;;  %v5948_v45 = vmul.f32 %v5889_v48, %v12309_v24  ;;  %v5968_v52 = vmul.f32 %v5889_v48, %v5889_v48  ;;  %v8568_v28 = vpop.f32.mrb[236].mxu0 }
0x14e3   : > { %v5955_v17 = vmul.f32 %v8568_v28, %v12313_v44  ;;  %v5975_v12 = vmul.f32 %v8568_v28, %v8568_v28  ;;  %v5926_v22 = vpop.f32.mrb[237].mxu0 }
0x14e4   : > { %v5952_v0 = vadd.f32 %v5948_v45, %v5944_v43  ;;  %v5972_v47 = vadd.f32 %v5968_v52, %v5964_v6  ;;  %v5953_v18 = vmul.f32 %v5926_v22, %v12315_v51  ;;  %v5973_v8 = vmul.f32 %v5926_v22, %v5926_v22  ;;  %v8569_v31 = vpop.f32.mrb[238].mxu0 }
0x14e5   : > { %v12370_v63 = vadd.f32 %v5955_v17, %v5951_v32  ;;  %v5979_v9 = vadd.f32 %v5975_v12, %v5971_v14  ;;  %v5956_v27 = vmul.f32 %v8569_v31, %v12317_v3  ;;  %v5976_v7 = vmul.f32 %v8569_v31, %v8569_v31  ;;  %v5929_v23 = vpop.f32.mrb[239].mxu0 }
0x14e6   : > { %v5957_v55 = vadd.f32 %v5953_v18, %v5949_v26  ;;  %v5977_v15 = vadd.f32 %v5973_v8, %v5969_v54  ;;  %v5954_v21 = vmul.f32 %v5929_v23, %v12320_v56  ;;  %v5974_v53 = vmul.f32 %v5929_v23, %v5929_v23 }
0x14e7   : > { %v5983_v11 = vadd.f32 1e-06, %v5979_v9  ;;  %v12374_v49 = vadd.f32 %v5956_v27, %v5952_v0  ;;  %v5980_v60 = vadd.f32 %v5976_v7, %v5972_v47  ;;  %vm5995_vm12 = vcmp.ge.f32.partialorder %v12370_v63, 0.0 }
0x14e8   : > { %v5981_v41 = vadd.f32 1e-06, %v5977_v15  ;;  %v5958_v39 = vadd.f32 %v5954_v21, %v5950_v35  ;;  %v5978_v4 = vadd.f32 %v5974_v53, %v5970_v57  ;;  %vm5993_vm13 = vcmp.ge.f32.partialorder %v5957_v55, 0.0  ;;  %v8790_v53 = vld [vmem:[%s13508_s2 + $0x188] sm:$0xff]  }
0x14e9   : > { %8935 = vrcp.f32 %v5983_v11  ;;  %v5984_v34 = vadd.f32 1e-06, %v5980_v60  ;;  %vm5996_vm15 = vcmp.ge.f32.partialorder %v12374_v49, 0.0  ;;  %v8791_v11 = vld [vmem:[%s13508_s2 + $0x190] sm:$0xff]  }
0x14ea   : > { %8937 = vrcp.f32 %v5981_v41  ;;  %v5982_v50 = vadd.f32 1e-06, %v5978_v4  ;;  %vm5994_vm14 = vcmp.ge.f32.partialorder %v5958_v39, 0.0 }
0x14eb   : > { %8939 = vrcp.f32 %v5984_v34 }
0x14ec   : > { %8941 = vrcp.f32 %v5982_v50 }
0x14f3   : > { %v8936_v1 = vpop.eup %8935 }
0x14f4   : > { %v8938_v36 = vpop.eup %8937  ;;  %v5991_v26 = vmul.f32 %v8936_v1, %v12370_v63 }
0x14f5   : > { %v8940_v54 = vpop.eup %8939  ;;  %v5989_v16 = vmul.f32 %v8938_v36, %v5957_v55 }
0x14f6   : > { %v8942_v35 = vpop.eup %8941  ;;  %v5999_v57 = vmul.f32 %v5991_v26, %v5883_v37  ;;  %v6023_v40 = vmul.f32 %v8568_v28, %v5991_v26  ;;  %v5992_v38 = vmul.f32 %v8940_v54, %v12374_v49  ;;  %v6011_v19 = vmul.f32 %v5991_v26, %v5885_v61 }
0x14f7   : > { %v5997_v43 = vmul.f32 %v5989_v16, %v12340_v5  ;;  %v6021_v6 = vmul.f32 %v5989_v16, %v5926_v22  ;;  %v5990_v32 = vmul.f32 %v8942_v35, %v5958_v39  ;;  %v6009_v14 = vmul.f32 %v5989_v16, %v12346_v59 }
0x14f8   : > { %v6027_v45 = vsub.f32 %v12313_v44, %v6023_v40  ;;  %v6000_v52 = vmul.f32 %v5992_v38, %v5887_v29  ;;  %v6024_v17 = vmul.f32 %v8569_v31, %v5992_v38  ;;  %v6012_v12 = vmul.f32 %v5992_v38, %v5889_v48 }
0x14f9   : > { %v6025_v0 = vsub.f32 %v12315_v51, %v6021_v6  ;;  %v5998_v47 = vmul.f32 %v5990_v32, %v12352_v62  ;;  %v6022_v37 = vmul.f32 %v5990_v32, %v5929_v23  ;;  %v6010_v28 = vmul.f32 %v5990_v32, %v12358_v30 }
0x14fa   : > { %v6028_v61 = vsub.f32 %v12317_v3, %v6024_v17  ;;  %v6013_v5 = vsub.f32 %v12291_v33, %v6009_v14  ;;  %v6001_v22 = vsub.f32 %v12289_v58, %v5997_v43  ;;  %v6015_v59 = vsub.f32 %v12303_v42, %v6011_v19 }
0x14fb   : > { %v6026_v18 = vsub.f32 %v12320_v56, %v6022_v37  ;;  %v6014_v29 = vsub.f32 %v12297_v46, %v6010_v28  ;;  %v6029_v48 = vsel %vm5993_vm13, %v12315_v51, %v6025_v0  ;;  %v6002_v62 = vsub.f32 %v12293_v10, %v5998_v47  ;;  %v8794_v0 = vld [vmem:[%s13508_s2 + $0x1a8] sm:$0xff]   ;;  %v8795_v28 = vld [vmem:[%s13508_s2 + $0x1b0] sm:$0xff]  }
0x14fc   : > { %v6017_v30 = vsel %vm5993_vm13, %v12291_v33, %v6013_v5  ;;  %v6005_v8 = vsel %vm5993_vm13, %v12289_v58, %v6001_v22  ;;  %v6016_v31 = vsub.f32 %v12309_v24, %v6012_v12  ;;  %v6019_v9 = vsel %vm5995_vm12, %v12303_v42, %v6015_v59 }
0x14fd   : > { %v6018_v27 = vsel %vm5994_vm14, %v12297_v46, %v6014_v29  ;;  %v6030_v51 = vsel %vm5994_vm14, %v12320_v56, %v6026_v18  ;;  %v6006_v7 = vsel %vm5994_vm14, %v12293_v10, %v6002_v62  ;;  %v6031_v33 = vsel %vm5995_vm12, %v12313_v44, %v6027_v45  ;;  %v8796_v18 = vld [vmem:[%s13508_s2 + $0x1b8] sm:$0xff]  }
0x14fe   : > { %v6034_v58 = vpack.c.bf16 %v6018_v27, %v6017_v30  ;;  %v6035_v23 = vpack.c.bf16 %v6030_v51, %v6029_v48  ;;  %v6033_v55 = vpack.c.bf16 %v6006_v7, %v6005_v8  ;;  %v6020_v42 = vsel %vm5996_vm15, %v12309_v24, %v6016_v31  ;;  %v12546_v30 = vld [vmem:[%s13508_s2 + $0x1c0] sm:$0xff]  }
0x14ff   : > { %v6037_v15 = vpack.c.bf16 %v6020_v42, %v6019_v9  ;;  %v6032_v46 = vsel %vm5996_vm15, %v12317_v3, %v6028_v61  ;;  %v6003_v56 = vsub.f32 %v12301_v25, %v5999_v57  ;;  %v6004_v10 = vsub.f32 %v12305_v13, %v6000_v52 }
0x1500   : > { %6071 = vmatprep.subr.bf16.mxu1 %v6034_v58  ;;  %8570 = vmatprep.subr.bf16.mxu0 %v6035_v23  ;;  %v6038_v21 = vpack.c.bf16 %v6032_v46, %v6031_v33 }
0x1501   : > { %6072 = vmatpush1.bf16.msra.mxu1 %v6033_v55  ;;  %8571 = vmatpush3.bf16.msra.mxu0 %v6035_v23  ;;  %v6007_v44 = vsel %vm5995_vm12, %v12301_v25, %v6003_v56  ;;  %v6008_v24 = vsel %vm5996_vm15, %v12305_v13, %v6004_v10  ;;  %v8792_v25 = vld [vmem:[%s13508_s2 + $0x198] sm:$0xff]   ;;  %v8793_v13 = vld [vmem:[%s13508_s2 + $0x1a0] sm:$0xff]  }
0x1502   : > { %6073 = vmatprep.subr.bf16.mxu1 %v6037_v15  ;;  %8572 = vmatprep.subr.bf16.mxu0 %v6038_v21  ;;  %v6036_v3 = vpack.c.bf16 %v6008_v24, %v6007_v44 }
0x1505   : > { %6074 = vmatpush1.bf16.msra.mxu1 %v6036_v3  ;;  %8573 = vmatpush3.bf16.msra.mxu0 %v6038_v21 }
0x1508   : > { %8081 = vmatmul.mubr.msk.bf16.vlgmr.msra.gmra.mrb[192].mxu1 %vm2404_vm3, %v12336_v2  ;;  %8575 = vmatmul.mubr.msk.bf16.vlgmr.msra.gmra.mrb[216].mxu0 %vm2404_vm3, %v8790_v53 }
0x1509   : > { %6113 = vmatprep.mubr.bf16.mxu1 %v13926_v20  ;;  %8578 = vmatprep.mubr.msk.bf16.mxu0 %vm2404_vm3, %v8791_v11 }
0x1510   : > { %8082 = vmatmul.mubr.msk.bf16.gmra.mrb[196].mxu1 %vm2404_vm3, %v8790_v53  ;;  %8579 = vmatmul.mubr.msk.bf16.gmra.mrb[220].mxu0 %vm2404_vm3, %v8792_v25 }
0x1511   : > { %6123 = vmatprep.mubr.bf16.mxu1 %v13926_v20  ;;  %6318 = vmatprep.mubr.bf16.mxu0 %v13926_v20 }
0x1518   : > { %8083 = vmatmul.mubr.msk.bf16.gmra.mrb[200].mxu1 %vm2404_vm3, %v8791_v11 }
0x1519   : > { %6133 = vmatprep.mubr.bf16.mxu1 %v13926_v20 }
0x1520   : > { %8084 = vmatmul.mubr.msk.bf16.gmra.mrb[204].mxu1 %vm2404_vm3, %v8792_v25 }
0x1521   : > { %8590 = vmatprep.mubr.msk.bf16.mxu1 %vm6273_vm1, %v8793_v13 }
0x15db   : > { %v12451_v2 = vpop.f32.mrb[192].mxu1  ;;  %v12453_v63 = vpop.f32.mrb[216].mxu0 }
0x15dc   : > { %v12455_v49 = vpop.f32.mrb[193].mxu1  ;;  %v12457_v60 = vpop.f32.mrb[217].mxu0 }
0x15dd   : > { %v12459_v41 = vpop.f32.mrb[194].mxu1  ;;  %v12461_v39 = vpop.f32.mrb[218].mxu0 }
0x15de   : > { %v6241_v4 = vpack.c.bf16 %v12459_v41, %v12451_v2  ;;  %v12465_v34 = vpop.f32.mrb[195].mxu1  ;;  %v12467_v50 = vpop.f32.mrb[219].mxu0  ;;  %v6246_v1 = vpack.c.bf16 %v12461_v39, %v12453_v63 }
0x15df   : > { %v6242_v36 = vpack.c.bf16 %v12465_v34, %v12455_v49  ;;  %v6243_v26 = vpack.c.bf16 %v12467_v50, %v12457_v60 }
0x15e1   : > { %6286 = vmatprep.subr.bf16.mxu0 %v6242_v36  ;;  %8582 = vmatprep.subr.bf16.mxu1 %v6243_v26 }
0x15e2   : > { %6287 = vmatpush1.bf16.msra.mxu0 %v6241_v4  ;;  %8583 = vmatpush3.bf16.msra.mxu1 %v6243_v26 }
0x15e3   : > { %v12475_v54 = vpop.f32.mrb[196].mxu1  ;;  %v12477_v16 = vpop.f32.mrb[220].mxu0  ;;  %8584 = vmatprep.subr.bf16.mxu1 %v6246_v1 }
0x15e4   : > { %13935 = vst [vmem:[#allocation35_spill] sm:$0xff] %v12477_v16  ;;  %v12479_v35 = vpop.f32.mrb[197].mxu1  ;;  %v12481_v57 = vpop.f32.mrb[221].mxu0 }
0x15e5   : > { %13936 = vst [vmem:[#allocation45_spill] sm:$0xff] %v12481_v57  ;;  %v12483_v40 = vpop.f32.mrb[198].mxu1  ;;  %v12485_v38 = vpop.f32.mrb[222].mxu0 }
0x15e6   : > { %13937 = vst [vmem:[#allocation65_spill] sm:$0xff] %v12485_v38  ;;  %v6244_v19 = vpack.c.bf16 %v12483_v40, %v12475_v54  ;;  %v12489_v43 = vpop.f32.mrb[199].mxu1  ;;  %v12491_v6 = vpop.f32.mrb[223].mxu0  ;;  %8585 = vmatpush3.bf16.msra.mxu1 %v6246_v1  ;;  %v6252_v32 = vpack.c.bf16 %v12485_v38, %v12477_v16 }
0x15e7   : > { %13938 = vst [vmem:[#allocation40_spill] sm:$0xff] %v12491_v6  ;;  %v6245_v14 = vpack.c.bf16 %v12489_v43, %v12479_v35  ;;  %v6249_v45 = vpack.c.bf16 %v12491_v6, %v12481_v57 }
0x15e9   : > { %6288 = vmatprep.subr.bf16.mxu0 %v6245_v14  ;;  %8586 = vmatprep.subr.bf16.mxu1 %v6249_v45 }
0x15ea   : > { %6289 = vmatpush1.bf16.msra.mxu0 %v6244_v19  ;;  %8587 = vmatpush3.bf16.msra.mxu1 %v6249_v45 }
0x15eb   : > { %v12499_v52 = vpop.f32.mrb[200].mxu1  ;;  %8588 = vmatprep.subr.bf16.mxu1 %v6252_v32 }
0x15ec   : > { %v12501_v17 = vpop.f32.mrb[201].mxu1 }
0x15ed   : > { %13939 = vst [vmem:[#allocation11_spill] sm:$0xff] %v12501_v17  ;;  %v12503_v12 = vpop.f32.mrb[202].mxu1 }
0x15ee   : > { %13940 = vst [vmem:[#allocation56_spill] sm:$0xff] %v12503_v12  ;;  %v6247_v47 = vpack.c.bf16 %v12503_v12, %v12499_v52  ;;  %v12510_v37 = vpop.f32.mrb[203].mxu1  ;;  %8589 = vmatpush3.bf16.msra.mxu1 %v6252_v32 }
0x15ef   : > { %13941 = vst [vmem:[#allocation26_spill] sm:$0xff] %v12510_v37  ;;  %v6248_v61 = vpack.c.bf16 %v12510_v37, %v12501_v17 }
0x15f1   : > { %6290 = vmatprep.subr.bf16.mxu0 %v6248_v61  ;;  %8591 = vmatmul.mubr.msk.bf16.vlgmr.msra.gmra.mrb[216].mxu1 %vm6273_vm1, %v8794_v0 }
0x15f2   : > { %6291 = vmatpush1.bf16.msra.mxu0 %v6247_v47  ;;  %8594 = vmatprep.mubr.msk.bf16.mxu1 %vm6273_vm1, %v8795_v28 }
0x15f3   : > { %v12519_v5 = vpop.f32.mrb[204].mxu1 }
0x15f4   : > { %13942 = vst [vmem:[#allocation18_spill] sm:$0xff] %v12519_v5  ;;  %v12521_v22 = vpop.f32.mrb[205].mxu1 }
0x15f5   : > { %13943 = vst [vmem:[#allocation51_spill] sm:$0xff] %v12521_v22  ;;  %v12523_v59 = vpop.f32.mrb[206].mxu1 }
0x15f6   : > { %13944 = vst [vmem:[#allocation52_spill] sm:$0xff] %v12523_v59  ;;  %v6250_v29 = vpack.c.bf16 %v12523_v59, %v12519_v5  ;;  %v12530_v48 = vpop.f32.mrb[207].mxu1 }
0x15f7   : > { %13945 = vst [vmem:[#allocation20_spill] sm:$0xff] %v12530_v48  ;;  %v6251_v62 = vpack.c.bf16 %v12530_v48, %v12521_v22 }
0x15f9   : > { %6292 = vmatprep.subr.bf16.mxu0 %v6251_v62  ;;  %8595 = vmatmul.mubr.msk.bf16.gmra.mrb[220].mxu1 %vm6273_vm1, %v8796_v18 }
0x15fa   : > { %6293 = vmatpush1.bf16.msra.mxu0 %v6250_v29  ;;  %8602 = vmatprep.mubr.msk.bf16.mxu1 %vm2404_vm3, %v12546_v30 }
0x15fd   : > { %8093 = vmatmul.mubr.msk.bf16.vlgmr.msra.gmra.mrb[240].mxu0 %vm6273_vm1, %v8793_v13 }
0x15fe   : > { %6328 = vmatprep.mubr.bf16.mxu0 %v13926_v20 }
0x1605   : > { %8094 = vmatmul.mubr.msk.bf16.gmra.mrb[244].mxu0 %vm6273_vm1, %v8794_v0 }
0x1606   : > { %6338 = vmatprep.mubr.bf16.mxu0 %v13926_v20 }
0x160d   : > { %8095 = vmatmul.mubr.msk.bf16.gmra.mrb[248].mxu0 %vm6273_vm1, %v8795_v28 }
0x160e   : > { %6348 = vmatprep.mubr.bf16.mxu0 %v13926_v20 }
0x1615   : > { %8096 = vmatmul.mubr.msk.bf16.gmra.mrb[252].mxu0 %vm6273_vm1, %v8796_v18 }
0x1616   : > { %6610 = vmatprep.mubr.bf16.mxu0 %v13926_v20 }
0x16c4   : > { %v12550_v8 = vpop.f32.mrb[216].mxu1 }
0x16c5   : > { %v12552_v31 = vpop.f32.mrb[217].mxu1  ;;  %v12650_v57 = vmul.f32 0.2, %v12550_v8 }
0x16c6   : > { %v12554_v9 = vpop.f32.mrb[218].mxu1 }
0x16c7   : > { %v12556_v27 = vpop.f32.mrb[219].mxu1 }
0x16cc   : > { %v12558_v51 = vpop.f32.mrb[220].mxu1 }
0x16cd   : > { %v6438_v7 = vmul.f32 %v12558_v51, %v12550_v8  ;;  %v12562_v33 = vpop.f32.mrb[221].mxu1 }
0x16ce   : > { %v6436_v58 = vmul.f32 %v12562_v33, %v12552_v31  ;;  %v12566_v23 = vpop.f32.mrb[222].mxu1  ;;  %v6456_v19 = vmul.f32 %v12562_v33, %v12562_v33 }
0x16cf   : > { %v6439_v55 = vmul.f32 %v12566_v23, %v12554_v9  ;;  %v12570_v42 = vpop.f32.mrb[223].mxu1 }
0x16d0   : > { %v12572_v15 = vpop.f32.mrb[240].mxu0  ;;  %v6437_v46 = vmul.f32 %v12570_v42, %v12556_v27  ;;  %v6457_v0 = vmul.f32 %v12570_v42, %v12570_v42 }
0x16d1   : > { %v12576_v56 = vpop.f32.mrb[241].mxu0 }
0x16d2   : > { %v12578_v10 = vpop.f32.mrb[242].mxu0 }
0x16d3   : > { %v12580_v21 = vpop.f32.mrb[243].mxu0 }
0x16d8   : > { %v12582_v44 = vpop.f32.mrb[244].mxu0 }
0x16d9   : > { %v12584_v24 = vpop.f32.mrb[245].mxu0 }
0x16da   : > { %v12586_v3 = vpop.f32.mrb[246].mxu0 }
0x16db   : > { %v12588_v53 = vpop.f32.mrb[247].mxu0 }
0x16e0   : > { %v12590_v11 = vpop.f32.mrb[248].mxu0 }
0x16e1   : > { %v6424_v25 = vmul.f32 %v12590_v11, %v12572_v15  ;;  %v6444_v13 = vmul.f32 %v12590_v11, %v12590_v11  ;;  %v6342_v4 = vpop.f32.mrb[249].mxu0 }
0x16e2   : > { %v6428_v1 = vmul.f32 %v6342_v4, %v12576_v56  ;;  %v6448_v36 = vmul.f32 %v6342_v4, %v6342_v4  ;;  %v12597_v26 = vpop.f32.mrb[250].mxu0 }
0x16e3   : > { %v6425_v32 = vmul.f32 %v12597_v26, %v12578_v10  ;;  %v6445_v14 = vmul.f32 %v12597_v26, %v12597_v26  ;;  %v12605_v45 = vpop.f32.mrb[251].mxu0 }
0x16e4   : > { %v6432_v47 = vadd.f32 %v6428_v1, %v6424_v25  ;;  %v6452_v28 = vadd.f32 %v6448_v36, %v6444_v13  ;;  %v6429_v61 = vmul.f32 %v12605_v45, %v12580_v21  ;;  %v6449_v18 = vmul.f32 %v12605_v45, %v12605_v45 }
0x16e6   : > { %v12613_v29 = vadd.f32 %v6436_v58, %v6432_v47  ;;  %v6460_v62 = vadd.f32 %v6456_v19, %v6452_v28  ;;  %v6433_v38 = vadd.f32 %v6429_v61, %v6425_v32  ;;  %v6453_v48 = vadd.f32 %v6449_v18, %v6445_v14 }
0x16e7   : > { %v6459_v28 = vmul.f32 %v12566_v23, %v12566_v23 }
0x16e8   : > { %v6464_v59 = vadd.f32 1e-06, %v6460_v62  ;;  %v12615_v16 = vadd.f32 %v6437_v46, %v6433_v38  ;;  %v6461_v22 = vadd.f32 %v6457_v0, %v6453_v48  ;;  %v12617_v5 = vpop.f32.mrb[252].mxu0  ;;  %v6458_v0 = vmul.f32 %v12558_v51, %v12558_v51 }
0x16e9   : > { %v6426_v25 = vmul.f32 %v12617_v5, %v12582_v44  ;;  %v6446_v13 = vmul.f32 %v12617_v5, %v12617_v5  ;;  %v12623_v1 = vpop.f32.mrb[253].mxu0  ;;  %vm6476_vm2 = vcmp.ge.f32.partialorder %v12613_v29, 0.0 }
0x16ea   : > { %8943 = vrcp.f32 %v6464_v59  ;;  %v6465_v58 = vadd.f32 1e-06, %v6461_v22  ;;  %v6430_v36 = vmul.f32 %v12623_v1, %v12584_v24  ;;  %v12627_v19 = vpop.f32.mrb[254].mxu0  ;;  %v6450_v38 = vmul.f32 %v12623_v1, %v12623_v1 }
0x16eb   : > { %v6427_v48 = vmul.f32 %v12627_v19, %v12586_v3  ;;  %v6447_v46 = vmul.f32 %v12627_v19, %v12627_v19  ;;  %v12635_v32 = vpop.f32.mrb[255].mxu0  ;;  %vm6477_vm4 = vcmp.ge.f32.partialorder %v12615_v16, 0.0 }
0x16ec   : > { %8945 = vrcp.f32 %v6465_v58  ;;  %v6434_v14 = vadd.f32 %v6430_v36, %v6426_v25  ;;  %v6431_v22 = vmul.f32 %v12635_v32, %v12588_v53  ;;  %v6451_v59 = vmul.f32 %v12635_v32, %v12635_v32 }
0x16ed   : > { %v6454_v47 = vadd.f32 %v6450_v38, %v6446_v13  ;;  %v6540_v13 = vmul.f32 0.2, %v12552_v31  ;;  %v12654_v38 = vmul.f32 0.2, %v12554_v9 }
0x16ee   : > { %v12645_v61 = vadd.f32 %v6438_v7, %v6434_v14  ;;  %v6435_v18 = vadd.f32 %v6431_v22, %v6427_v48  ;;  %v6455_v62 = vadd.f32 %v6451_v59, %v6447_v46  ;;  %v6492_v7 = vmul.f32 0.2, %v12572_v15 }
0x16ef   : > { %v6462_v6 = vadd.f32 %v6458_v0, %v6454_v47  ;;  %v6516_v48 = vmul.f32 0.2, %v12576_v56  ;;  %v6493_v14 = vmul.f32 0.2, %v12578_v10  ;;  %v6517_v22 = vmul.f32 0.2, %v12580_v21 }
0x16f0   : > { %v12647_v58 = vadd.f32 %v6439_v55, %v6435_v18  ;;  %v6463_v25 = vadd.f32 %v6459_v28, %v6455_v62  ;;  %v6541_v55 = vmul.f32 0.2, %v12556_v27  ;;  %v12663_v59 = vmul.f32 0.2, %v12582_v44 }
0x16f1   : > { %v6466_v36 = vadd.f32 1e-06, %v6462_v6  ;;  %v12669_v18 = vmul.f32 0.2, %v12584_v24  ;;  %v12675_v62 = vmul.f32 0.2, %v12588_v53 }
0x16f2   : > { %v6467_v37 = vadd.f32 1e-06, %v6463_v25  ;;  %vm6478_vm5 = vcmp.ge.f32.partialorder %v12645_v61, 0.0  ;;  %vm6479_vm6 = vcmp.ge.f32.partialorder %v12647_v58, 0.0 }
0x16f3   : > { %8947 = vrcp.f32 %v6466_v36 }
0x16f4   : > { %v8944_v12 = vpop.eup %8943  ;;  %8949 = vrcp.f32 %v6467_v37 }
0x16f5   : > { %v6472_v6 = vmul.f32 %v8944_v12, %v12613_v29  ;;  %v12672_v12 = vmul.f32 0.2, %v12586_v3 }
0x16f6   : > { %v8946_v46 = vpop.eup %8945 }
0x16f7   : > { %v6480_v0 = vmul.f32 %v6472_v6, %v12590_v11  ;;  %v6504_v47 = vmul.f32 %v6472_v6, %v6342_v4  ;;  %v6528_v37 = vmul.f32 %v6472_v6, %v12562_v33  ;;  %v6473_v28 = vmul.f32 %v8946_v46, %v12615_v16 }
0x16f9   : > { %v6484_v25 = vsub.f32 %v12572_v15, %v6480_v0  ;;  %v6532_v36 = vsub.f32 %v12552_v31, %v6528_v37  ;;  %v6481_v11 = vmul.f32 %v6473_v28, %v12597_v26  ;;  %v6505_v4 = vmul.f32 %v6473_v28, %v12605_v45 }
0x16fa   : > { %v6529_v33 = vmul.f32 %v6473_v28, %v12570_v42  ;;  %v6508_v6 = vsub.f32 %v12576_v56, %v6504_v47 }
0x16fb   : > { %v6488_v46 = vsel %vm6476_vm2, %v12572_v15, %v6484_v25  ;;  %v6485_v17 = vsub.f32 %v12578_v10, %v6481_v11  ;;  %v6509_v0 = vsub.f32 %v12580_v21, %v6505_v4  ;;  %v6536_v26 = vsel %vm6476_vm2, %v12552_v31, %v6532_v36 }
0x16fc   : > { %v6533_v45 = vsub.f32 %v12556_v27, %v6529_v33  ;;  %v6512_v29 = vsel %vm6476_vm2, %v12576_v56, %v6508_v6  ;;  %v6544_v37 = vmul.f32 0.8, %v6536_v26  ;;  %v6496_v28 = vmul.f32 0.8, %v6488_v46 }
0x16fd   : > { %v8948_v42 = vpop.eup %8947  ;;  %v6489_v15 = vsel %vm6477_vm4, %v12578_v10, %v6485_v17  ;;  %v6513_v47 = vsel %vm6477_vm4, %v12580_v21, %v6509_v0  ;;  %v6520_v25 = vmul.f32 0.8, %v6512_v29 }
0x16fe   : > { %v8950_v11 = vpop.eup %8949  ;;  %v6497_v31 = vmul.f32 0.8, %v6489_v15  ;;  %v6474_v36 = vmul.f32 %v8948_v42, %v12645_v61  ;;  %v6521_v4 = vmul.f32 0.8, %v6513_v47  ;;  %v6537_v56 = vsel %vm6477_vm4, %v12556_v27, %v6533_v45 }
0x16ff   : > { %v6475_v33 = vmul.f32 %v8950_v11, %v12647_v58  ;;  %v6524_v6 = vadd.f32 %v6520_v25, %v6516_v48  ;;  %v6545_v46 = vmul.f32 0.8, %v6537_v56  ;;  %v6548_v26 = vadd.f32 %v6544_v37, %v6540_v13 }
0x1700   : > { %v6482_v17 = vmul.f32 %v6474_v36, %v12617_v5  ;;  %v6506_v10 = vmul.f32 %v6474_v36, %v12623_v1  ;;  %v6530_v21 = vmul.f32 %v12558_v51, %v6474_v36  ;;  %v6525_v0 = vadd.f32 %v6521_v4, %v6517_v22 }
0x1701   : > { %v6483_v29 = vmul.f32 %v6475_v33, %v12627_v19  ;;  %v6507_v42 = vmul.f32 %v6475_v33, %v12635_v32  ;;  %v6531_v15 = vmul.f32 %v12566_v23, %v6475_v33  ;;  %v6549_v16 = vadd.f32 %v6545_v46, %v6541_v55  ;;  %v12775_v46 = vld [vmem:[%s12761_s12 + $0x48] sm:$0xff] }
0x1702   : > { %v6486_v27 = vsub.f32 %v12582_v44, %v6482_v17  ;;  %v6510_v48 = vsub.f32 %v12584_v24, %v6506_v10  ;;  %v6557_v45 = vpack.c.bf16 %v6525_v0, %v6524_v6  ;;  %v6500_v13 = vadd.f32 %v6496_v28, %v6492_v7  ;;  %v12770_v6 = vld [vmem:[%s12761_s12 + $0x30] sm:$0xff]  ;;  %v7112_v10 = vld [vmem:[%s12761_s12 + $0x20] sm:$0xff] }
0x1703   : > { %v6487_v5 = vsub.f32 %v12586_v3, %v6483_v29  ;;  %v6511_v1 = vsub.f32 %v12588_v53, %v6507_v42  ;;  %v6558_v37 = vpack.c.bf16 %v6549_v16, %v6548_v26  ;;  %v6501_v51 = vadd.f32 %v6497_v31, %v6493_v14  ;;  %v7110_v17 = vld [vmem:[%s12761_s12 + $0x10] sm:$0xff]  ;;  %v12792_v29 = vld [vmem:[%s12761_s12 + $0x68] sm:$0xff]  ;;  %v12812_v16 = vld [vmem:[%s12761_s12 + $0x58] sm:$0xff] }
0x1704   : > { %6578 = vmatprep.subr.bf16.mxu0 %v6557_v45  ;;  %v6514_v19 = vsel %vm6478_vm5, %v12584_v24, %v6510_v48  ;;  %v6534_v23 = vsub.f32 %v12550_v8, %v6530_v21  ;;  %v6535_v32 = vsub.f32 %v12554_v9, %v6531_v15  ;;  %v6490_v55 = vsel %vm6478_vm5, %v12582_v44, %v6486_v27  ;;  %v7115_v21 = vld [vmem:[%s12761_s12 + $0x38] sm:$0xff]  ;;  %v12787_v0 = vld [vmem:[%s12761_s12 + $0x50] sm:$0xff]  ;;  %v7113_v42 = vld [vmem:[%s12761_s12 + $0x28] sm:$0xff] }
0x1705   : > { %8598 = vmatprep.subr.bf16.mxu1 %v6558_v37  ;;  %v6556_v7 = vpack.c.bf16 %v6501_v51, %v6500_v13  ;;  %v6515_v22 = vsel %vm6479_vm6, %v12588_v53, %v6511_v1  ;;  %v6522_v14 = vmul.f32 0.8, %v6514_v19  ;;  %v6491_v28 = vsel %vm6479_vm6, %v12586_v3, %v6487_v5  ;;  %v12806_v15 = vld [vmem:[%s12761_s12 + $0x40] sm:$0xff]  ;;  %v12817_v27 = vld [vmem:[%s12761_s12 + $0x70] sm:$0xff]  ;;  %v12828_v45 = vld [vmem:[%s12761_s12 + $0x78] sm:$0xff] }
0x1706   : > { %8599 = vmatpush3.bf16.msra.mxu1 %v6558_v37  ;;  %v6523_v24 = vmul.f32 0.8, %v6515_v22  ;;  %v6538_v47 = vsel %vm6478_vm5, %v12550_v8, %v6534_v23  ;;  %v6539_v44 = vsel %vm6479_vm6, %v12554_v9, %v6535_v32  ;;  %v6498_v25 = vmul.f32 0.8, %v6490_v55  ;;  %v12822_v48 = vld [vmem:[%s12761_s12 + $0x60] sm:$0xff] }
0x1707   : > { %6579 = vmatpush1.bf16.msra.mxu0 %v6556_v7  ;;  %v6526_v11 = vadd.f32 %v6522_v14, %v12669_v18  ;;  %v6546_v53 = vmul.f32 0.8, %v6538_v47  ;;  %v6547_v31 = vmul.f32 0.8, %v6539_v44  ;;  %v6499_v36 = vmul.f32 0.8, %v6491_v28 }
0x1708   : > { %v6527_v4 = vadd.f32 %v6523_v24, %v12675_v62  ;;  %v6502_v3 = vadd.f32 %v6498_v25, %v12663_v59  ;;  %v8798_v18 = vld [vmem:[%s13508_s2 + $0x1c8] sm:$0xff]   ;;  %v7111_v59 = vld [vmem:[%s12761_s12 + $0x18] sm:$0xff]  ;;  %v8994_v62 = vmov 0.0   ;;  %v8996_v26 = vmov 3  }
0x1709   : > { %v6550_v56 = vadd.f32 %v6546_v53, %v12650_v57  ;;  %v6551_v8 = vadd.f32 %v6547_v31, %v12654_v38  ;;  %v6503_v61 = vadd.f32 %v6499_v36, %v12672_v12  ;;  %v8992_v57 = vmov 2   ;;  %v7109_v12 = vld [vmem:[%s12761_s12 + $0x8] sm:$0xff] }
0x170a   : > { %v6560_v9 = vpack.c.bf16 %v6527_v4, %v6526_v11  ;;  %8705 = vset.pattern.permute.xlu0 %v8992_v57  ;;  %v8993_v38 = vmov 1  }
0x170b   : > { %v6561_v58 = vpack.c.bf16 %v6551_v8, %v6550_v56  ;;  %v6559_v33 = vpack.c.bf16 %v6503_v61, %v6502_v3  ;;  %8704 = vset.pattern.permute.xlu1 %v8993_v38 }
0x170c   : > { %6580 = vmatprep.subr.bf16.mxu0 %v6560_v9 }
0x170d   : > { %8600 = vmatprep.subr.bf16.mxu1 %v6561_v58  ;;  %6581 = vmatpush1.bf16.msra.mxu0 %v6559_v33 }
0x170e   : > { %8601 = vmatpush3.bf16.msra.mxu1 %v6561_v58  ;;  %8606 = vmatprep.subr.bf16.mxu0 %v8994_v62 }
0x1710   : > { %8103 = vmatmul.mubr.msk.bf16.vlgmr.msra.gmra.mrb[0].mxu0 %vm2404_vm3, %v12546_v30  ;;  %v7108_v30 = vld [vmem:[%s12761_s12] sm:$0xff] }
0x1711   : > { %6620 = vmatprep.mubr.bf16.mxu0 %v13926_v20  ;;  %8603 = vmatmul.mubr.msk.bf16.vlgmr.msra.gmra.mrb[224].mxu1 %vm2404_vm3, %v8798_v18 }
0x1712   : > { %6783 = vmatprep.mubr.bf16.mxu1 %v13926_v20  ;;  %7320 = vperm.xlu0 %8705, %v7108_v30  }
0x1713   : > { %7208 = vperm.xlu1 %8704, %v7108_v30  }
0x1716   : > { %7329 = vperm.xlu0 %8705, %v7111_v59  }
0x1717   : > { %7211 = vperm.xlu1 %8704, %v7109_v12  }
0x1718   : > { %8104 = vmatmul.mubr.msk.bf16.gmra.mrb[4].mxu0 %vm2404_vm3, %v8798_v18  ;;  %vm8995_vm3 = vmmov 0  }
0x1719   : > { %8608 = vmatprep.mubr.msk.bf16.mxu0 %vm8995_vm3, %v8994_v62 }
0x171a   : > { %7338 = vperm.xlu0 %8705, %v12770_v6  }
0x171b   : > { %8706 = vset.pattern.permute.xlu1 %v8992_v57 }
0x171c   : > { %7323 = vperm.xlu1 %8706, %v7109_v12  }
0x171e   : > { %7347 = vperm.xlu0 %8705, %v12775_v46  }
0x1720   : > { %8707 = vset.pattern.permute.xlu1 %v8996_v26 }
0x1721   : > { %7432 = vperm.xlu1 %8707, %v7108_v30  }
0x1722   : > { %8723 = vset.pattern.permute.xlu0 %v13926_v20 }
0x1723   : > { %7128 = vperm.xlu0 %8723, %v7108_v30  }
0x1725   : > { %8708 = vset.pattern.permute.xlu1 %v13926_v20 }
0x1726   : > { %7134 = vperm.xlu1 %8708, %v7110_v17  }
0x1727   : > { %7131 = vperm.xlu0 %8723, %v7109_v12  }
0x172a   : > { %7137 = vperm.xlu1 %8708, %v7111_v59  }
0x172b   : > { %7140 = vperm.xlu0 %8723, %v7112_v10  }
0x172e   : > { %8709 = vset.pattern.permute.xlu1 %v8993_v38 }
0x172f   : > { %7149 = vperm.xlu0 %8723, %v7115_v21   ;;  %7217 = vperm.xlu1 %8709, %v7111_v59  }
0x1733   : > { %7158 = vperm.xlu0 %8723, %v12787_v0   ;;  %8710 = vset.pattern.permute.xlu1 %v8992_v57 }
0x1734   : > { %7326 = vperm.xlu1 %8710, %v7110_v17  }
0x1737   : > { %7167 = vperm.xlu0 %8723, %v12792_v29  }
0x1738   : > { %8711 = vset.pattern.permute.xlu1 %v8996_v26 }
0x1739   : > { %7438 = vperm.xlu1 %8711, %v7110_v17  }
0x173b   : > { %8730 = vset.pattern.permute.xlu0 %v8996_v26 }
0x173c   : > { %7435 = vperm.xlu0 %8730, %v7109_v12  }
0x173d   : > { %7441 = vperm.xlu1 %8711, %v7111_v59  }
0x1740   : > { %7444 = vperm.xlu0 %8730, %v7112_v10  }
0x1741   : > { %8712 = vset.pattern.permute.xlu1 %v13926_v20 }
0x1742   : > { %7143 = vperm.xlu1 %8712, %v7113_v42  }
0x1744   : > { %7453 = vperm.xlu0 %8730, %v7115_v21  }
0x1746   : > { %8713 = vset.pattern.permute.xlu1 %v8993_v38 }
0x1747   : > { %7220 = vperm.xlu1 %8713, %v7112_v10  }
0x1748   : > { %7462 = vperm.xlu0 %8730, %v12787_v0  }
0x174b   : > { %8714 = vset.pattern.permute.xlu1 %v8992_v57 }
0x174c   : > { %7471 = vperm.xlu0 %8730, %v12792_v29   ;;  %7332 = vperm.xlu1 %8714, %v7112_v10  }
0x1750   : > { %8734 = vset.pattern.permute.xlu0 %v8993_v38  ;;  %7335 = vperm.xlu1 %8714, %v7113_v42  }
0x1751   : > { %7214 = vperm.xlu0 %8734, %v7110_v17  }
0x1754   : > { %8715 = vset.pattern.permute.xlu1 %v8996_v26 }
0x1755   : > { %7447 = vperm.xlu1 %8715, %v7113_v42   ;;  %7223 = vperm.xlu0 %8734, %v7113_v42  }
0x1759   : > { %8716 = vset.pattern.permute.xlu1 %v13926_v20  ;;  %7232 = vperm.xlu0 %8734, %v12806_v15  }
0x175a   : > { %7146 = vperm.xlu1 %8716, %v12770_v6  }
0x175d   : > { %7241 = vperm.xlu0 %8734, %v12812_v16  }
0x175e   : > { %8717 = vset.pattern.permute.xlu1 %v8993_v38 }
0x175f   : > { %7226 = vperm.xlu1 %8717, %v12770_v6  }
0x1761   : > { %7250 = vperm.xlu0 %8734, %v12817_v27  }
0x1763   : > { %7229 = vperm.xlu1 %8717, %v7115_v21  }
0x1765   : > { %8736 = vset.pattern.permute.xlu0 %v8992_v57 }
0x1766   : > { %7356 = vperm.xlu0 %8736, %v12822_v48  }
0x1767   : > { %8718 = vset.pattern.permute.xlu1 %v8992_v57 }
0x1768   : > { %7341 = vperm.xlu1 %8718, %v7115_v21  }
0x176a   : > { %7365 = vperm.xlu0 %8736, %v12828_v45  }
0x176c   : > { %8719 = vset.pattern.permute.xlu1 %v8996_v26 }
0x176d   : > { %7450 = vperm.xlu1 %8719, %v12770_v6  }
0x176e   : > { %8740 = vset.pattern.permute.xlu0 %v8996_v26 }
0x1771   : > { %8720 = vset.pattern.permute.xlu1 %v13926_v20 }
0x1772   : > { %7152 = vperm.xlu1 %8720, %v12806_v15  }
0x1776   : > { %7155 = vperm.xlu1 %8720, %v12775_v46  }
0x177a   : > { %8721 = vset.pattern.permute.xlu1 %v8993_v38 }
0x177b   : > { %7235 = vperm.xlu1 %8721, %v12775_v46  }
0x177f   : > { %8722 = vset.pattern.permute.xlu1 %v8992_v57 }
0x1780   : > { %7344 = vperm.xlu1 %8722, %v12806_v15  }
0x1784   : > { %8724 = vset.pattern.permute.xlu1 %v8996_v26 }
0x1785   : > { %7456 = vperm.xlu1 %8724, %v12806_v15  }
0x1789   : > { %7459 = vperm.xlu1 %8724, %v12775_v46  }
0x178d   : > { %8725 = vset.pattern.permute.xlu1 %v13926_v20 }
0x178e   : > { %7161 = vperm.xlu1 %8725, %v12812_v16  }
0x1792   : > { %8726 = vset.pattern.permute.xlu1 %v8993_v38 }
0x1793   : > { %7238 = vperm.xlu1 %8726, %v12787_v0  }
0x1797   : > { %8727 = vset.pattern.permute.xlu1 %v8992_v57 }
0x1798   : > { %7350 = vperm.xlu1 %8727, %v12787_v0   ;;  %v6904_v0 = vlaneseq }
0x179c   : > { %7353 = vperm.xlu1 %8727, %v12812_v16  }
0x17a0   : > { %8728 = vset.pattern.permute.xlu1 %v8996_v26 }
0x17a1   : > { %7465 = vperm.xlu1 %8728, %v12812_v16  }
0x17a5   : > { %8729 = vset.pattern.permute.xlu1 %v13926_v20 }
0x17a6   : > { %7164 = vperm.xlu1 %8729, %v12822_v48  }
0x17aa   : > { %8731 = vset.pattern.permute.xlu1 %v8993_v38 }
0x17ab   : > { %7244 = vperm.xlu1 %8731, %v12822_v48  }
0x17af   : > { %7247 = vperm.xlu1 %8731, %v12792_v29  }
0x17b3   : > { %8732 = vset.pattern.permute.xlu1 %v8992_v57 }
0x17b4   : > { %7359 = vperm.xlu1 %8732, %v12792_v29   ;;  %v13975_v29 = vmov 0 }
0x17b8   : > { %8733 = vset.pattern.permute.xlu1 %v8996_v26 }
0x17b9   : > { %7468 = vperm.xlu1 %8733, %v12822_v48   ;;  %v8997_v48 = vmov 1.0|1.0  }
0x17bd   : > { %8735 = vset.pattern.permute.xlu1 %v13926_v20 }
0x17be   : > { %7170 = vperm.xlu1 %8735, %v12817_v27  }
0x17c2   : > { %7173 = vperm.xlu1 %8735, %v12828_v45  }
0x17c6   : > { %8737 = vset.pattern.permute.xlu1 %v8993_v38  ;;  %v13948_v38 = vmov 0 }
0x17c7   : > { %7253 = vperm.xlu1 %8737, %v12828_v45  }
0x17cb   : > { %8738 = vset.pattern.permute.xlu1 %v8992_v57 }
0x17cc   : > { %7362 = vperm.xlu1 %8738, %v12817_v27  }
0x17d0   : > { %8739 = vset.pattern.permute.xlu1 %v8996_v26 }
0x17d1   : > { %7474 = vperm.xlu1 %8739, %v12817_v27  }
0x17d5   : > { %7477 = vperm.xlu1 %8739, %v12828_v45  }
0x17e3   : > { %v12831_v13 = vpop.f32.mrb[0].mxu0 }
0x17e4   : > { %v12833_v5 = vpop.f32.mrb[1].mxu0  ;;  %v8604_v1 = vpop.f32.mrb[224].mxu1  ;;  %v6714_v42 = vmul.f32 0.2, %v12831_v13 }
0x17e5   : > { %v12836_v37 = vpop.f32.mrb[2].mxu0  ;;  %v12838_v51 = vpop.f32.mrb[225].mxu1  ;;  %v6696_v11 = vmul.f32 %v8604_v1, %v8604_v1 }
0x17e6   : > { %v12841_v19 = vpop.f32.mrb[3].mxu0  ;;  %v6686_v23 = vmul.f32 %v8604_v1, %v12838_v51  ;;  %v8605_v32 = vpop.f32.mrb[226].mxu1 }
0x17e7   : > { %v12845_v55 = vpop.f32.mrb[227].mxu1  ;;  %v6697_v61 = vmul.f32 %v8605_v32, %v8605_v32 }
0x17e8   : > { %v6687_v7 = vmul.f32 %v8605_v32, %v12845_v55 }
0x17eb   : > { %v6622_v22 = vpop.f32.mrb[4].mxu0 }
0x17ec   : > { %v6680_v14 = vmul.f32 %v6622_v22, %v12831_v13  ;;  %v6690_v28 = vmul.f32 %v6622_v22, %v6622_v22  ;;  %v6624_v24 = vpop.f32.mrb[5].mxu0 }
0x17ed   : > { %v6682_v47 = vmul.f32 %v6624_v24, %v12833_v5  ;;  %v6692_v44 = vmul.f32 %v6624_v24, %v6624_v24  ;;  %v6626_v25 = vpop.f32.mrb[6].mxu0 }
0x17ee   : > { %v6681_v53 = vmul.f32 %v6626_v25, %v12836_v37  ;;  %v6691_v31 = vmul.f32 %v6626_v25, %v6626_v25  ;;  %v6628_v36 = vpop.f32.mrb[7].mxu0 }
0x17ef   : > { %v6684_v4 = vadd.f32 %v6682_v47, %v6680_v14  ;;  %v6694_v3 = vadd.f32 %v6692_v44, %v6690_v28  ;;  %v6683_v56 = vmul.f32 %v6628_v36, %v12841_v19  ;;  %v6693_v8 = vmul.f32 %v6628_v36, %v6628_v36 }
0x17f0   : > { %v6726_v47 = vmul.f32 0.2, %v12833_v5  ;;  %v6715_v44 = vmul.f32 0.2, %v12836_v37 }
0x17f1   : > { %v6685_v9 = vadd.f32 %v6683_v56, %v6681_v53  ;;  %v6695_v58 = vadd.f32 %v6693_v8, %v6691_v31  ;;  %v6698_v33 = vadd.f32 %v6696_v11, %v6694_v3  ;;  %v6688_v18 = vadd.f32 %v6686_v23, %v6684_v4 }
0x17f2   : > { %v6738_v11 = vmul.f32 0.2, %v12838_v51 }
0x17f3   : > { %v6700_v30 = vadd.f32 1e-06, %v6698_v33  ;;  %v6699_v59 = vadd.f32 %v6697_v61, %v6695_v58  ;;  %v6689_v12 = vadd.f32 %v6687_v7, %v6685_v9  ;;  %vm6706_vm7 = vcmp.ge.f32.partialorder %v6688_v18, 0.0 }
0x17f4   : > { %v6727_v61 = vmul.f32 0.2, %v12841_v19 }
0x17f5   : > { %8951 = vrcp.f32 %v6700_v30  ;;  %v6701_v6 = vadd.f32 1e-06, %v6699_v59  ;;  %vm6707_vm8 = vcmp.ge.f32.partialorder %v6689_v12, 0.0  ;;  %v12884_v59 = vpop.permute.xlu0 %7320 }
0x17f7   : > { %8953 = vrcp.f32 %v6701_v6  ;;  %v6739_v6 = vmul.f32 0.2, %v12845_v55 }
0x17ff   : > { %v8952_v17 = vpop.eup %8951 }
0x1800   : > { %v6704_v10 = vmul.f32 %v8952_v17, %v6688_v18 }
0x1801   : > { %v8954_v21 = vpop.eup %8953 }
0x1802   : > { %v6708_v23 = vmul.f32 %v6704_v10, %v6622_v22  ;;  %v6720_v7 = vmul.f32 %v6704_v10, %v6624_v24  ;;  %v6732_v14 = vmul.f32 %v8604_v1, %v6704_v10  ;;  %v6705_v28 = vmul.f32 %v8954_v21, %v6689_v12  ;;  %v12889_v12 = vpop.permute.xlu0 %7329 }
0x1804   : > { %v6710_v53 = vsub.f32 %v12831_v13, %v6708_v23  ;;  %v6734_v15 = vsub.f32 %v12838_v51, %v6732_v14  ;;  %v6709_v31 = vmul.f32 %v6705_v28, %v6626_v25  ;;  %v6721_v4 = vmul.f32 %v6705_v28, %v6628_v36 }
0x1805   : > { %v6733_v3 = vmul.f32 %v8605_v32, %v6705_v28  ;;  %v6722_v46 = vsub.f32 %v12833_v5, %v6720_v7 }
0x1806   : > { %v6712_v1 = vsel %vm6706_vm7, %v12831_v13, %v6710_v53  ;;  %v6736_v22 = vsel %vm6706_vm7, %v12838_v51, %v6734_v15  ;;  %v6711_v24 = vsub.f32 %v12836_v37, %v6709_v31  ;;  %v6723_v56 = vsub.f32 %v12841_v19, %v6721_v4 }
0x1807   : > { %v6716_v8 = vmul.f32 0.8, %v6712_v1  ;;  %v6740_v25 = vmul.f32 0.8, %v6736_v22  ;;  %v6735_v36 = vsub.f32 %v12845_v55, %v6733_v3  ;;  %v6724_v32 = vsel %vm6706_vm7, %v12833_v5, %v6722_v46 }
0x1808   : > { %v6713_v9 = vsel %vm6707_vm8, %v12836_v37, %v6711_v24  ;;  %v6725_v13 = vsel %vm6707_vm8, %v12841_v19, %v6723_v56  ;;  %v6728_v51 = vmul.f32 0.8, %v6724_v32  ;;  %v7209_v37 = vpop.permute.xlu1 %7208  ;;  %v12911_v3 = vand.u32 127, %v6904_v0 }
0x1809   : > { %v6742_v58 = vadd.f32 %v6740_v25, %v6738_v11  ;;  %v6717_v33 = vmul.f32 0.8, %v6713_v9  ;;  %v6737_v18 = vsel %vm6707_vm8, %v12845_v55, %v6735_v36  ;;  %v6729_v30 = vmul.f32 0.8, %v6725_v13  ;;  %v6744_v55 = vld [vmem:[%s13508_s2 + $0x1d0] sm:$0x1] }
0x180a   : > { %v6741_v5 = vmul.f32 0.8, %v6737_v18  ;;  %v6730_v17 = vadd.f32 %v6728_v51, %v6726_v47  ;;  %v6718_v10 = vadd.f32 %v6716_v8, %v6714_v42  ;;  %v12896_v42 = vpop.permute.xlu0 %7338  ;;  %v12920_v16 = vadd.s32 128, %v12911_v3 }
0x180b   : > { %v6731_v21 = vadd.f32 %v6729_v30, %v6727_v61  ;;  %v6719_v23 = vadd.f32 %v6717_v33, %v6715_v44  ;;  %vm7255_vm9 = vcmp.eq.s32.totalorder %v12911_v3, %v7209_v37  ;;  %vm7367_vm12 = vcmp.eq.s32.totalorder %v12911_v3, %v12884_v59 }
0x180c   : > { %v6743_v19 = vadd.f32 %v6741_v5, %v6739_v6  ;;  %v7212_v11 = vpop.permute.xlu1 %7211  ;;  %vm7256_vm11 = vcmp.eq.s32.totalorder %v12920_v16, %v7209_v37  ;;  %vm7368_vm5 = vcmp.eq.s32.totalorder %v12920_v16, %v12884_v59  ;;  %v13950_v30 = vmov 0 }
0x180d   : > { %v6746_v7 = vpack.c.bf16 %v6731_v21, %v6730_v17  ;;  %v6745_v14 = vpack.c.bf16 %v6719_v23, %v6718_v10  ;;  %vm7257_vm15 = vcmp.eq.s32.totalorder %v12911_v3, %v7212_v11  ;;  %vm7258_vm4 = vcmp.eq.s32.totalorder %v12920_v16, %v7212_v11 }
0x180e   : > { %v6747_v28 = vpack.c.bf16 %v6743_v19, %v6742_v58  ;;  %v12902_v44 = vpop.permute.xlu0 %7347  ;;  %v13954_v5 = vmov 0  ;;  %v13959_v10 = vmov 0 }
0x180f   : > { %6751 = vmatprep.subr.bf16.mxu1 %v6746_v7 }
0x1810   : > { %8607 = vmatpush3.bf16.msra.mxu0 %v6747_v28  ;;  %6752 = vmatpush1.bf16.msra.mxu1 %v6745_v14  ;;  %v7324_v47 = vpop.permute.xlu1 %7323  ;;  %v13966_v14 = vmov 0 }
0x1811   : > { %vm7369_vm7 = vcmp.eq.s32.totalorder %v12911_v3, %v7324_v47 }
0x1812   : > { %v7129_v15 = vpop.permute.xlu0 %7128 }
0x1813   : > { %8107 = vmatmul.mubr.msk.bf16.vlgmr.msra.gmra.mrb[228].mxu1 %vm307_vm0, %v6744_v55  ;;  %8609 = vmatmul.mubr.msk.bf16.vlgmr.msra.gmra.mrb[8].mxu0 %vm307_vm0, %v6744_v55  ;;  %vm7175_vm0 = vcmp.eq.s32.totalorder %v12911_v3, %v7129_v15  ;;  %vm7176_vm10 = vcmp.eq.s32.totalorder %v12920_v16, %v7129_v15 }
0x1814   : > { %7671 = vmatprep.mubr.f32.mxu1 %v8994_v62  ;;  %v7433_v53 = vpop.permute.xlu1 %7432  ;;  %vm7287_vm13 = vmor %vm7175_vm0, %vm7255_vm9  ;;  %vm7370_vm0 = vcmp.eq.s32.totalorder %v12920_v16, %v7324_v47 }
0x1815   : > { %vm7288_vm2 = vmor %vm7176_vm10, %vm7256_vm11  ;;  %vm7479_vm10 = vcmp.eq.s32.totalorder %v12911_v3, %v7433_v53 }
0x1816   : > { %v7132_v4 = vpop.permute.xlu0 %7131  ;;  %vm7399_vm6 = vmor %vm7287_vm13, %vm7367_vm12  ;;  %vm7480_vm12 = vcmp.eq.s32.totalorder %v12920_v16, %v7433_v53 }
0x1817   : > { %vm7177_vm14 = vcmp.eq.s32.totalorder %v12911_v3, %v7132_v4  ;;  %vm7178_vm1 = vcmp.eq.s32.totalorder %v12920_v16, %v7132_v4  ;;  %vm7400_vm9 = vmor %vm7288_vm2, %vm7368_vm5 }
0x1818   : > { %v12906_v31 = vpop.permute.xlu1 %7134  ;;  %vm7289_vm3 = vmor %vm7177_vm14, %vm7257_vm15 }
0x1819   : > { %vm7290_vm8 = vmor %vm7178_vm1, %vm7258_vm4 }
0x181a   : > { %v12915_v1 = vpop.permute.xlu0 %7140  ;;  %vm7401_vm11 = vmor %vm7289_vm3, %vm7369_vm7 }
0x181b   : > { %vm7402_vm13 = vmor %vm7290_vm8, %vm7370_vm0 }
0x181c   : > { %v12913_v46 = vpop.permute.xlu1 %7137  ;;  %vm12953_vm14 = vmor %vm7399_vm6, %vm7479_vm10  ;;  %vm7373_vm10 = vcmp.eq.s32.totalorder %v12911_v3, %v12889_v12 }
0x181d   : > { %vm7512_vm15 = vmor %vm7400_vm9, %vm7480_vm12  ;;  %vm7181_vm7 = vcmp.eq.s32.totalorder %v12911_v3, %v12913_v46  ;;  %vm7182_vm0 = vcmp.eq.s32.totalorder %v12920_v16, %v12913_v46  ;;  %vm7374_vm12 = vcmp.eq.s32.totalorder %v12920_v16, %v12889_v12 }
0x181e   : > { %v12922_v22 = vpop.permute.xlu0 %7149 }
0x1820   : > { %v7218_v24 = vpop.permute.xlu1 %7217 }
0x1821   : > { %vm7261_vm8 = vcmp.eq.s32.totalorder %v12911_v3, %v7218_v24  ;;  %vm7262_vm9 = vcmp.eq.s32.totalorder %v12920_v16, %v7218_v24 }
0x1822   : > { %v12931_v56 = vpop.permute.xlu0 %7158 }
0x1824   : > { %v12935_v8 = vpop.permute.xlu1 %7326 }
0x1826   : > { %v12944_v25 = vpop.permute.xlu0 %7167 }
0x1828   : > { %v12948_v36 = vpop.permute.xlu1 %7438 }
0x182a   : > { %v7436_v32 = vpop.permute.xlu0 %7435 }
0x182b   : > { %vm7481_vm1 = vcmp.eq.s32.totalorder %v12911_v3, %v7436_v32  ;;  %vm7482_vm2 = vcmp.eq.s32.totalorder %v12920_v16, %v7436_v32 }
0x182c   : > { %v7442_v61 = vpop.permute.xlu1 %7441  ;;  %vm7513_vm4 = vmor %vm7401_vm11, %vm7481_vm1  ;;  %vm7183_vm1 = vcmp.eq.s32.totalorder %v12911_v3, %v12915_v1 }
0x182d   : > { %vm7514_vm5 = vmor %vm7402_vm13, %vm7482_vm2 }
0x182e   : > { %vm8614_vm3 = vmpackc.low %vm7513_vm4, %vm12953_vm14  ;;  %v12962_v9 = vpop.permute.xlu0 %7444 }
0x182f   : > { %vm8612_vm6 = vmpackc.low %vm7514_vm5, %vm7512_vm15  ;;  %vm7485_vm15 = vcmp.eq.s32.totalorder %v12911_v3, %v7442_v61  ;;  %vm7486_vm5 = vcmp.eq.s32.totalorder %v12920_v16, %v7442_v61  ;;  %v13977_v61 = vmov 0 }
0x1830   : > { %8613 = vmatprep.subr.msk.bf16.mxu1 %vm8612_vm6, %v8997_v48  ;;  %v12966_v13 = vpop.permute.xlu1 %7143  ;;  %vm7293_vm11 = vmor %vm7181_vm7, %vm7261_vm8 }
0x1831   : > { %8615 = vmatpush1.bf16.msk.msra.mxu1 %vm8614_vm3, %v8997_v48  ;;  %vm7294_vm13 = vmor %vm7182_vm0, %vm7262_vm9  ;;  %vm7184_vm3 = vcmp.eq.s32.totalorder %v12920_v16, %v12915_v1  ;;  %vm7179_vm9 = vcmp.eq.s32.totalorder %v12911_v3, %v12906_v31 }
0x1832   : > { %v12969_v51 = vpop.permute.xlu0 %7453  ;;  %vm7405_vm14 = vmor %vm7293_vm11, %vm7373_vm10  ;;  %vm7180_vm11 = vcmp.eq.s32.totalorder %v12920_v16, %v12906_v31 }
0x1833   : > { %vm7406_vm4 = vmor %vm7294_vm13, %vm7374_vm12 }
0x1834   : > { %v7221_v20 = vpop.permute.xlu1 %7220  ;;  %vm12996_vm6 = vmor %vm7405_vm14, %vm7485_vm15  ;;  %vm7371_vm14 = vcmp.eq.s32.totalorder %v12911_v3, %v12935_v8 }
0x1835   : > { %vm7263_vm2 = vcmp.eq.s32.totalorder %v12911_v3, %v7221_v20  ;;  %v13949_v38 = vsel %vm12996_vm6, 4294967295, %v13948_v38  ;;  %vm7264_vm7 = vcmp.eq.s32.totalorder %v12920_v16, %v7221_v20  ;;  %vm13005_vm10 = vmor %vm7406_vm4, %vm7486_vm5  ;;  %vm7372_vm4 = vcmp.eq.s32.totalorder %v12920_v16, %v12935_v8 }
0x1836   : > { %v12980_v58 = vpop.permute.xlu0 %7462  ;;  %vm7295_vm8 = vmor %vm7183_vm1, %vm7263_vm2  ;;  %v13951_v30 = vsel %vm13005_vm10, 4294967295, %v13950_v30 }
0x1837   : > { %vm7296_vm12 = vmor %vm7184_vm3, %vm7264_vm7  ;;  %vm7483_vm3 = vcmp.eq.s32.totalorder %v12911_v3, %v12948_v36 }
0x1838   : > { %v7333_v18 = vpop.permute.xlu1 %7332 }
0x1839   : > { %vm7375_vm0 = vcmp.eq.s32.totalorder %v12911_v3, %v7333_v18  ;;  %vm7376_vm13 = vcmp.eq.s32.totalorder %v12920_v16, %v7333_v18  ;;  %v13985_v18 = vmov 0 }
0x183a   : > { %v12989_v33 = vpop.permute.xlu0 %7471  ;;  %vm13017_vm2 = vmor %vm7295_vm8, %vm7375_vm0  ;;  %vm7487_vm8 = vcmp.eq.s32.totalorder %v12911_v3, %v12962_v9  ;;  %vm7484_vm0 = vcmp.eq.s32.totalorder %v12920_v16, %v12948_v36 }
0x183b   : > { %vm13026_vm10 = vmor %vm7296_vm12, %vm7376_vm13  ;;  %vm7185_vm13 = vcmp.eq.s32.totalorder %v12911_v3, %v12966_v13 }
0x183c   : > { %v7336_v57 = vpop.permute.xlu1 %7335  ;;  %v13955_v5 = vsel %vm13026_vm10, 4294967295, %v13954_v5 }
0x183e   : > { %v7215_v59 = vpop.permute.xlu0 %7214 }
0x183f   : > { %vm7259_vm15 = vcmp.eq.s32.totalorder %v12911_v3, %v7215_v59  ;;  %vm7260_vm1 = vcmp.eq.s32.totalorder %v12920_v16, %v7215_v59 }
0x1840   : > { %vm7291_vm5 = vmor %vm7179_vm9, %vm7259_vm15  ;;  %v7448_v26 = vpop.permute.xlu1 %7447 }
0x1841   : > { %vm7292_vm7 = vmor %vm7180_vm11, %vm7260_vm1  ;;  %vm13958_vm11 = vnez %v13949_v38  ;;  %vm7186_vm1 = vcmp.eq.s32.totalorder %v12920_v16, %v12966_v13  ;;  %v13979_v13 = vmov 0  ;;  %v13987_v38 = vmov 0 }
0x1842   : > { %vm7403_vm6 = vmor %vm7291_vm5, %vm7371_vm14  ;;  %v7224_v17 = vpop.permute.xlu0 %7223 }
0x1843   : > { %vm7404_vm9 = vmor %vm7292_vm7, %vm7372_vm4  ;;  %vm7265_vm14 = vcmp.eq.s32.totalorder %v12911_v3, %v7224_v17  ;;  %vm7266_vm5 = vcmp.eq.s32.totalorder %v12920_v16, %v7224_v17 }
0x1844   : > { %vm13034_vm15 = vmor %vm7403_vm6, %vm7483_vm3  ;;  %vm13961_vm3 = vnez %v13951_v30  ;;  %v7147_v45 = vpop.permute.xlu1 %7146 }
0x1845   : > { %vm8618_vm12 = vmpackc.low %vm13958_vm11, %vm13034_vm15  ;;  %vm7377_vm15 = vcmp.eq.s32.totalorder %v12911_v3, %v7336_v57  ;;  %vm7378_vm11 = vcmp.eq.s32.totalorder %v12920_v16, %v7336_v57 }
0x1846   : > { %vm7516_vm4 = vmor %vm7404_vm9, %vm7484_vm0  ;;  %vm7488_vm0 = vcmp.eq.s32.totalorder %v12920_v16, %v12962_v9  ;;  %v7233_v4 = vpop.permute.xlu0 %7232 }
0x1847   : > { %vm13050_vm6 = vmor %vm13017_vm2, %vm7487_vm8  ;;  %vm7490_vm8 = vcmp.eq.s32.totalorder %v12920_v16, %v7448_v26 }
0x1848   : > { %v13960_v10 = vsel %vm13050_vm6, 4294967295, %v13959_v10  ;;  %vm8616_vm7 = vmpackc.low %vm13961_vm3, %vm7516_vm4  ;;  %vm7489_vm6 = vcmp.eq.s32.totalorder %v12911_v3, %v7448_v26  ;;  %vm13962_vm3 = vnez %v13955_v5  ;;  %v7227_v37 = vpop.permute.xlu1 %7226 }
0x1849   : > { %8617 = vmatprep.subr.msk.bf16.mxu1 %vm8616_vm7, %v8997_v48  ;;  %vm7297_vm10 = vmor %vm7185_vm13, %vm7265_vm14 }
0x184a   : > { %8619 = vmatpush1.bf16.msk.msra.mxu1 %vm8618_vm12, %v8997_v48  ;;  %vm7298_vm2 = vmor %vm7186_vm1, %vm7266_vm5  ;;  %vm13963_vm1 = vnez %v13960_v10  ;;  %v7242_v8 = vpop.permute.xlu0 %7241 }
0x184b   : > { %vm7409_vm9 = vmor %vm7297_vm10, %vm7377_vm15  ;;  %vm7189_vm10 = vcmp.eq.s32.totalorder %v12911_v3, %v12922_v22 }
0x184c   : > { %vm7410_vm4 = vmor %vm7298_vm2, %vm7378_vm11  ;;  %v7230_v21 = vpop.permute.xlu1 %7229  ;;  %vm7187_vm11 = vcmp.eq.s32.totalorder %v12911_v3, %v7147_v45 }
0x184d   : > { %vm7520_vm7 = vmor %vm13962_vm3, %vm7488_vm0  ;;  %vm7269_vm15 = vcmp.eq.s32.totalorder %v12911_v3, %v7230_v21  ;;  %vm7267_vm0 = vcmp.eq.s32.totalorder %v12911_v3, %v7227_v37 }
0x184e   : > { %vm7522_vm13 = vmor %vm7410_vm4, %vm7490_vm8  ;;  %vm7493_vm4 = vcmp.eq.s32.totalorder %v12911_v3, %v12969_v51  ;;  %v13170_v32 = vpop.permute.xlu0 %7250 }
0x184f   : > { %vm7521_vm14 = vmor %vm7409_vm9, %vm7489_vm6  ;;  %vm7379_vm6 = vcmp.eq.s32.totalorder %v12911_v3, %v12896_v42 }
0x1850   : > { %vm8620_vm12 = vmpackc.low %vm7522_vm13, %vm7520_vm7  ;;  %v7342_v23 = vpop.permute.xlu1 %7341 }
0x1851   : > { %8621 = vmatprep.subr.msk.bf16.mxu1 %vm8620_vm12, %v8997_v48  ;;  %vm8622_vm5 = vmpackc.low %vm7521_vm14, %vm13963_vm1  ;;  %vm7381_vm9 = vcmp.eq.s32.totalorder %v12911_v3, %v7342_v23 }
0x1852   : > { %8623 = vmatpush1.bf16.msk.msra.mxu1 %vm8622_vm5, %v8997_v48  ;;  %vm7301_vm2 = vmor %vm7189_vm10, %vm7269_vm15  ;;  %vm7190_vm5 = vcmp.eq.s32.totalorder %v12920_v16, %v12922_v22  ;;  %vm7270_vm10 = vcmp.eq.s32.totalorder %v12920_v16, %v7230_v21  ;;  %vm7188_vm15 = vcmp.eq.s32.totalorder %v12920_v16, %v7147_v45 }
0x1853   : > { %vm7299_vm8 = vmor %vm7187_vm11, %vm7267_vm0  ;;  %vm7268_vm11 = vcmp.eq.s32.totalorder %v12920_v16, %v7227_v37 }
0x1854   : > { %vm7413_vm3 = vmor %vm7301_vm2, %vm7381_vm9  ;;  %v7451_v19 = vpop.permute.xlu1 %7450  ;;  %vm7382_vm2 = vcmp.eq.s32.totalorder %v12920_v16, %v7342_v23  ;;  %vm7494_vm9 = vcmp.eq.s32.totalorder %v12920_v16, %v12969_v51  ;;  %v13981_v51 = vmov 0 }
0x1855   : > { %vm7411_vm7 = vmor %vm7299_vm8, %vm7379_vm6  ;;  %vm7491_vm14 = vcmp.eq.s32.totalorder %v12911_v3, %v7451_v19  ;;  %vm7380_vm6 = vcmp.eq.s32.totalorder %v12920_v16, %v12896_v42 }
0x1856   : > { %vm13081_vm13 = vmor %vm7413_vm3, %vm7493_vm4 }
0x1857   : > { %vm13086_vm12 = vmor %vm7411_vm7, %vm7491_vm14  ;;  %vm7492_vm7 = vcmp.eq.s32.totalorder %v12920_v16, %v7451_v19 }
0x1858   : > { %v13967_v14 = vsel %vm13086_vm12, 4294967295, %v13966_v14  ;;  %v7153_v12 = vpop.permute.xlu1 %7152  ;;  %vm7302_vm0 = vmor %vm7190_vm5, %vm7270_vm10 }
0x1859   : > { %vm7300_vm8 = vmor %vm7188_vm15, %vm7268_vm11  ;;  %vm13968_vm5 = vnez %v13967_v14 }
0x185a   : > { %vm7414_vm4 = vmor %vm7302_vm0, %vm7382_vm2  ;;  %vm7386_vm0 = vcmp.eq.s32.totalorder %v12920_v16, %v12902_v44 }
0x185b   : > { %vm7412_vm3 = vmor %vm7300_vm8, %vm7380_vm6 }
0x185c   : > { %v7156_v28 = vpop.permute.xlu1 %7155  ;;  %vm7526_vm14 = vmor %vm7414_vm4, %vm7494_vm9 }
0x185d   : > { %vm7524_vm1 = vmor %vm7412_vm3, %vm7492_vm7  ;;  %vm7194_vm15 = vcmp.eq.s32.totalorder %v12920_v16, %v7156_v28  ;;  %vm7193_vm11 = vcmp.eq.s32.totalorder %v12911_v3, %v7156_v28  ;;  %vm7191_vm3 = vcmp.eq.s32.totalorder %v12911_v3, %v7153_v12 }
0x185e   : > { %vm8624_vm12 = vmpackc.low %vm7526_vm14, %vm7524_vm1  ;;  %vm7385_vm1 = vcmp.eq.s32.totalorder %v12911_v3, %v12902_v44  ;;  %vm7271_vm14 = vcmp.eq.s32.totalorder %v12911_v3, %v7233_v4  ;;  %v13970_v44 = vmov 0 }
0x185f   : > { %8625 = vmatprep.subr.msk.bf16.mxu1 %vm8624_vm12, %v8997_v48  ;;  %vm13969_vm10 = vmpackc.low %vm13081_vm13, %vm13968_vm5  ;;  %vm7192_vm5 = vcmp.eq.s32.totalorder %v12920_v16, %v7153_v12 }
0x1860   : > { %v7236_v11 = vpop.permute.xlu1 %7235  ;;  %8627 = vmatpush1.bf16.msk.msra.mxu1 %vm13969_vm10, %v8997_v48 }
0x1861   : > { %vm7274_vm12 = vcmp.eq.s32.totalorder %v12920_v16, %v7236_v11  ;;  %vm7273_vm13 = vcmp.eq.s32.totalorder %v12911_v3, %v7236_v11 }
0x1862   : > { %vm7306_vm2 = vmor %vm7194_vm15, %vm7274_vm12  ;;  %vm7272_vm15 = vcmp.eq.s32.totalorder %v12920_v16, %v7233_v4 }
0x1863   : > { %vm7305_vm6 = vmor %vm7193_vm11, %vm7273_vm13 }
0x1864   : > { %v7345_v55 = vpop.permute.xlu1 %7344  ;;  %vm7417_vm8 = vmor %vm7305_vm6, %vm7385_vm1 }
0x1865   : > { %vm7418_vm7 = vmor %vm7306_vm2, %vm7386_vm0  ;;  %vm7383_vm11 = vcmp.eq.s32.totalorder %v12911_v3, %v7345_v55  ;;  %vm7384_vm12 = vcmp.eq.s32.totalorder %v12920_v16, %v7345_v55 }
0x1866   : > { %vm7303_vm13 = vmor %vm7191_vm3, %vm7271_vm14 }
0x1867   : > { %vm7304_vm0 = vmor %vm7192_vm5, %vm7272_vm15  ;;  %vm7196_vm5 = vcmp.eq.s32.totalorder %v12920_v16, %v12931_v56  ;;  %vm7195_vm15 = vcmp.eq.s32.totalorder %v12911_v3, %v12931_v56  ;;  %v13973_v56 = vmov 0 }
0x1868   : > { %v7457_v42 = vpop.permute.xlu1 %7456 }
0x1869   : > { %vm7495_vm6 = vcmp.eq.s32.totalorder %v12911_v3, %v7457_v42  ;;  %vm7496_vm2 = vcmp.eq.s32.totalorder %v12920_v16, %v7457_v42 }
0x186c   : > { %v7460_v47 = vpop.permute.xlu1 %7459 }
0x186d   : > { %vm7497_vm9 = vcmp.eq.s32.totalorder %v12911_v3, %v7460_v47  ;;  %vm7498_vm4 = vcmp.eq.s32.totalorder %v12920_v16, %v7460_v47 }
0x186e   : > { %vm13127_vm10 = vmor %vm7417_vm8, %vm7497_vm9 }
0x186f   : > { %v13971_v44 = vsel %vm13127_vm10, 4294967295, %v13970_v44  ;;  %vm7530_vm1 = vmor %vm7418_vm7, %vm7498_vm4 }
0x1870   : > { %v13112_v53 = vpop.permute.xlu1 %7161  ;;  %vm7415_vm8 = vmor %vm7303_vm13, %vm7383_vm11  ;;  %vm13972_vm3 = vnez %v13971_v44 }
0x1871   : > { %vm7416_vm9 = vmor %vm7304_vm0, %vm7384_vm12 }
0x1872   : > { %vm7527_vm10 = vmor %vm7415_vm8, %vm7495_vm6 }
0x1873   : > { %vm7528_vm4 = vmor %vm7416_vm9, %vm7496_vm2  ;;  %vm7500_vm2 = vcmp.eq.s32.totalorder %v12920_v16, %v12980_v58 }
0x1874   : > { %v7239_v15 = vpop.permute.xlu1 %7238  ;;  %vm8628_vm7 = vmpackc.low %vm7530_vm1, %vm7528_vm4 }
0x1875   : > { %8629 = vmatprep.subr.msk.bf16.mxu1 %vm8628_vm7, %v8997_v48  ;;  %vm8630_vm14 = vmpackc.low %vm13972_vm3, %vm7527_vm10  ;;  %vm7276_vm11 = vcmp.eq.s32.totalorder %v12920_v16, %v7239_v15  ;;  %vm7275_vm12 = vcmp.eq.s32.totalorder %v12911_v3, %v7239_v15  ;;  %vm7499_vm10 = vcmp.eq.s32.totalorder %v12911_v3, %v12980_v58 }
0x1876   : > { %8631 = vmatpush1.bf16.msk.msra.mxu1 %vm8630_vm14, %v8997_v48  ;;  %vm7308_vm1 = vmor %vm7196_vm5, %vm7276_vm11  ;;  %vm7197_vm5 = vcmp.eq.s32.totalorder %v12911_v3, %v13112_v53  ;;  %vm7198_vm11 = vcmp.eq.s32.totalorder %v12920_v16, %v13112_v53  ;;  %v13273_v53 = vshrl.u32 %v6904_v0, 7 }
0x1877   : > { %vm7307_vm6 = vmor %vm7195_vm15, %vm7275_vm12  ;;  %vm7277_vm15 = vcmp.eq.s32.totalorder %v12911_v3, %v7242_v8  ;;  %vm7278_vm12 = vcmp.eq.s32.totalorder %v12920_v16, %v7242_v8 }
0x1878   : > { %v7351_v31 = vpop.permute.xlu1 %7350  ;;  %v13276_v15 = vsub.s32 0, %v13273_v53 }
0x1879   : > { %vm7388_vm13 = vcmp.eq.s32.totalorder %v12920_v16, %v7351_v31  ;;  %vm7387_vm0 = vcmp.eq.s32.totalorder %v12911_v3, %v7351_v31 }
0x187a   : > { %vm7419_vm8 = vmor %vm7307_vm6, %vm7387_vm0 }
0x187b   : > { %vm7420_vm9 = vmor %vm7308_vm1, %vm7388_vm13 }
0x187c   : > { %v7354_v46 = vpop.permute.xlu1 %7353  ;;  %vm13154_vm4 = vmor %vm7419_vm8, %vm7499_vm10 }
0x187d   : > { %v13974_v56 = vsel %vm13154_vm4, 4294967295, %v13973_v56  ;;  %vm13158_vm7 = vmor %vm7420_vm9, %vm7500_vm2  ;;  %vm7389_vm6 = vcmp.eq.s32.totalorder %v12911_v3, %v7354_v46  ;;  %vm7201_vm2 = vcmp.eq.s32.totalorder %v12911_v3, %v12944_v25  ;;  %vm7390_vm8 = vcmp.eq.s32.totalorder %v12920_v16, %v7354_v46 }
0x187e   : > { %v13976_v29 = vsel %vm13158_vm7, 4294967295, %v13975_v29  ;;  %vm7309_vm0 = vmor %vm7197_vm5, %vm7277_vm15  ;;  %vm7202_vm7 = vcmp.eq.s32.totalorder %v12920_v16, %v12944_v25  ;;  %v7357_v25 = vpop.permute.xlu0 %7356 }
0x187f   : > { %vm7310_vm9 = vmor %vm7198_vm11, %vm7278_vm12 }
0x1880   : > { %v13136_v1 = vpop.permute.xlu1 %7465  ;;  %vm13195_vm15 = vmor %vm7310_vm9, %vm7390_vm8 }
0x1882   : > { %v7366_v59 = vpop.permute.xlu0 %7365 }
0x1884   : > { %v7165_v22 = vpop.permute.xlu1 %7164 }
0x1885   : > { %vm7199_vm3 = vcmp.eq.s32.totalorder %v12911_v3, %v7165_v22  ;;  %vm7200_vm1 = vcmp.eq.s32.totalorder %v12920_v16, %v7165_v22 }
0x1888   : > { %v7245_v24 = vpop.permute.xlu1 %7244 }
0x1889   : > { %vm7279_vm14 = vcmp.eq.s32.totalorder %v12911_v3, %v7245_v24  ;;  %vm7280_vm13 = vcmp.eq.s32.totalorder %v12920_v16, %v7245_v24 }
0x188a   : > { %vm13174_vm10 = vmor %vm7199_vm3, %vm7279_vm14 }
0x188b   : > { %v13978_v61 = vsel %vm13174_vm10, 4294967295, %v13977_v61  ;;  %vm13185_vm3 = vmor %vm7200_vm1, %vm7280_vm13  ;;  %vm7505_vm1 = vcmp.eq.s32.totalorder %v12911_v3, %v12989_v33 }
0x188c   : > { %v7248_v36 = vpop.permute.xlu1 %7247  ;;  %v13980_v13 = vsel %vm13185_vm3, 4294967295, %v13979_v13  ;;  %vm13190_vm10 = vmor %vm7309_vm0, %vm7389_vm6  ;;  %vm7506_vm6 = vcmp.eq.s32.totalorder %v12920_v16, %v12989_v33 }
0x188d   : > { %vm7281_vm4 = vcmp.eq.s32.totalorder %v12911_v3, %v7248_v36  ;;  %vm7282_vm14 = vcmp.eq.s32.totalorder %v12920_v16, %v7248_v36  ;;  %v13982_v51 = vsel %vm13190_vm10, 4294967295, %v13981_v51  ;;  %vm7391_vm10 = vcmp.eq.s32.totalorder %v12911_v3, %v7357_v25 }
0x188e   : > { %vm7313_vm11 = vmor %vm7201_vm2, %vm7281_vm4  ;;  %vm7392_vm4 = vcmp.eq.s32.totalorder %v12920_v16, %v7357_v25  ;;  %vm7501_vm2 = vcmp.eq.s32.totalorder %v12911_v3, %v13136_v1 }
0x188f   : > { %vm7314_vm13 = vmor %vm7202_vm7, %vm7282_vm14  ;;  %vm13989_vm7 = vnez %v13978_v61 }
0x1890   : > { %v7360_v9 = vpop.permute.xlu1 %7359  ;;  %vm7423_vm14 = vmor %vm13989_vm7, %vm7391_vm10  ;;  %vm13992_vm10 = vnez %v13976_v29 }
0x1891   : > { %vm7393_vm5 = vcmp.eq.s32.totalorder %v12911_v3, %v7360_v9  ;;  %vm7394_vm12 = vcmp.eq.s32.totalorder %v12920_v16, %v7360_v9 }
0x1892   : > { %vm7425_vm0 = vmor %vm7313_vm11, %vm7393_vm5  ;;  %vm13990_vm11 = vnez %v13980_v13 }
0x1893   : > { %vm7426_vm3 = vmor %vm7314_vm13, %vm7394_vm12  ;;  %vm7502_vm13 = vcmp.eq.s32.totalorder %v12920_v16, %v13136_v1 }
0x1894   : > { %v7469_v58 = vpop.permute.xlu1 %7468  ;;  %vm13205_vm8 = vmor %vm7425_vm0, %vm7505_vm1  ;;  %vm13991_vm0 = vnez %v13982_v51 }
0x1895   : > { %v13986_v18 = vsel %vm13205_vm8, 4294967295, %v13985_v18  ;;  %vm13212_vm9 = vmor %vm7426_vm3, %vm7506_vm6  ;;  %vm7503_vm5 = vcmp.eq.s32.totalorder %v12911_v3, %v7469_v58  ;;  %vm7504_vm1 = vcmp.eq.s32.totalorder %v12920_v16, %v7469_v58 }
0x1896   : > { %v13988_v38 = vsel %vm13212_vm9, 4294967295, %v13987_v38  ;;  %vm7424_vm12 = vmor %vm13990_vm11, %vm7392_vm4  ;;  %vm13993_vm4 = vnez %v13974_v56 }
0x1897   : > { %vm7533_vm8 = vmor %vm13991_vm0, %vm7501_vm2  ;;  %vm13994_vm0 = vnez %v13988_v38 }
0x1898   : > { %vm7535_vm3 = vmor %vm7423_vm14, %vm7503_vm5  ;;  %v7171_v33 = vpop.permute.xlu1 %7170  ;;  %vm13995_vm14 = vnez %v13986_v18 }
0x1899   : > { %vm7536_vm6 = vmor %vm7424_vm12, %vm7504_vm1  ;;  %vm7284_vm1 = vcmp.eq.s32.totalorder %v12920_v16, %v13170_v32 }
0x189a   : > { %vm7534_vm9 = vmor %vm13195_vm15, %vm7502_vm13  ;;  %vm7283_vm15 = vcmp.eq.s32.totalorder %v12911_v3, %v13170_v32  ;;  %vm7204_vm13 = vcmp.eq.s32.totalorder %v12920_v16, %v7171_v33 }
0x189b   : > { %vm8632_vm7 = vmpackc.low %vm7534_vm9, %vm13992_vm10  ;;  %vm7203_vm9 = vcmp.eq.s32.totalorder %v12911_v3, %v7171_v33 }
0x189c   : > { %8633 = vmatprep.subr.msk.bf16.mxu1 %vm8632_vm7, %v8997_v48  ;;  %vm8634_vm11 = vmpackc.low %vm7533_vm8, %vm13993_vm4  ;;  %v7174_v30 = vpop.permute.xlu1 %7173  ;;  %vm7397_vm4 = vcmp.eq.s32.totalorder %v12911_v3, %v7366_v59 }
0x189d   : > { %8635 = vmatpush1.bf16.msk.msra.mxu1 %vm8634_vm11, %v8997_v48  ;;  %vm8636_vm2 = vmpackc.low %vm13994_vm0, %vm7536_vm6  ;;  %vm7205_vm8 = vcmp.eq.s32.totalorder %v12911_v3, %v7174_v30  ;;  %vm7206_vm6 = vcmp.eq.s32.totalorder %v12920_v16, %v7174_v30 }
0x189e   : > { %vm8638_vm5 = vmpackc.low %vm13995_vm14, %vm7535_vm3  ;;  %8637 = vmatprep.subr.msk.bf16.mxu1 %vm8636_vm2, %v8997_v48 }
0x189f   : > { %vm7315_vm3 = vmor %vm7203_vm9, %vm7283_vm15 }
0x18a0   : > { %v7254_v57 = vpop.permute.xlu1 %7253  ;;  %vm7316_vm11 = vmor %vm7204_vm13, %vm7284_vm1 }
0x18a1   : > { %8639 = vmatpush1.bf16.msk.msra.mxu1 %vm8638_vm5, %v8997_v48  ;;  %vm7285_vm12 = vcmp.eq.s32.totalorder %v12911_v3, %v7254_v57  ;;  %vm7286_vm10 = vcmp.eq.s32.totalorder %v12920_v16, %v7254_v57  ;;  %vm7398_vm5 = vcmp.eq.s32.totalorder %v12920_v16, %v7366_v59 }
0x18a2   : > { %vm7317_vm7 = vmor %vm7205_vm8, %vm7285_vm12 }
0x18a3   : > { %vm7318_vm14 = vmor %vm7206_vm6, %vm7286_vm10 }
0x18a4   : > { %v7363_v6 = vpop.permute.xlu1 %7362  ;;  %vm7429_vm9 = vmor %vm7317_vm7, %vm7397_vm4 }
0x18a5   : > { %vm7395_vm0 = vcmp.eq.s32.totalorder %v12911_v3, %v7363_v6  ;;  %vm7396_vm2 = vcmp.eq.s32.totalorder %v12920_v16, %v7363_v6  ;;  %vm7430_vm13 = vmor %vm7318_vm14, %vm7398_vm5 }
0x18a6   : > { %vm7427_vm15 = vmor %vm7315_vm3, %vm7395_vm0 }
0x18a7   : > { %vm7428_vm12 = vmor %vm7316_vm11, %vm7396_vm2 }
0x18a8   : > { %v7475_v5 = vpop.permute.xlu1 %7474 }
0x18a9   : > { %vm7507_vm8 = vcmp.eq.s32.totalorder %v12911_v3, %v7475_v5  ;;  %vm7508_vm1 = vcmp.eq.s32.totalorder %v12920_v16, %v7475_v5 }
0x18aa   : > { %vm7539_vm6 = vmor %vm7427_vm15, %vm7507_vm8 }
0x18ab   : > { %vm7540_vm10 = vmor %vm7428_vm12, %vm7508_vm1 }
0x18ac   : > { %v7478_v26 = vpop.permute.xlu1 %7477 }
0x18ad   : > { %vm7509_vm4 = vcmp.eq.s32.totalorder %v12911_v3, %v7478_v26  ;;  %vm7510_vm7 = vcmp.eq.s32.totalorder %v12920_v16, %v7478_v26 }
0x18ae   : > { %vm7541_vm0 = vmor %vm7429_vm9, %vm7509_vm4 }
0x18af   : > { %vm7542_vm3 = vmor %vm7430_vm13, %vm7510_vm7 }
0x18b0   : > { %vm8640_vm2 = vmpackc.low %vm7542_vm3, %vm7540_vm10 }
0x18b1   : > { %vm8642_vm11 = vmpackc.low %vm7541_vm0, %vm7539_vm6  ;;  %8641 = vmatprep.subr.msk.bf16.mxu1 %vm8640_vm2, %v8997_v48 }
0x18b2   : > { %8643 = vmatpush1.bf16.msk.msra.mxu1 %vm8642_vm11, %v8997_v48 }
0x18e6   : > { %v13260_v17 = vpop.f32.mrb[228].mxu1  ;;  %v13262_v27 = vpop.f32.mrb[8].mxu0 }
0x18e7   : > { %v6832_v10 = vmul.f32 %v13260_v17, %v13260_v17  ;;  %v13266_v45 = vpop.f32.mrb[229].mxu1  ;;  %v8610_v3 = vpop.f32.mrb[9].mxu0  ;;  %v6835_v37 = vmul.f32 %v13262_v27, %v13262_v27 }
0x18e8   : > { %v6833_v16 = vmul.f32 %v13266_v45, %v13266_v45  ;;  %v6789_v21 = vpop.f32.mrb[230].mxu1  ;;  %v6829_v23 = vpop.f32.mrb[10].mxu0 }
0x18e9   : > { %v6790_v19 = vpop.f32.mrb[231].mxu1  ;;  %v8611_v48 = vpop.f32.mrb[11].mxu0  ;;  %v13996_v21 = vld [vmem:[#allocation11_spill] sm:$0xff] }
0x18ea   : > { %v6834_v7 = vadd.f32 %v6833_v16, %v6832_v10 }
0x18ec   : > { %v6836_v14 = vadd.f32 %v6835_v37, %v6834_v7 }
0x18ee   : > { %8955 = vrsqrt.f32 %v6836_v14  ;;  %vm6839_vm14 = vcmp.eq.f32.partialorder %v6836_v14, inf  ;;  %v6842_v11 = vand.u32 2147483648, %v6836_v14  ;;  %vm6841_vm5 = vcmp.eq.f32.partialorder %v6836_v14, 0.0 }
0x18f8   : > { %v8956_v12 = vpop.eup %8955 }
0x18f9   : > { %v6838_v28 = vmul.f32 %v8956_v12, %v6836_v14 }
0x18fb   : > { %v6840_v55 = vsel %vm6839_vm14, %v6836_v14, %v6838_v28 }
0x18fc   : > { %v6843_v42 = vsel %vm6841_vm5, %v6842_v11, %v6840_v55 }
0x18fd   : > { %v6844_v47 = vadd.f32 1e-06, %v6843_v42 }
0x18ff   : > { %8957 = vrcp.f32 %v6844_v47 }
0x1909   : > { %v8958_v31 = vpop.eup %8957 }
0x190a   : > { %v13279_v4 = vmul.f32 %v8958_v31, %v13260_v17  ;;  %v13282_v46 = vmul.f32 %v8958_v31, %v13266_v45  ;;  %v13285_v44 = vmul.f32 %v8958_v31, %v13262_v27  ;;  %v13997_v31 = vld [vmem:[#allocation45_spill] sm:$0xff] }
0x190c   : > { %v6850_v1 = vrot.slane %v13279_v4, 7  ;;  %v6854_v22 = vrot.slane %v13282_v46, 7  ;;  %v6859_v0 = vrot.slane %v13285_v44, 7  ;;  %v6907_v24 = vrot.slane %v13279_v4, %v13276_v15 }
0x190d   : > { %v6919_v8 = vrot.slane %v13282_v46, %v13276_v15  ;;  %v6939_v56 = vrot.slane %v13285_v44, %v13276_v15 }
0x190e   : > { %v6852_v36 = vmul.f32 %v6850_v1, %v13260_v17  ;;  %v6856_v29 = vmul.f32 %v6854_v22, %v13266_v45  ;;  %v6861_v32 = vmul.f32 %v6859_v0, %v13262_v27  ;;  %v6908_v61 = vmul.f32 %v6907_v24, %v12451_v2 }
0x190f   : > { %v6920_v9 = vmul.f32 %v6919_v8, %v12455_v49  ;;  %v6940_v13 = vmul.f32 %v6939_v56, %v12457_v60  ;;  %v6909_v51 = vmul.f32 %v6907_v24, %v12459_v41  ;;  %v6921_v20 = vmul.f32 %v6919_v8, %v12465_v34 }
0x1910   : > { %v6857_v25 = vadd.f32 %v6856_v29, %v6852_v36  ;;  %v6941_v58 = vmul.f32 %v6939_v56, %v12467_v50  ;;  %v6910_v18 = vmul.f32 %v6907_v24, %v12475_v54  ;;  %v6922_v38 = vmul.f32 %v6919_v8, %v12479_v35  ;;  %v13998_v29 = vld [vmem:[#allocation56_spill] sm:$0xff] }
0x1911   : > { %v6928_v33 = vadd.f32 %v6920_v9, %v6908_v61  ;;  %v6929_v30 = vadd.f32 %v6921_v20, %v6909_v51  ;;  %v6942_v57 = vmul.f32 %v12453_v63, %v6939_v56  ;;  %v6911_v59 = vmul.f32 %v6907_v24, %v12483_v40  ;;  %v13999_v61 = vld [vmem:[#allocation26_spill] sm:$0xff] }
0x1912   : > { %v6862_v6 = vadd.f32 %v6861_v32, %v6857_v25  ;;  %v6930_v5 = vadd.f32 %v6922_v38, %v6910_v18  ;;  %v6923_v26 = vmul.f32 %v6919_v8, %v12489_v43  ;;  %v6943_v10 = vmul.f32 %v12461_v39, %v6939_v56 }
0x1913   : > { %v6948_v3 = vadd.f32 %v6940_v13, %v6928_v33  ;;  %v6949_v16 = vadd.f32 %v6941_v58, %v6929_v30  ;;  %v6912_v37 = vmul.f32 %v6907_v24, %v12499_v52  ;;  %v6924_v23 = vmul.f32 %v6919_v8, %v13996_v21  ;;  %v14001_v58 = vld [vmem:[#allocation18_spill] sm:$0xff]  ;;  %v14004_v30 = vld [vmem:[#allocation52_spill] sm:$0xff] }
0x1914   : > { %v6863_v19 = vmul.f32 %v6862_v6, %v6850_v1  ;;  %v6865_v48 = vmul.f32 %v6862_v6, %v6854_v22  ;;  %v6867_v7 = vmul.f32 %v6862_v6, %v6859_v0  ;;  %v6950_v14 = vadd.f32 %v6942_v57, %v6930_v5  ;;  %v14000_v22 = vld [vmem:[#allocation40_spill] sm:$0xff] }
0x1915   : > { %v6931_v12 = vadd.f32 %v6923_v26, %v6911_v59  ;;  %v6932_v28 = vadd.f32 %v6924_v23, %v6912_v37  ;;  %v6944_v36 = vmul.f32 %v6939_v56, %v13997_v31  ;;  %v6913_v32 = vmul.f32 %v6907_v24, %v13998_v29  ;;  %v14005_v6 = vld [vmem:[#allocation20_spill] sm:$0xff]  ;;  %v14006_v26 = vld [vmem:[#allocation65_spill] sm:$0xff] }
0x1916   : > { %v6864_v11 = vsub.f32 %v13260_v17, %v6863_v19  ;;  %v6866_v55 = vsub.f32 %v13266_v45, %v6865_v48  ;;  %v6868_v42 = vsub.f32 %v13262_v27, %v6867_v7  ;;  %v6925_v9 = vmul.f32 %v6919_v8, %v13999_v61  ;;  %v14002_v45 = vld [vmem:[#allocation51_spill] sm:$0xff] }
0x1917   : > { %v6951_v47 = vadd.f32 %v6943_v10, %v6931_v12  ;;  %v6945_v0 = vmul.f32 %v6939_v56, %v14000_v22  ;;  %v6952_v20 = vadd.f32 %v6944_v36, %v6932_v28  ;;  %v6914_v17 = vmul.f32 %v6907_v24, %v14001_v58  ;;  %v14003_v27 = vld [vmem:[#allocation35_spill] sm:$0xff] }
0x1918   : > { %v6869_v13 = vmul.f32 %v6864_v11, %v6864_v11  ;;  %v6870_v1 = vmul.f32 %v6866_v55, %v6866_v55  ;;  %v6872_v51 = vmul.f32 %v6868_v42, %v6868_v42  ;;  %v6933_v25 = vadd.f32 %v6925_v9, %v6913_v32 }
0x1919   : > { %v6926_v38 = vmul.f32 %v6919_v8, %v14002_v45  ;;  %v6946_v33 = vmul.f32 %v14003_v27, %v6939_v56  ;;  %v6915_v57 = vmul.f32 %v6907_v24, %v14004_v30  ;;  %v6927_v5 = vmul.f32 %v6919_v8, %v14005_v6 }
0x191a   : > { %v6871_v18 = vadd.f32 %v6870_v1, %v6869_v13  ;;  %v6953_v59 = vadd.f32 %v6945_v0, %v6933_v25  ;;  %v6947_v10 = vmul.f32 %v14006_v26, %v6939_v56  ;;  %v6974_v8 = vsub.s32 1, %v13273_v53 }
0x191b   : > { %v6934_v23 = vadd.f32 %v6926_v38, %v6914_v17  ;;  %v6935_v19 = vadd.f32 %v6927_v5, %v6915_v57  ;;  %v6957_v25 = vmul.f32 %v6949_v16, %v6949_v16  ;;  %v13329_v17 = vmul.f32 %v6950_v14, %v6950_v14 }
0x191c   : > { %v6873_v37 = vadd.f32 %v6872_v51, %v6871_v18  ;;  %v6956_v51 = vmul.f32 %v6948_v3, %v6948_v3  ;;  %v13331_v18 = vmul.f32 %v6951_v47, %v6951_v47  ;;  %v13333_v38 = vmul.f32 %v6952_v20, %v6952_v20 }
0x191d   : > { %v6954_v48 = vadd.f32 %v6946_v33, %v6934_v23  ;;  %v13326_v7 = vadd.f32 %v6947_v10, %v6935_v19 }
0x191e   : > { %8959 = vrsqrt.f32 %v6873_v37  ;;  %vm6876_vm9 = vcmp.eq.f32.partialorder %v6873_v37, inf  ;;  %v6879_v36 = vand.u32 2147483648, %v6873_v37  ;;  %vm6878_vm15 = vcmp.eq.f32.partialorder %v6873_v37, 0.0 }
0x1928   : > { %v8960_v12 = vpop.eup %8959 }
0x1929   : > { %v6875_v28 = vmul.f32 %v8960_v12, %v6873_v37 }
0x192b   : > { %v6877_v32 = vsel %vm6876_vm9, %v6873_v37, %v6875_v28 }
0x192c   : > { %v6880_v9 = vsel %vm6878_vm15, %v6879_v36, %v6877_v32 }
0x192d   : > { %v6881_v24 = vadd.f32 1e-06, %v6880_v9 }
0x192f   : > { %8961 = vrcp.f32 %v6881_v24 }
0x1939   : > { %v8962_v13 = vpop.eup %8961 }
0x193a   : > { %v6883_v56 = vmul.f32 %v8962_v13, %v6864_v11  ;;  %v6884_v1 = vmul.f32 %v8962_v13, %v6866_v55  ;;  %v6885_v0 = vmul.f32 %v8962_v13, %v6868_v42  ;;  %v13341_v11 = vmul.f32 %v6953_v59, %v6953_v59 }
0x193b   : > { %v13343_v55 = vmul.f32 %v6954_v48, %v6954_v48 }
0x193c   : > { %v6887_v33 = vrot.slane %v6885_v0, 1  ;;  %v6891_v57 = vrot.slane %v6884_v1, 1  ;;  %v6896_v5 = vrot.slane %v6883_v56, 1  ;;  %v13335_v10 = vrot.slane %v6883_v56, %v6974_v8 }
0x193d   : > { %v13337_v37 = vrot.slane %v6884_v1, %v6974_v8  ;;  %v13339_v53 = vrot.slane %v6885_v0, %v6974_v8 }
0x193e   : > { %v6889_v3 = vmul.f32 %v6887_v33, %v13282_v46  ;;  %v6893_v16 = vmul.f32 %v6891_v57, %v13285_v44  ;;  %v6898_v14 = vmul.f32 %v6896_v5, %v13285_v44  ;;  %v6899_v42 = vmul.f32 %v6887_v33, %v13279_v4 }
0x193f   : > { %v6901_v47 = vmul.f32 %v6891_v57, %v13279_v4  ;;  %v6902_v20 = vmul.f32 %v6896_v5, %v13282_v46  ;;  %v6976_v23 = vmul.f32 %v13335_v10, %v12451_v2  ;;  %v6988_v59 = vmul.f32 %v13337_v37, %v12455_v49 }
0x1940   : > { %v6894_v19 = vsub.f32 %v6889_v3, %v6893_v16  ;;  %v6900_v48 = vsub.f32 %v6898_v14, %v6899_v42  ;;  %v7008_v12 = vmul.f32 %v13339_v53, %v12457_v60  ;;  %v6977_v44 = vmul.f32 %v13335_v10, %v12459_v41 }
0x1941   : > { %v6903_v28 = vsub.f32 %v6901_v47, %v6902_v20  ;;  %v6996_v36 = vadd.f32 %v6988_v59, %v6976_v23  ;;  %v6989_v4 = vmul.f32 %v13337_v37, %v12465_v34  ;;  %v7009_v46 = vmul.f32 %v13339_v53, %v12467_v50 }
0x1942   : > { %v13364_v32 = vrot.slane %v6894_v19, %v13276_v15  ;;  %v13367_v9 = vrot.slane %v6900_v48, %v13276_v15  ;;  %v6978_v24 = vmul.f32 %v13335_v10, %v12475_v54  ;;  %v6990_v8 = vmul.f32 %v13337_v37, %v12479_v35 }
0x1943   : > { %v13374_v13 = vrot.slane %v6903_v28, %v13276_v15  ;;  %v7016_v56 = vadd.f32 %v7008_v12, %v6996_v36  ;;  %v6997_v1 = vadd.f32 %v6989_v4, %v6977_v44  ;;  %v7010_v0 = vmul.f32 %v12453_v63, %v13339_v53 }
0x1944   : > { %v7044_v33 = vmul.f32 %v13364_v32, %v12451_v2  ;;  %v7056_v57 = vmul.f32 %v13367_v9, %v12455_v49  ;;  %v7045_v5 = vmul.f32 %v13364_v32, %v12459_v41  ;;  %v7057_v3 = vmul.f32 %v13367_v9, %v12465_v34 }
0x1945   : > { %v7024_v16 = vmul.f32 %v7016_v56, %v7016_v56  ;;  %v7076_v14 = vmul.f32 %v13374_v13, %v12457_v60  ;;  %v7017_v42 = vadd.f32 %v7009_v46, %v6997_v1  ;;  %v7077_v47 = vmul.f32 %v13374_v13, %v12467_v50 }
0x1946   : > { %v7064_v20 = vadd.f32 %v7056_v57, %v7044_v33  ;;  %v7065_v23 = vadd.f32 %v7057_v3, %v7045_v5  ;;  %v6998_v2 = vadd.f32 %v6990_v8, %v6978_v24  ;;  %v7046_v49 = vmul.f32 %v13364_v32, %v12475_v54 }
0x1947   : > { %v7032_v59 = vadd.f32 %v7024_v16, %v6956_v51  ;;  %v7025_v19 = vmul.f32 %v7017_v42, %v7017_v42  ;;  %v7058_v41 = vmul.f32 %v13367_v9, %v12479_v35  ;;  %v7078_v34 = vmul.f32 %v12453_v63, %v13374_v13 }
0x1948   : > { %v7084_v48 = vadd.f32 %v7076_v14, %v7064_v20  ;;  %v7085_v60 = vadd.f32 %v7077_v47, %v7065_v23  ;;  %v7018_v12 = vadd.f32 %v7010_v0, %v6998_v2  ;;  %v6979_v50 = vmul.f32 %v13335_v10, %v12483_v40 }
0x1949   : > { %v7033_v44 = vadd.f32 %v7025_v19, %v6957_v25  ;;  %v7066_v28 = vadd.f32 %v7058_v41, %v7046_v49  ;;  %v6991_v36 = vmul.f32 %v13337_v37, %v12489_v43  ;;  %v7011_v54 = vmul.f32 %v12461_v39, %v13339_v53 }
0x194a   : > { %v7092_v51 = vmul.f32 %v7084_v48, %v7084_v48  ;;  %v7093_v4 = vmul.f32 %v7085_v60, %v7085_v60  ;;  %v7026_v35 = vmul.f32 %v7018_v12, %v7018_v12  ;;  %v7047_v63 = vmul.f32 %v13364_v32, %v12483_v40 }
0x194b   : > { %v7086_v46 = vadd.f32 %v7078_v34, %v7066_v28  ;;  %v6999_v24 = vadd.f32 %v6991_v36, %v6979_v50  ;;  %v7059_v8 = vmul.f32 %v13367_v9, %v12489_v43  ;;  %v7079_v25 = vmul.f32 %v12461_v39, %v13374_v13 }
0x194c   : > { %v7100_v56 = vadd.f32 %v7092_v51, %v7032_v59  ;;  %v7101_v1 = vadd.f32 %v7093_v4, %v7033_v44  ;;  %v7034_v0 = vadd.f32 %v7026_v35, %v13329_v17  ;;  %v6980_v33 = vmul.f32 %v13335_v10, %v12499_v52 }
0x194d   : > { %v7094_v57 = vmul.f32 %v7086_v46, %v7086_v46  ;;  %v7019_v5 = vadd.f32 %v7011_v54, %v6999_v24  ;;  %v7067_v3 = vadd.f32 %v7059_v8, %v7047_v63  ;;  %v6992_v40 = vmul.f32 %v13337_v37, %v13996_v21 }
0x194e   : > { %7672 = vmatmul.mubr.f32.vlgmr.msra.gmra.mrb[232].mxu1 %v7100_v56  ;;  %v7012_v43 = vmul.f32 %v13339_v53, %v13997_v31  ;;  %v7048_v39 = vmul.f32 %v13364_v32, %v12499_v52  ;;  %v7060_v16 = vmul.f32 %v13367_v9, %v13996_v21  ;;  %v7080_v17 = vmul.f32 %v13374_v13, %v13997_v31 }
0x194f   : > { %7677 = vmatprep.mubr.f32.mxu1 %v8994_v62  ;;  %v7102_v14 = vadd.f32 %v7094_v57, %v7034_v0  ;;  %v7027_v42 = vmul.f32 %v7019_v5, %v7019_v5  ;;  %v7087_v47 = vadd.f32 %v7079_v25, %v7067_v3  ;;  %v7000_v20 = vadd.f32 %v6992_v40, %v6980_v33 }
0x1950   : > { %v7068_v23 = vadd.f32 %v7060_v16, %v7048_v39  ;;  %v6981_v2 = vmul.f32 %v13335_v10, %v13998_v29  ;;  %v6993_v49 = vmul.f32 %v13337_v37, %v13999_v61  ;;  %v7013_v52 = vmul.f32 %v13339_v53, %v14000_v22 }
0x1951   : > { %v7035_v21 = vadd.f32 %v7027_v42, %v13331_v18  ;;  %v7095_v59 = vmul.f32 %v7087_v47, %v7087_v47  ;;  %v7020_v31 = vadd.f32 %v7012_v43, %v7000_v20  ;;  %v7049_v19 = vmul.f32 %v13364_v32, %v13998_v29 }
0x1952   : > { %7678 = vmatmul.mubr.f32.gmra.mrb[234].mxu1 %v7101_v1  ;;  %v7088_v41 = vadd.f32 %v7080_v17, %v7068_v23  ;;  %v7001_v34 = vadd.f32 %v6993_v49, %v6981_v2  ;;  %v7061_v48 = vmul.f32 %v13367_v9, %v13999_v61  ;;  %v7081_v60 = vmul.f32 %v13374_v13, %v14000_v22 }
0x1953   : > { %7683 = vmatprep.mubr.f32.mxu1 %v8994_v62  ;;  %v7103_v12 = vadd.f32 %v7095_v59, %v7035_v21  ;;  %v7028_v50 = vmul.f32 %v7020_v31, %v7020_v31  ;;  %v6982_v18 = vmul.f32 %v13335_v10, %v14001_v58  ;;  %v6994_v44 = vmul.f32 %v13337_v37, %v14002_v45 }
0x1954   : > { %v7096_v29 = vmul.f32 %v7088_v41, %v7088_v41  ;;  %v7021_v28 = vadd.f32 %v7013_v52, %v7001_v34  ;;  %v7069_v36 = vadd.f32 %v7061_v48, %v7049_v19  ;;  %v7014_v54 = vmul.f32 %v14003_v27, %v13339_v53 }
0x1955   : > { %v7036_v61 = vadd.f32 %v7028_v50, %v13333_v38  ;;  %v7002_v51 = vadd.f32 %v6994_v44, %v6982_v18  ;;  %v7050_v22 = vmul.f32 %v13364_v32, %v14001_v58  ;;  %v7062_v4 = vmul.f32 %v13367_v9, %v14002_v45 }
0x1956   : > { %7684 = vmatmul.mubr.f32.gmra.mrb[236].mxu1 %v7102_v14  ;;  %v7029_v35 = vmul.f32 %v7021_v28, %v7021_v28  ;;  %v7089_v63 = vadd.f32 %v7081_v60, %v7069_v36  ;;  %v7082_v46 = vmul.f32 %v14003_v27, %v13374_v13  ;;  %v6983_v24 = vmul.f32 %v13335_v10, %v14004_v30 }
0x1957   : > { %7689 = vmatprep.mubr.f32.mxu1 %v8994_v62  ;;  %v7104_v8 = vadd.f32 %v7096_v29, %v7036_v61  ;;  %v7022_v38 = vadd.f32 %v7014_v54, %v7002_v51  ;;  %v7070_v25 = vadd.f32 %v7062_v4, %v7050_v22  ;;  %v6995_v58 = vmul.f32 %v13337_v37, %v14005_v6 }
0x1958   : > { %v7037_v56 = vadd.f32 %v7029_v35, %v13341_v11  ;;  %v7097_v45 = vmul.f32 %v7089_v63, %v7089_v63  ;;  %v7015_v1 = vmul.f32 %v14006_v26, %v13339_v53  ;;  %v7051_v27 = vmul.f32 %v13364_v32, %v14004_v30 }
0x1959   : > { %v7030_v0 = vmul.f32 %v7022_v38, %v7022_v38  ;;  %v7090_v33 = vadd.f32 %v7082_v46, %v7070_v25  ;;  %v7003_v10 = vadd.f32 %v6995_v58, %v6983_v24  ;;  %v7063_v57 = vmul.f32 %v13367_v9, %v14005_v6 }
0x195a   : > { %7690 = vmatmul.mubr.f32.gmra.mrb[238].mxu1 %v7103_v12  ;;  %v7105_v5 = vadd.f32 %v7097_v45, %v7037_v56  ;;  %v7083_v37 = vmul.f32 %v14006_v26, %v13374_v13  ;;  %v6963_v30 = vmul.f32 %v13326_v7, %v13326_v7  ;;  %v8998_v26 = vmov 1.0  }
0x195b   : > { %7695 = vmatprep.mubr.f32.mxu1 %v8994_v62  ;;  %v7038_v11 = vadd.f32 %v7030_v0, %v13343_v55  ;;  %v7098_v3 = vmul.f32 %v7090_v33, %v7090_v33  ;;  %v7023_v53 = vadd.f32 %v7015_v1, %v7003_v10  ;;  %v7071_v40 = vadd.f32 %v7063_v57, %v7051_v27 }
0x195d   : > { %v7106_v43 = vadd.f32 %v7098_v3, %v7038_v11  ;;  %v7031_v32 = vmul.f32 %v7023_v53, %v7023_v53  ;;  %v7091_v39 = vadd.f32 %v7083_v37, %v7071_v40 }
0x195e   : > { %7696 = vmatmul.mubr.f32.gmra.mrb[240].mxu1 %v7104_v8 }
0x195f   : > { %7701 = vmatprep.mubr.f32.mxu1 %v8994_v62  ;;  %v7039_v6 = vadd.f32 %v7031_v32, %v6963_v30  ;;  %v7099_v9 = vmul.f32 %v7091_v39, %v7091_v39 }
0x1961   : > { %v7107_v16 = vadd.f32 %v7099_v9, %v7039_v6 }
0x1962   : > { %7702 = vmatmul.mubr.f32.gmra.mrb[242].mxu1 %v7105_v5 }
0x1963   : > { %7707 = vmatprep.mubr.f32.mxu1 %v8994_v62 }
0x1966   : > { %7708 = vmatmul.mubr.f32.gmra.mrb[244].mxu1 %v7106_v43 }
0x1967   : > { %7713 = vmatprep.mubr.f32.mxu1 %v8994_v62 }
0x196a   : > { %7714 = vmatmul.mubr.f32.gmra.mrb[246].mxu1 %v7107_v16 }
0x196b   : > { %7719 = vmatprep.mubr.f32.mxu1 %v8994_v62 }
0x196e   : > { %7720 = vmatmul.mubr.f32.gmra.mrb[248].mxu1 %v8998_v26 }
0x1a21   : > { %v7673_v7 = vpop.f32.mrb[232].mxu1 }
0x1a22   : > { %v7675_v55 = vpop.f32.mrb[233].mxu1 }
0x1a25   : > { %v7679_v13 = vpop.f32.mrb[234].mxu1 }
0x1a26   : > { %v7681_v17 = vpop.f32.mrb[235].mxu1 }
0x1a29   : > { %v7685_v14 = vpop.f32.mrb[236].mxu1 }
0x1a2a   : > { %v7687_v42 = vpop.f32.mrb[237].mxu1 }
0x1a2d   : > { %v7691_v47 = vpop.f32.mrb[238].mxu1 }
0x1a2e   : > { %v7693_v20 = vpop.f32.mrb[239].mxu1 }
0x1a31   : > { %v7697_v23 = vpop.f32.mrb[240].mxu1 }
0x1a32   : > { %v7699_v2 = vpop.f32.mrb[241].mxu1 }
0x1a35   : > { %v7703_v49 = vpop.f32.mrb[242].mxu1 }
0x1a36   : > { %v7705_v52 = vpop.f32.mrb[243].mxu1 }
0x1a39   : > { %v7709_v21 = vpop.f32.mrb[244].mxu1 }
0x1a3a   : > { %v7711_v59 = vpop.f32.mrb[245].mxu1 }
0x1a3d   : > { %v7715_v31 = vpop.f32.mrb[246].mxu1 }
0x1a3e   : > { %v7717_v19 = vpop.f32.mrb[247].mxu1 }
0x1a41   : > { %v7721_v62 = vpop.f32.mrb[248].mxu1 }
0x1a42   : > { %v7726_v41 = vmax.f32 %v7721_v62, 1.0  ;;  %v7723_v34 = vpop.f32.mrb[249].mxu1 }
0x1a43   : > { %v7727_v48 = vmax.f32 %v7723_v34, 1.0 }
0x1a44   : > { %v7731_v60 = vrot.slane %v7726_v41, %v13276_v15 }
0x1a45   : > { %v7735_v12 = vrot.slane %v7727_v48, %v13276_v15 }
0x1a46   : > { %8963 = vrcp.f32 %v7731_v60 }
0x1a47   : > { %8965 = vrcp.f32 %v7735_v12 }
0x1a50   : > { %v8964_v50 = vpop.eup %8963 }
0x1a51   : > { %v8966_v18 = vpop.eup %8965  ;;  %v7737_v44 = vmul.f32 %v8964_v50, %v7673_v7  ;;  %v7740_v29 = vmul.f32 %v8964_v50, %v7679_v13  ;;  %v7742_v28 = vmul.f32 %v8964_v50, %v7685_v14  ;;  %v7744_v15 = vmul.f32 %v8964_v50, %v7691_v47 }
0x1a52   : > { %v7746_v36 = vmul.f32 %v8964_v50, %v7697_v23  ;;  %v7748_v54 = vmul.f32 %v8964_v50, %v7703_v49  ;;  %v7750_v61 = vmul.f32 %v8964_v50, %v7709_v21  ;;  %v7752_v51 = vmul.f32 %v8964_v50, %v7715_v31 }
0x1a53   : > { %7754 = vst [vmem:[%s13478_s21] sm:$0xff] %v7737_v44  ;;  %7756 = vst [vmem:[%s13478_s21 + $0x10] sm:$0xff] %v7740_v29  ;;  %v7739_v22 = vmul.f32 %v8966_v18, %v7675_v55  ;;  %v7741_v4 = vmul.f32 %v8966_v18, %v7681_v17  ;;  %v7743_v35 = vmul.f32 %v8966_v18, %v7687_v42 }
0x1a54   : > { %7758 = vst [vmem:[%s13478_s21 + $0x20] sm:$0xff] %v7742_v28  ;;  %7760 = vst [vmem:[%s13478_s21 + $0x30] sm:$0xff] %v7744_v15  ;;  %v7745_v63 = vmul.f32 %v8966_v18, %v7693_v20  ;;  %v7747_v46 = vmul.f32 %v8966_v18, %v7699_v2  ;;  %v7749_v24 = vmul.f32 %v8966_v18, %v7705_v52 }
0x1a55   : > { %7762 = vst [vmem:[%s13478_s21 + $0x40] sm:$0xff] %v7746_v36  ;;  %7764 = vst [vmem:[%s13478_s21 + $0x50] sm:$0xff] %v7748_v54  ;;  %v7751_v8 = vmul.f32 %v8966_v18, %v7711_v59  ;;  %v7753_v38 = vmul.f32 %v8966_v18, %v7717_v19 }
0x1a56   : > { %7766 = vst [vmem:[%s13478_s21 + $0x60] sm:$0xff] %v7750_v61  ;;  %7768 = vst [vmem:[%s13478_s21 + $0x70] sm:$0xff] %v7752_v51 }
0x1a57   : > { %7755 = vst [vmem:[%s13478_s21 + $0x8] sm:$0xff] %v7739_v22  ;;  %7757 = vst [vmem:[%s13478_s21 + $0x18] sm:$0xff] %v7741_v4 }
0x1a58   : > { %7759 = vst [vmem:[%s13478_s21 + $0x28] sm:$0xff] %v7743_v35  ;;  %7761 = vst [vmem:[%s13478_s21 + $0x38] sm:$0xff] %v7745_v63 }
0x1a59   : > { %7763 = vst [vmem:[%s13478_s21 + $0x48] sm:$0xff] %v7747_v46  ;;  %7765 = vst [vmem:[%s13478_s21 + $0x58] sm:$0xff] %v7749_v24 }
0x1a5a   : > { %7767 = vst [vmem:[%s13478_s21 + $0x68] sm:$0xff] %v7751_v8  ;;  %7769 = vst [vmem:[%s13478_s21 + $0x78] sm:$0xff] %v7753_v38 }
0x1a5b PF: > { %p10_p9 = scmp.ge.s32.totalorder %s9036_s16, 4   ;;  %s14007_s12 = smov %s8985_s13 }
0x1a5c   : > { %s14008_s13 = smov %s9045_s19  ;;  %s14009_s14 = smov %s9036_s16 }
0x1a5d   :  { %12 = sbr.rel (!%p10_p9) target bundleno = 2 (0x2), region = 93 }

</bundles_post_ra>
